<compile_context>
chip_gen: v7x
topology: tpu7x:2x2x1
jax: 0.10.0
libtpu: 0.0.40
codegen_flags: <defaults>
</compile_context>

<pallas_src>
import jax
import jax.numpy as jnp
from jax.experimental import pallas as pl
from jax.experimental.pallas import tpu as pltpu

# ---------------- model config (small, DistilBERT-shaped) ----------------
VOCAB = 100
MAX_POS = 32
HIDDEN = 64
N_HEADS = 2
HEAD_DIM = HIDDEN // N_HEADS
FFN = 128
N_LAYERS = 2
NUM_LABELS = 2
LN_EPS = 1e-12
LANE = 128          # lane-dense padding for the logits output


def _layer_norm(v, g, b):
    mu = jnp.mean(v, axis=-1, keepdims=True)
    var = jnp.mean(jnp.square(v - mu), axis=-1, keepdims=True)
    return (v - mu) * jax.lax.rsqrt(var + LN_EPS) * g + b


# ---------------- fused forward kernel (one batch tile per grid step) ----------------
def fused_forward_kernel(emb_ref, bias_ref,
                         eg_ref, eb_ref,
                         wqkv_ref, bqkv_ref,
                         wo_ref, bo_ref, ln1g_ref, ln1b_ref,
                         w1_ref, b1_ref, w2_ref, b2_ref, ln2g_ref, ln2b_ref,
                         wp_ref, bp_ref, wc_ref, bc_ref,
                         out_ref):
    Bt = bias_ref.shape[1]          # sequences in this batch tile
    S = bias_ref.shape[2]           # sequence length
    H = emb_ref.shape[2]            # hidden size
    hd = H // N_HEADS

    x = emb_ref[0]                  # (Bt*S, H) f32 : word + position embeddings
    mask_bias = bias_ref[0]         # (Bt, S)  f32 : additive key mask, precomputed

    # embedding LayerNorm
    h = _layer_norm(x, eg_ref[...], eb_ref[...])

    for l in range(N_LAYERS):                      # static unroll over layers (toy size)
        hb = h.astype(jnp.bfloat16)

        # fused QKV projection: one (Bt*S, H) x (H, 3H) matmul, scale folded into Wq/bq
        qkv = jnp.dot(hb, wqkv_ref[l],
                      preferred_element_type=jnp.float32) + bqkv_ref[l]      # (Bt*S, 3H)
        qkv_b = qkv.astype(jnp.bfloat16)           # single cast reused by all heads

        ctx_rows = []
        for b in range(Bt):                        # per-sequence attention
            r0 = b * S
            ctx_heads = []
            for head in range(N_HEADS):            # static unroll over heads
                c0 = head * hd
                q = qkv_b[r0:r0 + S, c0:c0 + hd]
                k = qkv_b[r0:r0 + S, H + c0:H + c0 + hd]
                v = qkv_b[r0:r0 + S, 2 * H + c0:2 * H + c0 + hd]

                # scores: contract last dims directly (no K transpose relayout)
                s = jax.lax.dot_general(q, k, (((1,), (1,)), ((), ())),
                                        preferred_element_type=jnp.float32)  # (S, S)
                s = s + mask_bias[b:b + 1, :]
                s = s - jnp.max(s, axis=-1, keepdims=True)
                p = jnp.exp(s)
                p = p * pl.reciprocal(jnp.sum(p, axis=-1, keepdims=True), approx=True)

                ctx_heads.append(jnp.dot(p.astype(jnp.bfloat16), v,
                                         preferred_element_type=jnp.float32))  # (S, hd)
            ctx_rows.append(jnp.concatenate(ctx_heads, axis=-1))               # (S, H)
        ctx = jnp.concatenate(ctx_rows, axis=0)                                # (Bt*S, H)

        # single output projection per layer
        attn_out = jnp.dot(ctx.astype(jnp.bfloat16), wo_ref[l],
                           preferred_element_type=jnp.float32) + bo_ref[l]
        h1 = _layer_norm(h + attn_out, ln1g_ref[l], ln1b_ref[l])               # sa_layer_norm

        ff = jnp.dot(h1.astype(jnp.bfloat16), w1_ref[l],
                     preferred_element_type=jnp.float32) + b1_ref[l]
        # tanh-approx GELU rides the EUP slot; HF's "gelu" is the exact erf variant
        # (swap to 0.5*x*(1+erf(x/sqrt(2))) for bit-closer logits).
        ff = jax.nn.gelu(ff, approximate=True)
        ff = jnp.dot(ff.astype(jnp.bfloat16), w2_ref[l],
                     preferred_element_type=jnp.float32) + b2_ref[l]
        h = _layer_norm(h1 + ff, ln2g_ref[l], ln2b_ref[l])                     # output_layer_norm

    # classification head: CLS pooling -> pre_classifier + ReLU -> classifier (lane-padded)
    pooled = jnp.concatenate([h[b * S:b * S + 1, :] for b in range(Bt)], axis=0)  # (Bt, H)
    z = jnp.dot(pooled.astype(jnp.bfloat16), wp_ref[...],
                preferred_element_type=jnp.float32) + bp_ref[...]
    z = jnp.maximum(z, 0.0)
    out_ref[0] = jnp.dot(z.astype(jnp.bfloat16), wc_ref[...],
                         preferred_element_type=jnp.float32) + bc_ref[...]         # (Bt, LANE)


# ---------------- wrapper ----------------
def distilbert_forward(params, input_ids, attention_mask, *, batch_tile=None):
    B, S = input_ids.shape
    H, F, L = HIDDEN, FFN, N_LAYERS

    if batch_tile is None:
        # fold batch into the matmul M dim, but keep the parallel grid even (v7x: 2 TCs)
        batch_tile = B // 2 if (B % 2 == 0 and B >= 2) else 1
    assert B % batch_tile == 0
    Bt = batch_tile
    G = B // Bt

    # embedding gathers stay in plain JAX (glue); sum stays f32
    emb = (params["word_emb"][input_ids]
           + params["pos_emb"][jnp.arange(S)][None, :, :]).astype(jnp.float32)
    emb = emb.reshape(G, Bt * S, H)
    # additive key-mask bias precomputed once in the wrapper
    mask_bias = ((attention_mask.astype(jnp.float32) - 1.0) * 1e9).reshape(G, Bt, S)

    args = (emb, mask_bias,
            params["emb_ln_g"], params["emb_ln_b"],
            params["wqkv"], params["bqkv"],
            params["wo"], params["bo"],
            params["ln1_g"], params["ln1_b"],
            params["w1"], params["b1"], params["w2"], params["b2"],
            params["ln2_g"], params["ln2_b"],
            params["wp"], params["bp"], params["wc_pad"], params["bc_pad"])

    def _call(single_buffer_weights):
        def w(shape):
            n = len(shape)
            idx = lambda *a, n=n: (0,) * n
            if single_buffer_weights:
                # constant across grid steps -> no point double-buffering
                return pl.BlockSpec(shape, idx, pipeline_mode=pl.Buffered(1))
            return pl.BlockSpec(shape, idx)

        in_specs = [
            pl.BlockSpec((1, Bt * S, H), lambda g: (g, 0, 0)),     # embeddings (batch tile)
            pl.BlockSpec((1, Bt, S), lambda g: (g, 0, 0)),         # additive mask bias
            w((1, H)), w((1, H)),                                  # embedding LayerNorm g, b
            w((L, H, 3 * H)), w((L, 1, 3 * H)),                    # fused Wqkv, bqkv
            w((L, H, H)), w((L, 1, H)),                            # Wo, bo
            w((L, 1, H)), w((L, 1, H)),                            # sa_layer_norm g, b
            w((L, H, F)), w((L, 1, F)),                            # FFN lin1
            w((L, F, H)), w((L, 1, H)),                            # FFN lin2
            w((L, 1, H)), w((L, 1, H)),                            # output_layer_norm g, b
            w((H, H)), w((1, H)),                                  # pre_classifier
            w((H, LANE)), w((1, LANE)),                            # classifier (lane-padded)
        ]

        out = pl.pallas_call(
            fused_forward_kernel,
            grid=(G,),
            in_specs=in_specs,
            out_specs=pl.BlockSpec((1, Bt, LANE), lambda g: (g, 0, 0)),
            out_shape=jax.ShapeDtypeStruct((G, Bt, LANE), jnp.float32),
            compiler_params=pltpu.CompilerParams(
                dimension_semantics=("parallel",),
                vmem_limit_bytes=32 * 1024 * 1024),
        )(*args)
        return jax.block_until_ready(out)

    try:
        out = _call(True)
    except Exception:
        # pipeline_mode=pl.Buffered(1) not supported on this jax build; use defaults
        out = _call(False)

    return out.reshape(B, LANE)[:, :NUM_LABELS]


# ---------------- deterministic parameter synthesis ----------------
def init_params(key):
    std = 0.02
    keys = iter(jax.random.split(key, 64))
    H, F, L, NH, hd = HIDDEN, FFN, N_LAYERS, N_HEADS, HEAD_DIM
    scale = 1.0 / (hd ** 0.5)

    def dense(*shape):
        return jax.random.normal(next(keys), shape, jnp.float32) * std

    # fused QKV weights, column order [Q | K | V]; 1/sqrt(head_dim) folded into Q
    wq = dense(L, H, H) * scale
    wk = dense(L, H, H)
    wv = dense(L, H, H)
    wqkv = jnp.concatenate([wq, wk, wv], axis=-1).astype(jnp.bfloat16)   # (L, H, 3H)
    # biases are zero; a nonzero bq would be pre-scaled by 1/sqrt(head_dim) too
    bqkv = jnp.zeros((L, 1, 3 * H), jnp.float32)

    params = {
        "word_emb": dense(VOCAB, H),
        "pos_emb": dense(MAX_POS, H),
        "emb_ln_g": jnp.ones((1, H), jnp.float32),
        "emb_ln_b": jnp.zeros((1, H), jnp.float32),
        "wqkv": wqkv,
        "bqkv": bqkv,
        # Wo rows ordered head-major (head*hd + d), matching the lane-concat of heads
        "wo": dense(L, H, H).astype(jnp.bfloat16),
        "bo": jnp.zeros((L, 1, H), jnp.float32),
        "ln1_g": jnp.ones((L, 1, H), jnp.float32),
        "ln1_b": jnp.zeros((L, 1, H), jnp.float32),
        "w1": dense(L, H, F).astype(jnp.bfloat16),
        "b1": jnp.zeros((L, 1, F), jnp.float32),
        "w2": dense(L, F, H).astype(jnp.bfloat16),
        "b2": jnp.zeros((L, 1, H), jnp.float32),
        "ln2_g": jnp.ones((L, 1, H), jnp.float32),
        "ln2_b": jnp.zeros((L, 1, H), jnp.float32),
        "wp": dense(H, H).astype(jnp.bfloat16),
        "bp": jnp.zeros((1, H), jnp.float32),
    }
    wc = dense(H, NUM_LABELS)
    params["wc_pad"] = jnp.pad(wc, ((0, 0), (0, LANE - NUM_LABELS))).astype(jnp.bfloat16)
    params["bc_pad"] = jnp.zeros((1, LANE), jnp.float32)
    return params


if __name__ == "__main__":
    B, S = 4, 16
    key = jax.random.PRNGKey(0)
    k_param, k_ids = jax.random.split(key)

    params = init_params(k_param)
    input_ids = jax.random.randint(k_ids, (B, S), 0, VOCAB, dtype=jnp.int32)
    # some sequences have trailing padding tokens
    attention_mask = jnp.array(
        [[1] * S,
         [1] * (S - 4) + [0] * 4,
         [1] * S,
         [1] * (S - 2) + [0] * 2], dtype=jnp.int32)

    logits = distilbert_forward(params, input_ids, attention_mask)
    logits = jax.block_until_ready(logits)
    assert logits.shape == (B, NUM_LABELS)
    assert bool(jnp.all(jnp.isfinite(logits)))
    print("KERNEL_OK")
</pallas_src>

<mosaic_0001>
module attributes {stable_mosaic.version = 11 : i64} {
  func.func @fused_forward_kernel(%arg0: i32, %arg1: memref<1x32x64xf32, #tpu.memory_space<vmem>>, %arg2: memref<1x2x16xf32, #tpu.memory_space<vmem>>, %arg3: memref<1x64xf32, #tpu.memory_space<vmem>>, %arg4: memref<1x64xf32, #tpu.memory_space<vmem>>, %arg5: memref<2x64x192xbf16, #tpu.memory_space<vmem>>, %arg6: memref<2x1x192xf32, #tpu.memory_space<vmem>>, %arg7: memref<2x64x64xbf16, #tpu.memory_space<vmem>>, %arg8: memref<2x1x64xf32, #tpu.memory_space<vmem>>, %arg9: memref<2x1x64xf32, #tpu.memory_space<vmem>>, %arg10: memref<2x1x64xf32, #tpu.memory_space<vmem>>, %arg11: memref<2x64x128xbf16, #tpu.memory_space<vmem>>, %arg12: memref<2x1x128xf32, #tpu.memory_space<vmem>>, %arg13: memref<2x128x64xbf16, #tpu.memory_space<vmem>>, %arg14: memref<2x1x64xf32, #tpu.memory_space<vmem>>, %arg15: memref<2x1x64xf32, #tpu.memory_space<vmem>>, %arg16: memref<2x1x64xf32, #tpu.memory_space<vmem>>, %arg17: memref<64x64xbf16, #tpu.memory_space<vmem>>, %arg18: memref<1x64xf32, #tpu.memory_space<vmem>>, %arg19: memref<64x128xbf16, #tpu.memory_space<vmem>>, %arg20: memref<1x128xf32, #tpu.memory_space<vmem>>, %arg21: memref<1x2x128xf32, #tpu.memory_space<vmem>>) attributes {dimension_semantics = [#tpu.dimension_semantics<parallel>], iteration_bounds = array<i64: 2>, scalar_prefetch = 0 : i64, scratch_operands = 0 : i64, tpu.core_type = #tpu.core_type<tc>, window_params = [{transform_indices = @transform_0, window_bounds = array<i64: 1, 32, 64>}, {transform_indices = @transform_1, window_bounds = array<i64: 1, 2, 16>}, {pipeline_mode = #tpu.pipeline_mode<synchronous>, transform_indices = @transform_2, window_bounds = array<i64: 1, 64>}, {pipeline_mode = #tpu.pipeline_mode<synchronous>, transform_indices = @transform_3, window_bounds = array<i64: 1, 64>}, {pipeline_mode = #tpu.pipeline_mode<synchronous>, transform_indices = @transform_4, window_bounds = array<i64: 2, 64, 192>}, {pipeline_mode = #tpu.pipeline_mode<synchronous>, transform_indices = @transform_5, window_bounds = array<i64: 2, 1, 192>}, {pipeline_mode = #tpu.pipeline_mode<synchronous>, transform_indices = @transform_6, window_bounds = array<i64: 2, 64, 64>}, {pipeline_mode = #tpu.pipeline_mode<synchronous>, transform_indices = @transform_7, window_bounds = array<i64: 2, 1, 64>}, {pipeline_mode = #tpu.pipeline_mode<synchronous>, transform_indices = @transform_8, window_bounds = array<i64: 2, 1, 64>}, {pipeline_mode = #tpu.pipeline_mode<synchronous>, transform_indices = @transform_9, window_bounds = array<i64: 2, 1, 64>}, {pipeline_mode = #tpu.pipeline_mode<synchronous>, transform_indices = @transform_10, window_bounds = array<i64: 2, 64, 128>}, {pipeline_mode = #tpu.pipeline_mode<synchronous>, transform_indices = @transform_11, window_bounds = array<i64: 2, 1, 128>}, {pipeline_mode = #tpu.pipeline_mode<synchronous>, transform_indices = @transform_12, window_bounds = array<i64: 2, 128, 64>}, {pipeline_mode = #tpu.pipeline_mode<synchronous>, transform_indices = @transform_13, window_bounds = array<i64: 2, 1, 64>}, {pipeline_mode = #tpu.pipeline_mode<synchronous>, transform_indices = @transform_14, window_bounds = array<i64: 2, 1, 64>}, {pipeline_mode = #tpu.pipeline_mode<synchronous>, transform_indices = @transform_15, window_bounds = array<i64: 2, 1, 64>}, {pipeline_mode = #tpu.pipeline_mode<synchronous>, transform_indices = @transform_16, window_bounds = array<i64: 64, 64>}, {pipeline_mode = #tpu.pipeline_mode<synchronous>, transform_indices = @transform_17, window_bounds = array<i64: 1, 64>}, {pipeline_mode = #tpu.pipeline_mode<synchronous>, transform_indices = @transform_18, window_bounds = array<i64: 64, 128>}, {pipeline_mode = #tpu.pipeline_mode<synchronous>, transform_indices = @transform_19, window_bounds = array<i64: 1, 128>}, {transform_indices = @transform_20, window_bounds = array<i64: 1, 2, 128>}]} {
    %c0 = arith.constant 0 : index
    %c0_0 = arith.constant 0 : index
    %c0_1 = arith.constant 0 : index
    %0 = vector.load %arg1[%c0, %c0_0, %c0_1] : memref<1x32x64xf32, #tpu.memory_space<vmem>>, vector<1x32x64xf32>
    %1 = vector.shape_cast %0 : vector<1x32x64xf32> to vector<32x64xf32>
    %c0_2 = arith.constant 0 : index
    %c0_3 = arith.constant 0 : index
    %c0_4 = arith.constant 0 : index
    %2 = vector.load %arg2[%c0_2, %c0_3, %c0_4] : memref<1x2x16xf32, #tpu.memory_space<vmem>>, vector<1x2x16xf32>
    %3 = vector.shape_cast %2 : vector<1x2x16xf32> to vector<2x16xf32>
    %c0_5 = arith.constant 0 : index
    %c0_6 = arith.constant 0 : index
    %4 = vector.load %arg3[%c0_5, %c0_6] : memref<1x64xf32, #tpu.memory_space<vmem>>, vector<1x64xf32>
    %c0_7 = arith.constant 0 : index
    %c0_8 = arith.constant 0 : index
    %5 = vector.load %arg4[%c0_7, %c0_8] : memref<1x64xf32, #tpu.memory_space<vmem>>, vector<1x64xf32>
    %cst = arith.constant dense<0.000000e+00> : vector<32xf32>
    %6 = vector.multi_reduction <add>, %1, %cst [1] : vector<32x64xf32> to vector<32xf32>
    %7 = vector.shape_cast %6 : vector<32xf32> to vector<32x1xf32>
    %cst_9 = arith.constant 6.400000e+01 : f32
    %8 = vector.broadcast %cst_9 : f32 to vector<32x1xf32>
    %9 = arith.divf %7, %8 : vector<32x1xf32>
    %10 = vector.broadcast %9 : vector<32x1xf32> to vector<32x64xf32>
    %11 = arith.subf %1, %10 : vector<32x64xf32>
    %12 = arith.mulf %11, %11 : vector<32x64xf32>
    %cst_10 = arith.constant dense<0.000000e+00> : vector<32xf32>
    %13 = vector.multi_reduction <add>, %12, %cst_10 [1] : vector<32x64xf32> to vector<32xf32>
    %14 = vector.shape_cast %13 : vector<32xf32> to vector<32x1xf32>
    %cst_11 = arith.constant 6.400000e+01 : f32
    %15 = vector.broadcast %cst_11 : f32 to vector<32x1xf32>
    %16 = arith.divf %14, %15 : vector<32x1xf32>
    %17 = vector.broadcast %9 : vector<32x1xf32> to vector<32x64xf32>
    %18 = arith.subf %1, %17 : vector<32x64xf32>
    %cst_12 = arith.constant 9.99999996E-13 : f32
    %19 = vector.broadcast %cst_12 : f32 to vector<32x1xf32>
    %20 = arith.addf %16, %19 : vector<32x1xf32>
    %21 = math.rsqrt %20 : vector<32x1xf32>
    %22 = vector.broadcast %21 : vector<32x1xf32> to vector<32x64xf32>
    %23 = arith.mulf %18, %22 : vector<32x64xf32>
    %24 = vector.broadcast %4 : vector<1x64xf32> to vector<32x64xf32>
    %25 = arith.mulf %23, %24 : vector<32x64xf32>
    %26 = vector.broadcast %5 : vector<1x64xf32> to vector<32x64xf32>
    %27 = arith.addf %25, %26 : vector<32x64xf32>
    %28 = arith.truncf %27 : vector<32x64xf32> to vector<32x64xbf16>
    %c0_13 = arith.constant 0 : index
    %c0_14 = arith.constant 0 : index
    %c0_15 = arith.constant 0 : index
    %29 = vector.load %arg5[%c0_13, %c0_14, %c0_15] : memref<2x64x192xbf16, #tpu.memory_space<vmem>>, vector<1x64x192xbf16>
    %30 = vector.shape_cast %29 : vector<1x64x192xbf16> to vector<64x192xbf16>
    %cst_16 = arith.constant dense<0.000000e+00> : vector<32x192xf32>
    %31 = tpu.matmul %28, %30, %cst_16 {dimension_numbers = #tpu.dot_dimension_numbers<[1], [0], [0], [1], [0, 0, 1, 1], [], []>} : vector<32x64xbf16>, vector<64x192xbf16>, vector<32x192xf32> -> vector<32x192xf32>
    %c0_17 = arith.constant 0 : index
    %c0_18 = arith.constant 0 : index
    %c0_19 = arith.constant 0 : index
    %32 = vector.load %arg6[%c0_17, %c0_18, %c0_19] : memref<2x1x192xf32, #tpu.memory_space<vmem>>, vector<1x1x192xf32>
    %33 = vector.shape_cast %32 : vector<1x1x192xf32> to vector<1x192xf32>
    %34 = vector.broadcast %33 : vector<1x192xf32> to vector<32x192xf32>
    %35 = arith.addf %31, %34 : vector<32x192xf32>
    %36 = arith.truncf %35 : vector<32x192xf32> to vector<32x192xbf16>
    %37 = vector.extract_strided_slice %36 {offsets = [0, 0], sizes = [16, 32], strides = [1, 1]} : vector<32x192xbf16> to vector<16x32xbf16>
    %38 = vector.extract_strided_slice %36 {offsets = [0, 64], sizes = [16, 32], strides = [1, 1]} : vector<32x192xbf16> to vector<16x32xbf16>
    %39 = vector.extract_strided_slice %36 {offsets = [0, 128], sizes = [16, 32], strides = [1, 1]} : vector<32x192xbf16> to vector<16x32xbf16>
    %cst_20 = arith.constant dense<0.000000e+00> : vector<16x16xf32>
    %40 = tpu.matmul %37, %38, %cst_20 {dimension_numbers = #tpu.dot_dimension_numbers<[1], [1], [0], [0], [0, 0, 1, 0], [], []>} : vector<16x32xbf16>, vector<16x32xbf16>, vector<16x16xf32> -> vector<16x16xf32>
    %41 = vector.extract_strided_slice %3 {offsets = [0, 0], sizes = [1, 16], strides = [1, 1]} : vector<2x16xf32> to vector<1x16xf32>
    %42 = vector.broadcast %41 : vector<1x16xf32> to vector<16x16xf32>
    %43 = arith.addf %40, %42 : vector<16x16xf32>
    %cst_21 = arith.constant dense<0xFF800000> : vector<16xf32>
    %44 = vector.multi_reduction <maximumf>, %43, %cst_21 [1] : vector<16x16xf32> to vector<16xf32>
    %45 = vector.shape_cast %44 : vector<16xf32> to vector<16x1xf32>
    %46 = vector.broadcast %45 : vector<16x1xf32> to vector<16x16xf32>
    %47 = arith.subf %43, %46 : vector<16x16xf32>
    %48 = math.exp %47 : vector<16x16xf32>
    %cst_22 = arith.constant dense<0.000000e+00> : vector<16xf32>
    %49 = vector.multi_reduction <add>, %48, %cst_22 [1] : vector<16x16xf32> to vector<16xf32>
    %50 = vector.shape_cast %49 : vector<16xf32> to vector<16x1xf32>
    %51 = tpu.reciprocal %50 {approx = true} : vector<16x1xf32> -> vector<16x1xf32>
    %52 = vector.broadcast %51 : vector<16x1xf32> to vector<16x16xf32>
    %53 = arith.mulf %48, %52 : vector<16x16xf32>
    %54 = arith.truncf %53 : vector<16x16xf32> to vector<16x16xbf16>
    %cst_23 = arith.constant dense<0.000000e+00> : vector<16x32xf32>
    %55 = tpu.matmul %54, %39, %cst_23 {dimension_numbers = #tpu.dot_dimension_numbers<[1], [0], [0], [1], [0, 0, 1, 1], [], []>} : vector<16x16xbf16>, vector<16x32xbf16>, vector<16x32xf32> -> vector<16x32xf32>
    %56 = vector.extract_strided_slice %36 {offsets = [0, 32], sizes = [16, 32], strides = [1, 1]} : vector<32x192xbf16> to vector<16x32xbf16>
    %57 = vector.extract_strided_slice %36 {offsets = [0, 96], sizes = [16, 32], strides = [1, 1]} : vector<32x192xbf16> to vector<16x32xbf16>
    %58 = vector.extract_strided_slice %36 {offsets = [0, 160], sizes = [16, 32], strides = [1, 1]} : vector<32x192xbf16> to vector<16x32xbf16>
    %cst_24 = arith.constant dense<0.000000e+00> : vector<16x16xf32>
    %59 = tpu.matmul %56, %57, %cst_24 {dimension_numbers = #tpu.dot_dimension_numbers<[1], [1], [0], [0], [0, 0, 1, 0], [], []>} : vector<16x32xbf16>, vector<16x32xbf16>, vector<16x16xf32> -> vector<16x16xf32>
    %60 = vector.extract_strided_slice %3 {offsets = [0, 0], sizes = [1, 16], strides = [1, 1]} : vector<2x16xf32> to vector<1x16xf32>
    %61 = vector.broadcast %60 : vector<1x16xf32> to vector<16x16xf32>
    %62 = arith.addf %59, %61 : vector<16x16xf32>
    %cst_25 = arith.constant dense<0xFF800000> : vector<16xf32>
    %63 = vector.multi_reduction <maximumf>, %62, %cst_25 [1] : vector<16x16xf32> to vector<16xf32>
    %64 = vector.shape_cast %63 : vector<16xf32> to vector<16x1xf32>
    %65 = vector.broadcast %64 : vector<16x1xf32> to vector<16x16xf32>
    %66 = arith.subf %62, %65 : vector<16x16xf32>
    %67 = math.exp %66 : vector<16x16xf32>
    %cst_26 = arith.constant dense<0.000000e+00> : vector<16xf32>
    %68 = vector.multi_reduction <add>, %67, %cst_26 [1] : vector<16x16xf32> to vector<16xf32>
    %69 = vector.shape_cast %68 : vector<16xf32> to vector<16x1xf32>
    %70 = tpu.reciprocal %69 {approx = true} : vector<16x1xf32> -> vector<16x1xf32>
    %71 = vector.broadcast %70 : vector<16x1xf32> to vector<16x16xf32>
    %72 = arith.mulf %67, %71 : vector<16x16xf32>
    %73 = arith.truncf %72 : vector<16x16xf32> to vector<16x16xbf16>
    %cst_27 = arith.constant dense<0.000000e+00> : vector<16x32xf32>
    %74 = tpu.matmul %73, %58, %cst_27 {dimension_numbers = #tpu.dot_dimension_numbers<[1], [0], [0], [1], [0, 0, 1, 1], [], []>} : vector<16x16xbf16>, vector<16x32xbf16>, vector<16x32xf32> -> vector<16x32xf32>
    %75 = tpu.concatenate %55, %74 in 1 : vector<16x32xf32>, vector<16x32xf32> -> vector<16x64xf32>
    %76 = vector.extract_strided_slice %36 {offsets = [16, 0], sizes = [16, 32], strides = [1, 1]} : vector<32x192xbf16> to vector<16x32xbf16>
    %77 = vector.extract_strided_slice %36 {offsets = [16, 64], sizes = [16, 32], strides = [1, 1]} : vector<32x192xbf16> to vector<16x32xbf16>
    %78 = vector.extract_strided_slice %36 {offsets = [16, 128], sizes = [16, 32], strides = [1, 1]} : vector<32x192xbf16> to vector<16x32xbf16>
    %cst_28 = arith.constant dense<0.000000e+00> : vector<16x16xf32>
    %79 = tpu.matmul %76, %77, %cst_28 {dimension_numbers = #tpu.dot_dimension_numbers<[1], [1], [0], [0], [0, 0, 1, 0], [], []>} : vector<16x32xbf16>, vector<16x32xbf16>, vector<16x16xf32> -> vector<16x16xf32>
    %80 = vector.extract_strided_slice %3 {offsets = [1, 0], sizes = [1, 16], strides = [1, 1]} : vector<2x16xf32> to vector<1x16xf32>
    %81 = vector.broadcast %80 : vector<1x16xf32> to vector<16x16xf32>
    %82 = arith.addf %79, %81 : vector<16x16xf32>
    %cst_29 = arith.constant dense<0xFF800000> : vector<16xf32>
    %83 = vector.multi_reduction <maximumf>, %82, %cst_29 [1] : vector<16x16xf32> to vector<16xf32>
    %84 = vector.shape_cast %83 : vector<16xf32> to vector<16x1xf32>
    %85 = vector.broadcast %84 : vector<16x1xf32> to vector<16x16xf32>
    %86 = arith.subf %82, %85 : vector<16x16xf32>
    %87 = math.exp %86 : vector<16x16xf32>
    %cst_30 = arith.constant dense<0.000000e+00> : vector<16xf32>
    %88 = vector.multi_reduction <add>, %87, %cst_30 [1] : vector<16x16xf32> to vector<16xf32>
    %89 = vector.shape_cast %88 : vector<16xf32> to vector<16x1xf32>
    %90 = tpu.reciprocal %89 {approx = true} : vector<16x1xf32> -> vector<16x1xf32>
    %91 = vector.broadcast %90 : vector<16x1xf32> to vector<16x16xf32>
    %92 = arith.mulf %87, %91 : vector<16x16xf32>
    %93 = arith.truncf %92 : vector<16x16xf32> to vector<16x16xbf16>
    %cst_31 = arith.constant dense<0.000000e+00> : vector<16x32xf32>
    %94 = tpu.matmul %93, %78, %cst_31 {dimension_numbers = #tpu.dot_dimension_numbers<[1], [0], [0], [1], [0, 0, 1, 1], [], []>} : vector<16x16xbf16>, vector<16x32xbf16>, vector<16x32xf32> -> vector<16x32xf32>
    %95 = vector.extract_strided_slice %36 {offsets = [16, 32], sizes = [16, 32], strides = [1, 1]} : vector<32x192xbf16> to vector<16x32xbf16>
    %96 = vector.extract_strided_slice %36 {offsets = [16, 96], sizes = [16, 32], strides = [1, 1]} : vector<32x192xbf16> to vector<16x32xbf16>
    %97 = vector.extract_strided_slice %36 {offsets = [16, 160], sizes = [16, 32], strides = [1, 1]} : vector<32x192xbf16> to vector<16x32xbf16>
    %cst_32 = arith.constant dense<0.000000e+00> : vector<16x16xf32>
    %98 = tpu.matmul %95, %96, %cst_32 {dimension_numbers = #tpu.dot_dimension_numbers<[1], [1], [0], [0], [0, 0, 1, 0], [], []>} : vector<16x32xbf16>, vector<16x32xbf16>, vector<16x16xf32> -> vector<16x16xf32>
    %99 = vector.extract_strided_slice %3 {offsets = [1, 0], sizes = [1, 16], strides = [1, 1]} : vector<2x16xf32> to vector<1x16xf32>
    %100 = vector.broadcast %99 : vector<1x16xf32> to vector<16x16xf32>
    %101 = arith.addf %98, %100 : vector<16x16xf32>
    %cst_33 = arith.constant dense<0xFF800000> : vector<16xf32>
    %102 = vector.multi_reduction <maximumf>, %101, %cst_33 [1] : vector<16x16xf32> to vector<16xf32>
    %103 = vector.shape_cast %102 : vector<16xf32> to vector<16x1xf32>
    %104 = vector.broadcast %103 : vector<16x1xf32> to vector<16x16xf32>
    %105 = arith.subf %101, %104 : vector<16x16xf32>
    %106 = math.exp %105 : vector<16x16xf32>
    %cst_34 = arith.constant dense<0.000000e+00> : vector<16xf32>
    %107 = vector.multi_reduction <add>, %106, %cst_34 [1] : vector<16x16xf32> to vector<16xf32>
    %108 = vector.shape_cast %107 : vector<16xf32> to vector<16x1xf32>
    %109 = tpu.reciprocal %108 {approx = true} : vector<16x1xf32> -> vector<16x1xf32>
    %110 = vector.broadcast %109 : vector<16x1xf32> to vector<16x16xf32>
    %111 = arith.mulf %106, %110 : vector<16x16xf32>
    %112 = arith.truncf %111 : vector<16x16xf32> to vector<16x16xbf16>
    %cst_35 = arith.constant dense<0.000000e+00> : vector<16x32xf32>
    %113 = tpu.matmul %112, %97, %cst_35 {dimension_numbers = #tpu.dot_dimension_numbers<[1], [0], [0], [1], [0, 0, 1, 1], [], []>} : vector<16x16xbf16>, vector<16x32xbf16>, vector<16x32xf32> -> vector<16x32xf32>
    %114 = tpu.concatenate %94, %113 in 1 : vector<16x32xf32>, vector<16x32xf32> -> vector<16x64xf32>
    %115 = tpu.concatenate %75, %114 in 0 : vector<16x64xf32>, vector<16x64xf32> -> vector<32x64xf32>
    %116 = arith.truncf %115 : vector<32x64xf32> to vector<32x64xbf16>
    %c0_36 = arith.constant 0 : index
    %c0_37 = arith.constant 0 : index
    %c0_38 = arith.constant 0 : index
    %117 = vector.load %arg7[%c0_36, %c0_37, %c0_38] : memref<2x64x64xbf16, #tpu.memory_space<vmem>>, vector<1x64x64xbf16>
    %118 = vector.shape_cast %117 : vector<1x64x64xbf16> to vector<64x64xbf16>
    %cst_39 = arith.constant dense<0.000000e+00> : vector<32x64xf32>
    %119 = tpu.matmul %116, %118, %cst_39 {dimension_numbers = #tpu.dot_dimension_numbers<[1], [0], [0], [1], [0, 0, 1, 1], [], []>} : vector<32x64xbf16>, vector<64x64xbf16>, vector<32x64xf32> -> vector<32x64xf32>
    %c0_40 = arith.constant 0 : index
    %c0_41 = arith.constant 0 : index
    %c0_42 = arith.constant 0 : index
    %120 = vector.load %arg8[%c0_40, %c0_41, %c0_42] : memref<2x1x64xf32, #tpu.memory_space<vmem>>, vector<1x1x64xf32>
    %121 = vector.shape_cast %120 : vector<1x1x64xf32> to vector<1x64xf32>
    %122 = vector.broadcast %121 : vector<1x64xf32> to vector<32x64xf32>
    %123 = arith.addf %119, %122 : vector<32x64xf32>
    %124 = arith.addf %27, %123 : vector<32x64xf32>
    %c0_43 = arith.constant 0 : index
    %c0_44 = arith.constant 0 : index
    %c0_45 = arith.constant 0 : index
    %125 = vector.load %arg9[%c0_43, %c0_44, %c0_45] : memref<2x1x64xf32, #tpu.memory_space<vmem>>, vector<1x1x64xf32>
    %126 = vector.shape_cast %125 : vector<1x1x64xf32> to vector<1x64xf32>
    %c0_46 = arith.constant 0 : index
    %c0_47 = arith.constant 0 : index
    %c0_48 = arith.constant 0 : index
    %127 = vector.load %arg10[%c0_46, %c0_47, %c0_48] : memref<2x1x64xf32, #tpu.memory_space<vmem>>, vector<1x1x64xf32>
    %128 = vector.shape_cast %127 : vector<1x1x64xf32> to vector<1x64xf32>
    %cst_49 = arith.constant dense<0.000000e+00> : vector<32xf32>
    %129 = vector.multi_reduction <add>, %124, %cst_49 [1] : vector<32x64xf32> to vector<32xf32>
    %130 = vector.shape_cast %129 : vector<32xf32> to vector<32x1xf32>
    %cst_50 = arith.constant 6.400000e+01 : f32
    %131 = vector.broadcast %cst_50 : f32 to vector<32x1xf32>
    %132 = arith.divf %130, %131 : vector<32x1xf32>
    %133 = vector.broadcast %132 : vector<32x1xf32> to vector<32x64xf32>
    %134 = arith.subf %124, %133 : vector<32x64xf32>
    %135 = arith.mulf %134, %134 : vector<32x64xf32>
    %cst_51 = arith.constant dense<0.000000e+00> : vector<32xf32>
    %136 = vector.multi_reduction <add>, %135, %cst_51 [1] : vector<32x64xf32> to vector<32xf32>
    %137 = vector.shape_cast %136 : vector<32xf32> to vector<32x1xf32>
    %cst_52 = arith.constant 6.400000e+01 : f32
    %138 = vector.broadcast %cst_52 : f32 to vector<32x1xf32>
    %139 = arith.divf %137, %138 : vector<32x1xf32>
    %140 = vector.broadcast %132 : vector<32x1xf32> to vector<32x64xf32>
    %141 = arith.subf %124, %140 : vector<32x64xf32>
    %cst_53 = arith.constant 9.99999996E-13 : f32
    %142 = vector.broadcast %cst_53 : f32 to vector<32x1xf32>
    %143 = arith.addf %139, %142 : vector<32x1xf32>
    %144 = math.rsqrt %143 : vector<32x1xf32>
    %145 = vector.broadcast %144 : vector<32x1xf32> to vector<32x64xf32>
    %146 = arith.mulf %141, %145 : vector<32x64xf32>
    %147 = vector.broadcast %126 : vector<1x64xf32> to vector<32x64xf32>
    %148 = arith.mulf %146, %147 : vector<32x64xf32>
    %149 = vector.broadcast %128 : vector<1x64xf32> to vector<32x64xf32>
    %150 = arith.addf %148, %149 : vector<32x64xf32>
    %151 = arith.truncf %150 : vector<32x64xf32> to vector<32x64xbf16>
    %c0_54 = arith.constant 0 : index
    %c0_55 = arith.constant 0 : index
    %c0_56 = arith.constant 0 : index
    %152 = vector.load %arg11[%c0_54, %c0_55, %c0_56] : memref<2x64x128xbf16, #tpu.memory_space<vmem>>, vector<1x64x128xbf16>
    %153 = vector.shape_cast %152 : vector<1x64x128xbf16> to vector<64x128xbf16>
    %cst_57 = arith.constant dense<0.000000e+00> : vector<32x128xf32>
    %154 = tpu.matmul %151, %153, %cst_57 {dimension_numbers = #tpu.dot_dimension_numbers<[1], [0], [0], [1], [0, 0, 1, 1], [], []>} : vector<32x64xbf16>, vector<64x128xbf16>, vector<32x128xf32> -> vector<32x128xf32>
    %c0_58 = arith.constant 0 : index
    %c0_59 = arith.constant 0 : index
    %c0_60 = arith.constant 0 : index
    %155 = vector.load %arg12[%c0_58, %c0_59, %c0_60] : memref<2x1x128xf32, #tpu.memory_space<vmem>>, vector<1x1x128xf32>
    %156 = vector.shape_cast %155 : vector<1x1x128xf32> to vector<1x128xf32>
    %157 = vector.broadcast %156 : vector<1x128xf32> to vector<32x128xf32>
    %158 = arith.addf %154, %157 : vector<32x128xf32>
    %159 = arith.mulf %158, %158 : vector<32x128xf32>
    %160 = arith.mulf %158, %159 : vector<32x128xf32>
    %cst_61 = arith.constant 4.471500e-02 : f32
    %161 = vector.broadcast %cst_61 : f32 to vector<32x128xf32>
    %162 = arith.mulf %161, %160 : vector<32x128xf32>
    %163 = arith.addf %158, %162 : vector<32x128xf32>
    %cst_62 = arith.constant 0.797884583 : f32
    %164 = vector.broadcast %cst_62 : f32 to vector<32x128xf32>
    %165 = arith.mulf %164, %163 : vector<32x128xf32>
    %166 = math.tanh %165 : vector<32x128xf32>
    %cst_63 = arith.constant 1.000000e+00 : f32
    %167 = vector.broadcast %cst_63 : f32 to vector<32x128xf32>
    %168 = arith.addf %167, %166 : vector<32x128xf32>
    %cst_64 = arith.constant 5.000000e-01 : f32
    %169 = vector.broadcast %cst_64 : f32 to vector<32x128xf32>
    %170 = arith.mulf %169, %168 : vector<32x128xf32>
    %171 = arith.mulf %158, %170 : vector<32x128xf32>
    %172 = arith.truncf %171 : vector<32x128xf32> to vector<32x128xbf16>
    %c0_65 = arith.constant 0 : index
    %c0_66 = arith.constant 0 : index
    %c0_67 = arith.constant 0 : index
    %173 = vector.load %arg13[%c0_65, %c0_66, %c0_67] : memref<2x128x64xbf16, #tpu.memory_space<vmem>>, vector<1x128x64xbf16>
    %174 = vector.shape_cast %173 : vector<1x128x64xbf16> to vector<128x64xbf16>
    %cst_68 = arith.constant dense<0.000000e+00> : vector<32x64xf32>
    %175 = tpu.matmul %172, %174, %cst_68 {dimension_numbers = #tpu.dot_dimension_numbers<[1], [0], [0], [1], [0, 0, 1, 1], [], []>} : vector<32x128xbf16>, vector<128x64xbf16>, vector<32x64xf32> -> vector<32x64xf32>
    %c0_69 = arith.constant 0 : index
    %c0_70 = arith.constant 0 : index
    %c0_71 = arith.constant 0 : index
    %176 = vector.load %arg14[%c0_69, %c0_70, %c0_71] : memref<2x1x64xf32, #tpu.memory_space<vmem>>, vector<1x1x64xf32>
    %177 = vector.shape_cast %176 : vector<1x1x64xf32> to vector<1x64xf32>
    %178 = vector.broadcast %177 : vector<1x64xf32> to vector<32x64xf32>
    %179 = arith.addf %175, %178 : vector<32x64xf32>
    %180 = arith.addf %150, %179 : vector<32x64xf32>
    %c0_72 = arith.constant 0 : index
    %c0_73 = arith.constant 0 : index
    %c0_74 = arith.constant 0 : index
    %181 = vector.load %arg15[%c0_72, %c0_73, %c0_74] : memref<2x1x64xf32, #tpu.memory_space<vmem>>, vector<1x1x64xf32>
    %182 = vector.shape_cast %181 : vector<1x1x64xf32> to vector<1x64xf32>
    %c0_75 = arith.constant 0 : index
    %c0_76 = arith.constant 0 : index
    %c0_77 = arith.constant 0 : index
    %183 = vector.load %arg16[%c0_75, %c0_76, %c0_77] : memref<2x1x64xf32, #tpu.memory_space<vmem>>, vector<1x1x64xf32>
    %184 = vector.shape_cast %183 : vector<1x1x64xf32> to vector<1x64xf32>
    %cst_78 = arith.constant dense<0.000000e+00> : vector<32xf32>
    %185 = vector.multi_reduction <add>, %180, %cst_78 [1] : vector<32x64xf32> to vector<32xf32>
    %186 = vector.shape_cast %185 : vector<32xf32> to vector<32x1xf32>
    %cst_79 = arith.constant 6.400000e+01 : f32
    %187 = vector.broadcast %cst_79 : f32 to vector<32x1xf32>
    %188 = arith.divf %186, %187 : vector<32x1xf32>
    %189 = vector.broadcast %188 : vector<32x1xf32> to vector<32x64xf32>
    %190 = arith.subf %180, %189 : vector<32x64xf32>
    %191 = arith.mulf %190, %190 : vector<32x64xf32>
    %cst_80 = arith.constant dense<0.000000e+00> : vector<32xf32>
    %192 = vector.multi_reduction <add>, %191, %cst_80 [1] : vector<32x64xf32> to vector<32xf32>
    %193 = vector.shape_cast %192 : vector<32xf32> to vector<32x1xf32>
    %cst_81 = arith.constant 6.400000e+01 : f32
    %194 = vector.broadcast %cst_81 : f32 to vector<32x1xf32>
    %195 = arith.divf %193, %194 : vector<32x1xf32>
    %196 = vector.broadcast %188 : vector<32x1xf32> to vector<32x64xf32>
    %197 = arith.subf %180, %196 : vector<32x64xf32>
    %cst_82 = arith.constant 9.99999996E-13 : f32
    %198 = vector.broadcast %cst_82 : f32 to vector<32x1xf32>
    %199 = arith.addf %195, %198 : vector<32x1xf32>
    %200 = math.rsqrt %199 : vector<32x1xf32>
    %201 = vector.broadcast %200 : vector<32x1xf32> to vector<32x64xf32>
    %202 = arith.mulf %197, %201 : vector<32x64xf32>
    %203 = vector.broadcast %182 : vector<1x64xf32> to vector<32x64xf32>
    %204 = arith.mulf %202, %203 : vector<32x64xf32>
    %205 = vector.broadcast %184 : vector<1x64xf32> to vector<32x64xf32>
    %206 = arith.addf %204, %205 : vector<32x64xf32>
    %207 = arith.truncf %206 : vector<32x64xf32> to vector<32x64xbf16>
    %c1 = arith.constant 1 : index
    %c0_83 = arith.constant 0 : index
    %c0_84 = arith.constant 0 : index
    %208 = vector.load %arg5[%c1, %c0_83, %c0_84] : memref<2x64x192xbf16, #tpu.memory_space<vmem>>, vector<1x64x192xbf16>
    %209 = vector.shape_cast %208 : vector<1x64x192xbf16> to vector<64x192xbf16>
    %cst_85 = arith.constant dense<0.000000e+00> : vector<32x192xf32>
    %210 = tpu.matmul %207, %209, %cst_85 {dimension_numbers = #tpu.dot_dimension_numbers<[1], [0], [0], [1], [0, 0, 1, 1], [], []>} : vector<32x64xbf16>, vector<64x192xbf16>, vector<32x192xf32> -> vector<32x192xf32>
    %c1_86 = arith.constant 1 : index
    %c0_87 = arith.constant 0 : index
    %c0_88 = arith.constant 0 : index
    %211 = vector.load %arg6[%c1_86, %c0_87, %c0_88] : memref<2x1x192xf32, #tpu.memory_space<vmem>>, vector<1x1x192xf32>
    %212 = vector.shape_cast %211 : vector<1x1x192xf32> to vector<1x192xf32>
    %213 = vector.broadcast %212 : vector<1x192xf32> to vector<32x192xf32>
    %214 = arith.addf %210, %213 : vector<32x192xf32>
    %215 = arith.truncf %214 : vector<32x192xf32> to vector<32x192xbf16>
    %216 = vector.extract_strided_slice %215 {offsets = [0, 0], sizes = [16, 32], strides = [1, 1]} : vector<32x192xbf16> to vector<16x32xbf16>
    %217 = vector.extract_strided_slice %215 {offsets = [0, 64], sizes = [16, 32], strides = [1, 1]} : vector<32x192xbf16> to vector<16x32xbf16>
    %218 = vector.extract_strided_slice %215 {offsets = [0, 128], sizes = [16, 32], strides = [1, 1]} : vector<32x192xbf16> to vector<16x32xbf16>
    %cst_89 = arith.constant dense<0.000000e+00> : vector<16x16xf32>
    %219 = tpu.matmul %216, %217, %cst_89 {dimension_numbers = #tpu.dot_dimension_numbers<[1], [1], [0], [0], [0, 0, 1, 0], [], []>} : vector<16x32xbf16>, vector<16x32xbf16>, vector<16x16xf32> -> vector<16x16xf32>
    %220 = vector.extract_strided_slice %3 {offsets = [0, 0], sizes = [1, 16], strides = [1, 1]} : vector<2x16xf32> to vector<1x16xf32>
    %221 = vector.broadcast %220 : vector<1x16xf32> to vector<16x16xf32>
    %222 = arith.addf %219, %221 : vector<16x16xf32>
    %cst_90 = arith.constant dense<0xFF800000> : vector<16xf32>
    %223 = vector.multi_reduction <maximumf>, %222, %cst_90 [1] : vector<16x16xf32> to vector<16xf32>
    %224 = vector.shape_cast %223 : vector<16xf32> to vector<16x1xf32>
    %225 = vector.broadcast %224 : vector<16x1xf32> to vector<16x16xf32>
    %226 = arith.subf %222, %225 : vector<16x16xf32>
    %227 = math.exp %226 : vector<16x16xf32>
    %cst_91 = arith.constant dense<0.000000e+00> : vector<16xf32>
    %228 = vector.multi_reduction <add>, %227, %cst_91 [1] : vector<16x16xf32> to vector<16xf32>
    %229 = vector.shape_cast %228 : vector<16xf32> to vector<16x1xf32>
    %230 = tpu.reciprocal %229 {approx = true} : vector<16x1xf32> -> vector<16x1xf32>
    %231 = vector.broadcast %230 : vector<16x1xf32> to vector<16x16xf32>
    %232 = arith.mulf %227, %231 : vector<16x16xf32>
    %233 = arith.truncf %232 : vector<16x16xf32> to vector<16x16xbf16>
    %cst_92 = arith.constant dense<0.000000e+00> : vector<16x32xf32>
    %234 = tpu.matmul %233, %218, %cst_92 {dimension_numbers = #tpu.dot_dimension_numbers<[1], [0], [0], [1], [0, 0, 1, 1], [], []>} : vector<16x16xbf16>, vector<16x32xbf16>, vector<16x32xf32> -> vector<16x32xf32>
    %235 = vector.extract_strided_slice %215 {offsets = [0, 32], sizes = [16, 32], strides = [1, 1]} : vector<32x192xbf16> to vector<16x32xbf16>
    %236 = vector.extract_strided_slice %215 {offsets = [0, 96], sizes = [16, 32], strides = [1, 1]} : vector<32x192xbf16> to vector<16x32xbf16>
    %237 = vector.extract_strided_slice %215 {offsets = [0, 160], sizes = [16, 32], strides = [1, 1]} : vector<32x192xbf16> to vector<16x32xbf16>
    %cst_93 = arith.constant dense<0.000000e+00> : vector<16x16xf32>
    %238 = tpu.matmul %235, %236, %cst_93 {dimension_numbers = #tpu.dot_dimension_numbers<[1], [1], [0], [0], [0, 0, 1, 0], [], []>} : vector<16x32xbf16>, vector<16x32xbf16>, vector<16x16xf32> -> vector<16x16xf32>
    %239 = vector.extract_strided_slice %3 {offsets = [0, 0], sizes = [1, 16], strides = [1, 1]} : vector<2x16xf32> to vector<1x16xf32>
    %240 = vector.broadcast %239 : vector<1x16xf32> to vector<16x16xf32>
    %241 = arith.addf %238, %240 : vector<16x16xf32>
    %cst_94 = arith.constant dense<0xFF800000> : vector<16xf32>
    %242 = vector.multi_reduction <maximumf>, %241, %cst_94 [1] : vector<16x16xf32> to vector<16xf32>
    %243 = vector.shape_cast %242 : vector<16xf32> to vector<16x1xf32>
    %244 = vector.broadcast %243 : vector<16x1xf32> to vector<16x16xf32>
    %245 = arith.subf %241, %244 : vector<16x16xf32>
    %246 = math.exp %245 : vector<16x16xf32>
    %cst_95 = arith.constant dense<0.000000e+00> : vector<16xf32>
    %247 = vector.multi_reduction <add>, %246, %cst_95 [1] : vector<16x16xf32> to vector<16xf32>
    %248 = vector.shape_cast %247 : vector<16xf32> to vector<16x1xf32>
    %249 = tpu.reciprocal %248 {approx = true} : vector<16x1xf32> -> vector<16x1xf32>
    %250 = vector.broadcast %249 : vector<16x1xf32> to vector<16x16xf32>
    %251 = arith.mulf %246, %250 : vector<16x16xf32>
    %252 = arith.truncf %251 : vector<16x16xf32> to vector<16x16xbf16>
    %cst_96 = arith.constant dense<0.000000e+00> : vector<16x32xf32>
    %253 = tpu.matmul %252, %237, %cst_96 {dimension_numbers = #tpu.dot_dimension_numbers<[1], [0], [0], [1], [0, 0, 1, 1], [], []>} : vector<16x16xbf16>, vector<16x32xbf16>, vector<16x32xf32> -> vector<16x32xf32>
    %254 = tpu.concatenate %234, %253 in 1 : vector<16x32xf32>, vector<16x32xf32> -> vector<16x64xf32>
    %255 = vector.extract_strided_slice %215 {offsets = [16, 0], sizes = [16, 32], strides = [1, 1]} : vector<32x192xbf16> to vector<16x32xbf16>
    %256 = vector.extract_strided_slice %215 {offsets = [16, 64], sizes = [16, 32], strides = [1, 1]} : vector<32x192xbf16> to vector<16x32xbf16>
    %257 = vector.extract_strided_slice %215 {offsets = [16, 128], sizes = [16, 32], strides = [1, 1]} : vector<32x192xbf16> to vector<16x32xbf16>
    %cst_97 = arith.constant dense<0.000000e+00> : vector<16x16xf32>
    %258 = tpu.matmul %255, %256, %cst_97 {dimension_numbers = #tpu.dot_dimension_numbers<[1], [1], [0], [0], [0, 0, 1, 0], [], []>} : vector<16x32xbf16>, vector<16x32xbf16>, vector<16x16xf32> -> vector<16x16xf32>
    %259 = vector.extract_strided_slice %3 {offsets = [1, 0], sizes = [1, 16], strides = [1, 1]} : vector<2x16xf32> to vector<1x16xf32>
    %260 = vector.broadcast %259 : vector<1x16xf32> to vector<16x16xf32>
    %261 = arith.addf %258, %260 : vector<16x16xf32>
    %cst_98 = arith.constant dense<0xFF800000> : vector<16xf32>
    %262 = vector.multi_reduction <maximumf>, %261, %cst_98 [1] : vector<16x16xf32> to vector<16xf32>
    %263 = vector.shape_cast %262 : vector<16xf32> to vector<16x1xf32>
    %264 = vector.broadcast %263 : vector<16x1xf32> to vector<16x16xf32>
    %265 = arith.subf %261, %264 : vector<16x16xf32>
    %266 = math.exp %265 : vector<16x16xf32>
    %cst_99 = arith.constant dense<0.000000e+00> : vector<16xf32>
    %267 = vector.multi_reduction <add>, %266, %cst_99 [1] : vector<16x16xf32> to vector<16xf32>
    %268 = vector.shape_cast %267 : vector<16xf32> to vector<16x1xf32>
    %269 = tpu.reciprocal %268 {approx = true} : vector<16x1xf32> -> vector<16x1xf32>
    %270 = vector.broadcast %269 : vector<16x1xf32> to vector<16x16xf32>
    %271 = arith.mulf %266, %270 : vector<16x16xf32>
    %272 = arith.truncf %271 : vector<16x16xf32> to vector<16x16xbf16>
    %cst_100 = arith.constant dense<0.000000e+00> : vector<16x32xf32>
    %273 = tpu.matmul %272, %257, %cst_100 {dimension_numbers = #tpu.dot_dimension_numbers<[1], [0], [0], [1], [0, 0, 1, 1], [], []>} : vector<16x16xbf16>, vector<16x32xbf16>, vector<16x32xf32> -> vector<16x32xf32>
    %274 = vector.extract_strided_slice %215 {offsets = [16, 32], sizes = [16, 32], strides = [1, 1]} : vector<32x192xbf16> to vector<16x32xbf16>
    %275 = vector.extract_strided_slice %215 {offsets = [16, 96], sizes = [16, 32], strides = [1, 1]} : vector<32x192xbf16> to vector<16x32xbf16>
    %276 = vector.extract_strided_slice %215 {offsets = [16, 160], sizes = [16, 32], strides = [1, 1]} : vector<32x192xbf16> to vector<16x32xbf16>
    %cst_101 = arith.constant dense<0.000000e+00> : vector<16x16xf32>
    %277 = tpu.matmul %274, %275, %cst_101 {dimension_numbers = #tpu.dot_dimension_numbers<[1], [1], [0], [0], [0, 0, 1, 0], [], []>} : vector<16x32xbf16>, vector<16x32xbf16>, vector<16x16xf32> -> vector<16x16xf32>
    %278 = vector.extract_strided_slice %3 {offsets = [1, 0], sizes = [1, 16], strides = [1, 1]} : vector<2x16xf32> to vector<1x16xf32>
    %279 = vector.broadcast %278 : vector<1x16xf32> to vector<16x16xf32>
    %280 = arith.addf %277, %279 : vector<16x16xf32>
    %cst_102 = arith.constant dense<0xFF800000> : vector<16xf32>
    %281 = vector.multi_reduction <maximumf>, %280, %cst_102 [1] : vector<16x16xf32> to vector<16xf32>
    %282 = vector.shape_cast %281 : vector<16xf32> to vector<16x1xf32>
    %283 = vector.broadcast %282 : vector<16x1xf32> to vector<16x16xf32>
    %284 = arith.subf %280, %283 : vector<16x16xf32>
    %285 = math.exp %284 : vector<16x16xf32>
    %cst_103 = arith.constant dense<0.000000e+00> : vector<16xf32>
    %286 = vector.multi_reduction <add>, %285, %cst_103 [1] : vector<16x16xf32> to vector<16xf32>
    %287 = vector.shape_cast %286 : vector<16xf32> to vector<16x1xf32>
    %288 = tpu.reciprocal %287 {approx = true} : vector<16x1xf32> -> vector<16x1xf32>
    %289 = vector.broadcast %288 : vector<16x1xf32> to vector<16x16xf32>
    %290 = arith.mulf %285, %289 : vector<16x16xf32>
    %291 = arith.truncf %290 : vector<16x16xf32> to vector<16x16xbf16>
    %cst_104 = arith.constant dense<0.000000e+00> : vector<16x32xf32>
    %292 = tpu.matmul %291, %276, %cst_104 {dimension_numbers = #tpu.dot_dimension_numbers<[1], [0], [0], [1], [0, 0, 1, 1], [], []>} : vector<16x16xbf16>, vector<16x32xbf16>, vector<16x32xf32> -> vector<16x32xf32>
    %293 = tpu.concatenate %273, %292 in 1 : vector<16x32xf32>, vector<16x32xf32> -> vector<16x64xf32>
    %294 = tpu.concatenate %254, %293 in 0 : vector<16x64xf32>, vector<16x64xf32> -> vector<32x64xf32>
    %295 = arith.truncf %294 : vector<32x64xf32> to vector<32x64xbf16>
    %c1_105 = arith.constant 1 : index
    %c0_106 = arith.constant 0 : index
    %c0_107 = arith.constant 0 : index
    %296 = vector.load %arg7[%c1_105, %c0_106, %c0_107] : memref<2x64x64xbf16, #tpu.memory_space<vmem>>, vector<1x64x64xbf16>
    %297 = vector.shape_cast %296 : vector<1x64x64xbf16> to vector<64x64xbf16>
    %cst_108 = arith.constant dense<0.000000e+00> : vector<32x64xf32>
    %298 = tpu.matmul %295, %297, %cst_108 {dimension_numbers = #tpu.dot_dimension_numbers<[1], [0], [0], [1], [0, 0, 1, 1], [], []>} : vector<32x64xbf16>, vector<64x64xbf16>, vector<32x64xf32> -> vector<32x64xf32>
    %c1_109 = arith.constant 1 : index
    %c0_110 = arith.constant 0 : index
    %c0_111 = arith.constant 0 : index
    %299 = vector.load %arg8[%c1_109, %c0_110, %c0_111] : memref<2x1x64xf32, #tpu.memory_space<vmem>>, vector<1x1x64xf32>
    %300 = vector.shape_cast %299 : vector<1x1x64xf32> to vector<1x64xf32>
    %301 = vector.broadcast %300 : vector<1x64xf32> to vector<32x64xf32>
    %302 = arith.addf %298, %301 : vector<32x64xf32>
    %303 = arith.addf %206, %302 : vector<32x64xf32>
    %c1_112 = arith.constant 1 : index
    %c0_113 = arith.constant 0 : index
    %c0_114 = arith.constant 0 : index
    %304 = vector.load %arg9[%c1_112, %c0_113, %c0_114] : memref<2x1x64xf32, #tpu.memory_space<vmem>>, vector<1x1x64xf32>
    %305 = vector.shape_cast %304 : vector<1x1x64xf32> to vector<1x64xf32>
    %c1_115 = arith.constant 1 : index
    %c0_116 = arith.constant 0 : index
    %c0_117 = arith.constant 0 : index
    %306 = vector.load %arg10[%c1_115, %c0_116, %c0_117] : memref<2x1x64xf32, #tpu.memory_space<vmem>>, vector<1x1x64xf32>
    %307 = vector.shape_cast %306 : vector<1x1x64xf32> to vector<1x64xf32>
    %cst_118 = arith.constant dense<0.000000e+00> : vector<32xf32>
    %308 = vector.multi_reduction <add>, %303, %cst_118 [1] : vector<32x64xf32> to vector<32xf32>
    %309 = vector.shape_cast %308 : vector<32xf32> to vector<32x1xf32>
    %cst_119 = arith.constant 6.400000e+01 : f32
    %310 = vector.broadcast %cst_119 : f32 to vector<32x1xf32>
    %311 = arith.divf %309, %310 : vector<32x1xf32>
    %312 = vector.broadcast %311 : vector<32x1xf32> to vector<32x64xf32>
    %313 = arith.subf %303, %312 : vector<32x64xf32>
    %314 = arith.mulf %313, %313 : vector<32x64xf32>
    %cst_120 = arith.constant dense<0.000000e+00> : vector<32xf32>
    %315 = vector.multi_reduction <add>, %314, %cst_120 [1] : vector<32x64xf32> to vector<32xf32>
    %316 = vector.shape_cast %315 : vector<32xf32> to vector<32x1xf32>
    %cst_121 = arith.constant 6.400000e+01 : f32
    %317 = vector.broadcast %cst_121 : f32 to vector<32x1xf32>
    %318 = arith.divf %316, %317 : vector<32x1xf32>
    %319 = vector.broadcast %311 : vector<32x1xf32> to vector<32x64xf32>
    %320 = arith.subf %303, %319 : vector<32x64xf32>
    %cst_122 = arith.constant 9.99999996E-13 : f32
    %321 = vector.broadcast %cst_122 : f32 to vector<32x1xf32>
    %322 = arith.addf %318, %321 : vector<32x1xf32>
    %323 = math.rsqrt %322 : vector<32x1xf32>
    %324 = vector.broadcast %323 : vector<32x1xf32> to vector<32x64xf32>
    %325 = arith.mulf %320, %324 : vector<32x64xf32>
    %326 = vector.broadcast %305 : vector<1x64xf32> to vector<32x64xf32>
    %327 = arith.mulf %325, %326 : vector<32x64xf32>
    %328 = vector.broadcast %307 : vector<1x64xf32> to vector<32x64xf32>
    %329 = arith.addf %327, %328 : vector<32x64xf32>
    %330 = arith.truncf %329 : vector<32x64xf32> to vector<32x64xbf16>
    %c1_123 = arith.constant 1 : index
    %c0_124 = arith.constant 0 : index
    %c0_125 = arith.constant 0 : index
    %331 = vector.load %arg11[%c1_123, %c0_124, %c0_125] : memref<2x64x128xbf16, #tpu.memory_space<vmem>>, vector<1x64x128xbf16>
    %332 = vector.shape_cast %331 : vector<1x64x128xbf16> to vector<64x128xbf16>
    %cst_126 = arith.constant dense<0.000000e+00> : vector<32x128xf32>
    %333 = tpu.matmul %330, %332, %cst_126 {dimension_numbers = #tpu.dot_dimension_numbers<[1], [0], [0], [1], [0, 0, 1, 1], [], []>} : vector<32x64xbf16>, vector<64x128xbf16>, vector<32x128xf32> -> vector<32x128xf32>
    %c1_127 = arith.constant 1 : index
    %c0_128 = arith.constant 0 : index
    %c0_129 = arith.constant 0 : index
    %334 = vector.load %arg12[%c1_127, %c0_128, %c0_129] : memref<2x1x128xf32, #tpu.memory_space<vmem>>, vector<1x1x128xf32>
    %335 = vector.shape_cast %334 : vector<1x1x128xf32> to vector<1x128xf32>
    %336 = vector.broadcast %335 : vector<1x128xf32> to vector<32x128xf32>
    %337 = arith.addf %333, %336 : vector<32x128xf32>
    %338 = arith.mulf %337, %337 : vector<32x128xf32>
    %339 = arith.mulf %337, %338 : vector<32x128xf32>
    %cst_130 = arith.constant 4.471500e-02 : f32
    %340 = vector.broadcast %cst_130 : f32 to vector<32x128xf32>
    %341 = arith.mulf %340, %339 : vector<32x128xf32>
    %342 = arith.addf %337, %341 : vector<32x128xf32>
    %cst_131 = arith.constant 0.797884583 : f32
    %343 = vector.broadcast %cst_131 : f32 to vector<32x128xf32>
    %344 = arith.mulf %343, %342 : vector<32x128xf32>
    %345 = math.tanh %344 : vector<32x128xf32>
    %cst_132 = arith.constant 1.000000e+00 : f32
    %346 = vector.broadcast %cst_132 : f32 to vector<32x128xf32>
    %347 = arith.addf %346, %345 : vector<32x128xf32>
    %cst_133 = arith.constant 5.000000e-01 : f32
    %348 = vector.broadcast %cst_133 : f32 to vector<32x128xf32>
    %349 = arith.mulf %348, %347 : vector<32x128xf32>
    %350 = arith.mulf %337, %349 : vector<32x128xf32>
    %351 = arith.truncf %350 : vector<32x128xf32> to vector<32x128xbf16>
    %c1_134 = arith.constant 1 : index
    %c0_135 = arith.constant 0 : index
    %c0_136 = arith.constant 0 : index
    %352 = vector.load %arg13[%c1_134, %c0_135, %c0_136] : memref<2x128x64xbf16, #tpu.memory_space<vmem>>, vector<1x128x64xbf16>
    %353 = vector.shape_cast %352 : vector<1x128x64xbf16> to vector<128x64xbf16>
    %cst_137 = arith.constant dense<0.000000e+00> : vector<32x64xf32>
    %354 = tpu.matmul %351, %353, %cst_137 {dimension_numbers = #tpu.dot_dimension_numbers<[1], [0], [0], [1], [0, 0, 1, 1], [], []>} : vector<32x128xbf16>, vector<128x64xbf16>, vector<32x64xf32> -> vector<32x64xf32>
    %c1_138 = arith.constant 1 : index
    %c0_139 = arith.constant 0 : index
    %c0_140 = arith.constant 0 : index
    %355 = vector.load %arg14[%c1_138, %c0_139, %c0_140] : memref<2x1x64xf32, #tpu.memory_space<vmem>>, vector<1x1x64xf32>
    %356 = vector.shape_cast %355 : vector<1x1x64xf32> to vector<1x64xf32>
    %357 = vector.broadcast %356 : vector<1x64xf32> to vector<32x64xf32>
    %358 = arith.addf %354, %357 : vector<32x64xf32>
    %359 = arith.addf %329, %358 : vector<32x64xf32>
    %c1_141 = arith.constant 1 : index
    %c0_142 = arith.constant 0 : index
    %c0_143 = arith.constant 0 : index
    %360 = vector.load %arg15[%c1_141, %c0_142, %c0_143] : memref<2x1x64xf32, #tpu.memory_space<vmem>>, vector<1x1x64xf32>
    %361 = vector.shape_cast %360 : vector<1x1x64xf32> to vector<1x64xf32>
    %c1_144 = arith.constant 1 : index
    %c0_145 = arith.constant 0 : index
    %c0_146 = arith.constant 0 : index
    %362 = vector.load %arg16[%c1_144, %c0_145, %c0_146] : memref<2x1x64xf32, #tpu.memory_space<vmem>>, vector<1x1x64xf32>
    %363 = vector.shape_cast %362 : vector<1x1x64xf32> to vector<1x64xf32>
    %cst_147 = arith.constant dense<0.000000e+00> : vector<32xf32>
    %364 = vector.multi_reduction <add>, %359, %cst_147 [1] : vector<32x64xf32> to vector<32xf32>
    %365 = vector.shape_cast %364 : vector<32xf32> to vector<32x1xf32>
    %cst_148 = arith.constant 6.400000e+01 : f32
    %366 = vector.broadcast %cst_148 : f32 to vector<32x1xf32>
    %367 = arith.divf %365, %366 : vector<32x1xf32>
    %368 = vector.broadcast %367 : vector<32x1xf32> to vector<32x64xf32>
    %369 = arith.subf %359, %368 : vector<32x64xf32>
    %370 = arith.mulf %369, %369 : vector<32x64xf32>
    %cst_149 = arith.constant dense<0.000000e+00> : vector<32xf32>
    %371 = vector.multi_reduction <add>, %370, %cst_149 [1] : vector<32x64xf32> to vector<32xf32>
    %372 = vector.shape_cast %371 : vector<32xf32> to vector<32x1xf32>
    %cst_150 = arith.constant 6.400000e+01 : f32
    %373 = vector.broadcast %cst_150 : f32 to vector<32x1xf32>
    %374 = arith.divf %372, %373 : vector<32x1xf32>
    %375 = vector.broadcast %367 : vector<32x1xf32> to vector<32x64xf32>
    %376 = arith.subf %359, %375 : vector<32x64xf32>
    %cst_151 = arith.constant 9.99999996E-13 : f32
    %377 = vector.broadcast %cst_151 : f32 to vector<32x1xf32>
    %378 = arith.addf %374, %377 : vector<32x1xf32>
    %379 = math.rsqrt %378 : vector<32x1xf32>
    %380 = vector.broadcast %379 : vector<32x1xf32> to vector<32x64xf32>
    %381 = arith.mulf %376, %380 : vector<32x64xf32>
    %382 = vector.broadcast %361 : vector<1x64xf32> to vector<32x64xf32>
    %383 = arith.mulf %381, %382 : vector<32x64xf32>
    %384 = vector.broadcast %363 : vector<1x64xf32> to vector<32x64xf32>
    %385 = arith.addf %383, %384 : vector<32x64xf32>
    %386 = vector.extract_strided_slice %385 {offsets = [0, 0], sizes = [1, 64], strides = [1, 1]} : vector<32x64xf32> to vector<1x64xf32>
    %387 = vector.extract_strided_slice %385 {offsets = [16, 0], sizes = [1, 64], strides = [1, 1]} : vector<32x64xf32> to vector<1x64xf32>
    %388 = tpu.concatenate %386, %387 in 0 : vector<1x64xf32>, vector<1x64xf32> -> vector<2x64xf32>
    %389 = arith.truncf %388 : vector<2x64xf32> to vector<2x64xbf16>
    %c0_152 = arith.constant 0 : index
    %c0_153 = arith.constant 0 : index
    %390 = vector.load %arg17[%c0_152, %c0_153] : memref<64x64xbf16, #tpu.memory_space<vmem>>, vector<64x64xbf16>
    %cst_154 = arith.constant dense<0.000000e+00> : vector<2x64xf32>
    %391 = tpu.matmul %389, %390, %cst_154 {dimension_numbers = #tpu.dot_dimension_numbers<[1], [0], [0], [1], [0, 0, 1, 1], [], []>} : vector<2x64xbf16>, vector<64x64xbf16>, vector<2x64xf32> -> vector<2x64xf32>
    %c0_155 = arith.constant 0 : index
    %c0_156 = arith.constant 0 : index
    %392 = vector.load %arg18[%c0_155, %c0_156] : memref<1x64xf32, #tpu.memory_space<vmem>>, vector<1x64xf32>
    %393 = vector.broadcast %392 : vector<1x64xf32> to vector<2x64xf32>
    %394 = arith.addf %391, %393 : vector<2x64xf32>
    %cst_157 = arith.constant 0.000000e+00 : f32
    %395 = vector.broadcast %cst_157 : f32 to vector<2x64xf32>
    %396 = arith.maximumf %394, %395 : vector<2x64xf32>
    %397 = arith.truncf %396 : vector<2x64xf32> to vector<2x64xbf16>
    %c0_158 = arith.constant 0 : index
    %c0_159 = arith.constant 0 : index
    %398 = vector.load %arg19[%c0_158, %c0_159] : memref<64x128xbf16, #tpu.memory_space<vmem>>, vector<64x128xbf16>
    %cst_160 = arith.constant dense<0.000000e+00> : vector<2x128xf32>
    %399 = tpu.matmul %397, %398, %cst_160 {dimension_numbers = #tpu.dot_dimension_numbers<[1], [0], [0], [1], [0, 0, 1, 1], [], []>} : vector<2x64xbf16>, vector<64x128xbf16>, vector<2x128xf32> -> vector<2x128xf32>
    %c0_161 = arith.constant 0 : index
    %c0_162 = arith.constant 0 : index
    %400 = vector.load %arg20[%c0_161, %c0_162] : memref<1x128xf32, #tpu.memory_space<vmem>>, vector<1x128xf32>
    %401 = vector.broadcast %400 : vector<1x128xf32> to vector<2x128xf32>
    %402 = arith.addf %399, %401 : vector<2x128xf32>
    %c0_163 = arith.constant 0 : index
    %c0_164 = arith.constant 0 : index
    %c0_165 = arith.constant 0 : index
    %403 = vector.load %arg21[%c0_163, %c0_164, %c0_165] : memref<1x2x128xf32, #tpu.memory_space<vmem>>, vector<1x2x128xf32>
    %404 = vector.shape_cast %403 : vector<1x2x128xf32> to vector<2x128xf32>
    %405 = vector.shape_cast %402 : vector<2x128xf32> to vector<1x2x128xf32>
    tpu.vector_store %arg21[%c0_163, %c0_164, %c0_165], %405 {strides = array<i32>} : memref<1x2x128xf32, #tpu.memory_space<vmem>>, vector<1x2x128xf32>,
    return
  }
  func.func @transform_0(%arg0: i32) -> (i32, i32, i32) {
    %c0_i32 = arith.constant 0 : i32
    %c0_i32_0 = arith.constant 0 : i32
    %c0_i32_1 = arith.constant 0 : i32
    return %arg0, %c0_i32, %c0_i32_0 : i32, i32, i32
  }
  func.func @transform_1(%arg0: i32) -> (i32, i32, i32) {
    %c0_i32 = arith.constant 0 : i32
    %c0_i32_0 = arith.constant 0 : i32
    %c0_i32_1 = arith.constant 0 : i32
    return %arg0, %c0_i32, %c0_i32_0 : i32, i32, i32
  }
  func.func @transform_2(%arg0: i32) -> (i32, i32) {
    %c0_i32 = arith.constant 0 : i32
    %c0_i32_0 = arith.constant 0 : i32
    %c0_i32_1 = arith.constant 0 : i32
    return %c0_i32, %c0_i32_0 : i32, i32
  }
  func.func @transform_3(%arg0: i32) -> (i32, i32) {
    %c0_i32 = arith.constant 0 : i32
    %c0_i32_0 = arith.constant 0 : i32
    %c0_i32_1 = arith.constant 0 : i32
    return %c0_i32, %c0_i32_0 : i32, i32
  }
  func.func @transform_4(%arg0: i32) -> (i32, i32, i32) {
    %c0_i32 = arith.constant 0 : i32
    %c0_i32_0 = arith.constant 0 : i32
    %c0_i32_1 = arith.constant 0 : i32
    %c0_i32_2 = arith.constant 0 : i32
    return %c0_i32, %c0_i32_0, %c0_i32_1 : i32, i32, i32
  }
  func.func @transform_5(%arg0: i32) -> (i32, i32, i32) {
    %c0_i32 = arith.constant 0 : i32
    %c0_i32_0 = arith.constant 0 : i32
    %c0_i32_1 = arith.constant 0 : i32
    %c0_i32_2 = arith.constant 0 : i32
    return %c0_i32, %c0_i32_0, %c0_i32_1 : i32, i32, i32
  }
  func.func @transform_6(%arg0: i32) -> (i32, i32, i32) {
    %c0_i32 = arith.constant 0 : i32
    %c0_i32_0 = arith.constant 0 : i32
    %c0_i32_1 = arith.constant 0 : i32
    %c0_i32_2 = arith.constant 0 : i32
    return %c0_i32, %c0_i32_0, %c0_i32_1 : i32, i32, i32
  }
  func.func @transform_7(%arg0: i32) -> (i32, i32, i32) {
    %c0_i32 = arith.constant 0 : i32
    %c0_i32_0 = arith.constant 0 : i32
    %c0_i32_1 = arith.constant 0 : i32
    %c0_i32_2 = arith.constant 0 : i32
    return %c0_i32, %c0_i32_0, %c0_i32_1 : i32, i32, i32
  }
  func.func @transform_8(%arg0: i32) -> (i32, i32, i32) {
    %c0_i32 = arith.constant 0 : i32
    %c0_i32_0 = arith.constant 0 : i32
    %c0_i32_1 = arith.constant 0 : i32
    %c0_i32_2 = arith.constant 0 : i32
    return %c0_i32, %c0_i32_0, %c0_i32_1 : i32, i32, i32
  }
  func.func @transform_9(%arg0: i32) -> (i32, i32, i32) {
    %c0_i32 = arith.constant 0 : i32
    %c0_i32_0 = arith.constant 0 : i32
    %c0_i32_1 = arith.constant 0 : i32
    %c0_i32_2 = arith.constant 0 : i32
    return %c0_i32, %c0_i32_0, %c0_i32_1 : i32, i32, i32
  }
  func.func @transform_10(%arg0: i32) -> (i32, i32, i32) {
    %c0_i32 = arith.constant 0 : i32
    %c0_i32_0 = arith.constant 0 : i32
    %c0_i32_1 = arith.constant 0 : i32
    %c0_i32_2 = arith.constant 0 : i32
    return %c0_i32, %c0_i32_0, %c0_i32_1 : i32, i32, i32
  }
  func.func @transform_11(%arg0: i32) -> (i32, i32, i32) {
    %c0_i32 = arith.constant 0 : i32
    %c0_i32_0 = arith.constant 0 : i32
    %c0_i32_1 = arith.constant 0 : i32
    %c0_i32_2 = arith.constant 0 : i32
    return %c0_i32, %c0_i32_0, %c0_i32_1 : i32, i32, i32
  }
  func.func @transform_12(%arg0: i32) -> (i32, i32, i32) {
    %c0_i32 = arith.constant 0 : i32
    %c0_i32_0 = arith.constant 0 : i32
    %c0_i32_1 = arith.constant 0 : i32
    %c0_i32_2 = arith.constant 0 : i32
    return %c0_i32, %c0_i32_0, %c0_i32_1 : i32, i32, i32
  }
  func.func @transform_13(%arg0: i32) -> (i32, i32, i32) {
    %c0_i32 = arith.constant 0 : i32
    %c0_i32_0 = arith.constant 0 : i32
    %c0_i32_1 = arith.constant 0 : i32
    %c0_i32_2 = arith.constant 0 : i32
    return %c0_i32, %c0_i32_0, %c0_i32_1 : i32, i32, i32
  }
  func.func @transform_14(%arg0: i32) -> (i32, i32, i32) {
    %c0_i32 = arith.constant 0 : i32
    %c0_i32_0 = arith.constant 0 : i32
    %c0_i32_1 = arith.constant 0 : i32
    %c0_i32_2 = arith.constant 0 : i32
    return %c0_i32, %c0_i32_0, %c0_i32_1 : i32, i32, i32
  }
  func.func @transform_15(%arg0: i32) -> (i32, i32, i32) {
    %c0_i32 = arith.constant 0 : i32
    %c0_i32_0 = arith.constant 0 : i32
    %c0_i32_1 = arith.constant 0 : i32
    %c0_i32_2 = arith.constant 0 : i32
    return %c0_i32, %c0_i32_0, %c0_i32_1 : i32, i32, i32
  }
  func.func @transform_16(%arg0: i32) -> (i32, i32) {
    %c0_i32 = arith.constant 0 : i32
    %c0_i32_0 = arith.constant 0 : i32
    %c0_i32_1 = arith.constant 0 : i32
    return %c0_i32, %c0_i32_0 : i32, i32
  }
  func.func @transform_17(%arg0: i32) -> (i32, i32) {
    %c0_i32 = arith.constant 0 : i32
    %c0_i32_0 = arith.constant 0 : i32
    %c0_i32_1 = arith.constant 0 : i32
    return %c0_i32, %c0_i32_0 : i32, i32
  }
  func.func @transform_18(%arg0: i32) -> (i32, i32) {
    %c0_i32 = arith.constant 0 : i32
    %c0_i32_0 = arith.constant 0 : i32
    %c0_i32_1 = arith.constant 0 : i32
    return %c0_i32, %c0_i32_0 : i32, i32
  }
  func.func @transform_19(%arg0: i32) -> (i32, i32) {
    %c0_i32 = arith.constant 0 : i32
    %c0_i32_0 = arith.constant 0 : i32
    %c0_i32_1 = arith.constant 0 : i32
    return %c0_i32, %c0_i32_0 : i32, i32
  }
  func.func @transform_20(%arg0: i32) -> (i32, i32, i32) {
    %c0_i32 = arith.constant 0 : i32
    %c0_i32_0 = arith.constant 0 : i32
    %c0_i32_1 = arith.constant 0 : i32
    return %arg0, %c0_i32, %c0_i32_0 : i32, i32, i32
  }
}

module attributes {stable_mosaic.version = 11 : i64} {
  func.func @fused_forward_kernel(%arg0: i32, %arg1: memref<1x32x64xf32, #tpu.memory_space<vmem>>, %arg2: memref<1x2x16xf32, #tpu.memory_space<vmem>>, %arg3: memref<1x64xf32, #tpu.memory_space<vmem>>, %arg4: memref<1x64xf32, #tpu.memory_space<vmem>>, %arg5: memref<2x64x192xbf16, #tpu.memory_space<vmem>>, %arg6: memref<2x1x192xf32, #tpu.memory_space<vmem>>, %arg7: memref<2x64x64xbf16, #tpu.memory_space<vmem>>, %arg8: memref<2x1x64xf32, #tpu.memory_space<vmem>>, %arg9: memref<2x1x64xf32, #tpu.memory_space<vmem>>, %arg10: memref<2x1x64xf32, #tpu.memory_space<vmem>>, %arg11: memref<2x64x128xbf16, #tpu.memory_space<vmem>>, %arg12: memref<2x1x128xf32, #tpu.memory_space<vmem>>, %arg13: memref<2x128x64xbf16, #tpu.memory_space<vmem>>, %arg14: memref<2x1x64xf32, #tpu.memory_space<vmem>>, %arg15: memref<2x1x64xf32, #tpu.memory_space<vmem>>, %arg16: memref<2x1x64xf32, #tpu.memory_space<vmem>>, %arg17: memref<64x64xbf16, #tpu.memory_space<vmem>>, %arg18: memref<1x64xf32, #tpu.memory_space<vmem>>, %arg19: memref<64x128xbf16, #tpu.memory_space<vmem>>, %arg20: memref<1x128xf32, #tpu.memory_space<vmem>>, %arg21: memref<1x2x128xf32, #tpu.memory_space<vmem>>) attributes {dimension_semantics = [#tpu.dimension_semantics<parallel>], iteration_bounds = array<i64: 2>, scalar_prefetch = 0 : i64, scratch_operands = 0 : i64, tpu.core_type = #tpu.core_type<tc>, window_params = [{transform_indices = @transform_0, window_bounds = array<i64: 1, 32, 64>}, {transform_indices = @transform_1, window_bounds = array<i64: 1, 2, 16>}, {pipeline_mode = #tpu.pipeline_mode<synchronous>, transform_indices = @transform_2, window_bounds = array<i64: 1, 64>}, {pipeline_mode = #tpu.pipeline_mode<synchronous>, transform_indices = @transform_3, window_bounds = array<i64: 1, 64>}, {pipeline_mode = #tpu.pipeline_mode<synchronous>, transform_indices = @transform_4, window_bounds = array<i64: 2, 64, 192>}, {pipeline_mode = #tpu.pipeline_mode<synchronous>, transform_indices = @transform_5, window_bounds = array<i64: 2, 1, 192>}, {pipeline_mode = #tpu.pipeline_mode<synchronous>, transform_indices = @transform_6, window_bounds = array<i64: 2, 64, 64>}, {pipeline_mode = #tpu.pipeline_mode<synchronous>, transform_indices = @transform_7, window_bounds = array<i64: 2, 1, 64>}, {pipeline_mode = #tpu.pipeline_mode<synchronous>, transform_indices = @transform_8, window_bounds = array<i64: 2, 1, 64>}, {pipeline_mode = #tpu.pipeline_mode<synchronous>, transform_indices = @transform_9, window_bounds = array<i64: 2, 1, 64>}, {pipeline_mode = #tpu.pipeline_mode<synchronous>, transform_indices = @transform_10, window_bounds = array<i64: 2, 64, 128>}, {pipeline_mode = #tpu.pipeline_mode<synchronous>, transform_indices = @transform_11, window_bounds = array<i64: 2, 1, 128>}, {pipeline_mode = #tpu.pipeline_mode<synchronous>, transform_indices = @transform_12, window_bounds = array<i64: 2, 128, 64>}, {pipeline_mode = #tpu.pipeline_mode<synchronous>, transform_indices = @transform_13, window_bounds = array<i64: 2, 1, 64>}, {pipeline_mode = #tpu.pipeline_mode<synchronous>, transform_indices = @transform_14, window_bounds = array<i64: 2, 1, 64>}, {pipeline_mode = #tpu.pipeline_mode<synchronous>, transform_indices = @transform_15, window_bounds = array<i64: 2, 1, 64>}, {pipeline_mode = #tpu.pipeline_mode<synchronous>, transform_indices = @transform_16, window_bounds = array<i64: 64, 64>}, {pipeline_mode = #tpu.pipeline_mode<synchronous>, transform_indices = @transform_17, window_bounds = array<i64: 1, 64>}, {pipeline_mode = #tpu.pipeline_mode<synchronous>, transform_indices = @transform_18, window_bounds = array<i64: 64, 128>}, {pipeline_mode = #tpu.pipeline_mode<synchronous>, transform_indices = @transform_19, window_bounds = array<i64: 1, 128>}, {transform_indices = @transform_20, window_bounds = array<i64: 1, 2, 128>}]} {
    %c0 = arith.constant 0 : index
    %c0_0 = arith.constant 0 : index
    %c0_1 = arith.constant 0 : index
    %0 = vector.load %arg1[%c0, %c0_0, %c0_1] : memref<1x32x64xf32, #tpu.memory_space<vmem>>, vector<1x32x64xf32>
    %1 = vector.shape_cast %0 : vector<1x32x64xf32> to vector<32x64xf32>
    %c0_2 = arith.constant 0 : index
    %c0_3 = arith.constant 0 : index
    %c0_4 = arith.constant 0 : index
    %2 = vector.load %arg2[%c0_2, %c0_3, %c0_4] : memref<1x2x16xf32, #tpu.memory_space<vmem>>, vector<1x2x16xf32>
    %3 = vector.shape_cast %2 : vector<1x2x16xf32> to vector<2x16xf32>
    %c0_5 = arith.constant 0 : index
    %c0_6 = arith.constant 0 : index
    %4 = vector.load %arg3[%c0_5, %c0_6] : memref<1x64xf32, #tpu.memory_space<vmem>>, vector<1x64xf32>
    %c0_7 = arith.constant 0 : index
    %c0_8 = arith.constant 0 : index
    %5 = vector.load %arg4[%c0_7, %c0_8] : memref<1x64xf32, #tpu.memory_space<vmem>>, vector<1x64xf32>
    %cst = arith.constant dense<0.000000e+00> : vector<32xf32>
    %6 = vector.multi_reduction <add>, %1, %cst [1] : vector<32x64xf32> to vector<32xf32>
    %7 = vector.shape_cast %6 : vector<32xf32> to vector<32x1xf32>
    %cst_9 = arith.constant 6.400000e+01 : f32
    %8 = vector.broadcast %cst_9 : f32 to vector<32x1xf32>
    %9 = arith.divf %7, %8 : vector<32x1xf32>
    %10 = vector.broadcast %9 : vector<32x1xf32> to vector<32x64xf32>
    %11 = arith.subf %1, %10 : vector<32x64xf32>
    %12 = arith.mulf %11, %11 : vector<32x64xf32>
    %cst_10 = arith.constant dense<0.000000e+00> : vector<32xf32>
    %13 = vector.multi_reduction <add>, %12, %cst_10 [1] : vector<32x64xf32> to vector<32xf32>
    %14 = vector.shape_cast %13 : vector<32xf32> to vector<32x1xf32>
    %cst_11 = arith.constant 6.400000e+01 : f32
    %15 = vector.broadcast %cst_11 : f32 to vector<32x1xf32>
    %16 = arith.divf %14, %15 : vector<32x1xf32>
    %17 = vector.broadcast %9 : vector<32x1xf32> to vector<32x64xf32>
    %18 = arith.subf %1, %17 : vector<32x64xf32>
    %cst_12 = arith.constant 9.99999996E-13 : f32
    %19 = vector.broadcast %cst_12 : f32 to vector<32x1xf32>
    %20 = arith.addf %16, %19 : vector<32x1xf32>
    %21 = math.rsqrt %20 : vector<32x1xf32>
    %22 = vector.broadcast %21 : vector<32x1xf32> to vector<32x64xf32>
    %23 = arith.mulf %18, %22 : vector<32x64xf32>
    %24 = vector.broadcast %4 : vector<1x64xf32> to vector<32x64xf32>
    %25 = arith.mulf %23, %24 : vector<32x64xf32>
    %26 = vector.broadcast %5 : vector<1x64xf32> to vector<32x64xf32>
    %27 = arith.addf %25, %26 : vector<32x64xf32>
    %28 = arith.truncf %27 : vector<32x64xf32> to vector<32x64xbf16>
    %c0_13 = arith.constant 0 : index
    %c0_14 = arith.constant 0 : index
    %c0_15 = arith.constant 0 : index
    %29 = vector.load %arg5[%c0_13, %c0_14, %c0_15] : memref<2x64x192xbf16, #tpu.memory_space<vmem>>, vector<1x64x192xbf16>
    %30 = vector.shape_cast %29 : vector<1x64x192xbf16> to vector<64x192xbf16>
    %cst_16 = arith.constant dense<0.000000e+00> : vector<32x192xf32>
    %31 = tpu.matmul %28, %30, %cst_16 {dimension_numbers = #tpu.dot_dimension_numbers<[1], [0], [0], [1], [0, 0, 1, 1], [], []>} : vector<32x64xbf16>, vector<64x192xbf16>, vector<32x192xf32> -> vector<32x192xf32>
    %c0_17 = arith.constant 0 : index
    %c0_18 = arith.constant 0 : index
    %c0_19 = arith.constant 0 : index
    %32 = vector.load %arg6[%c0_17, %c0_18, %c0_19] : memref<2x1x192xf32, #tpu.memory_space<vmem>>, vector<1x1x192xf32>
    %33 = vector.shape_cast %32 : vector<1x1x192xf32> to vector<1x192xf32>
    %34 = vector.broadcast %33 : vector<1x192xf32> to vector<32x192xf32>
    %35 = arith.addf %31, %34 : vector<32x192xf32>
    %36 = arith.truncf %35 : vector<32x192xf32> to vector<32x192xbf16>
    %37 = vector.extract_strided_slice %36 {offsets = [0, 0], sizes = [16, 32], strides = [1, 1]} : vector<32x192xbf16> to vector<16x32xbf16>
    %38 = vector.extract_strided_slice %36 {offsets = [0, 64], sizes = [16, 32], strides = [1, 1]} : vector<32x192xbf16> to vector<16x32xbf16>
    %39 = vector.extract_strided_slice %36 {offsets = [0, 128], sizes = [16, 32], strides = [1, 1]} : vector<32x192xbf16> to vector<16x32xbf16>
    %cst_20 = arith.constant dense<0.000000e+00> : vector<16x16xf32>
    %40 = tpu.matmul %37, %38, %cst_20 {dimension_numbers = #tpu.dot_dimension_numbers<[1], [1], [0], [0], [0, 0, 1, 0], [], []>} : vector<16x32xbf16>, vector<16x32xbf16>, vector<16x16xf32> -> vector<16x16xf32>
    %41 = vector.extract_strided_slice %3 {offsets = [0, 0], sizes = [1, 16], strides = [1, 1]} : vector<2x16xf32> to vector<1x16xf32>
    %42 = vector.broadcast %41 : vector<1x16xf32> to vector<16x16xf32>
    %43 = arith.addf %40, %42 : vector<16x16xf32>
    %cst_21 = arith.constant dense<0xFF800000> : vector<16xf32>
    %44 = vector.multi_reduction <maximumf>, %43, %cst_21 [1] : vector<16x16xf32> to vector<16xf32>
    %45 = vector.shape_cast %44 : vector<16xf32> to vector<16x1xf32>
    %46 = vector.broadcast %45 : vector<16x1xf32> to vector<16x16xf32>
    %47 = arith.subf %43, %46 : vector<16x16xf32>
    %48 = math.exp %47 : vector<16x16xf32>
    %cst_22 = arith.constant dense<0.000000e+00> : vector<16xf32>
    %49 = vector.multi_reduction <add>, %48, %cst_22 [1] : vector<16x16xf32> to vector<16xf32>
    %50 = vector.shape_cast %49 : vector<16xf32> to vector<16x1xf32>
    %51 = tpu.reciprocal %50 {approx = true} : vector<16x1xf32> -> vector<16x1xf32>
    %52 = vector.broadcast %51 : vector<16x1xf32> to vector<16x16xf32>
    %53 = arith.mulf %48, %52 : vector<16x16xf32>
    %54 = arith.truncf %53 : vector<16x16xf32> to vector<16x16xbf16>
    %cst_23 = arith.constant dense<0.000000e+00> : vector<16x32xf32>
    %55 = tpu.matmul %54, %39, %cst_23 {dimension_numbers = #tpu.dot_dimension_numbers<[1], [0], [0], [1], [0, 0, 1, 1], [], []>} : vector<16x16xbf16>, vector<16x32xbf16>, vector<16x32xf32> -> vector<16x32xf32>
    %56 = vector.extract_strided_slice %36 {offsets = [0, 32], sizes = [16, 32], strides = [1, 1]} : vector<32x192xbf16> to vector<16x32xbf16>
    %57 = vector.extract_strided_slice %36 {offsets = [0, 96], sizes = [16, 32], strides = [1, 1]} : vector<32x192xbf16> to vector<16x32xbf16>
    %58 = vector.extract_strided_slice %36 {offsets = [0, 160], sizes = [16, 32], strides = [1, 1]} : vector<32x192xbf16> to vector<16x32xbf16>
    %cst_24 = arith.constant dense<0.000000e+00> : vector<16x16xf32>
    %59 = tpu.matmul %56, %57, %cst_24 {dimension_numbers = #tpu.dot_dimension_numbers<[1], [1], [0], [0], [0, 0, 1, 0], [], []>} : vector<16x32xbf16>, vector<16x32xbf16>, vector<16x16xf32> -> vector<16x16xf32>
    %60 = vector.extract_strided_slice %3 {offsets = [0, 0], sizes = [1, 16], strides = [1, 1]} : vector<2x16xf32> to vector<1x16xf32>
    %61 = vector.broadcast %60 : vector<1x16xf32> to vector<16x16xf32>
    %62 = arith.addf %59, %61 : vector<16x16xf32>
    %cst_25 = arith.constant dense<0xFF800000> : vector<16xf32>
    %63 = vector.multi_reduction <maximumf>, %62, %cst_25 [1] : vector<16x16xf32> to vector<16xf32>
    %64 = vector.shape_cast %63 : vector<16xf32> to vector<16x1xf32>
    %65 = vector.broadcast %64 : vector<16x1xf32> to vector<16x16xf32>
    %66 = arith.subf %62, %65 : vector<16x16xf32>
    %67 = math.exp %66 : vector<16x16xf32>
    %cst_26 = arith.constant dense<0.000000e+00> : vector<16xf32>
    %68 = vector.multi_reduction <add>, %67, %cst_26 [1] : vector<16x16xf32> to vector<16xf32>
    %69 = vector.shape_cast %68 : vector<16xf32> to vector<16x1xf32>
    %70 = tpu.reciprocal %69 {approx = true} : vector<16x1xf32> -> vector<16x1xf32>
    %71 = vector.broadcast %70 : vector<16x1xf32> to vector<16x16xf32>
    %72 = arith.mulf %67, %71 : vector<16x16xf32>
    %73 = arith.truncf %72 : vector<16x16xf32> to vector<16x16xbf16>
    %cst_27 = arith.constant dense<0.000000e+00> : vector<16x32xf32>
    %74 = tpu.matmul %73, %58, %cst_27 {dimension_numbers = #tpu.dot_dimension_numbers<[1], [0], [0], [1], [0, 0, 1, 1], [], []>} : vector<16x16xbf16>, vector<16x32xbf16>, vector<16x32xf32> -> vector<16x32xf32>
    %75 = tpu.concatenate %55, %74 in 1 : vector<16x32xf32>, vector<16x32xf32> -> vector<16x64xf32>
    %76 = vector.extract_strided_slice %36 {offsets = [16, 0], sizes = [16, 32], strides = [1, 1]} : vector<32x192xbf16> to vector<16x32xbf16>
    %77 = vector.extract_strided_slice %36 {offsets = [16, 64], sizes = [16, 32], strides = [1, 1]} : vector<32x192xbf16> to vector<16x32xbf16>
    %78 = vector.extract_strided_slice %36 {offsets = [16, 128], sizes = [16, 32], strides = [1, 1]} : vector<32x192xbf16> to vector<16x32xbf16>
    %cst_28 = arith.constant dense<0.000000e+00> : vector<16x16xf32>
    %79 = tpu.matmul %76, %77, %cst_28 {dimension_numbers = #tpu.dot_dimension_numbers<[1], [1], [0], [0], [0, 0, 1, 0], [], []>} : vector<16x32xbf16>, vector<16x32xbf16>, vector<16x16xf32> -> vector<16x16xf32>
    %80 = vector.extract_strided_slice %3 {offsets = [1, 0], sizes = [1, 16], strides = [1, 1]} : vector<2x16xf32> to vector<1x16xf32>
    %81 = vector.broadcast %80 : vector<1x16xf32> to vector<16x16xf32>
    %82 = arith.addf %79, %81 : vector<16x16xf32>
    %cst_29 = arith.constant dense<0xFF800000> : vector<16xf32>
    %83 = vector.multi_reduction <maximumf>, %82, %cst_29 [1] : vector<16x16xf32> to vector<16xf32>
    %84 = vector.shape_cast %83 : vector<16xf32> to vector<16x1xf32>
    %85 = vector.broadcast %84 : vector<16x1xf32> to vector<16x16xf32>
    %86 = arith.subf %82, %85 : vector<16x16xf32>
    %87 = math.exp %86 : vector<16x16xf32>
    %cst_30 = arith.constant dense<0.000000e+00> : vector<16xf32>
    %88 = vector.multi_reduction <add>, %87, %cst_30 [1] : vector<16x16xf32> to vector<16xf32>
    %89 = vector.shape_cast %88 : vector<16xf32> to vector<16x1xf32>
    %90 = tpu.reciprocal %89 {approx = true} : vector<16x1xf32> -> vector<16x1xf32>
    %91 = vector.broadcast %90 : vector<16x1xf32> to vector<16x16xf32>
    %92 = arith.mulf %87, %91 : vector<16x16xf32>
    %93 = arith.truncf %92 : vector<16x16xf32> to vector<16x16xbf16>
    %cst_31 = arith.constant dense<0.000000e+00> : vector<16x32xf32>
    %94 = tpu.matmul %93, %78, %cst_31 {dimension_numbers = #tpu.dot_dimension_numbers<[1], [0], [0], [1], [0, 0, 1, 1], [], []>} : vector<16x16xbf16>, vector<16x32xbf16>, vector<16x32xf32> -> vector<16x32xf32>
    %95 = vector.extract_strided_slice %36 {offsets = [16, 32], sizes = [16, 32], strides = [1, 1]} : vector<32x192xbf16> to vector<16x32xbf16>
    %96 = vector.extract_strided_slice %36 {offsets = [16, 96], sizes = [16, 32], strides = [1, 1]} : vector<32x192xbf16> to vector<16x32xbf16>
    %97 = vector.extract_strided_slice %36 {offsets = [16, 160], sizes = [16, 32], strides = [1, 1]} : vector<32x192xbf16> to vector<16x32xbf16>
    %cst_32 = arith.constant dense<0.000000e+00> : vector<16x16xf32>
    %98 = tpu.matmul %95, %96, %cst_32 {dimension_numbers = #tpu.dot_dimension_numbers<[1], [1], [0], [0], [0, 0, 1, 0], [], []>} : vector<16x32xbf16>, vector<16x32xbf16>, vector<16x16xf32> -> vector<16x16xf32>
    %99 = vector.extract_strided_slice %3 {offsets = [1, 0], sizes = [1, 16], strides = [1, 1]} : vector<2x16xf32> to vector<1x16xf32>
    %100 = vector.broadcast %99 : vector<1x16xf32> to vector<16x16xf32>
    %101 = arith.addf %98, %100 : vector<16x16xf32>
    %cst_33 = arith.constant dense<0xFF800000> : vector<16xf32>
    %102 = vector.multi_reduction <maximumf>, %101, %cst_33 [1] : vector<16x16xf32> to vector<16xf32>
    %103 = vector.shape_cast %102 : vector<16xf32> to vector<16x1xf32>
    %104 = vector.broadcast %103 : vector<16x1xf32> to vector<16x16xf32>
    %105 = arith.subf %101, %104 : vector<16x16xf32>
    %106 = math.exp %105 : vector<16x16xf32>
    %cst_34 = arith.constant dense<0.000000e+00> : vector<16xf32>
    %107 = vector.multi_reduction <add>, %106, %cst_34 [1] : vector<16x16xf32> to vector<16xf32>
    %108 = vector.shape_cast %107 : vector<16xf32> to vector<16x1xf32>
    %109 = tpu.reciprocal %108 {approx = true} : vector<16x1xf32> -> vector<16x1xf32>
    %110 = vector.broadcast %109 : vector<16x1xf32> to vector<16x16xf32>
    %111 = arith.mulf %106, %110 : vector<16x16xf32>
    %112 = arith.truncf %111 : vector<16x16xf32> to vector<16x16xbf16>
    %cst_35 = arith.constant dense<0.000000e+00> : vector<16x32xf32>
    %113 = tpu.matmul %112, %97, %cst_35 {dimension_numbers = #tpu.dot_dimension_numbers<[1], [0], [0], [1], [0, 0, 1, 1], [], []>} : vector<16x16xbf16>, vector<16x32xbf16>, vector<16x32xf32> -> vector<16x32xf32>
    %114 = tpu.concatenate %94, %113 in 1 : vector<16x32xf32>, vector<16x32xf32> -> vector<16x64xf32>
    %115 = tpu.concatenate %75, %114 in 0 : vector<16x64xf32>, vector<16x64xf32> -> vector<32x64xf32>
    %116 = arith.truncf %115 : vector<32x64xf32> to vector<32x64xbf16>
    %c0_36 = arith.constant 0 : index
    %c0_37 = arith.constant 0 : index
    %c0_38 = arith.constant 0 : index
    %117 = vector.load %arg7[%c0_36, %c0_37, %c0_38] : memref<2x64x64xbf16, #tpu.memory_space<vmem>>, vector<1x64x64xbf16>
    %118 = vector.shape_cast %117 : vector<1x64x64xbf16> to vector<64x64xbf16>
    %cst_39 = arith.constant dense<0.000000e+00> : vector<32x64xf32>
    %119 = tpu.matmul %116, %118, %cst_39 {dimension_numbers = #tpu.dot_dimension_numbers<[1], [0], [0], [1], [0, 0, 1, 1], [], []>} : vector<32x64xbf16>, vector<64x64xbf16>, vector<32x64xf32> -> vector<32x64xf32>
    %c0_40 = arith.constant 0 : index
    %c0_41 = arith.constant 0 : index
    %c0_42 = arith.constant 0 : index
    %120 = vector.load %arg8[%c0_40, %c0_41, %c0_42] : memref<2x1x64xf32, #tpu.memory_space<vmem>>, vector<1x1x64xf32>
    %121 = vector.shape_cast %120 : vector<1x1x64xf32> to vector<1x64xf32>
    %122 = vector.broadcast %121 : vector<1x64xf32> to vector<32x64xf32>
    %123 = arith.addf %119, %122 : vector<32x64xf32>
    %124 = arith.addf %27, %123 : vector<32x64xf32>
    %c0_43 = arith.constant 0 : index
    %c0_44 = arith.constant 0 : index
    %c0_45 = arith.constant 0 : index
    %125 = vector.load %arg9[%c0_43, %c0_44, %c0_45] : memref<2x1x64xf32, #tpu.memory_space<vmem>>, vector<1x1x64xf32>
    %126 = vector.shape_cast %125 : vector<1x1x64xf32> to vector<1x64xf32>
    %c0_46 = arith.constant 0 : index
    %c0_47 = arith.constant 0 : index
    %c0_48 = arith.constant 0 : index
    %127 = vector.load %arg10[%c0_46, %c0_47, %c0_48] : memref<2x1x64xf32, #tpu.memory_space<vmem>>, vector<1x1x64xf32>
    %128 = vector.shape_cast %127 : vector<1x1x64xf32> to vector<1x64xf32>
    %cst_49 = arith.constant dense<0.000000e+00> : vector<32xf32>
    %129 = vector.multi_reduction <add>, %124, %cst_49 [1] : vector<32x64xf32> to vector<32xf32>
    %130 = vector.shape_cast %129 : vector<32xf32> to vector<32x1xf32>
    %cst_50 = arith.constant 6.400000e+01 : f32
    %131 = vector.broadcast %cst_50 : f32 to vector<32x1xf32>
    %132 = arith.divf %130, %131 : vector<32x1xf32>
    %133 = vector.broadcast %132 : vector<32x1xf32> to vector<32x64xf32>
    %134 = arith.subf %124, %133 : vector<32x64xf32>
    %135 = arith.mulf %134, %134 : vector<32x64xf32>
    %cst_51 = arith.constant dense<0.000000e+00> : vector<32xf32>
    %136 = vector.multi_reduction <add>, %135, %cst_51 [1] : vector<32x64xf32> to vector<32xf32>
    %137 = vector.shape_cast %136 : vector<32xf32> to vector<32x1xf32>
    %cst_52 = arith.constant 6.400000e+01 : f32
    %138 = vector.broadcast %cst_52 : f32 to vector<32x1xf32>
    %139 = arith.divf %137, %138 : vector<32x1xf32>
    %140 = vector.broadcast %132 : vector<32x1xf32> to vector<32x64xf32>
    %141 = arith.subf %124, %140 : vector<32x64xf32>
    %cst_53 = arith.constant 9.99999996E-13 : f32
    %142 = vector.broadcast %cst_53 : f32 to vector<32x1xf32>
    %143 = arith.addf %139, %142 : vector<32x1xf32>
    %144 = math.rsqrt %143 : vector<32x1xf32>
    %145 = vector.broadcast %144 : vector<32x1xf32> to vector<32x64xf32>
    %146 = arith.mulf %141, %145 : vector<32x64xf32>
    %147 = vector.broadcast %126 : vector<1x64xf32> to vector<32x64xf32>
    %148 = arith.mulf %146, %147 : vector<32x64xf32>
    %149 = vector.broadcast %128 : vector<1x64xf32> to vector<32x64xf32>
    %150 = arith.addf %148, %149 : vector<32x64xf32>
    %151 = arith.truncf %150 : vector<32x64xf32> to vector<32x64xbf16>
    %c0_54 = arith.constant 0 : index
    %c0_55 = arith.constant 0 : index
    %c0_56 = arith.constant 0 : index
    %152 = vector.load %arg11[%c0_54, %c0_55, %c0_56] : memref<2x64x128xbf16, #tpu.memory_space<vmem>>, vector<1x64x128xbf16>
    %153 = vector.shape_cast %152 : vector<1x64x128xbf16> to vector<64x128xbf16>
    %cst_57 = arith.constant dense<0.000000e+00> : vector<32x128xf32>
    %154 = tpu.matmul %151, %153, %cst_57 {dimension_numbers = #tpu.dot_dimension_numbers<[1], [0], [0], [1], [0, 0, 1, 1], [], []>} : vector<32x64xbf16>, vector<64x128xbf16>, vector<32x128xf32> -> vector<32x128xf32>
    %c0_58 = arith.constant 0 : index
    %c0_59 = arith.constant 0 : index
    %c0_60 = arith.constant 0 : index
    %155 = vector.load %arg12[%c0_58, %c0_59, %c0_60] : memref<2x1x128xf32, #tpu.memory_space<vmem>>, vector<1x1x128xf32>
    %156 = vector.shape_cast %155 : vector<1x1x128xf32> to vector<1x128xf32>
    %157 = vector.broadcast %156 : vector<1x128xf32> to vector<32x128xf32>
    %158 = arith.addf %154, %157 : vector<32x128xf32>
    %159 = arith.mulf %158, %158 : vector<32x128xf32>
    %160 = arith.mulf %158, %159 : vector<32x128xf32>
    %cst_61 = arith.constant 4.471500e-02 : f32
    %161 = vector.broadcast %cst_61 : f32 to vector<32x128xf32>
    %162 = arith.mulf %161, %160 : vector<32x128xf32>
    %163 = arith.addf %158, %162 : vector<32x128xf32>
    %cst_62 = arith.constant 0.797884583 : f32
    %164 = vector.broadcast %cst_62 : f32 to vector<32x128xf32>
    %165 = arith.mulf %164, %163 : vector<32x128xf32>
    %166 = math.tanh %165 : vector<32x128xf32>
    %cst_63 = arith.constant 1.000000e+00 : f32
    %167 = vector.broadcast %cst_63 : f32 to vector<32x128xf32>
    %168 = arith.addf %167, %166 : vector<32x128xf32>
    %cst_64 = arith.constant 5.000000e-01 : f32
    %169 = vector.broadcast %cst_64 : f32 to vector<32x128xf32>
    %170 = arith.mulf %169, %168 : vector<32x128xf32>
    %171 = arith.mulf %158, %170 : vector<32x128xf32>
    %172 = arith.truncf %171 : vector<32x128xf32> to vector<32x128xbf16>
    %c0_65 = arith.constant 0 : index
    %c0_66 = arith.constant 0 : index
    %c0_67 = arith.constant 0 : index
    %173 = vector.load %arg13[%c0_65, %c0_66, %c0_67] : memref<2x128x64xbf16, #tpu.memory_space<vmem>>, vector<1x128x64xbf16>
    %174 = vector.shape_cast %173 : vector<1x128x64xbf16> to vector<128x64xbf16>
    %cst_68 = arith.constant dense<0.000000e+00> : vector<32x64xf32>
    %175 = tpu.matmul %172, %174, %cst_68 {dimension_numbers = #tpu.dot_dimension_numbers<[1], [0], [0], [1], [0, 0, 1, 1], [], []>} : vector<32x128xbf16>, vector<128x64xbf16>, vector<32x64xf32> -> vector<32x64xf32>
    %c0_69 = arith.constant 0 : index
    %c0_70 = arith.constant 0 : index
    %c0_71 = arith.constant 0 : index
    %176 = vector.load %arg14[%c0_69, %c0_70, %c0_71] : memref<2x1x64xf32, #tpu.memory_space<vmem>>, vector<1x1x64xf32>
    %177 = vector.shape_cast %176 : vector<1x1x64xf32> to vector<1x64xf32>
    %178 = vector.broadcast %177 : vector<1x64xf32> to vector<32x64xf32>
    %179 = arith.addf %175, %178 : vector<32x64xf32>
    %180 = arith.addf %150, %179 : vector<32x64xf32>
    %c0_72 = arith.constant 0 : index
    %c0_73 = arith.constant 0 : index
    %c0_74 = arith.constant 0 : index
    %181 = vector.load %arg15[%c0_72, %c0_73, %c0_74] : memref<2x1x64xf32, #tpu.memory_space<vmem>>, vector<1x1x64xf32>
    %182 = vector.shape_cast %181 : vector<1x1x64xf32> to vector<1x64xf32>
    %c0_75 = arith.constant 0 : index
    %c0_76 = arith.constant 0 : index
    %c0_77 = arith.constant 0 : index
    %183 = vector.load %arg16[%c0_75, %c0_76, %c0_77] : memref<2x1x64xf32, #tpu.memory_space<vmem>>, vector<1x1x64xf32>
    %184 = vector.shape_cast %183 : vector<1x1x64xf32> to vector<1x64xf32>
    %cst_78 = arith.constant dense<0.000000e+00> : vector<32xf32>
    %185 = vector.multi_reduction <add>, %180, %cst_78 [1] : vector<32x64xf32> to vector<32xf32>
    %186 = vector.shape_cast %185 : vector<32xf32> to vector<32x1xf32>
    %cst_79 = arith.constant 6.400000e+01 : f32
    %187 = vector.broadcast %cst_79 : f32 to vector<32x1xf32>
    %188 = arith.divf %186, %187 : vector<32x1xf32>
    %189 = vector.broadcast %188 : vector<32x1xf32> to vector<32x64xf32>
    %190 = arith.subf %180, %189 : vector<32x64xf32>
    %191 = arith.mulf %190, %190 : vector<32x64xf32>
    %cst_80 = arith.constant dense<0.000000e+00> : vector<32xf32>
    %192 = vector.multi_reduction <add>, %191, %cst_80 [1] : vector<32x64xf32> to vector<32xf32>
    %193 = vector.shape_cast %192 : vector<32xf32> to vector<32x1xf32>
    %cst_81 = arith.constant 6.400000e+01 : f32
    %194 = vector.broadcast %cst_81 : f32 to vector<32x1xf32>
    %195 = arith.divf %193, %194 : vector<32x1xf32>
    %196 = vector.broadcast %188 : vector<32x1xf32> to vector<32x64xf32>
    %197 = arith.subf %180, %196 : vector<32x64xf32>
    %cst_82 = arith.constant 9.99999996E-13 : f32
    %198 = vector.broadcast %cst_82 : f32 to vector<32x1xf32>
    %199 = arith.addf %195, %198 : vector<32x1xf32>
    %200 = math.rsqrt %199 : vector<32x1xf32>
    %201 = vector.broadcast %200 : vector<32x1xf32> to vector<32x64xf32>
    %202 = arith.mulf %197, %201 : vector<32x64xf32>
    %203 = vector.broadcast %182 : vector<1x64xf32> to vector<32x64xf32>
    %204 = arith.mulf %202, %203 : vector<32x64xf32>
    %205 = vector.broadcast %184 : vector<1x64xf32> to vector<32x64xf32>
    %206 = arith.addf %204, %205 : vector<32x64xf32>
    %207 = arith.truncf %206 : vector<32x64xf32> to vector<32x64xbf16>
    %c1 = arith.constant 1 : index
    %c0_83 = arith.constant 0 : index
    %c0_84 = arith.constant 0 : index
    %208 = vector.load %arg5[%c1, %c0_83, %c0_84] : memref<2x64x192xbf16, #tpu.memory_space<vmem>>, vector<1x64x192xbf16>
    %209 = vector.shape_cast %208 : vector<1x64x192xbf16> to vector<64x192xbf16>
    %cst_85 = arith.constant dense<0.000000e+00> : vector<32x192xf32>
    %210 = tpu.matmul %207, %209, %cst_85 {dimension_numbers = #tpu.dot_dimension_numbers<[1], [0], [0], [1], [0, 0, 1, 1], [], []>} : vector<32x64xbf16>, vector<64x192xbf16>, vector<32x192xf32> -> vector<32x192xf32>
    %c1_86 = arith.constant 1 : index
    %c0_87 = arith.constant 0 : index
    %c0_88 = arith.constant 0 : index
    %211 = vector.load %arg6[%c1_86, %c0_87, %c0_88] : memref<2x1x192xf32, #tpu.memory_space<vmem>>, vector<1x1x192xf32>
    %212 = vector.shape_cast %211 : vector<1x1x192xf32> to vector<1x192xf32>
    %213 = vector.broadcast %212 : vector<1x192xf32> to vector<32x192xf32>
    %214 = arith.addf %210, %213 : vector<32x192xf32>
    %215 = arith.truncf %214 : vector<32x192xf32> to vector<32x192xbf16>
    %216 = vector.extract_strided_slice %215 {offsets = [0, 0], sizes = [16, 32], strides = [1, 1]} : vector<32x192xbf16> to vector<16x32xbf16>
    %217 = vector.extract_strided_slice %215 {offsets = [0, 64], sizes = [16, 32], strides = [1, 1]} : vector<32x192xbf16> to vector<16x32xbf16>
    %218 = vector.extract_strided_slice %215 {offsets = [0, 128], sizes = [16, 32], strides = [1, 1]} : vector<32x192xbf16> to vector<16x32xbf16>
    %cst_89 = arith.constant dense<0.000000e+00> : vector<16x16xf32>
    %219 = tpu.matmul %216, %217, %cst_89 {dimension_numbers = #tpu.dot_dimension_numbers<[1], [1], [0], [0], [0, 0, 1, 0], [], []>} : vector<16x32xbf16>, vector<16x32xbf16>, vector<16x16xf32> -> vector<16x16xf32>
    %220 = vector.extract_strided_slice %3 {offsets = [0, 0], sizes = [1, 16], strides = [1, 1]} : vector<2x16xf32> to vector<1x16xf32>
    %221 = vector.broadcast %220 : vector<1x16xf32> to vector<16x16xf32>
    %222 = arith.addf %219, %221 : vector<16x16xf32>
    %cst_90 = arith.constant dense<0xFF800000> : vector<16xf32>
    %223 = vector.multi_reduction <maximumf>, %222, %cst_90 [1] : vector<16x16xf32> to vector<16xf32>
    %224 = vector.shape_cast %223 : vector<16xf32> to vector<16x1xf32>
    %225 = vector.broadcast %224 : vector<16x1xf32> to vector<16x16xf32>
    %226 = arith.subf %222, %225 : vector<16x16xf32>
    %227 = math.exp %226 : vector<16x16xf32>
    %cst_91 = arith.constant dense<0.000000e+00> : vector<16xf32>
    %228 = vector.multi_reduction <add>, %227, %cst_91 [1] : vector<16x16xf32> to vector<16xf32>
    %229 = vector.shape_cast %228 : vector<16xf32> to vector<16x1xf32>
    %230 = tpu.reciprocal %229 {approx = true} : vector<16x1xf32> -> vector<16x1xf32>
    %231 = vector.broadcast %230 : vector<16x1xf32> to vector<16x16xf32>
    %232 = arith.mulf %227, %231 : vector<16x16xf32>
    %233 = arith.truncf %232 : vector<16x16xf32> to vector<16x16xbf16>
    %cst_92 = arith.constant dense<0.000000e+00> : vector<16x32xf32>
    %234 = tpu.matmul %233, %218, %cst_92 {dimension_numbers = #tpu.dot_dimension_numbers<[1], [0], [0], [1], [0, 0, 1, 1], [], []>} : vector<16x16xbf16>, vector<16x32xbf16>, vector<16x32xf32> -> vector<16x32xf32>
    %235 = vector.extract_strided_slice %215 {offsets = [0, 32], sizes = [16, 32], strides = [1, 1]} : vector<32x192xbf16> to vector<16x32xbf16>
    %236 = vector.extract_strided_slice %215 {offsets = [0, 96], sizes = [16, 32], strides = [1, 1]} : vector<32x192xbf16> to vector<16x32xbf16>
    %237 = vector.extract_strided_slice %215 {offsets = [0, 160], sizes = [16, 32], strides = [1, 1]} : vector<32x192xbf16> to vector<16x32xbf16>
    %cst_93 = arith.constant dense<0.000000e+00> : vector<16x16xf32>
    %238 = tpu.matmul %235, %236, %cst_93 {dimension_numbers = #tpu.dot_dimension_numbers<[1], [1], [0], [0], [0, 0, 1, 0], [], []>} : vector<16x32xbf16>, vector<16x32xbf16>, vector<16x16xf32> -> vector<16x16xf32>
    %239 = vector.extract_strided_slice %3 {offsets = [0, 0], sizes = [1, 16], strides = [1, 1]} : vector<2x16xf32> to vector<1x16xf32>
    %240 = vector.broadcast %239 : vector<1x16xf32> to vector<16x16xf32>
    %241 = arith.addf %238, %240 : vector<16x16xf32>
    %cst_94 = arith.constant dense<0xFF800000> : vector<16xf32>
    %242 = vector.multi_reduction <maximumf>, %241, %cst_94 [1] : vector<16x16xf32> to vector<16xf32>
    %243 = vector.shape_cast %242 : vector<16xf32> to vector<16x1xf32>
    %244 = vector.broadcast %243 : vector<16x1xf32> to vector<16x16xf32>
    %245 = arith.subf %241, %244 : vector<16x16xf32>
    %246 = math.exp %245 : vector<16x16xf32>
    %cst_95 = arith.constant dense<0.000000e+00> : vector<16xf32>
    %247 = vector.multi_reduction <add>, %246, %cst_95 [1] : vector<16x16xf32> to vector<16xf32>
    %248 = vector.shape_cast %247 : vector<16xf32> to vector<16x1xf32>
    %249 = tpu.reciprocal %248 {approx = true} : vector<16x1xf32> -> vector<16x1xf32>
    %250 = vector.broadcast %249 : vector<16x1xf32> to vector<16x16xf32>
    %251 = arith.mulf %246, %250 : vector<16x16xf32>
    %252 = arith.truncf %251 : vector<16x16xf32> to vector<16x16xbf16>
    %cst_96 = arith.constant dense<0.000000e+00> : vector<16x32xf32>
    %253 = tpu.matmul %252, %237, %cst_96 {dimension_numbers = #tpu.dot_dimension_numbers<[1], [0], [0], [1], [0, 0, 1, 1], [], []>} : vector<16x16xbf16>, vector<16x32xbf16>, vector<16x32xf32> -> vector<16x32xf32>
    %254 = tpu.concatenate %234, %253 in 1 : vector<16x32xf32>, vector<16x32xf32> -> vector<16x64xf32>
    %255 = vector.extract_strided_slice %215 {offsets = [16, 0], sizes = [16, 32], strides = [1, 1]} : vector<32x192xbf16> to vector<16x32xbf16>
    %256 = vector.extract_strided_slice %215 {offsets = [16, 64], sizes = [16, 32], strides = [1, 1]} : vector<32x192xbf16> to vector<16x32xbf16>
    %257 = vector.extract_strided_slice %215 {offsets = [16, 128], sizes = [16, 32], strides = [1, 1]} : vector<32x192xbf16> to vector<16x32xbf16>
    %cst_97 = arith.constant dense<0.000000e+00> : vector<16x16xf32>
    %258 = tpu.matmul %255, %256, %cst_97 {dimension_numbers = #tpu.dot_dimension_numbers<[1], [1], [0], [0], [0, 0, 1, 0], [], []>} : vector<16x32xbf16>, vector<16x32xbf16>, vector<16x16xf32> -> vector<16x16xf32>
    %259 = vector.extract_strided_slice %3 {offsets = [1, 0], sizes = [1, 16], strides = [1, 1]} : vector<2x16xf32> to vector<1x16xf32>
    %260 = vector.broadcast %259 : vector<1x16xf32> to vector<16x16xf32>
    %261 = arith.addf %258, %260 : vector<16x16xf32>
    %cst_98 = arith.constant dense<0xFF800000> : vector<16xf32>
    %262 = vector.multi_reduction <maximumf>, %261, %cst_98 [1] : vector<16x16xf32> to vector<16xf32>
    %263 = vector.shape_cast %262 : vector<16xf32> to vector<16x1xf32>
    %264 = vector.broadcast %263 : vector<16x1xf32> to vector<16x16xf32>
    %265 = arith.subf %261, %264 : vector<16x16xf32>
    %266 = math.exp %265 : vector<16x16xf32>
    %cst_99 = arith.constant dense<0.000000e+00> : vector<16xf32>
    %267 = vector.multi_reduction <add>, %266, %cst_99 [1] : vector<16x16xf32> to vector<16xf32>
    %268 = vector.shape_cast %267 : vector<16xf32> to vector<16x1xf32>
    %269 = tpu.reciprocal %268 {approx = true} : vector<16x1xf32> -> vector<16x1xf32>
    %270 = vector.broadcast %269 : vector<16x1xf32> to vector<16x16xf32>
    %271 = arith.mulf %266, %270 : vector<16x16xf32>
    %272 = arith.truncf %271 : vector<16x16xf32> to vector<16x16xbf16>
    %cst_100 = arith.constant dense<0.000000e+00> : vector<16x32xf32>
    %273 = tpu.matmul %272, %257, %cst_100 {dimension_numbers = #tpu.dot_dimension_numbers<[1], [0], [0], [1], [0, 0, 1, 1], [], []>} : vector<16x16xbf16>, vector<16x32xbf16>, vector<16x32xf32> -> vector<16x32xf32>
    %274 = vector.extract_strided_slice %215 {offsets = [16, 32], sizes = [16, 32], strides = [1, 1]} : vector<32x192xbf16> to vector<16x32xbf16>
    %275 = vector.extract_strided_slice %215 {offsets = [16, 96], sizes = [16, 32], strides = [1, 1]} : vector<32x192xbf16> to vector<16x32xbf16>
    %276 = vector.extract_strided_slice %215 {offsets = [16, 160], sizes = [16, 32], strides = [1, 1]} : vector<32x192xbf16> to vector<16x32xbf16>
    %cst_101 = arith.constant dense<0.000000e+00> : vector<16x16xf32>
    %277 = tpu.matmul %274, %275, %cst_101 {dimension_numbers = #tpu.dot_dimension_numbers<[1], [1], [0], [0], [0, 0, 1, 0], [], []>} : vector<16x32xbf16>, vector<16x32xbf16>, vector<16x16xf32> -> vector<16x16xf32>
    %278 = vector.extract_strided_slice %3 {offsets = [1, 0], sizes = [1, 16], strides = [1, 1]} : vector<2x16xf32> to vector<1x16xf32>
    %279 = vector.broadcast %278 : vector<1x16xf32> to vector<16x16xf32>
    %280 = arith.addf %277, %279 : vector<16x16xf32>
    %cst_102 = arith.constant dense<0xFF800000> : vector<16xf32>
    %281 = vector.multi_reduction <maximumf>, %280, %cst_102 [1] : vector<16x16xf32> to vector<16xf32>
    %282 = vector.shape_cast %281 : vector<16xf32> to vector<16x1xf32>
    %283 = vector.broadcast %282 : vector<16x1xf32> to vector<16x16xf32>
    %284 = arith.subf %280, %283 : vector<16x16xf32>
    %285 = math.exp %284 : vector<16x16xf32>
    %cst_103 = arith.constant dense<0.000000e+00> : vector<16xf32>
    %286 = vector.multi_reduction <add>, %285, %cst_103 [1] : vector<16x16xf32> to vector<16xf32>
    %287 = vector.shape_cast %286 : vector<16xf32> to vector<16x1xf32>
    %288 = tpu.reciprocal %287 {approx = true} : vector<16x1xf32> -> vector<16x1xf32>
    %289 = vector.broadcast %288 : vector<16x1xf32> to vector<16x16xf32>
    %290 = arith.mulf %285, %289 : vector<16x16xf32>
    %291 = arith.truncf %290 : vector<16x16xf32> to vector<16x16xbf16>
    %cst_104 = arith.constant dense<0.000000e+00> : vector<16x32xf32>
    %292 = tpu.matmul %291, %276, %cst_104 {dimension_numbers = #tpu.dot_dimension_numbers<[1], [0], [0], [1], [0, 0, 1, 1], [], []>} : vector<16x16xbf16>, vector<16x32xbf16>, vector<16x32xf32> -> vector<16x32xf32>
    %293 = tpu.concatenate %273, %292 in 1 : vector<16x32xf32>, vector<16x32xf32> -> vector<16x64xf32>
    %294 = tpu.concatenate %254, %293 in 0 : vector<16x64xf32>, vector<16x64xf32> -> vector<32x64xf32>
    %295 = arith.truncf %294 : vector<32x64xf32> to vector<32x64xbf16>
    %c1_105 = arith.constant 1 : index
    %c0_106 = arith.constant 0 : index
    %c0_107 = arith.constant 0 : index
    %296 = vector.load %arg7[%c1_105, %c0_106, %c0_107] : memref<2x64x64xbf16, #tpu.memory_space<vmem>>, vector<1x64x64xbf16>
    %297 = vector.shape_cast %296 : vector<1x64x64xbf16> to vector<64x64xbf16>
    %cst_108 = arith.constant dense<0.000000e+00> : vector<32x64xf32>
    %298 = tpu.matmul %295, %297, %cst_108 {dimension_numbers = #tpu.dot_dimension_numbers<[1], [0], [0], [1], [0, 0, 1, 1], [], []>} : vector<32x64xbf16>, vector<64x64xbf16>, vector<32x64xf32> -> vector<32x64xf32>
    %c1_109 = arith.constant 1 : index
    %c0_110 = arith.constant 0 : index
    %c0_111 = arith.constant 0 : index
    %299 = vector.load %arg8[%c1_109, %c0_110, %c0_111] : memref<2x1x64xf32, #tpu.memory_space<vmem>>, vector<1x1x64xf32>
    %300 = vector.shape_cast %299 : vector<1x1x64xf32> to vector<1x64xf32>
    %301 = vector.broadcast %300 : vector<1x64xf32> to vector<32x64xf32>
    %302 = arith.addf %298, %301 : vector<32x64xf32>
    %303 = arith.addf %206, %302 : vector<32x64xf32>
    %c1_112 = arith.constant 1 : index
    %c0_113 = arith.constant 0 : index
    %c0_114 = arith.constant 0 : index
    %304 = vector.load %arg9[%c1_112, %c0_113, %c0_114] : memref<2x1x64xf32, #tpu.memory_space<vmem>>, vector<1x1x64xf32>
    %305 = vector.shape_cast %304 : vector<1x1x64xf32> to vector<1x64xf32>
    %c1_115 = arith.constant 1 : index
    %c0_116 = arith.constant 0 : index
    %c0_117 = arith.constant 0 : index
    %306 = vector.load %arg10[%c1_115, %c0_116, %c0_117] : memref<2x1x64xf32, #tpu.memory_space<vmem>>, vector<1x1x64xf32>
    %307 = vector.shape_cast %306 : vector<1x1x64xf32> to vector<1x64xf32>
    %cst_118 = arith.constant dense<0.000000e+00> : vector<32xf32>
    %308 = vector.multi_reduction <add>, %303, %cst_118 [1] : vector<32x64xf32> to vector<32xf32>
    %309 = vector.shape_cast %308 : vector<32xf32> to vector<32x1xf32>
    %cst_119 = arith.constant 6.400000e+01 : f32
    %310 = vector.broadcast %cst_119 : f32 to vector<32x1xf32>
    %311 = arith.divf %309, %310 : vector<32x1xf32>
    %312 = vector.broadcast %311 : vector<32x1xf32> to vector<32x64xf32>
    %313 = arith.subf %303, %312 : vector<32x64xf32>
    %314 = arith.mulf %313, %313 : vector<32x64xf32>
    %cst_120 = arith.constant dense<0.000000e+00> : vector<32xf32>
    %315 = vector.multi_reduction <add>, %314, %cst_120 [1] : vector<32x64xf32> to vector<32xf32>
    %316 = vector.shape_cast %315 : vector<32xf32> to vector<32x1xf32>
    %cst_121 = arith.constant 6.400000e+01 : f32
    %317 = vector.broadcast %cst_121 : f32 to vector<32x1xf32>
    %318 = arith.divf %316, %317 : vector<32x1xf32>
    %319 = vector.broadcast %311 : vector<32x1xf32> to vector<32x64xf32>
    %320 = arith.subf %303, %319 : vector<32x64xf32>
    %cst_122 = arith.constant 9.99999996E-13 : f32
    %321 = vector.broadcast %cst_122 : f32 to vector<32x1xf32>
    %322 = arith.addf %318, %321 : vector<32x1xf32>
    %323 = math.rsqrt %322 : vector<32x1xf32>
    %324 = vector.broadcast %323 : vector<32x1xf32> to vector<32x64xf32>
    %325 = arith.mulf %320, %324 : vector<32x64xf32>
    %326 = vector.broadcast %305 : vector<1x64xf32> to vector<32x64xf32>
    %327 = arith.mulf %325, %326 : vector<32x64xf32>
    %328 = vector.broadcast %307 : vector<1x64xf32> to vector<32x64xf32>
    %329 = arith.addf %327, %328 : vector<32x64xf32>
    %330 = arith.truncf %329 : vector<32x64xf32> to vector<32x64xbf16>
    %c1_123 = arith.constant 1 : index
    %c0_124 = arith.constant 0 : index
    %c0_125 = arith.constant 0 : index
    %331 = vector.load %arg11[%c1_123, %c0_124, %c0_125] : memref<2x64x128xbf16, #tpu.memory_space<vmem>>, vector<1x64x128xbf16>
    %332 = vector.shape_cast %331 : vector<1x64x128xbf16> to vector<64x128xbf16>
    %cst_126 = arith.constant dense<0.000000e+00> : vector<32x128xf32>
    %333 = tpu.matmul %330, %332, %cst_126 {dimension_numbers = #tpu.dot_dimension_numbers<[1], [0], [0], [1], [0, 0, 1, 1], [], []>} : vector<32x64xbf16>, vector<64x128xbf16>, vector<32x128xf32> -> vector<32x128xf32>
    %c1_127 = arith.constant 1 : index
    %c0_128 = arith.constant 0 : index
    %c0_129 = arith.constant 0 : index
    %334 = vector.load %arg12[%c1_127, %c0_128, %c0_129] : memref<2x1x128xf32, #tpu.memory_space<vmem>>, vector<1x1x128xf32>
    %335 = vector.shape_cast %334 : vector<1x1x128xf32> to vector<1x128xf32>
    %336 = vector.broadcast %335 : vector<1x128xf32> to vector<32x128xf32>
    %337 = arith.addf %333, %336 : vector<32x128xf32>
    %338 = arith.mulf %337, %337 : vector<32x128xf32>
    %339 = arith.mulf %337, %338 : vector<32x128xf32>
    %cst_130 = arith.constant 4.471500e-02 : f32
    %340 = vector.broadcast %cst_130 : f32 to vector<32x128xf32>
    %341 = arith.mulf %340, %339 : vector<32x128xf32>
    %342 = arith.addf %337, %341 : vector<32x128xf32>
    %cst_131 = arith.constant 0.797884583 : f32
    %343 = vector.broadcast %cst_131 : f32 to vector<32x128xf32>
    %344 = arith.mulf %343, %342 : vector<32x128xf32>
    %345 = math.tanh %344 : vector<32x128xf32>
    %cst_132 = arith.constant 1.000000e+00 : f32
    %346 = vector.broadcast %cst_132 : f32 to vector<32x128xf32>
    %347 = arith.addf %346, %345 : vector<32x128xf32>
    %cst_133 = arith.constant 5.000000e-01 : f32
    %348 = vector.broadcast %cst_133 : f32 to vector<32x128xf32>
    %349 = arith.mulf %348, %347 : vector<32x128xf32>
    %350 = arith.mulf %337, %349 : vector<32x128xf32>
    %351 = arith.truncf %350 : vector<32x128xf32> to vector<32x128xbf16>
    %c1_134 = arith.constant 1 : index
    %c0_135 = arith.constant 0 : index
    %c0_136 = arith.constant 0 : index
    %352 = vector.load %arg13[%c1_134, %c0_135, %c0_136] : memref<2x128x64xbf16, #tpu.memory_space<vmem>>, vector<1x128x64xbf16>
    %353 = vector.shape_cast %352 : vector<1x128x64xbf16> to vector<128x64xbf16>
    %cst_137 = arith.constant dense<0.000000e+00> : vector<32x64xf32>
    %354 = tpu.matmul %351, %353, %cst_137 {dimension_numbers = #tpu.dot_dimension_numbers<[1], [0], [0], [1], [0, 0, 1, 1], [], []>} : vector<32x128xbf16>, vector<128x64xbf16>, vector<32x64xf32> -> vector<32x64xf32>
    %c1_138 = arith.constant 1 : index
    %c0_139 = arith.constant 0 : index
    %c0_140 = arith.constant 0 : index
    %355 = vector.load %arg14[%c1_138, %c0_139, %c0_140] : memref<2x1x64xf32, #tpu.memory_space<vmem>>, vector<1x1x64xf32>
    %356 = vector.shape_cast %355 : vector<1x1x64xf32> to vector<1x64xf32>
    %357 = vector.broadcast %356 : vector<1x64xf32> to vector<32x64xf32>
    %358 = arith.addf %354, %357 : vector<32x64xf32>
    %359 = arith.addf %329, %358 : vector<32x64xf32>
    %c1_141 = arith.constant 1 : index
    %c0_142 = arith.constant 0 : index
    %c0_143 = arith.constant 0 : index
    %360 = vector.load %arg15[%c1_141, %c0_142, %c0_143] : memref<2x1x64xf32, #tpu.memory_space<vmem>>, vector<1x1x64xf32>
    %361 = vector.shape_cast %360 : vector<1x1x64xf32> to vector<1x64xf32>
    %c1_144 = arith.constant 1 : index
    %c0_145 = arith.constant 0 : index
    %c0_146 = arith.constant 0 : index
    %362 = vector.load %arg16[%c1_144, %c0_145, %c0_146] : memref<2x1x64xf32, #tpu.memory_space<vmem>>, vector<1x1x64xf32>
    %363 = vector.shape_cast %362 : vector<1x1x64xf32> to vector<1x64xf32>
    %cst_147 = arith.constant dense<0.000000e+00> : vector<32xf32>
    %364 = vector.multi_reduction <add>, %359, %cst_147 [1] : vector<32x64xf32> to vector<32xf32>
    %365 = vector.shape_cast %364 : vector<32xf32> to vector<32x1xf32>
    %cst_148 = arith.constant 6.400000e+01 : f32
    %366 = vector.broadcast %cst_148 : f32 to vector<32x1xf32>
    %367 = arith.divf %365, %366 : vector<32x1xf32>
    %368 = vector.broadcast %367 : vector<32x1xf32> to vector<32x64xf32>
    %369 = arith.subf %359, %368 : vector<32x64xf32>
    %370 = arith.mulf %369, %369 : vector<32x64xf32>
    %cst_149 = arith.constant dense<0.000000e+00> : vector<32xf32>
    %371 = vector.multi_reduction <add>, %370, %cst_149 [1] : vector<32x64xf32> to vector<32xf32>
    %372 = vector.shape_cast %371 : vector<32xf32> to vector<32x1xf32>
    %cst_150 = arith.constant 6.400000e+01 : f32
    %373 = vector.broadcast %cst_150 : f32 to vector<32x1xf32>
    %374 = arith.divf %372, %373 : vector<32x1xf32>
    %375 = vector.broadcast %367 : vector<32x1xf32> to vector<32x64xf32>
    %376 = arith.subf %359, %375 : vector<32x64xf32>
    %cst_151 = arith.constant 9.99999996E-13 : f32
    %377 = vector.broadcast %cst_151 : f32 to vector<32x1xf32>
    %378 = arith.addf %374, %377 : vector<32x1xf32>
    %379 = math.rsqrt %378 : vector<32x1xf32>
    %380 = vector.broadcast %379 : vector<32x1xf32> to vector<32x64xf32>
    %381 = arith.mulf %376, %380 : vector<32x64xf32>
    %382 = vector.broadcast %361 : vector<1x64xf32> to vector<32x64xf32>
    %383 = arith.mulf %381, %382 : vector<32x64xf32>
    %384 = vector.broadcast %363 : vector<1x64xf32> to vector<32x64xf32>
    %385 = arith.addf %383, %384 : vector<32x64xf32>
    %386 = vector.extract_strided_slice %385 {offsets = [0, 0], sizes = [1, 64], strides = [1, 1]} : vector<32x64xf32> to vector<1x64xf32>
    %387 = vector.extract_strided_slice %385 {offsets = [16, 0], sizes = [1, 64], strides = [1, 1]} : vector<32x64xf32> to vector<1x64xf32>
    %388 = tpu.concatenate %386, %387 in 0 : vector<1x64xf32>, vector<1x64xf32> -> vector<2x64xf32>
    %389 = arith.truncf %388 : vector<2x64xf32> to vector<2x64xbf16>
    %c0_152 = arith.constant 0 : index
    %c0_153 = arith.constant 0 : index
    %390 = vector.load %arg17[%c0_152, %c0_153] : memref<64x64xbf16, #tpu.memory_space<vmem>>, vector<64x64xbf16>
    %cst_154 = arith.constant dense<0.000000e+00> : vector<2x64xf32>
    %391 = tpu.matmul %389, %390, %cst_154 {dimension_numbers = #tpu.dot_dimension_numbers<[1], [0], [0], [1], [0, 0, 1, 1], [], []>} : vector<2x64xbf16>, vector<64x64xbf16>, vector<2x64xf32> -> vector<2x64xf32>
    %c0_155 = arith.constant 0 : index
    %c0_156 = arith.constant 0 : index
    %392 = vector.load %arg18[%c0_155, %c0_156] : memref<1x64xf32, #tpu.memory_space<vmem>>, vector<1x64xf32>
    %393 = vector.broadcast %392 : vector<1x64xf32> to vector<2x64xf32>
    %394 = arith.addf %391, %393 : vector<2x64xf32>
    %cst_157 = arith.constant 0.000000e+00 : f32
    %395 = vector.broadcast %cst_157 : f32 to vector<2x64xf32>
    %396 = arith.maximumf %394, %395 : vector<2x64xf32>
    %397 = arith.truncf %396 : vector<2x64xf32> to vector<2x64xbf16>
    %c0_158 = arith.constant 0 : index
    %c0_159 = arith.constant 0 : index
    %398 = vector.load %arg19[%c0_158, %c0_159] : memref<64x128xbf16, #tpu.memory_space<vmem>>, vector<64x128xbf16>
    %cst_160 = arith.constant dense<0.000000e+00> : vector<2x128xf32>
    %399 = tpu.matmul %397, %398, %cst_160 {dimension_numbers = #tpu.dot_dimension_numbers<[1], [0], [0], [1], [0, 0, 1, 1], [], []>} : vector<2x64xbf16>, vector<64x128xbf16>, vector<2x128xf32> -> vector<2x128xf32>
    %c0_161 = arith.constant 0 : index
    %c0_162 = arith.constant 0 : index
    %400 = vector.load %arg20[%c0_161, %c0_162] : memref<1x128xf32, #tpu.memory_space<vmem>>, vector<1x128xf32>
    %401 = vector.broadcast %400 : vector<1x128xf32> to vector<2x128xf32>
    %402 = arith.addf %399, %401 : vector<2x128xf32>
    %c0_163 = arith.constant 0 : index
    %c0_164 = arith.constant 0 : index
    %c0_165 = arith.constant 0 : index
    %403 = vector.load %arg21[%c0_163, %c0_164, %c0_165] : memref<1x2x128xf32, #tpu.memory_space<vmem>>, vector<1x2x128xf32>
    %404 = vector.shape_cast %403 : vector<1x2x128xf32> to vector<2x128xf32>
    %405 = vector.shape_cast %402 : vector<2x128xf32> to vector<1x2x128xf32>
    tpu.vector_store %arg21[%c0_163, %c0_164, %c0_165], %405 {strides = array<i32>} : memref<1x2x128xf32, #tpu.memory_space<vmem>>, vector<1x2x128xf32>,
    return
  }
  func.func @transform_0(%arg0: i32) -> (i32, i32, i32) {
    %c0_i32 = arith.constant 0 : i32
    %c0_i32_0 = arith.constant 0 : i32
    %c0_i32_1 = arith.constant 0 : i32
    return %arg0, %c0_i32, %c0_i32_0 : i32, i32, i32
  }
  func.func @transform_1(%arg0: i32) -> (i32, i32, i32) {
    %c0_i32 = arith.constant 0 : i32
    %c0_i32_0 = arith.constant 0 : i32
    %c0_i32_1 = arith.constant 0 : i32
    return %arg0, %c0_i32, %c0_i32_0 : i32, i32, i32
  }
  func.func @transform_2(%arg0: i32) -> (i32, i32) {
    %c0_i32 = arith.constant 0 : i32
    %c0_i32_0 = arith.constant 0 : i32
    %c0_i32_1 = arith.constant 0 : i32
    return %c0_i32, %c0_i32_0 : i32, i32
  }
  func.func @transform_3(%arg0: i32) -> (i32, i32) {
    %c0_i32 = arith.constant 0 : i32
    %c0_i32_0 = arith.constant 0 : i32
    %c0_i32_1 = arith.constant 0 : i32
    return %c0_i32, %c0_i32_0 : i32, i32
  }
  func.func @transform_4(%arg0: i32) -> (i32, i32, i32) {
    %c0_i32 = arith.constant 0 : i32
    %c0_i32_0 = arith.constant 0 : i32
    %c0_i32_1 = arith.constant 0 : i32
    %c0_i32_2 = arith.constant 0 : i32
    return %c0_i32, %c0_i32_0, %c0_i32_1 : i32, i32, i32
  }
  func.func @transform_5(%arg0: i32) -> (i32, i32, i32) {
    %c0_i32 = arith.constant 0 : i32
    %c0_i32_0 = arith.constant 0 : i32
    %c0_i32_1 = arith.constant 0 : i32
    %c0_i32_2 = arith.constant 0 : i32
    return %c0_i32, %c0_i32_0, %c0_i32_1 : i32, i32, i32
  }
  func.func @transform_6(%arg0: i32) -> (i32, i32, i32) {
    %c0_i32 = arith.constant 0 : i32
    %c0_i32_0 = arith.constant 0 : i32
    %c0_i32_1 = arith.constant 0 : i32
    %c0_i32_2 = arith.constant 0 : i32
    return %c0_i32, %c0_i32_0, %c0_i32_1 : i32, i32, i32
  }
  func.func @transform_7(%arg0: i32) -> (i32, i32, i32) {
    %c0_i32 = arith.constant 0 : i32
    %c0_i32_0 = arith.constant 0 : i32
    %c0_i32_1 = arith.constant 0 : i32
    %c0_i32_2 = arith.constant 0 : i32
    return %c0_i32, %c0_i32_0, %c0_i32_1 : i32, i32, i32
  }
  func.func @transform_8(%arg0: i32) -> (i32, i32, i32) {
    %c0_i32 = arith.constant 0 : i32
    %c0_i32_0 = arith.constant 0 : i32
    %c0_i32_1 = arith.constant 0 : i32
    %c0_i32_2 = arith.constant 0 : i32
    return %c0_i32, %c0_i32_0, %c0_i32_1 : i32, i32, i32
  }
  func.func @transform_9(%arg0: i32) -> (i32, i32, i32) {
    %c0_i32 = arith.constant 0 : i32
    %c0_i32_0 = arith.constant 0 : i32
    %c0_i32_1 = arith.constant 0 : i32
    %c0_i32_2 = arith.constant 0 : i32
    return %c0_i32, %c0_i32_0, %c0_i32_1 : i32, i32, i32
  }
  func.func @transform_10(%arg0: i32) -> (i32, i32, i32) {
    %c0_i32 = arith.constant 0 : i32
    %c0_i32_0 = arith.constant 0 : i32
    %c0_i32_1 = arith.constant 0 : i32
    %c0_i32_2 = arith.constant 0 : i32
    return %c0_i32, %c0_i32_0, %c0_i32_1 : i32, i32, i32
  }
  func.func @transform_11(%arg0: i32) -> (i32, i32, i32) {
    %c0_i32 = arith.constant 0 : i32
    %c0_i32_0 = arith.constant 0 : i32
    %c0_i32_1 = arith.constant 0 : i32
    %c0_i32_2 = arith.constant 0 : i32
    return %c0_i32, %c0_i32_0, %c0_i32_1 : i32, i32, i32
  }
  func.func @transform_12(%arg0: i32) -> (i32, i32, i32) {
    %c0_i32 = arith.constant 0 : i32
    %c0_i32_0 = arith.constant 0 : i32
    %c0_i32_1 = arith.constant 0 : i32
    %c0_i32_2 = arith.constant 0 : i32
    return %c0_i32, %c0_i32_0, %c0_i32_1 : i32, i32, i32
  }
  func.func @transform_13(%arg0: i32) -> (i32, i32, i32) {
    %c0_i32 = arith.constant 0 : i32
    %c0_i32_0 = arith.constant 0 : i32
    %c0_i32_1 = arith.constant 0 : i32
    %c0_i32_2 = arith.constant 0 : i32
    return %c0_i32, %c0_i32_0, %c0_i32_1 : i32, i32, i32
  }
  func.func @transform_14(%arg0: i32) -> (i32, i32, i32) {
    %c0_i32 = arith.constant 0 : i32
    %c0_i32_0 = arith.constant 0 : i32
    %c0_i32_1 = arith.constant 0 : i32
    %c0_i32_2 = arith.constant 0 : i32
    return %c0_i32, %c0_i32_0, %c0_i32_1 : i32, i32, i32
  }
  func.func @transform_15(%arg0: i32) -> (i32, i32, i32) {
    %c0_i32 = arith.constant 0 : i32
    %c0_i32_0 = arith.constant 0 : i32
    %c0_i32_1 = arith.constant 0 : i32
    %c0_i32_2 = arith.constant 0 : i32
    return %c0_i32, %c0_i32_0, %c0_i32_1 : i32, i32, i32
  }
  func.func @transform_16(%arg0: i32) -> (i32, i32) {
    %c0_i32 = arith.constant 0 : i32
    %c0_i32_0 = arith.constant 0 : i32
    %c0_i32_1 = arith.constant 0 : i32
    return %c0_i32, %c0_i32_0 : i32, i32
  }
  func.func @transform_17(%arg0: i32) -> (i32, i32) {
    %c0_i32 = arith.constant 0 : i32
    %c0_i32_0 = arith.constant 0 : i32
    %c0_i32_1 = arith.constant 0 : i32
    return %c0_i32, %c0_i32_0 : i32, i32
  }
  func.func @transform_18(%arg0: i32) -> (i32, i32) {
    %c0_i32 = arith.constant 0 : i32
    %c0_i32_0 = arith.constant 0 : i32
    %c0_i32_1 = arith.constant 0 : i32
    return %c0_i32, %c0_i32_0 : i32, i32
  }
  func.func @transform_19(%arg0: i32) -> (i32, i32) {
    %c0_i32 = arith.constant 0 : i32
    %c0_i32_0 = arith.constant 0 : i32
    %c0_i32_1 = arith.constant 0 : i32
    return %c0_i32, %c0_i32_0 : i32, i32
  }
  func.func @transform_20(%arg0: i32) -> (i32, i32, i32) {
    %c0_i32 = arith.constant 0 : i32
    %c0_i32_0 = arith.constant 0 : i32
    %c0_i32_1 = arith.constant 0 : i32
    return %arg0, %c0_i32, %c0_i32_0 : i32, i32, i32
  }
}

</mosaic_0001>

<bundles_post_ra>
// kernel: tpu_custom_call.1
= control target key start
LH: loop header
LB: loop body
LE: loop exit
PB: predicated region body
PF: predicated region fallthrough
CT: control target
= control target key end

     0   :  { %s5998_s0 = inlined_call_operand.vmem [shape: f32[2,32,64], index: 0, kind: input, shape index: {}]   ;;  %s5999_s1 = inlined_call_operand.hbm [shape: f32[2,2,16], index: 1, kind: input, shape index: {}]   ;;  %s6000_s2 = inlined_call_operand.hbm [shape: f32[1,64], index: 2, kind: input, shape index: {}]   ;;  %s6001_s3 = inlined_call_operand.hbm [shape: f32[1,64], index: 3, kind: input, shape index: {}]   ;;  %s6002_s4 = inlined_call_operand.vmem [shape: bf16[2,64,192], index: 4, kind: input, shape index: {}]   ;;  %s6003_s5 = inlined_call_operand.hbm [shape: f32[2,1,192], index: 5, kind: input, shape index: {}]   ;;  %s6004_s6 = inlined_call_operand.hbm [shape: bf16[2,64,64], index: 6, kind: input, shape index: {}]   ;;  %s6005_s7 = inlined_call_operand.hbm [shape: f32[2,1,64], index: 7, kind: input, shape index: {}]   ;;  %s6006_s8 = inlined_call_operand.hbm [shape: f32[2,1,64], index: 8, kind: input, shape index: {}]   ;;  %s6007_s9 = inlined_call_operand.hbm [shape: f32[2,1,64], index: 9, kind: input, shape index: {}]   ;;  %s6008_s10 = inlined_call_operand.hbm [shape: bf16[2,64,128], index: 10, kind: input, shape index: {}]   ;;  %s6009_s11 = inlined_call_operand.hbm [shape: f32[2,1,128], index: 11, kind: input, shape index: {}]   ;;  %s6010_s12 = inlined_call_operand.vmem [shape: bf16[2,128,64], index: 12, kind: input, shape index: {}]   ;;  %s6011_s13 = inlined_call_operand.hbm [shape: f32[2,1,64], index: 13, kind: input, shape index: {}]   ;;  %s6012_s14 = inlined_call_operand.hbm [shape: f32[2,1,64], index: 14, kind: input, shape index: {}]   ;;  %s6013_s15 = inlined_call_operand.hbm [shape: f32[2,1,64], index: 15, kind: input, shape index: {}]   ;;  %s6014_s16 = inlined_call_operand.vmem [shape: bf16[64,64], index: 16, kind: input, shape index: {}]   ;;  %s6015_s17 = inlined_call_operand.hbm [shape: f32[1,64], index: 17, kind: input, shape index: {}]   ;;  %s6016_s18 = inlined_call_operand.vmem [shape: bf16[64,128], index: 18, kind: input, shape index: {}]   ;;  %s6017_s19 = inlined_call_operand.vmem [shape: f32[1,128], index: 19, kind: input, shape index: {}]   ;;  %s6018_s20 = inlined_call_operand.hbm [shape: f32[2,2,128], index: 20, kind: output, shape index: {}]  }
   0x1   :  { %6047 = sst [smem:[#allocation38_spill]] %s5998_s0 }
   0x2   :  { %6048 = sst [smem:[#allocation39_spill]] %s5999_s1 }
   0x3   :  { %6049 = sst [smem:[#allocation40_spill]] %s6000_s2 }
   0x4   :  { %6050 = sst [smem:[#allocation41_spill]] %s6001_s3 }
   0x5   :  { %6051 = sst [smem:[#allocation42_spill]] %s6002_s4 }
   0x6   :  { %6052 = sst [smem:[#allocation43_spill]] %s6003_s5 }
   0x7   :  { %6053 = sst [smem:[#allocation44_spill]] %s6004_s6 }
   0x8   :  { %6054 = sst [smem:[#allocation45_spill]] %s6005_s7 }
   0x9   :  { %6055 = sst [smem:[#allocation46_spill]] %s6010_s12 }
   0xa   :  { %6056 = sst [smem:[#allocation47_spill]] %s6014_s16 }
   0xb   :  { %6057 = sst [smem:[#allocation48_spill]] %s6016_s18 }
   0xc   :  { %6058 = sst [smem:[#allocation49_spill]] %s6017_s19 }
   0xd   :  { %6059 = sst [smem:[#allocation50_spill]] %s6018_s20 }
   0xe   :  { %25 = vsyncpa [#allocation3], 0 }
   0xf   :  { %27 = vsyncpa [#allocation3 + $0x1], 0 }
  0x10   :  { %28 = vsyncpa [#allocation6], 0 }
  0x11   :  { %29 = vsyncpa [#allocation9], 0 }
  0x12   :  { %30 = vsyncpa [#allocation12], 0 }
  0x13   :  { %31 = vsyncpa [#allocation15], 0 }
  0x14   :  { %32 = vsyncpa [#allocation18], 0 }
  0x15   :  { %33 = vsyncpa [#allocation21], 0 }
  0x16   :  { %34 = vsyncpa [#allocation24], 0 }
  0x17   :  { %35 = vsyncpa [#allocation4], 0 }
  0x18   :  { %37 = vsyncpa [#allocation4 + $0x1], 0  ;;  %s5043_s1 = smov 0   ;;  %s5045_s22 = smov 0  }
  0x19   :  { %s5047_s23 = smov 0   ;;  %s5049_s24 = smov 0  }
  0x1a LB: > { %6060 = sst [smem:[#allocation35_spill]] %s4897_s1  ;;  %s4911_s2 = smov [#allocation5]   ;;  %s4909_s24 = sphi %s5049_s24, %s6115_s24   ;;  %s4905_s23 = sphi %s5047_s23, %s6114_s23   ;;  %s4901_s22 = sphi %s5045_s22, %s6113_s22   ;;  %s4897_s1 = sphi %s5043_s1, %s6112_s1  }
  0x1b   : > { %s517_s25 = sshll.u32 %s4911_s2, 4  ;;  %s5064_s3 = sadd.s32 4294967295, %s4909_s24   ;;  %s5069_s25 = int_to_ptr.vmem [resolvable:$true] %s517_s25 }
  0x1c   : > { %6061 = sst [smem:[#allocation36_spill]] %s5064_s3  ;;  %p3570_p0 = scmp.ge.s32.totalorder %s4909_s24, 1 }
  0x1d   : > { %p6032_p1 = scmp.eq.s32.totalorder %s5064_s3, 0  ;;  %p504_p2 = scmp.lt.s32.totalorder %s4909_s24, 3 }
  0x1e   : > { %s4912_s27 = smov [#allocation8]   ;;  %s4913_s29 = smov [#allocation11]  }
  0x1f   : > { %p5071_p3 = pnand %p3570_p0, %p504_p2  ;;  %s541_s28 = sshll.u32 %s4912_s27, 4  ;;  %s5078_s28 = int_to_ptr.vmem [resolvable:$true] %s541_s28 }
  0x20   : > { %s567_s30 = sshll.u32 %s4913_s29, 4  ;;  %s6065_s2 = sld [smem:[#allocation40_spill]]  ;;  %s5086_s30 = int_to_ptr.vmem [resolvable:$true] %s567_s30 }
  0x21   : > { %s6062_s26 = scalar_select %p5071_p3, 1, 0 }
  0x22   : > { %p4088_p5 = pneg %p5071_p3 }
  0x23   : > { %6063 = sst [smem:[#allocation37_spill]] %s6062_s26 }
  0x24   : > { %p5082_p6 = pnand %p4088_p5, %p6032_p1 }
  0x26   : > { %s4421_s20 = scalar_lea.hbm %s6065_s2, 16  ;;  %p5096_p8 = pneg %p5082_p6 }
  0x27   : > { %p4422_p7 = scmp.ne.s32.totalorder %s6065_s2, %s4421_s20  ;;  %p4428_p11 = scmp.lt.u32.totalorder %s4421_s20, %s6065_s2 }
  0x29   : > { %p4424_p9 = pnand %p5096_p8, %p4422_p7 }
  0x2b   : > { %p4425_p10 = pneg %p4424_p9 }
  0x2d   : > { %p4430_p12 = pnand %p4428_p11, %p4425_p10 }
  0x2f   : > { %4433 = shalt.err (!%p4430_p12)
}
  0x30   : > { %s4434_s18 = scalar_lea.vmem %s5069_s25, 16  ;;  %s4441_s19 = scalar_lea.vmem %s5069_s25, 32 }
  0x31   : > { %p4435_p13 = scmp.ne.s32.totalorder %s5069_s25, %s4434_s18  ;;  %p4442_p5 = scmp.lt.s32.totalorder %s5069_s25, %s5069_s25 }
  0x32   : > { %p4443_p7 = scmp.lt.s32.totalorder %s4441_s19, %s4434_s18 }
  0x33   : > { %p4437_p0 = pnand %p4435_p13, %p5096_p8 }
  0x34   : > { %p4444_p9 = por %p4443_p7, %p4442_p5 }
  0x35   : > { %p4438_p2 = pneg %p4437_p0 }
  0x37   : > { %p4445_p4 = pnand %p4444_p9, %p4438_p2 }
  0x39   : > { %4448 = shalt.err (!%p4445_p4)
}
  0x3a   : > { %4091 = dma.hbm_to_vmem [thread:$0]  (!%p5082_p6), %s6065_s2, 16, %s5069_s25, [#allocation6]  }
  0x3b   : > { %s6067_s5 = sld [smem:[#allocation43_spill]] }
  0x41   : > { %s4449_s29 = scalar_lea.hbm %s6067_s5, 64 }
  0x42   : > { %p4450_p10 = scmp.ne.s32.totalorder %s6067_s5, %s4449_s29  ;;  %p4456_p4 = scmp.lt.u32.totalorder %s4449_s29, %s6067_s5 }
  0x44   : > { %p4452_p11 = pnand %p4450_p10, %p5096_p8 }
  0x46   : > { %p4453_p12 = pneg %p4452_p11 }
  0x48   : > { %p4458_p13 = pnand %p4456_p4, %p4453_p12 }
  0x4a   : > { %4461 = shalt.err (!%p4458_p13)
}
  0x4b   : > { %s4462_s25 = scalar_lea.vmem %s5078_s28, 64  ;;  %p4470_p7 = scmp.lt.s32.totalorder %s5078_s28, %s5078_s28 }
  0x4c   : > { %p4463_p0 = scmp.ne.s32.totalorder %s5078_s28, %s4462_s25  ;;  %p4471_p9 = scmp.lt.s32.totalorder %s4462_s25, %s4462_s25 }
  0x4e   : > { %p4465_p2 = pnand %p4463_p0, %p5096_p8  ;;  %p4472_p10 = por %p4471_p9, %p4470_p7 }
  0x50   : > { %p4466_p5 = pneg %p4465_p2 }
  0x52   : > { %p4473_p11 = pnand %p4472_p10, %p4466_p5 }
  0x54   : > { %4476 = shalt.err (!%p4473_p11)
}
  0x55   : > { %s4914_s12 = smov 32   ;;  %s4915_s26 = smov 2  }
  0x56   : > { %4097 = dma.hbm_to_vmem [thread:$0]  (!%p5082_p6), %s6067_s5, 64, %s5078_s28, [#allocation9], %s4914_s12, %s4914_s12, %s4915_s26  }
  0x57   : > { %s6068_s7 = sld [smem:[#allocation45_spill]] }
  0x5d   : > { %s4477_s29 = scalar_lea.hbm %s6068_s7, 32 }
  0x5e   : > { %p4478_p12 = scmp.ne.s32.totalorder %s6068_s7, %s4477_s29  ;;  %p4484_p0 = scmp.lt.u32.totalorder %s4477_s29, %s6068_s7 }
  0x60   : > { %p4480_p4 = pnand %p4478_p12, %p5096_p8 }
  0x62   : > { %p4481_p13 = pneg %p4480_p4 }
  0x64   : > { %p4486_p2 = pnand %p4484_p0, %p4481_p13 }
  0x66   : > { %4489 = shalt.err (!%p4486_p2)
}
  0x67   : > { %s4490_s28 = scalar_lea.vmem %s5086_s30, 32  ;;  %p4498_p10 = scmp.lt.s32.totalorder %s5086_s30, %s5086_s30 }
  0x68   : > { %p4491_p5 = scmp.ne.s32.totalorder %s5086_s30, %s4490_s28  ;;  %p4499_p11 = scmp.lt.s32.totalorder %s4490_s28, %s4490_s28 }
  0x6a   : > { %p4493_p7 = pnand %p4491_p5, %p5096_p8  ;;  %p4500_p12 = por %p4499_p11, %p4498_p10 }
  0x6c   : > { %p4494_p9 = pneg %p4493_p7 }
  0x6e   : > { %p4501_p4 = pnand %p4500_p12, %p4494_p9 }
  0x70   : > { %4504 = shalt.err (!%p4501_p4)
}
  0x71   : > { %s6034_s12 = smov 16   ;;  %s6036_s2 = smov 1  }
  0x72   : > { %4103 = dma.hbm_to_vmem [thread:$0]  (!%p5082_p6), %s6068_s7, 32, %s5086_s30, [#allocation12], %s6034_s12, %s6034_s12, %s6036_s2  }
  0x73   : > { %s4918_s20 = smov [#allocation14]   ;;  %s4919_s21 = smov [#allocation17]  }
  0x74   : > { %s593_s0 = sshll.u32 %s4918_s20, 4  ;;  %s619_s29 = sshll.u32 %s4919_s21, 4  ;;  %s594_s0 = int_to_ptr.vmem [resolvable:$true] %s593_s0  ;;  %s620_s29 = int_to_ptr.vmem [resolvable:$true] %s619_s29 }
  0x75   : > { %s4505_s25 = scalar_lea.hbm %s6007_s9, 32 }
  0x76   : > { %p4506_p13 = scmp.ne.s32.totalorder %s6007_s9, %s4505_s25  ;;  %p4512_p5 = scmp.lt.u32.totalorder %s4505_s25, %s6007_s9 }
  0x78   : > { %p4508_p0 = pnand %p4506_p13, %p5096_p8 }
  0x7a   : > { %p4509_p2 = pneg %p4508_p0 }
  0x7c   : > { %p4514_p7 = pnand %p4512_p5, %p4509_p2 }
  0x7e   : > { %4517 = shalt.err (!%p4514_p7)
}
  0x7f   : > { %s4518_s30 = scalar_lea.vmem %s594_s0, 32  ;;  %p4526_p12 = scmp.lt.s32.totalorder %s594_s0, %s594_s0 }
  0x80   : > { %p4519_p9 = scmp.ne.s32.totalorder %s594_s0, %s4518_s30  ;;  %p4527_p4 = scmp.lt.s32.totalorder %s4518_s30, %s4518_s30 }
  0x82   : > { %p4521_p10 = pnand %p4519_p9, %p5096_p8  ;;  %p4528_p1 = por %p4527_p4, %p4526_p12 }
  0x84   : > { %p4522_p11 = pneg %p4521_p10 }
  0x86   : > { %p4529_p3 = pnand %p4528_p1, %p4522_p11 }
  0x88   : > { %4532 = shalt.err (!%p4529_p3)
}
  0x89   : > { %4109 = dma.hbm_to_vmem [thread:$0]  (!%p5082_p6), %s6007_s9, 32, %s594_s0, [#allocation15], %s6034_s12, %s6034_s12, %s6036_s2  }
  0x8a   : > { %s4533_s16 = scalar_lea.hbm %s6009_s11, 32 }
  0x8b   : > { %p4534_p1 = scmp.ne.s32.totalorder %s6009_s11, %s4533_s16  ;;  %p4540_p0 = scmp.lt.u32.totalorder %s4533_s16, %s6009_s11 }
  0x8d   : > { %p4536_p3 = pnand %p4534_p1, %p5096_p8 }
  0x8f   : > { %p4537_p13 = pneg %p4536_p3 }
  0x91   : > { %p4542_p2 = pnand %p4540_p0, %p4537_p13 }
  0x93   : > { %4545 = shalt.err (!%p4542_p2)
}
  0x94   : > { %s4546_s25 = scalar_lea.vmem %s620_s29, 32  ;;  %p4554_p10 = scmp.lt.s32.totalorder %s620_s29, %s620_s29 }
  0x95   : > { %p4547_p5 = scmp.ne.s32.totalorder %s620_s29, %s4546_s25  ;;  %p4555_p11 = scmp.lt.s32.totalorder %s4546_s25, %s4546_s25 }
  0x97   : > { %p4549_p7 = pnand %p4547_p5, %p5096_p8  ;;  %p4556_p12 = por %p4555_p11, %p4554_p10 }
  0x99   : > { %p4550_p9 = pneg %p4549_p7 }
  0x9b   : > { %p4557_p4 = pnand %p4556_p12, %p4550_p9 }
  0x9d   : > { %4560 = shalt.err (!%p4557_p4)
}
  0x9e   : > { %4115 = dma.hbm_to_vmem [thread:$0]  (!%p5082_p6), %s6009_s11, 32, %s620_s29, [#allocation18], %s6034_s12, %s6034_s12, %s6036_s2  }
  0x9f   : > { %s4920_s30 = smov [#allocation20]   ;;  %s4921_s1 = smov [#allocation7]  }
  0xa0   : > { %s648_s5 = sshll.u32 %s4920_s30, 4  ;;  %s528_s3 = sshll.u32 %s4921_s1, 4  ;;  %s649_s5 = int_to_ptr.vmem [resolvable:$true] %s648_s5  ;;  %s529_s3 = int_to_ptr.vmem [resolvable:$true] %s528_s3 }
  0xa1   : > { %s4561_s20 = scalar_lea.hbm %s6012_s14, 32 }
  0xa2   : > { %p4562_p1 = scmp.ne.s32.totalorder %s6012_s14, %s4561_s20  ;;  %p4568_p0 = scmp.lt.u32.totalorder %s4561_s20, %s6012_s14 }
  0xa4   : > { %p4564_p3 = pnand %p4562_p1, %p5096_p8 }
  0xa6   : > { %p4565_p13 = pneg %p4564_p3 }
  0xa8   : > { %p4570_p2 = pnand %p4568_p0, %p4565_p13 }
  0xaa   : > { %4573 = shalt.err (!%p4570_p2)
}
  0xab   : > { %s4574_s29 = scalar_lea.vmem %s649_s5, 32  ;;  %p4582_p10 = scmp.lt.s32.totalorder %s649_s5, %s649_s5 }
  0xac   : > { %p4575_p5 = scmp.ne.s32.totalorder %s649_s5, %s4574_s29  ;;  %p4583_p11 = scmp.lt.s32.totalorder %s4574_s29, %s4574_s29 }
  0xae   : > { %p4577_p7 = pnand %p4575_p5, %p5096_p8  ;;  %p4584_p12 = por %p4583_p11, %p4582_p10 }
  0xb0   : > { %p4578_p9 = pneg %p4577_p7 }
  0xb2   : > { %p4585_p4 = pnand %p4584_p12, %p4578_p9 }
  0xb4   : > { %4588 = shalt.err (!%p4585_p4)
}
  0xb5   : > { %4121 = dma.hbm_to_vmem [thread:$0]  (!%p5082_p6), %s6012_s14, 32, %s649_s5, [#allocation21], %s6034_s12, %s6034_s12, %s6036_s2  }
  0xb6   : > { %s6069_s26 = sld [smem:[#allocation41_spill]] }
  0xbc   : > { %s4589_s16 = scalar_lea.hbm %s6069_s26, 16 }
  0xbd   : > { %p4590_p1 = scmp.ne.s32.totalorder %s6069_s26, %s4589_s16  ;;  %p4596_p0 = scmp.lt.u32.totalorder %s4589_s16, %s6069_s26 }
  0xbf   : > { %p4592_p3 = pnand %p4590_p1, %p5096_p8 }
  0xc1   : > { %p4593_p13 = pneg %p4592_p3 }
  0xc3   : > { %p4598_p2 = pnand %p4596_p0, %p4593_p13 }
  0xc5   : > { %4601 = shalt.err (!%p4598_p2)
}
  0xc6   : > { %s4602_s25 = scalar_lea.vmem %s529_s3, 16  ;;  %s4609_s5 = scalar_lea.vmem %s529_s3, 32 }
  0xc7   : > { %p4603_p5 = scmp.ne.s32.totalorder %s529_s3, %s4602_s25  ;;  %p4610_p10 = scmp.lt.s32.totalorder %s529_s3, %s529_s3 }
  0xc8   : > { %p4611_p11 = scmp.lt.s32.totalorder %s4609_s5, %s4602_s25 }
  0xc9   : > { %p4605_p7 = pnand %p4603_p5, %p5096_p8 }
  0xca   : > { %p4612_p12 = por %p4611_p11, %p4610_p10 }
  0xcb   : > { %p4606_p9 = pneg %p4605_p7 }
  0xcd   : > { %p4613_p4 = pnand %p4612_p12, %p4606_p9 }
  0xcf   : > { %4616 = shalt.err (!%p4613_p4)
}
  0xd0   : > { %4094 = dma.hbm_to_vmem [thread:$0]  (!%p5082_p6), %s6069_s26, 16, %s529_s3, [#allocation6]  }
  0xd1   : > { %s4922_s28 = smov [#allocation10]   ;;  %s6070_s6 = sld [smem:[#allocation44_spill]] }
  0xd2   : > { %s554_s30 = sshll.u32 %s4922_s28, 4  ;;  %s555_s30 = int_to_ptr.vmem [resolvable:$true] %s554_s30 }
  0xd7   : > { %s4617_s20 = scalar_lea.hbm %s6070_s6, 1024 }
  0xd8   : > { %p4618_p1 = scmp.ne.s32.totalorder %s6070_s6, %s4617_s20  ;;  %p4624_p0 = scmp.lt.u32.totalorder %s4617_s20, %s6070_s6 }
  0xda   : > { %p4620_p3 = pnand %p4618_p1, %p5096_p8 }
  0xdc   : > { %p4621_p13 = pneg %p4620_p3 }
  0xde   : > { %p4626_p2 = pnand %p4624_p0, %p4621_p13 }
  0xe0   : > { %4629 = shalt.err (!%p4626_p2)
}
  0xe1   : > { %s4630_s3 = scalar_lea.vmem %s555_s30, 1024  ;;  %p4638_p10 = scmp.lt.s32.totalorder %s555_s30, %s555_s30 }
  0xe2   : > { %p4631_p5 = scmp.ne.s32.totalorder %s555_s30, %s4630_s3  ;;  %p4639_p11 = scmp.lt.s32.totalorder %s4630_s3, %s4630_s3 }
  0xe4   : > { %p4633_p7 = pnand %p4631_p5, %p5096_p8  ;;  %p4640_p12 = por %p4639_p11, %p4638_p10 }
  0xe6   : > { %p4634_p9 = pneg %p4633_p7 }
  0xe8   : > { %p4641_p4 = pnand %p4640_p12, %p4634_p9 }
  0xea   : > { %4644 = shalt.err (!%p4641_p4)
}
  0xeb   : > { %s4923_s5 = smov 64   ;;  %s4924_s29 = smov 4  }
  0xec   : > { %4100 = dma.hbm_to_vmem [thread:$0]  (!%p5082_p6), %s6070_s6, 1024, %s555_s30, [#allocation9], %s4923_s5, %s4923_s5, %s4924_s29  }
  0xed   : > { %s4925_s1 = smov [#allocation13]   ;;  %s4926_s20 = smov [#allocation16]  }
  0xee   : > { %s580_s16 = sshll.u32 %s4925_s1, 4  ;;  %s606_s21 = sshll.u32 %s4926_s20, 4  ;;  %s581_s16 = int_to_ptr.vmem [resolvable:$true] %s580_s16  ;;  %s5269_s21 = int_to_ptr.vmem [resolvable:$true] %s606_s21 }
  0xef   : > { %s4645_s25 = scalar_lea.hbm %s6006_s8, 32 }
  0xf0   : > { %p4646_p1 = scmp.ne.s32.totalorder %s6006_s8, %s4645_s25  ;;  %p4652_p0 = scmp.lt.u32.totalorder %s4645_s25, %s6006_s8 }
  0xf2   : > { %p4648_p3 = pnand %p4646_p1, %p5096_p8 }
  0xf4   : > { %p4649_p13 = pneg %p4648_p3 }
  0xf6   : > { %p4654_p2 = pnand %p4652_p0, %p4649_p13 }
  0xf8   : > { %4657 = shalt.err (!%p4654_p2)
}
  0xf9   : > { %s4658_s28 = scalar_lea.vmem %s581_s16, 32  ;;  %p4666_p10 = scmp.lt.s32.totalorder %s581_s16, %s581_s16 }
  0xfa   : > { %p4659_p5 = scmp.ne.s32.totalorder %s581_s16, %s4658_s28  ;;  %p4667_p11 = scmp.lt.s32.totalorder %s4658_s28, %s4658_s28 }
  0xfc   : > { %p4661_p7 = pnand %p4659_p5, %p5096_p8  ;;  %p4668_p12 = por %p4667_p11, %p4666_p10 }
  0xfe   : > { %p4662_p9 = pneg %p4661_p7 }
 0x100   : > { %p4669_p4 = pnand %p4668_p12, %p4662_p9 }
 0x102   : > { %4672 = shalt.err (!%p4669_p4)
}
 0x103   : > { %s6071_s12 = smov 16   ;;  %s4673_s25 = scalar_lea.hbm %s6008_s10, 1024 }
 0x104   : > { %4106 = dma.hbm_to_vmem [thread:$0]  (!%p5082_p6), %s6006_s8, 32, %s581_s16, [#allocation12], %s6071_s12, %s6071_s12, %s6036_s2  }
 0x105   : > { %p4674_p1 = scmp.ne.s32.totalorder %s6008_s10, %s4673_s25  ;;  %p4680_p0 = scmp.lt.u32.totalorder %s4673_s25, %s6008_s10 }
 0x107   : > { %p4676_p3 = pnand %p4674_p1, %p5096_p8 }
 0x109   : > { %p4677_p13 = pneg %p4676_p3 }
 0x10b   : > { %p4682_p2 = pnand %p4680_p0, %p4677_p13 }
 0x10d   : > { %4685 = shalt.err (!%p4682_p2)
}
 0x10e   : > { %s4686_s16 = scalar_lea.vmem %s5269_s21, 1024  ;;  %p4694_p10 = scmp.lt.s32.totalorder %s5269_s21, %s5269_s21 }
 0x10f   : > { %p4687_p5 = scmp.ne.s32.totalorder %s5269_s21, %s4686_s16  ;;  %p4695_p11 = scmp.lt.s32.totalorder %s4686_s16, %s4686_s16 }
 0x111   : > { %p4689_p7 = pnand %p4687_p5, %p5096_p8  ;;  %p4696_p12 = por %p4695_p11, %p4694_p10 }
 0x113   : > { %p4690_p9 = pneg %p4689_p7 }
 0x115   : > { %p4697_p4 = pnand %p4696_p12, %p4690_p9 }
 0x117   : > { %4700 = shalt.err (!%p4697_p4)
}
 0x118   : > { %4112 = dma.hbm_to_vmem [thread:$0]  (!%p5082_p6), %s6008_s10, 1024, %s5269_s21, [#allocation15], %s4923_s5, %s4923_s5, %s4924_s29  }
 0x119   : > { %s4927_s18 = smov [#allocation19]   ;;  %s4928_s25 = smov [#allocation22]  }
 0x11a   : > { %s635_s19 = sshll.u32 %s4927_s18, 4  ;;  %s661_s3 = sshll.u32 %s4928_s25, 4  ;;  %s636_s19 = int_to_ptr.vmem [resolvable:$true] %s635_s19  ;;  %s5318_s3 = int_to_ptr.vmem [resolvable:$true] %s661_s3 }
 0x11b   : > { %s4701_s28 = scalar_lea.hbm %s6011_s13, 32 }
 0x11c   : > { %p4702_p1 = scmp.ne.s32.totalorder %s6011_s13, %s4701_s28  ;;  %p4708_p0 = scmp.lt.u32.totalorder %s4701_s28, %s6011_s13 }
 0x11e   : > { %p4704_p3 = pnand %p4702_p1, %p5096_p8 }
 0x120   : > { %p4705_p13 = pneg %p4704_p3 }
 0x122   : > { %p4710_p2 = pnand %p4708_p0, %p4705_p13 }
 0x124   : > { %4713 = shalt.err (!%p4710_p2)
}
 0x125   : > { %s4714_s29 = scalar_lea.vmem %s636_s19, 32  ;;  %p4722_p10 = scmp.lt.s32.totalorder %s636_s19, %s636_s19 }
 0x126   : > { %p4715_p5 = scmp.ne.s32.totalorder %s636_s19, %s4714_s29  ;;  %p4723_p11 = scmp.lt.s32.totalorder %s4714_s29, %s4714_s29 }
 0x128   : > { %p4717_p7 = pnand %p4715_p5, %p5096_p8  ;;  %p4724_p12 = por %p4723_p11, %p4722_p10 }
 0x12a   : > { %p4718_p9 = pneg %p4717_p7 }
 0x12c   : > { %p4725_p4 = pnand %p4724_p12, %p4718_p9 }
 0x12e   : > { %4728 = shalt.err (!%p4725_p4)
}
 0x12f   : > { %s6072_s2 = smov 1   ;;  %s4729_s0 = scalar_lea.hbm %s6013_s15, 32 }
 0x130   : > { %4118 = dma.hbm_to_vmem [thread:$0]  (!%p5082_p6), %s6011_s13, 32, %s636_s19, [#allocation18], %s6071_s12, %s6071_s12, %s6072_s2  }
 0x131   : > { %p4730_p1 = scmp.ne.s32.totalorder %s6013_s15, %s4729_s0  ;;  %p4736_p0 = scmp.lt.u32.totalorder %s4729_s0, %s6013_s15 }
 0x133   : > { %p4732_p3 = pnand %p4730_p1, %p5096_p8 }
 0x135   : > { %p4733_p13 = pneg %p4732_p3 }
 0x137   : > { %p4738_p2 = pnand %p4736_p0, %p4733_p13 }
 0x139   : > { %4741 = shalt.err (!%p4738_p2)
}
 0x13a   : > { %s4742_s19 = scalar_lea.vmem %s5318_s3, 32  ;;  %p4750_p10 = scmp.lt.s32.totalorder %s5318_s3, %s5318_s3 }
 0x13b   : > { %p4743_p5 = scmp.ne.s32.totalorder %s5318_s3, %s4742_s19  ;;  %p4751_p11 = scmp.lt.s32.totalorder %s4742_s19, %s4742_s19 }
 0x13d   : > { %p4745_p7 = pnand %p4743_p5, %p5096_p8  ;;  %p4752_p12 = por %p4751_p11, %p4750_p10 }
 0x13f   : > { %p4746_p9 = pneg %p4745_p7 }
 0x141   : > { %p4753_p4 = pnand %p4752_p12, %p4746_p9 }
 0x143   : > { %4756 = shalt.err (!%p4753_p4)
}
 0x144   : > { %4124 = dma.hbm_to_vmem [thread:$0]  (!%p5082_p6), %s6013_s15, 32, %s5318_s3, [#allocation21], %s6071_s12, %s6071_s12, %s6072_s2  }
 0x145   : > { %s4929_s21 = smov [#allocation23]   ;;  %s4757_s0 = scalar_lea.hbm %s6015_s17, 16 }
 0x146   : > { %s678_s20 = sshll.u32 %s4929_s21, 4  ;;  %p4758_p1 = scmp.ne.s32.totalorder %s6015_s17, %s4757_s0  ;;  %s679_s20 = int_to_ptr.vmem [resolvable:$true] %s678_s20 }
 0x147   : > { %p4764_p0 = scmp.lt.u32.totalorder %s4757_s0, %s6015_s17 }
 0x148   : > { %p4760_p3 = pnand %p4758_p1, %p5096_p8 }
 0x14a   : > { %p4761_p13 = pneg %p4760_p3 }
 0x14c   : > { %p4766_p2 = pnand %p4764_p0, %p4761_p13 }
 0x14e   : > { %4769 = shalt.err (!%p4766_p2)
}
 0x14f   : > { %s4770_s12 = scalar_lea.vmem %s679_s20, 16  ;;  %s4777_s3 = scalar_lea.vmem %s679_s20, 32 }
 0x150   : > { %p4771_p5 = scmp.ne.s32.totalorder %s679_s20, %s4770_s12  ;;  %p4778_p10 = scmp.lt.s32.totalorder %s679_s20, %s679_s20 }
 0x151   : > { %p4779_p11 = scmp.lt.s32.totalorder %s4777_s3, %s4770_s12 }
 0x152   : > { %p4773_p7 = pnand %p4771_p5, %p5096_p8 }
 0x153   : > { %p4780_p12 = por %p4779_p11, %p4778_p10 }
 0x154   : > { %p4774_p9 = pneg %p4773_p7 }
 0x156   : > { %p4781_p4 = pnand %p4780_p12, %p4774_p9 }
 0x158   : > { %4784 = shalt.err (!%p4781_p4)
}
 0x159   : > { %s6073_s27 = sld [smem:[#allocation35_spill]]  ;;  %s6074_s5 = sld [smem:[#allocation36_spill]] }
 0x15a   : > { %4127 = dma.hbm_to_vmem [thread:$0]  (!%p5082_p6), %s6015_s17, 16, %s679_s20, [#allocation24]  }
 0x15b   : > { %s3569_s29 = sadd.s32 4294967294, %s4909_s24   ;;  %s5387_s4 = sadd.s32 1, %s4909_s24  }
 0x15c   : > { %s76_s21 = sadd.s32 1, %s4905_s23  ;;  %s73_s18 = ssub.s32 %s4909_s24, %s5387_s4 }
 0x15d   : > { %p83_p8 = scmp.ne.s32.totalorder %s4905_s23, %s4901_s22  ;;  %p74_p1 = scmp.eq.s32.totalorder %s73_s18, 0 }
 0x15e   : > { %p84_p3 = scmp.eq.s32.totalorder %s4909_s24, 0  ;;  %p497_p9 = scmp.eq.s32.totalorder %s3569_s29, 1 }
 0x15f   : > { %p89_p13 = scmp.ne.s32.totalorder %s4901_s22, %s6073_s27  ;;  %p491_p0 = scmp.eq.s32.totalorder %s6074_s5, 1 }
 0x160   : > { %s5399_s25 = scalar_select %p74_p1, %s4905_s23, %s76_s21  }
 0x161   : > { %p85_p2 = por %p84_p3, %p83_p8  ;;  %p6075_p5 = scmp.eq.s32.totalorder %s6074_s5, 0 }
 0x162   : > { %p5407_p6 = por %p491_p0, %p83_p8  ;;  %p4149_p10 = scmp.lt.s32.totalorder %s4909_s24, 2 }
 0x163   : > { %p5403_p7 = por %p6075_p5, %p89_p13  ;;  %s703_s30 = sand.u32 1, %s4905_s23  }
 0x164   : > { %s6077_s20 = scalar_select %p5407_p6, 1, 0 }
 0x165   : > { %p5413_p11 = por %p497_p9, %p89_p13  ;;  %s3585_s16 = sshll.u32 %s703_s30, 1 }
 0x166   : > { %s3586_s1 = sshll.u32 %s4909_s24, 5  ;;  %s6079_s2 = sld [smem:[#allocation39_spill]] }
 0x167   : > { %s6078_s28 = scalar_select %p5413_p11, 1, 0 }
 0x168   : > { %s707_s27 = scalar_lea.vmem [#allocation2], %s3585_s16  ;;  %p5423_p12 = pnand %p4149_p10, %p85_p2 }
 0x169   : > { %s714_s5 = sshll.u32 %s707_s27, 4  ;;  %s704_s21 = scalar_lea.sflag [#allocation3], %s703_s30  ;;  %s5427_s5 = int_to_ptr.vmem [resolvable:$true] %s714_s5 }
 0x16a   : > { %p4787_p8 = pneg %p5423_p12 }
 0x16c   : > { %s5421_s19 = scalar_lea.hbm %s6079_s2, %s3586_s1  ;;  %s4790_s12 = scalar_lea.hbm %s6079_s2, 64 }
 0x16d   : > { %s4785_s18 = scalar_lea.hbm %s5421_s19, 32  ;;  %p4791_p13 = scmp.lt.u32.totalorder %s5421_s19, %s6079_s2 }
 0x16e   : > { %p4786_p4 = scmp.ne.s32.totalorder %s5421_s19, %s4785_s18  ;;  %p4792_p0 = scmp.lt.u32.totalorder %s4790_s12, %s4785_s18 }
 0x16f   : > { %p4794_p5 = scmp.lt.u32.totalorder %s4785_s18, %s5421_s19 }
 0x170   : > { %p4788_p1 = pnand %p4787_p8, %p4786_p4  ;;  %p4793_p2 = por %p4792_p0, %p4791_p13 }
 0x172   : > { %p4789_p3 = pneg %p4788_p1  ;;  %p4795_p9 = por %p4794_p5, %p4793_p2 }
 0x174   : > { %p4796_p10 = pnand %p4795_p9, %p4789_p3 }
 0x176   : > { %4799 = shalt.err (!%p4796_p10)
}
 0x177   : > { %s4800_s30 = scalar_lea.vmem %s5427_s5, 32  ;;  %s4930_s1 = smov [#allocation2]  }
 0x178   : > { %p4801_p4 = scmp.ne.s32.totalorder %s5427_s5, %s4800_s30  ;;  %s4805_s16 = sshll.u32 %s4930_s1, 4  ;;  %s4806_s16 = int_to_ptr.vmem [resolvable:$false] %s4805_s16 }
 0x179   : > { %s4807_s3 = scalar_lea.vmem %s4806_s16, 64  ;;  %p4808_p6 = scmp.lt.s32.totalorder %s5427_s5, %s4806_s16 }
 0x17a   : > { %p4803_p1 = pnand %p4801_p4, %p4787_p8  ;;  %p4809_p13 = scmp.lt.s32.totalorder %s4807_s3, %s4800_s30 }
 0x17c   : > { %p4804_p11 = pneg %p4803_p1  ;;  %p4810_p0 = por %p4809_p13, %p4808_p6 }
 0x17e   : > { %p4811_p2 = pnand %p4810_p0, %p4804_p11 }
 0x180   : > { %4814 = shalt.err (!%p4811_p2)
}
 0x181   : > { %4131 = dma.hbm_to_vmem [thread:$0]  (!%p5423_p12), %s5421_s19, 32, %s5427_s5, %s704_s21  }
 0x182   : > { %s6081_s18 = sld [smem:[#allocation37_spill]] }
 0x188   : > { %p6082_p3 = scmp.ne.s32.totalorder %s6081_s18, 0 }
 0x189   : > { %s5457_s12 = sand.u32 (!%p6082_p3), 1, %s4901_s22  }
 0x18a   : > { %723 = sbr.rel (%p6082_p3) target bundleno = 6855 (0x1ac7), region = 100  ;;  %s6039_s27 = sshll.u32 (!%p6082_p3), %s5457_s12, 1 }
 0x18b   : > { %s726_s30 = scalar_lea.sflag (!%p6082_p3), [#allocation3], %s5457_s12  ;;  %s5463_s1 = scalar_lea.vmem (!%p6082_p3), [#allocation2], %s6039_s27 }
 0x191   : > { %4860 = dma.done.wait (%p5403_p7), %s726_s30, 32  }
 0x192   : > { %4862 = vsyncadd (%p5403_p7), %s726_s30, 4294967264  ;;  %s6083_s19 = sld [smem:[#allocation36_spill]] }
 0x198   : > { %p6084_p6 = scmp.eq.s32.totalorder %s6083_s19, 0 }
 0x19a   : > { %4864 = dma.done.wait (%p6084_p6), [#allocation6], 32   ;;  %p6085_p11 = pmov %p6084_p6 }
 0x19b   : > { %p6086_p12 = pmov %p6084_p6 }
 0x19c   : > { %4866 = vsyncadd (%p6085_p11), [#allocation6], 4294967264 }
 0x19d   : > { %4868 = dma.done.wait (%p6086_p12), [#allocation9], 1088   ;;  %p6087_p8 = pmov %p6084_p6 }
 0x19e   : > { %p6088_p5 = pmov %p6084_p6 }
 0x19f   : > { %4870 = vsyncadd (%p6087_p8), [#allocation9], 4294966208 }
 0x1a0   : > { %4872 = dma.done.wait (%p6088_p5), [#allocation12], 64   ;;  %p6089_p9 = pmov %p6088_p5 }
 0x1a1   : > { %p6090_p7 = pmov %p6088_p5 }
 0x1a2   : > { %4874 = vsyncadd (%p6089_p9), [#allocation12], 4294967232 }
 0x1a3   : > { %4876 = dma.done.wait (%p6090_p7), [#allocation15], 1056   ;;  %p6091_p10 = pmov %p6088_p5 }
 0x1a4   : > { %p6092_p4 = pmov %p6088_p5 }
 0x1a5   : > { %4878 = vsyncadd (%p6091_p10), [#allocation15], 4294966240 }
 0x1a6   : > { %4880 = dma.done.wait (%p6092_p4), [#allocation18], 64   ;;  %p6093_p1 = pmov %p6092_p4 }
 0x1a8   : > { %4882 = vsyncadd (%p6093_p1), [#allocation18], 4294967232  ;;  %p6094_p13 = pmov %p6093_p1 }
 0x1a9   : > { %p6095_p0 = pmov %p6093_p1 }
 0x1aa   : > { %4884 = dma.done.wait (%p6094_p13), [#allocation21], 64  }
 0x1ab   : > { %4886 = vsyncadd (%p6095_p0), [#allocation21], 4294967232  ;;  %p6096_p2 = pmov %p6095_p0 }
 0x1ac   : > { %p6097_p3 = pmov %p6095_p0 }
 0x1ad   : > { %4888 = dma.done.wait (%p6096_p2), [#allocation24], 16  }
 0x1ae   : > { %4890 = vsyncadd (%p6097_p3), [#allocation24], 4294967280  ;;  %p843_p6 = scmp.lt.s32.totalorder %s6083_s19, 1  ;;  %s6098_s16 = sld [smem:[#allocation38_spill]]  ;;  %vm856_vm0 = vcmask 523264   ;;  %v4931_v22 = vmov 0   ;;  %v942_v54 = vlaneseq }
 0x1af   : > { %1030 = vmatprep.mubr.bf16.mxu0 %v4931_v22  ;;  %v3605_v35 = vld [vmem:[#allocation5] ss:$0 sm:$0xff]  ;;  %v3606_v39 = vld [vmem:[#allocation7] ss:$0 sm:$0xff]  ;;  %v4932_v56 = vmov 0.0   ;;  %vm4933_vm1 = vmmov 0  }
 0x1b0   : > { %s844_s0 = scalar_select %p843_p6, %s6083_s19, 1  ;;  %v943_v55 = vshrl.u32 %v942_v54, 7  ;;  %3824 = vmatprep.subr.bf16.mxu1 %v4932_v56  ;;  %v940_v58 = vld [vmem:[#allocation8] sm:$0x3]  ;;  %3826 = vmatprep.mubr.msk.bf16.mxu1 %vm4933_vm1, %v4932_v56  ;;  %vm1062_vm2 = vcmask 261120   ;;  %vm1110_vm3 = vcmask 130048  }
 0x1b1   : > { %s6043_s6 = smov 64   ;;  %s4935_s7 = smov 32   ;;  %vm3179_vm4 = vcmask 1040384  }
 0x1b2   : > { %s3737_s5 = sshll.u32 %s844_s0, 5  ;;  %s6099_s0 = sld [smem:[#allocation42_spill]]  ;;  %v5551_v57 = vsub.s32 0, %v943_v55  ;;  %v5553_v59 = vsub.s32 1, %v943_v55 }
 0x1b3   : > { %s6041_s2 = smov 96   ;;  %s6104_s18 = sld [smem:[#allocation48_spill]] }
 0x1b4   : > { %s5502_s3 = scalar_lea.vmem %s6098_s16, %s3737_s5  ;;  %v945_v60 = vrot.slane %v940_v58, %v5551_v57  ;;  %v949_v62 = vrot.slane %v940_v58, %v5553_v59  ;;  %s6103_s5 = sld [smem:[#allocation47_spill]] }
 0x1b5   : > { %v849_v0 = vld [vmem:[%s5502_s3] sm:$0xff]  ;;  %v850_v1 = vld [vmem:[%s5502_s3 + $0x8] sm:$0xff]  ;;  %v851_v23 = vld [vmem:[%s5502_s3 + $0x10] sm:$0xff]  ;;  %s3734_s30 = sshll.u32 %s6083_s19, 5  ;;  %s6106_s29 = sshll.u32 %s5457_s12, 1 }
 0x1b6   : > { %v857_v2 = vsel %vm856_vm0, %v849_v0, 0.0  ;;  %v860_v3 = vsel %vm856_vm0, %v850_v1, 0.0  ;;  %v852_v24 = vld [vmem:[%s5502_s3 + $0x18] sm:$0xff]  ;;  %v863_v25 = vsel %vm856_vm0, %v851_v23, 0.0  ;;  %s6100_s3 = sld [smem:[#allocation46_spill]]  ;;  %s3350_s19 = scalar_lea.sflag [#allocation4], %s5457_s12 }
 0x1b7   : > { %858 = vadd.xlane.f32.xlu0 %v857_v2  ;;  %v866_v26 = vsel %vm856_vm0, %v852_v24, 0.0  ;;  %p6108_p12 = scmp.ne.s32.totalorder %s6077_s20, 0  ;;  %s4937_s27 = smov [#allocation25]  }
 0x1b8   : > { %v4241_v14 = vld [vmem:[%s6099_s0 + $0x4] ss:$8 sps:$4 sm:$0xff]   ;;  %v4243_v15 = vld [vmem:[%s6099_s0] ss:$8 sps:$4 sm:$0xff]   ;;  %v4244_v16 = vld [vmem:[%s6099_s0 + $0x14] ss:$8 sps:$4 sm:$0xff]  }
 0x1b9   : > { %998 = vmatprep.subr.bf16.mxu0 %v4241_v14  ;;  %v4246_v17 = vld [vmem:[%s6099_s0 + $0x10] ss:$8 sps:$4 sm:$0xff]   ;;  %v4247_v18 = vld [vmem:[%s6099_s0 + $0x24] ss:$8 sps:$4 sm:$0xff]   ;;  %v4249_v19 = vld [vmem:[%s6099_s0 + $0x20] ss:$8 sps:$4 sm:$0xff]  }
 0x1ba   : > { %999 = vmatpush1.bf16.msra.mxu0 %v4243_v15  ;;  %v4250_v20 = vld [vmem:[%s6099_s0 + $0x34] ss:$8 sps:$4 sm:$0xff]   ;;  %v4252_v21 = vld [vmem:[%s6099_s0 + $0x30] ss:$8 sps:$4 sm:$0xff]  }
 0x1bb   : > { %861 = vadd.xlane.f32.xlu0 %v860_v3  ;;  %1000 = vmatprep.subr.bf16.mxu0 %v4244_v16 }
 0x1be   : > { %1001 = vmatpush1.bf16.msra.mxu0 %v4246_v17 }
 0x1bf   : > { %1002 = vmatprep.subr.bf16.mxu0 %v4247_v18 }
 0x1c2   : > { %1003 = vmatpush1.bf16.msra.mxu0 %v4249_v19 }
 0x1c3   : > { %1004 = vmatprep.subr.bf16.mxu0 %v4250_v20 }
 0x1c6   : > { %1005 = vmatpush1.bf16.msra.mxu0 %v4252_v21 }
 0x1c7   : > { %3842 = vmatprep.subr.bf16.mxu0 %v4932_v56 }
 0x244   : > { %v859_v4 = vpop.xlane.xlu0 %858 }
 0x245   : > { %v870_v5 = vmul.f32 0.015625, %v859_v4 }
 0x247   : > { %v874_v6 = vsub.f32 %v849_v0, %v870_v5 }
 0x248   : > { %v862_v7 = vpop.xlane.xlu0 %861 }
 0x249   : > { %v871_v8 = vmul.f32 0.015625, %v862_v7  ;;  %v878_v9 = vmul.f32 %v874_v6, %v874_v6 }
 0x24b   : > { %v875_v10 = vsub.f32 %v850_v1, %v871_v8  ;;  %v882_v11 = vsel %vm856_vm0, %v878_v9, 0.0 }
 0x24c   : > { %883 = vadd.xlane.f32.xlu1 %v882_v11 }
 0x24d   : > { %v879_v12 = vmul.f32 %v875_v10, %v875_v10 }
 0x24f   : > { %v885_v13 = vsel %vm856_vm0, %v879_v12, 0.0 }
 0x250   : > { %886 = vadd.xlane.f32.xlu1 %v885_v13 }
 0x254   : > { %864 = vadd.xlane.f32.xlu1 %v863_v25 }
 0x258   : > { %867 = vadd.xlane.f32.xlu1 %v866_v26 }
 0x2d9   : > { %v884_v27 = vpop.xlane.xlu1 %883 }
 0x2da   : > { %v894_v28 = vmul.f32 0.015625, %v884_v27 }
 0x2dc   : > { %v898_v29 = vadd.f32 1e-12, %v894_v28 }
 0x2dd   : > { %v887_v30 = vpop.xlane.xlu1 %886 }
 0x2de   : > { %4305 = vrsqrt.f32 %v898_v29  ;;  %v895_v31 = vmul.f32 0.015625, %v887_v30 }
 0x2e0   : > { %v899_v32 = vadd.f32 1e-12, %v895_v31 }
 0x2e1   : > { %v865_v44 = vpop.xlane.xlu1 %864 }
 0x2e2   : > { %4307 = vrsqrt.f32 %v899_v32  ;;  %v872_v45 = vmul.f32 0.015625, %v865_v44 }
 0x2e4   : > { %v876_v47 = vsub.f32 %v851_v23, %v872_v45 }
 0x2e5   : > { %v868_v46 = vpop.xlane.xlu1 %867 }
 0x2e6   : > { %v873_v48 = vmul.f32 0.015625, %v868_v46  ;;  %v880_v50 = vmul.f32 %v876_v47, %v876_v47 }
 0x2e8   : > { %v4306_v33 = vpop.eup %4305  ;;  %v877_v49 = vsub.f32 %v852_v24, %v873_v48  ;;  %v888_v51 = vsel %vm856_vm0, %v880_v50, 0.0 }
 0x2e9   : > { %v906_v34 = vmul.f32 %v4306_v33, %v874_v6  ;;  %889 = vadd.xlane.f32.xlu1 %v888_v51 }
 0x2ea   : > { %v881_v52 = vmul.f32 %v877_v49, %v877_v49 }
 0x2eb   : > { %v916_v38 = vmul.f32 %v3605_v35, %v906_v34 }
 0x2ec   : > { %v4308_v36 = vpop.eup %4307  ;;  %v891_v53 = vsel %vm856_vm0, %v881_v52, 0.0 }
 0x2ed   : > { %v907_v37 = vmul.f32 %v4308_v36, %v875_v10  ;;  %v5539_v41 = vadd.f32 %v3606_v39, %v916_v38  ;;  %892 = vadd.xlane.f32.xlu1 %v891_v53  ;;  %v5585_v36 = vld [vmem:[%s5463_s1] sm:$0x3]  ;;  %s6105_s1 = sld [smem:[#allocation49_spill]] }
 0x2ef   : > { %v917_v40 = vmul.f32 %v3605_v35, %v907_v37  ;;  %v5589_v37 = vrot.slane %v5585_v36, %v5551_v57 }
 0x2f1   : > { %v5541_v42 = vadd.f32 %v3606_v39, %v917_v40 }
 0x2f3   : > { %v930_v43 = vpack.c.bf16 %v5541_v42, %v5539_v41 }
 0x2f5   : > { %3615 = vmatmul.mubr.msk.bf16.vlgmr.msra.gmra.mrb[0].mxu0 %vm856_vm0, %v930_v43 }
 0x2f6   : > { %1040 = vmatprep.mubr.bf16.mxu0 %v4931_v22 }
 0x376   : > { %v890_v8 = vpop.xlane.xlu1 %889 }
 0x377   : > { %v896_v9 = vmul.f32 0.015625, %v890_v8 }
 0x379   : > { %v900_v10 = vadd.f32 1e-12, %v896_v9 }
 0x37a   : > { %v893_v11 = vpop.xlane.xlu1 %892 }
 0x37b   : > { %4309 = vrsqrt.f32 %v900_v10  ;;  %v897_v12 = vmul.f32 0.015625, %v893_v11 }
 0x37d   : > { %v901_v13 = vadd.f32 1e-12, %v897_v12 }
 0x37f   : > { %4311 = vrsqrt.f32 %v901_v13 }
 0x385   : > { %v4310_v14 = vpop.eup %4309 }
 0x386   : > { %v908_v15 = vmul.f32 %v4310_v14, %v876_v47 }
 0x388   : > { %v918_v16 = vmul.f32 %v3605_v35, %v908_v15 }
 0x389   : > { %v4312_v17 = vpop.eup %4311 }
 0x38a   : > { %v909_v18 = vmul.f32 %v4312_v17, %v877_v49  ;;  %v5565_v20 = vadd.f32 %v3606_v39, %v918_v16 }
 0x38c   : > { %v919_v19 = vmul.f32 %v3605_v35, %v909_v18 }
 0x38e   : > { %v5567_v21 = vadd.f32 %v3606_v39, %v919_v19 }
 0x390   : > { %v931_v23 = vpack.c.bf16 %v5567_v21, %v5565_v20 }
 0x392   : > { %3616 = vmatmul.mubr.msk.bf16.gmra.mrb[4].mxu0 %vm856_vm0, %v931_v23 }
 0x393   : > { %3844 = vmatprep.mubr.msk.bf16.mxu0 %vm4933_vm1, %v4932_v56 }
 0x3c8   : > { %v1032_v61 = vpop.f32.mrb[0].mxu0 }
 0x3c9   : > { %v1034_v63 = vpop.f32.mrb[1].mxu0  ;;  %v1033_v1 = vadd.f32 %v1032_v61, %v945_v60 }
 0x3ca   : > { %v1036_v0 = vpop.f32.mrb[2].mxu0  ;;  %v1035_v4 = vadd.f32 %v1034_v63, %v949_v62 }
 0x3cb   : > { %v1037_v2 = vadd.f32 %v1036_v0, %v945_v60  ;;  %v1038_v3 = vpop.f32.mrb[3].mxu0 }
 0x3cc   : > { %v1039_v5 = vadd.f32 %v1038_v3, %v949_v62 }
 0x3cd   : > { %v5559_v6 = vpack.c.bf16 %v1037_v2, %v1033_v1 }
 0x3ce   : > { %v5561_v7 = vpack.c.bf16 %v1039_v5, %v1035_v4 }
 0x3cf   : > { %1060 = vrot.lane.b32.xlu0 %v5559_v6, %s6043_s6 }
 0x441   : > { %v1061_v24 = vpop.permute.xlu0 %1060 }
 0x442   : > { %v1067_v25 = vsel %vm1062_vm2, %v1061_v24, 0 }
 0x443   : > { %3825 = vmatpush3.bf16.xpose.msra.mxu1 %v1067_v25 }
 0x444   : > { %3830 = vmatprep.subr.bf16.mxu1 %v4932_v56 }
 0x44a   : > { %3827 = vmatmul.mubr.msk.bf16.vlgmr.msra.gmra.mrb[0].mxu1 %vm1062_vm2, %v5559_v6 }
 0x44b   : > { %3831 = vmatpush3.bf16.msra.mxu1 %v5561_v7  ;;  %3832 = vmatprep.mubr.msk.bf16.mxu1 %vm4933_vm1, %v4932_v56 }
 0x44c   : > { %3836 = vmatprep.subr.bf16.mxu1 %v4932_v56 }
 0x465   : > { %v1042_v26 = vpop.f32.mrb[4].mxu0 }
 0x466   : > { %v1043_v27 = vadd.f32 %v1042_v26, %v945_v60  ;;  %v1044_v28 = vpop.f32.mrb[5].mxu0 }
 0x467   : > { %v1045_v29 = vadd.f32 %v1044_v28, %v949_v62  ;;  %v1046_v30 = vpop.f32.mrb[6].mxu0 }
 0x468   : > { %v1047_v31 = vadd.f32 %v1046_v30, %v945_v60  ;;  %v1048_v32 = vpop.f32.mrb[7].mxu0 }
 0x469   : > { %v1049_v33 = vadd.f32 %v1048_v32, %v949_v62 }
 0x46a   : > { %v1053_v34 = vpack.c.bf16 %v1047_v31, %v1043_v27  ;;  %v5628_v27 = vrot.slane %v5585_v36, %v5553_v59 }
 0x46b   : > { %v5582_v35 = vpack.c.bf16 %v1049_v33, %v1045_v29 }
 0x51d   : > { %v1103_v38 = vpop.f32.mrb[0].mxu1 }
 0x51e   : > { %v1104_v39 = vadd.f32 %v1103_v38, %v5589_v37  ;;  %v3828_v40 = vpop.f32.mrb[1].mxu1 }
 0x51f   : > { %v1106_v43 = vpop.f32.mrb[2].mxu1 }
 0x520   : > { %v1107_v44 = vadd.f32 %v1106_v43, %v5589_v37  ;;  %v3829_v45 = vpop.f32.mrb[3].mxu1  ;;  %v1111_v46 = vsel %vm1110_vm3, %v1104_v39, -inf }
 0x521   : > { %1112 = vmax.xlane.f32.xlu1 %v1111_v46 }
 0x522   : > { %v1114_v47 = vsel %vm1110_vm3, %v1107_v44, -inf }
 0x525   : > { %1115 = vmax.xlane.f32.xlu1 %v1114_v47 }
 0x536   : > { %1180 = vrot.lane.b32.xlu1 %v5559_v6, %s4935_s7 }
 0x5ae   : > { %v1113_v48 = vpop.xlane.xlu1 %1112 }
 0x5af   : > { %v1117_v49 = vsub.f32 %v1104_v39, %v1113_v48 }
 0x5b1   : > { %v1119_v50 = vmul.f32 1.442695, %v1117_v49 }
 0x5b2   : > { %v1116_v51 = vpop.xlane.xlu1 %1115 }
 0x5b3   : > { %4313 = vpow2.f32 %v1119_v50  ;;  %v1118_v52 = vsub.f32 %v1107_v44, %v1116_v51 }
 0x5b5   : > { %v1121_v53 = vmul.f32 1.442695, %v1118_v52 }
 0x5b6   : > { %v1181_v61 = vpop.permute.xlu1 %1180 }
 0x5b7   : > { %4315 = vpow2.f32 %v1121_v53  ;;  %v1186_v8 = vsel %vm1062_vm2, %v1181_v61, 0 }
 0x5bd   : > { %v4314_v54 = vpop.eup %4313 }
 0x5be   : > { %v1123_v55 = vsel %vm1110_vm3, %v4314_v54, 0.0 }
 0x5bf   : > { %1124 = vadd.xlane.f32.xlu0 %v1123_v55 }
 0x5c1   : > { %v4316_v58 = vpop.eup %4315 }
 0x5c2   : > { %v1126_v60 = vsel %vm1110_vm3, %v4316_v58, 0.0 }
 0x5c3   : > { %1127 = vadd.xlane.f32.xlu1 %v1126_v60 }
 0x5d4   : > { %1178 = vrot.lane.b32.xlu1 %v5559_v6, %s6041_s2 }
 0x5d5   : > { %1433 = vrot.lane.b32.xlu0 %v1053_v34, %s4935_s7 }
 0x5d8   : > { %1315 = vrot.lane.b32.xlu1 %v1053_v34, %s6043_s6  ;;  %s6101_s6 = smov 64  }
 0x5dc   : > { %1431 = vrot.lane.b32.xlu1 %v1053_v34, %s6041_s2 }
 0x64c   : > { %v1125_v62 = vpop.xlane.xlu0 %1124 }
 0x64d   : > { %4317 = vrcp.f32 %v1125_v62 }
 0x650   : > { %v1128_v63 = vpop.xlane.xlu1 %1127  ;;  %v1434_v10 = vpop.permute.xlu0 %1433 }
 0x651   : > { %4319 = vrcp.f32 %v1128_v63  ;;  %v1439_v11 = vsel %vm1062_vm2, %v1434_v10, 0 }
 0x654   : > { %v1179_v5 = vpop.permute.xlu1 %1178 }
 0x657   : > { %v4318_v0 = vpop.eup %4317 }
 0x658   : > { %v1131_v2 = vmul.f32 %v4318_v0, %v4314_v54  ;;  %v1316_v6 = vpop.permute.xlu1 %1315 }
 0x659   : > { %v1321_v9 = vsel %vm1062_vm2, %v1316_v6, 0 }
 0x65b   : > { %v4320_v1 = vpop.eup %4319 }
 0x65c   : > { %v1132_v3 = vmul.f32 %v4320_v1, %v4316_v58  ;;  %v1432_v12 = vpop.permute.xlu1 %1431 }
 0x65e   : > { %v1133_v4 = vpack.c.bf16 %v1132_v3, %v1131_v2 }
 0x660   : > { %3833 = vmatmul.mubr.msk.bf16.vlgmr.msra.gmra.mrb[4].mxu1 %vm1110_vm3, %v1133_v4 }
 0x661   : > { %3837 = vmatpush3.bf16.xpose.msra.mxu1 %v1186_v8  ;;  %3838 = vmatprep.mubr.msk.bf16.mxu1 %vm4933_vm1, %v4932_v56 }
 0x662   : > { %3848 = vmatprep.subr.bf16.mxu1 %v4932_v56 }
 0x668   : > { %3839 = vmatmul.mubr.msk.bf16.vlgmr.msra.gmra.mrb[8].mxu1 %vm1062_vm2, %v1179_v5 }
 0x669   : > { %3849 = vmatpush3.bf16.xpose.msra.mxu1 %v1321_v9  ;;  %3850 = vmatprep.mubr.msk.bf16.mxu1 %vm4933_vm1, %v4932_v56 }
 0x66a   : > { %3860 = vmatprep.subr.bf16.mxu1 %v4932_v56 }
 0x670   : > { %3851 = vmatmul.mubr.msk.bf16.vlgmr.msra.gmra.mrb[12].mxu1 %vm1062_vm2, %v1053_v34 }
 0x671   : > { %3861 = vmatpush3.bf16.xpose.msra.mxu1 %v1439_v11  ;;  %3862 = vmatprep.mubr.msk.bf16.mxu1 %vm4933_vm1, %v4932_v56 }
 0x678   : > { %3863 = vmatmul.mubr.msk.bf16.vlgmr.msra.gmra.mrb[16].mxu1 %vm1062_vm2, %v1432_v12 }
 0x733   : > { %v5619_v13 = vpop.f32.mrb[4].mxu1 }
 0x734   : > { %v3834_v14 = vpop.f32.mrb[5].mxu1 }
 0x735   : > { %v5621_v15 = vpop.f32.mrb[6].mxu1 }
 0x736   : > { %v3835_v16 = vpop.f32.mrb[7].mxu1 }
 0x73b   : > { %v1222_v17 = vpop.f32.mrb[8].mxu1 }
 0x73c   : > { %v1223_v18 = vadd.f32 %v1222_v17, %v5589_v37  ;;  %v3840_v19 = vpop.f32.mrb[9].mxu1 }
 0x73d   : > { %v1225_v23 = vpop.f32.mrb[10].mxu1 }
 0x73e   : > { %v1226_v24 = vadd.f32 %v1225_v23, %v5589_v37  ;;  %v3841_v25 = vpop.f32.mrb[11].mxu1  ;;  %v1229_v26 = vsel %vm1110_vm3, %v1223_v18, -inf }
 0x73f   : > { %1230 = vmax.xlane.f32.xlu1 %v1229_v26 }
 0x740   : > { %v1232_v28 = vsel %vm1110_vm3, %v1226_v24, -inf }
 0x741   : > { %1233 = vmax.xlane.f32.xlu0 %v1232_v28 }
 0x743   : > { %v1357_v29 = vpop.f32.mrb[12].mxu1 }
 0x744   : > { %v1358_v30 = vadd.f32 %v1357_v29, %v5628_v27  ;;  %v3852_v31 = vpop.f32.mrb[13].mxu1 }
 0x745   : > { %v1360_v32 = vpop.f32.mrb[14].mxu1 }
 0x746   : > { %v1361_v33 = vadd.f32 %v1360_v32, %v5628_v27  ;;  %v3853_v34 = vpop.f32.mrb[15].mxu1  ;;  %v1364_v38 = vsel %vm1110_vm3, %v1358_v30, -inf }
 0x747   : > { %1365 = vmax.xlane.f32.xlu1 %v1364_v38 }
 0x748   : > { %v1367_v39 = vsel %vm1110_vm3, %v1361_v33, -inf }
 0x74b   : > { %1368 = vmax.xlane.f32.xlu1 %v1367_v39  ;;  %v1475_v40 = vpop.f32.mrb[16].mxu1 }
 0x74c   : > { %v1476_v36 = vadd.f32 %v1475_v40, %v5628_v27  ;;  %v3864_v43 = vpop.f32.mrb[17].mxu1 }
 0x74d   : > { %v1478_v44 = vpop.f32.mrb[18].mxu1 }
 0x74e   : > { %v1479_v45 = vadd.f32 %v1478_v44, %v5628_v27  ;;  %v3865_v46 = vpop.f32.mrb[19].mxu1  ;;  %v1482_v47 = vsel %vm1110_vm3, %v1476_v36, -inf }
 0x74f   : > { %1483 = vmax.xlane.f32.xlu1 %v1482_v47 }
 0x750   : > { %v1485_v48 = vsel %vm1110_vm3, %v1479_v45, -inf }
 0x753   : > { %1486 = vmax.xlane.f32.xlu1 %v1485_v48 }
 0x7cc   : > { %v1231_v49 = vpop.xlane.xlu1 %1230 }
 0x7cd   : > { %v1235_v50 = vsub.f32 %v1223_v18, %v1231_v49 }
 0x7ce   : > { %v1234_v51 = vpop.xlane.xlu0 %1233 }
 0x7cf   : > { %v1237_v52 = vmul.f32 1.442695, %v1235_v50  ;;  %v1236_v53 = vsub.f32 %v1226_v24, %v1234_v51  ;;  %v4253_v50 = vld [vmem:[#allocation10] sm:$0xff]   ;;  %v4254_v51 = vld [vmem:[#allocation10 + $0x8] sm:$0xff]  }
 0x7d0   : > { %3872 = vmatprep.subr.bf16.mxu1 %v4253_v50 }
 0x7d1   : > { %4321 = vpow2.f32 %v1237_v52  ;;  %v1239_v54 = vmul.f32 1.442695, %v1236_v53  ;;  %3873 = vmatpush3.bf16.msra.mxu1 %v4253_v50  ;;  %v4255_v52 = vld [vmem:[#allocation10 + $0x10] sm:$0xff]  }
 0x7d2   : > { %3874 = vmatprep.subr.bf16.mxu1 %v4254_v51 }
 0x7d3   : > { %4323 = vpow2.f32 %v1239_v54 }
 0x7d4   : > { %v1366_v55 = vpop.xlane.xlu1 %1365 }
 0x7d5   : > { %v1370_v58 = vsub.f32 %v1358_v30, %v1366_v55  ;;  %3875 = vmatpush3.bf16.msra.mxu1 %v4254_v51 }
 0x7d6   : > { %3876 = vmatprep.subr.bf16.mxu1 %v4255_v52 }
 0x7d7   : > { %v1372_v60 = vmul.f32 1.442695, %v1370_v58 }
 0x7d8   : > { %v1369_v61 = vpop.xlane.xlu1 %1368 }
 0x7d9   : > { %4325 = vpow2.f32 %v1372_v60  ;;  %v1371_v62 = vsub.f32 %v1361_v33, %v1369_v61  ;;  %3877 = vmatpush3.bf16.msra.mxu1 %v4255_v52 }
 0x7db   : > { %v4322_v63 = vpop.eup %4321  ;;  %v1374_v0 = vmul.f32 1.442695, %v1371_v62  ;;  %v4256_v62 = vld [vmem:[#allocation10 + $0x18] sm:$0xff]  }
 0x7dc   : > { %v1484_v1 = vpop.xlane.xlu1 %1483  ;;  %v1241_v2 = vsel %vm1110_vm3, %v4322_v63, 0.0  ;;  %3878 = vmatprep.subr.bf16.mxu1 %v4256_v62 }
 0x7dd   : > { %v4324_v3 = vpop.eup %4323  ;;  %4327 = vpow2.f32 %v1374_v0  ;;  %v1488_v4 = vsub.f32 %v1476_v36, %v1484_v1  ;;  %1242 = vadd.xlane.f32.xlu0 %v1241_v2  ;;  %3879 = vmatpush3.bf16.msra.mxu1 %v4256_v62  ;;  %v4257_v62 = vld [vmem:[#allocation16] sm:$0xff]  }
 0x7de   : > { %v1244_v5 = vsel %vm1110_vm3, %v4324_v3, 0.0 }
 0x7df   : > { %v1490_v8 = vmul.f32 1.442695, %v1488_v4  ;;  %1245 = vadd.xlane.f32.xlu1 %v1244_v5 }
 0x7e0   : > { %v1487_v6 = vpop.xlane.xlu1 %1486 }
 0x7e1   : > { %4329 = vpow2.f32 %v1490_v8  ;;  %v1489_v9 = vsub.f32 %v1479_v45, %v1487_v6 }
 0x7e3   : > { %v4326_v10 = vpop.eup %4325  ;;  %v1492_v11 = vmul.f32 1.442695, %v1489_v9 }
 0x7e4   : > { %v1376_v12 = vsel %vm1110_vm3, %v4326_v10, 0.0 }
 0x7e5   : > { %4331 = vpow2.f32 %v1492_v11  ;;  %1377 = vadd.xlane.f32.xlu0 %v1376_v12 }
 0x7e7   : > { %v4328_v14 = vpop.eup %4327 }
 0x7e8   : > { %v1379_v16 = vsel %vm1110_vm3, %v4328_v14, 0.0 }
 0x7e9   : > { %1380 = vadd.xlane.f32.xlu1 %v1379_v16 }
 0x7eb   : > { %v4330_v17 = vpop.eup %4329 }
 0x7ec   : > { %v1494_v18 = vsel %vm1110_vm3, %v4330_v17, 0.0 }
 0x7ed   : > { %1495 = vadd.xlane.f32.xlu0 %v1494_v18 }
 0x7ef   : > { %v4332_v19 = vpop.eup %4331 }
 0x7f0   : > { %v1497_v23 = vsel %vm1110_vm3, %v4332_v19, 0.0 }
 0x7f1   : > { %1498 = vadd.xlane.f32.xlu1 %v1497_v23 }
 0x802   : > { %1506 = vrot.lane.b32.xlu1 %v5582_v35, %s6041_s2 }
 0x803   : > { %1253 = vrot.lane.b32.xlu0 %v5561_v7, %s6041_s2  ;;  %s6102_s2 = smov 96  }
 0x86a   : > { %v1243_v25 = vpop.xlane.xlu0 %1242 }
 0x86c   : > { %v1246_v24 = vpop.xlane.xlu1 %1245 }
 0x86d   : > { %4333 = vrcp.f32 %v1246_v24 }
 0x86e   : > { %4335 = vrcp.f32 %v1243_v25  ;;  %v3625_v25 = vld [vmem:[#allocation11] ss:$0 sm:$0xff] }
 0x872   : > { %v1378_v26 = vpop.xlane.xlu0 %1377 }
 0x876   : > { %v1381_v28 = vpop.xlane.xlu1 %1380 }
 0x877   : > { %4337 = vrcp.f32 %v1381_v28  ;;  %v4334_v29 = vpop.eup %4333 }
 0x878   : > { %4339 = vrcp.f32 %v1378_v26  ;;  %v4336_v31 = vpop.eup %4335  ;;  %v1250_v32 = vmul.f32 %v4334_v29, %v4324_v3 }
 0x879   : > { %v1249_v33 = vmul.f32 %v4336_v31, %v4322_v63 }
 0x87a   : > { %v1496_v30 = vpop.xlane.xlu0 %1495 }
 0x87b   : > { %v1251_v39 = vpack.c.bf16 %v1250_v32, %v1249_v33 }
 0x87e   : > { %v1254_v34 = vpop.permute.xlu0 %1253  ;;  %v1499_v38 = vpop.xlane.xlu1 %1498 }
 0x87f   : > { %4341 = vrcp.f32 %v1499_v38  ;;  %3843 = vmatpush3.bf16.msra.mxu0 %v1254_v34 }
 0x880   : > { %3854 = vmatprep.subr.bf16.mxu0 %v4932_v56  ;;  %4343 = vrcp.f32 %v1496_v30 }
 0x881   : > { %v4338_v7 = vpop.eup %4337 }
 0x882   : > { %3845 = vmatmul.mubr.msk.bf16.vlgmr.msra.gmra.mrb[8].mxu0 %vm1110_vm3, %v1251_v39  ;;  %v4340_v40 = vpop.eup %4339  ;;  %v1385_v36 = vmul.f32 %v4338_v7, %v4328_v14  ;;  %v1507_v46 = vpop.permute.xlu1 %1506 }
 0x883   : > { %3855 = vmatpush3.bf16.msra.mxu0 %v5582_v35  ;;  %3856 = vmatprep.mubr.msk.bf16.mxu0 %vm4933_vm1, %v4932_v56  ;;  %v1384_v43 = vmul.f32 %v4340_v40, %v4326_v10 }
 0x884   : > { %3866 = vmatprep.subr.bf16.mxu0 %v4932_v56 }
 0x885   : > { %v1386_v44 = vpack.c.bf16 %v1385_v36, %v1384_v43 }
 0x889   : > { %v4342_v45 = vpop.eup %4341 }
 0x88a   : > { %3857 = vmatmul.mubr.msk.bf16.vlgmr.msra.gmra.mrb[12].mxu0 %vm1110_vm3, %v1386_v44  ;;  %v4344_v47 = vpop.eup %4343  ;;  %v1503_v48 = vmul.f32 %v4342_v45, %v4332_v19 }
 0x88b   : > { %3867 = vmatpush3.bf16.msra.mxu0 %v1507_v46  ;;  %3868 = vmatprep.mubr.msk.bf16.mxu0 %vm4933_vm1, %v4932_v56  ;;  %v1502_v49 = vmul.f32 %v4344_v47, %v4330_v17 }
 0x88c   : > { %3884 = vmatprep.subr.bf16.mxu0 %v4257_v62 }
 0x88d   : > { %v1504_v35 = vpack.c.bf16 %v1503_v48, %v1502_v49 }
 0x892   : > { %3869 = vmatmul.mubr.msk.bf16.vlgmr.msra.gmra.mrb[16].mxu0 %vm1110_vm3, %v1504_v35 }
 0x893   : > { %3885 = vmatpush3.bf16.msra.mxu0 %v4257_v62 }
 0x955   : > { %v1293_v53 = vpop.f32.mrb[8].mxu0 }
 0x956   : > { %v3846_v54 = vpop.f32.mrb[9].mxu0 }
 0x957   : > { %v1296_v55 = vpop.f32.mrb[10].mxu0 }
 0x958   : > { %v4221_v58 = vpack.i.bf16 %v1296_v55, %v1293_v53  ;;  %v3847_v60 = vpop.f32.mrb[11].mxu0 }
 0x95a   : > { %4222 = vrot.lane.b32.xlu1 %v4221_v58, %s4935_s7 }
 0x95d   : > { %v1424_v61 = vpop.f32.mrb[12].mxu0 }
 0x95e   : > { %v3858_v63 = vpop.f32.mrb[13].mxu0 }
 0x95f   : > { %v1427_v0 = vpop.f32.mrb[14].mxu0  ;;  %v4258_v63 = vld [vmem:[#allocation16 + $0x8] sm:$0xff]  }
 0x960   : > { %v3859_v1 = vpop.f32.mrb[15].mxu0  ;;  %3886 = vmatprep.subr.bf16.mxu0 %v4258_v63 }
 0x961   : > { %3887 = vmatpush3.bf16.msra.mxu0 %v4258_v63  ;;  %v4260_v1 = vld [vmem:[#allocation16 + $0x18] sm:$0xff]  }
 0x965   : > { %v1546_v2 = vpop.f32.mrb[16].mxu0 }
 0x966   : > { %v3870_v3 = vpop.f32.mrb[17].mxu0 }
 0x967   : > { %v1549_v4 = vpop.f32.mrb[18].mxu0 }
 0x968   : > { %v4226_v5 = vpack.i.bf16 %v1549_v4, %v1546_v2  ;;  %v3871_v8 = vpop.f32.mrb[19].mxu0 }
 0x96a   : > { %4227 = vrot.lane.b32.xlu0 %v4226_v5, %s4935_s7 }
 0x9cc   : > { %v4223_v6 = vpop.permute.xlu1 %4222 }
 0x9cd   : > { %v4225_v9 = vunpack.i.h.bf16 %v4223_v6  ;;  %v4224_v10 = vunpack.i.l.bf16 %v4223_v6 }
 0x9cf   : > { %v1309_v11 = vsel %vm1062_vm2, %v5621_v15, %v4225_v9  ;;  %v1308_v12 = vsel %vm1062_vm2, %v5619_v13, %v4224_v10 }
 0x9d0   : > { %v1563_v14 = vpack.c.bf16 %v1309_v11, %v1308_v12 }
 0x9d2   : > { %3880 = vmatprep.mubr.msk.bf16.mxu1 %vm856_vm0, %v1563_v14 }
 0x9dc   : > { %v4228_v16 = vpop.permute.xlu0 %4227 }
 0x9dd   : > { %v4230_v17 = vunpack.i.h.bf16 %v4228_v16  ;;  %v4229_v18 = vunpack.i.l.bf16 %v4228_v16 }
 0x9df   : > { %v1562_v19 = vsel %vm1062_vm2, %v1427_v0, %v4230_v17  ;;  %v1561_v23 = vsel %vm1062_vm2, %v1424_v61, %v4229_v18  ;;  %v4259_v0 = vld [vmem:[#allocation16 + $0x10] sm:$0xff]   ;;  %v3632_v18 = vld [vmem:[#allocation13] ss:$0 sm:$0xff] }
 0x9e0   : > { %v1564_v24 = vpack.c.bf16 %v1562_v19, %v1561_v23  ;;  %3888 = vmatprep.subr.bf16.mxu0 %v4259_v0 }
 0x9e1   : > { %3889 = vmatpush3.bf16.msra.mxu0 %v4259_v0 }
 0x9e2   : > { %3881 = vmatmul.mubr.msk.bf16.vlgmr.msra.gmra.mrb[20].mxu1 %vm856_vm0, %v1564_v24  ;;  %3890 = vmatprep.subr.bf16.mxu0 %v4260_v1 }
 0x9e5   : > { %3891 = vmatpush3.bf16.msra.mxu0 %v4260_v1 }
 0xab5   : > { %v3882_v26 = vpop.f32.mrb[20].mxu1 }
 0xab6   : > { %v1644_v28 = vpop.f32.mrb[21].mxu1  ;;  %v1653_v31 = vadd.f32 %v3882_v26, %v3625_v25  ;;  %v3633_v26 = vld [vmem:[#allocation14] ss:$0 sm:$0xff] }
 0xab7   : > { %v1645_v15 = vadd.f32 %v3625_v25, %v1644_v28  ;;  %v3883_v29 = vpop.f32.mrb[22].mxu1 }
 0xab8   : > { %v1656_v30 = vadd.f32 %v3883_v29, %v3625_v25  ;;  %v1647_v13 = vpop.f32.mrb[23].mxu1  ;;  %v1661_v40 = vadd.f32 %v1653_v31, %v5565_v20 }
 0xab9   : > { %v1648_v32 = vadd.f32 %v3625_v25, %v1647_v13  ;;  %v1659_v33 = vadd.f32 %v1645_v15, %v5539_v41 }
 0xaba   : > { %v1662_v39 = vadd.f32 %v1656_v30, %v5567_v21  ;;  %v1671_v43 = vsel %vm856_vm0, %v1661_v40, 0.0 }
 0xabb   : > { %v1665_v34 = vsel %vm856_vm0, %v1659_v33, 0.0  ;;  %v1660_v38 = vadd.f32 %v1648_v32, %v5541_v42 }
 0xabc   : > { %1666 = vadd.xlane.f32.xlu1 %v1665_v34  ;;  %v1674_v36 = vsel %vm856_vm0, %v1662_v39, 0.0 }
 0xabd   : > { %v1668_v7 = vsel %vm856_vm0, %v1660_v38, 0.0 }
 0xabe   : > { %1669 = vadd.xlane.f32.xlu0 %v1668_v7 }
 0xac0   : > { %1675 = vadd.xlane.f32.xlu1 %v1674_v36  ;;  %v4261_v36 = vld [vmem:[%s6100_s3] sm:$0xff]  }
 0xac1   : > { %3896 = vmatprep.subr.bf16.mxu1 %v4261_v36 }
 0xac2   : > { %1672 = vadd.xlane.f32.xlu0 %v1671_v43  ;;  %3897 = vmatpush3.bf16.msra.mxu1 %v4261_v36  ;;  %v4262_v43 = vld [vmem:[%s6100_s3 + $0x8] sm:$0xff]  }
 0xac3   : > { %3898 = vmatprep.subr.bf16.mxu1 %v4262_v43 }
 0xac6   : > { %3899 = vmatpush3.bf16.msra.mxu1 %v4262_v43  ;;  %v3641_v43 = vld [vmem:[#allocation19] ss:$0 sm:$0xff] }
 0xb49   : > { %v1667_v44 = vpop.xlane.xlu1 %1666 }
 0xb4a   : > { %v1677_v41 = vmul.f32 0.015625, %v1667_v44  ;;  %v4263_v44 = vld [vmem:[%s6100_s3 + $0x10] sm:$0xff]  }
 0xb4b   : > { %v1670_v45 = vpop.xlane.xlu0 %1669  ;;  %3900 = vmatprep.subr.bf16.mxu1 %v4263_v44 }
 0xb4c   : > { %v1681_v46 = vsub.f32 %v1659_v33, %v1677_v41  ;;  %v1678_v47 = vmul.f32 0.015625, %v1670_v45  ;;  %3901 = vmatpush3.bf16.msra.mxu1 %v4263_v44  ;;  %v4264_v41 = vld [vmem:[%s6100_s3 + $0x18] sm:$0xff]   ;;  %v4265_v45 = vld [vmem:[%s6100_s3 + $0x20] sm:$0xff]  }
 0xb4d   : > { %v1676_v42 = vpop.xlane.xlu1 %1675  ;;  %3902 = vmatprep.subr.bf16.mxu1 %v4264_v41 }
 0xb4e   : > { %v1682_v48 = vsub.f32 %v1660_v38, %v1678_v47  ;;  %v1680_v21 = vmul.f32 0.015625, %v1676_v42  ;;  %v1685_v49 = vmul.f32 %v1681_v46, %v1681_v46  ;;  %v4267_v47 = vld [vmem:[%s6100_s3 + $0x30] sm:$0xff]   ;;  %v4268_v42 = vld [vmem:[%s6100_s3 + $0x38] sm:$0xff]  }
 0xb4f   : > { %v1673_v35 = vpop.xlane.xlu0 %1672 }
 0xb50   : > { %v1684_v50 = vsub.f32 %v1662_v39, %v1680_v21  ;;  %v1679_v51 = vmul.f32 0.015625, %v1673_v35  ;;  %v1689_v20 = vsel %vm856_vm0, %v1685_v49, 0.0  ;;  %v1686_v52 = vmul.f32 %v1682_v48, %v1682_v48  ;;  %3903 = vmatpush3.bf16.msra.mxu1 %v4264_v41 }
 0xb51   : > { %1690 = vadd.xlane.f32.xlu0 %v1689_v20  ;;  %3904 = vmatprep.subr.bf16.mxu1 %v4265_v45 }
 0xb52   : > { %v1683_v53 = vsub.f32 %v1661_v40, %v1679_v51  ;;  %v1692_v54 = vsel %vm856_vm0, %v1686_v52, 0.0  ;;  %v1688_v55 = vmul.f32 %v1684_v50, %v1684_v50 }
 0xb53   : > { %1693 = vadd.xlane.f32.xlu1 %v1692_v54 }
 0xb54   : > { %v1687_v58 = vmul.f32 %v1683_v53, %v1683_v53  ;;  %v1698_v61 = vsel %vm856_vm0, %v1688_v55, 0.0  ;;  %3905 = vmatpush3.bf16.msra.mxu1 %v4265_v45 }
 0xb56   : > { %v1695_v60 = vsel %vm856_vm0, %v1687_v58, 0.0 }
 0xb57   : > { %1696 = vadd.xlane.f32.xlu0 %v1695_v60  ;;  %1699 = vadd.xlane.f32.xlu1 %v1698_v61 }
 0xbde   : > { %v1691_v2 = vpop.xlane.xlu0 %1690 }
 0xbdf   : > { %v1701_v3 = vmul.f32 0.015625, %v1691_v2 }
 0xbe0   : > { %v1694_v4 = vpop.xlane.xlu1 %1693 }
 0xbe1   : > { %v1705_v5 = vadd.f32 1e-12, %v1701_v3  ;;  %v1702_v8 = vmul.f32 0.015625, %v1694_v4 }
 0xbe3   : > { %4345 = vrsqrt.f32 %v1705_v5  ;;  %v1706_v6 = vadd.f32 1e-12, %v1702_v8 }
 0xbe4   : > { %v1697_v9 = vpop.xlane.xlu0 %1696  ;;  %v1700_v10 = vpop.xlane.xlu1 %1699 }
 0xbe5   : > { %4347 = vrsqrt.f32 %v1706_v6  ;;  %v1703_v11 = vmul.f32 0.015625, %v1697_v9  ;;  %v1704_v12 = vmul.f32 0.015625, %v1700_v10 }
 0xbe7   : > { %v1707_v14 = vadd.f32 1e-12, %v1703_v11  ;;  %v1708_v16 = vadd.f32 1e-12, %v1704_v12 }
 0xbe9   : > { %4349 = vrsqrt.f32 %v1707_v14 }
 0xbea   : > { %4351 = vrsqrt.f32 %v1708_v16 }
 0xbed   : > { %v4346_v17 = vpop.eup %4345 }
 0xbee   : > { %v1713_v19 = vmul.f32 %v4346_v17, %v1681_v46  ;;  %v4266_v46 = vld [vmem:[%s6100_s3 + $0x28] sm:$0xff]  }
 0xbef   : > { %v4348_v23 = vpop.eup %4347  ;;  %3906 = vmatprep.subr.bf16.mxu1 %v4266_v46 }
 0xbf0   : > { %v1714_v24 = vmul.f32 %v4348_v23, %v1682_v48  ;;  %v1723_v25 = vmul.f32 %v3632_v18, %v1713_v19  ;;  %3907 = vmatpush3.bf16.msra.mxu1 %v4266_v46  ;;  %v3634_v48 = vld [vmem:[#allocation17] ss:$0 sm:$0xff] }
 0xbf1   : > { %3908 = vmatprep.subr.bf16.mxu1 %v4267_v47 }
 0xbf2   : > { %v1724_v28 = vmul.f32 %v3632_v18, %v1714_v24  ;;  %v5681_v13 = vadd.f32 %v3633_v26, %v1723_v25 }
 0xbf3   : > { %v4350_v15 = vpop.eup %4349 }
 0xbf4   : > { %v4352_v29 = vpop.eup %4351  ;;  %v1715_v30 = vmul.f32 %v4350_v15, %v1683_v53  ;;  %v5683_v31 = vadd.f32 %v3633_v26, %v1724_v28  ;;  %3909 = vmatpush3.bf16.msra.mxu1 %v4267_v47 }
 0xbf5   : > { %v1716_v32 = vmul.f32 %v4352_v29, %v1684_v50  ;;  %3910 = vmatprep.subr.bf16.mxu1 %v4268_v42 }
 0xbf6   : > { %v1725_v33 = vmul.f32 %v3632_v18, %v1715_v30  ;;  %v1737_v34 = vpack.c.bf16 %v5683_v31, %v5681_v13 }
 0xbf7   : > { %v1726_v38 = vmul.f32 %v3632_v18, %v1716_v32 }
 0xbf8   : > { %3892 = vmatprep.mubr.msk.bf16.mxu0 %vm856_vm0, %v1737_v34  ;;  %v5688_v39 = vadd.f32 %v3633_v26, %v1725_v33  ;;  %3911 = vmatpush3.bf16.msra.mxu1 %v4268_v42 }
 0xbf9   : > { %v5690_v7 = vadd.f32 %v3633_v26, %v1726_v38  ;;  %3922 = vmatprep.subr.bf16.mxu1 %v4932_v56 }
 0xbfb   : > { %v1738_v40 = vpack.c.bf16 %v5690_v7, %v5688_v39 }
 0xbfd   : > { %3893 = vmatmul.mubr.msk.bf16.vlgmr.msra.gmra.mrb[20].mxu0 %vm856_vm0, %v1738_v40 }
 0xbfe   : > { %2171 = vmatprep.mubr.bf16.mxu0 %v4931_v22 }
 0xcd0   : > { %v3894_v21 = vpop.f32.mrb[20].mxu0 }
 0xcd1   : > { %v1827_v49 = vadd.f32 %v3894_v21, %v3634_v48  ;;  %v1818_v35 = vpop.f32.mrb[21].mxu0 }
 0xcd2   : > { %v1819_v50 = vadd.f32 %v3634_v48, %v1818_v35  ;;  %v3895_v51 = vpop.f32.mrb[22].mxu0 }
 0xcd3   : > { %v1835_v20 = vmul.f32 %v1827_v49, %v1827_v49  ;;  %v1830_v52 = vadd.f32 %v3895_v51, %v3634_v48  ;;  %v1821_v53 = vpop.f32.mrb[23].mxu0 }
 0xcd4   : > { %v1833_v54 = vmul.f32 %v1819_v50, %v1819_v50  ;;  %v1822_v55 = vadd.f32 %v3634_v48, %v1821_v53 }
 0xcd5   : > { %v1839_v58 = vmul.f32 %v1835_v20, %v1827_v49  ;;  %v1836_v60 = vmul.f32 %v1830_v52, %v1830_v52 }
 0xcd6   : > { %v1837_v61 = vmul.f32 %v1833_v54, %v1819_v50  ;;  %v1834_v62 = vmul.f32 %v1822_v55, %v1822_v55 }
 0xcd7   : > { %v1843_v63 = vmul.f32 0.044715, %v1839_v58  ;;  %v1840_v0 = vmul.f32 %v1836_v60, %v1830_v52 }
 0xcd8   : > { %v1841_v1 = vmul.f32 0.044715, %v1837_v61  ;;  %v1838_v2 = vmul.f32 %v1834_v62, %v1822_v55 }
 0xcd9   : > { %v1847_v3 = vadd.f32 %v1843_v63, %v1827_v49  ;;  %v1844_v4 = vmul.f32 0.044715, %v1840_v0 }
 0xcda   : > { %v1845_v5 = vadd.f32 %v1841_v1, %v1819_v50  ;;  %v1842_v8 = vmul.f32 0.044715, %v1838_v2 }
 0xcdb   : > { %v1851_v6 = vmul.f32 0.7978846, %v1847_v3  ;;  %v1848_v9 = vadd.f32 %v1844_v4, %v1830_v52 }
 0xcdc   : > { %v1849_v10 = vmul.f32 0.7978846, %v1845_v5  ;;  %v1846_v11 = vadd.f32 %v1842_v8, %v1822_v55 }
 0xcdd   : > { %4353 = vtanh.f32 %v1851_v6  ;;  %v1852_v12 = vmul.f32 0.7978846, %v1848_v9 }
 0xcde   : > { %4355 = vtanh.f32 %v1849_v10  ;;  %v1850_v14 = vmul.f32 0.7978846, %v1846_v11  ;;  %v4271_v11 = vld [vmem:[%s6099_s0 + $0x44] ss:$8 sps:$4 sm:$0xff]  }
 0xcdf   : > { %4357 = vtanh.f32 %v1852_v12  ;;  %v4269_v12 = vld [vmem:[%s6099_s0 + $0x40] ss:$8 sps:$4 sm:$0xff]   ;;  %2139 = vmatprep.subr.bf16.mxu0 %v4271_v11 }
 0xce0   : > { %4359 = vtanh.f32 %v1850_v14  ;;  %2140 = vmatpush1.bf16.msra.mxu0 %v4269_v12  ;;  %v4274_v14 = vld [vmem:[%s6099_s0 + $0x54] ss:$8 sps:$4 sm:$0xff]  }
 0xce1   : > { %2141 = vmatprep.subr.bf16.mxu0 %v4274_v14 }
 0xce7   : > { %v4354_v16 = vpop.eup %4353 }
 0xce8   : > { %v4356_v17 = vpop.eup %4355  ;;  %v1859_v18 = vadd.f32 1.0, %v4354_v16  ;;  %v4272_v16 = vld [vmem:[%s6099_s0 + $0x50] ss:$8 sps:$4 sm:$0xff]  }
 0xce9   : > { %v4358_v19 = vpop.eup %4357  ;;  %v1857_v23 = vadd.f32 1.0, %v4356_v17  ;;  %2142 = vmatpush1.bf16.msra.mxu0 %v4272_v16  ;;  %v4277_v17 = vld [vmem:[%s6099_s0 + $0x64] ss:$8 sps:$4 sm:$0xff]  }
 0xcea   : > { %v4360_v24 = vpop.eup %4359  ;;  %v1863_v25 = vmul.f32 0.5, %v1859_v18  ;;  %v1860_v26 = vadd.f32 1.0, %v4358_v19  ;;  %v4275_v18 = vld [vmem:[%s6099_s0 + $0x60] ss:$8 sps:$4 sm:$0xff]   ;;  %2143 = vmatprep.subr.bf16.mxu0 %v4277_v17  ;;  %v4280_v19 = vld [vmem:[%s6099_s0 + $0x74] ss:$8 sps:$4 sm:$0xff]  }
 0xceb   : > { %v1858_v28 = vadd.f32 1.0, %v4360_v24  ;;  %v1861_v15 = vmul.f32 0.5, %v1857_v23  ;;  %v4278_v23 = vld [vmem:[%s6099_s0 + $0x70] ss:$8 sps:$4 sm:$0xff]   ;;  %s6107_s0 = sld [smem:[#allocation50_spill]] }
 0xcec   : > { %v1864_v29 = vmul.f32 0.5, %v1860_v26  ;;  %v1867_v32 = vmul.f32 %v1863_v25, %v1827_v49 }
 0xced   : > { %v1862_v30 = vmul.f32 0.5, %v1858_v28  ;;  %v1865_v34 = vmul.f32 %v1861_v15, %v1819_v50  ;;  %2144 = vmatpush1.bf16.msra.mxu0 %v4275_v18 }
 0xcee   : > { %v1868_v33 = vmul.f32 %v1864_v29, %v1830_v52  ;;  %2145 = vmatprep.subr.bf16.mxu0 %v4280_v19 }
 0xcef   : > { %v1866_v38 = vmul.f32 %v1862_v30, %v1822_v55 }
 0xcf0   : > { %v1870_v40 = vpack.c.bf16 %v1868_v33, %v1867_v32 }
 0xcf1   : > { %v1869_v36 = vpack.c.bf16 %v1866_v38, %v1865_v34  ;;  %2146 = vmatpush1.bf16.msra.mxu0 %v4278_v23 }
 0xcf2   : > { %3916 = vmatprep.subr.bf16.mxu0 %v4932_v56 }
 0xcf3   : > { %3912 = vmatprep.mubr.bf16.mxu1 %v1869_v36 }
 0xcf4   : > { %3913 = vmatmul.mubr.bf16.vlgmr.msra.gmra.mrb[24].mxu1 %v1870_v40 }
 0xcf5   : > { %3924 = vmatprep.mubr.msk.bf16.mxu1 %vm4933_vm1, %v4932_v56 }
 0xdc7   : > { %v3914_v44 = vpop.f32.mrb[24].mxu1 }
 0xdc8   : > { %v1976_v41 = vpop.f32.mrb[25].mxu1  ;;  %v1985_v45 = vadd.f32 %v3914_v44, %v3641_v43 }
 0xdc9   : > { %v1977_v46 = vadd.f32 %v3641_v43, %v1976_v41  ;;  %v3915_v47 = vpop.f32.mrb[26].mxu1 }
 0xdca   : > { %v1979_v42 = vpop.f32.mrb[27].mxu1  ;;  %v1988_v48 = vadd.f32 %v3915_v47, %v3641_v43  ;;  %v1993_v51 = vadd.f32 %v1985_v45, %v5688_v39 }
 0xdcb   : > { %v1980_v21 = vadd.f32 %v3641_v43, %v1979_v42  ;;  %v1991_v49 = vadd.f32 %v1977_v46, %v5681_v13  ;;  %v3650_v43 = vld [vmem:[#allocation20] ss:$0 sm:$0xff]  ;;  %v3651_v42 = vld [vmem:[#allocation22] ss:$0 sm:$0xff] }
 0xdcc   : > { %v1994_v52 = vadd.f32 %v1988_v48, %v5690_v7  ;;  %v2003_v53 = vsel %vm856_vm0, %v1993_v51, 0.0 }
 0xdcd   : > { %v1997_v35 = vsel %vm856_vm0, %v1991_v49, 0.0  ;;  %v1992_v50 = vadd.f32 %v1980_v21, %v5683_v31 }
 0xdce   : > { %1998 = vadd.xlane.f32.xlu0 %v1997_v35  ;;  %v2006_v54 = vsel %vm856_vm0, %v1994_v52, 0.0 }
 0xdcf   : > { %v2000_v20 = vsel %vm856_vm0, %v1992_v50, 0.0 }
 0xdd0   : > { %2001 = vadd.xlane.f32.xlu1 %v2000_v20 }
 0xdd2   : > { %2004 = vadd.xlane.f32.xlu0 %v2003_v53 }
 0xdd4   : > { %2007 = vadd.xlane.f32.xlu1 %v2006_v54 }
 0xe5b   : > { %v1999_v55 = vpop.xlane.xlu0 %1998 }
 0xe5c   : > { %v2009_v13 = vmul.f32 0.015625, %v1999_v55 }
 0xe5d   : > { %v2002_v58 = vpop.xlane.xlu1 %2001 }
 0xe5e   : > { %v2013_v60 = vsub.f32 %v1991_v49, %v2009_v13  ;;  %v2010_v61 = vmul.f32 0.015625, %v2002_v58  ;;  %v2081_v58 = vld [vmem:[#allocation8 + $0x2] sm:$0x3] }
 0xe5f   : > { %v2005_v31 = vpop.xlane.xlu0 %2004 }
 0xe60   : > { %v2014_v62 = vsub.f32 %v1992_v50, %v2010_v61  ;;  %v2011_v39 = vmul.f32 0.015625, %v2005_v31  ;;  %v2017_v63 = vmul.f32 %v2013_v60, %v2013_v60  ;;  %v2090_v31 = vrot.slane %v2081_v58, %v5553_v59 }
 0xe61   : > { %v2008_v0 = vpop.xlane.xlu1 %2007 }
 0xe62   : > { %v2015_v1 = vsub.f32 %v1993_v51, %v2011_v39  ;;  %v2012_v2 = vmul.f32 0.015625, %v2008_v0  ;;  %v2021_v7 = vsel %vm856_vm0, %v2017_v63, 0.0  ;;  %v2018_v3 = vmul.f32 %v2014_v62, %v2014_v62 }
 0xe63   : > { %2022 = vadd.xlane.f32.xlu0 %v2021_v7 }
 0xe64   : > { %v2016_v4 = vsub.f32 %v1994_v52, %v2012_v2  ;;  %v2024_v5 = vsel %vm856_vm0, %v2018_v3, 0.0  ;;  %v2019_v8 = vmul.f32 %v2015_v1, %v2015_v1 }
 0xe65   : > { %2025 = vadd.xlane.f32.xlu1 %v2024_v5 }
 0xe66   : > { %v2027_v6 = vsel %vm856_vm0, %v2019_v8, 0.0  ;;  %v2020_v9 = vmul.f32 %v2016_v4, %v2016_v4 }
 0xe67   : > { %2028 = vadd.xlane.f32.xlu0 %v2027_v6 }
 0xe68   : > { %v2030_v10 = vsel %vm856_vm0, %v2020_v9, 0.0 }
 0xe69   : > { %2031 = vadd.xlane.f32.xlu1 %v2030_v10 }
 0xef0   : > { %v2023_v24 = vpop.xlane.xlu0 %2022 }
 0xef1   : > { %v2033_v25 = vmul.f32 0.015625, %v2023_v24 }
 0xef2   : > { %v2026_v26 = vpop.xlane.xlu1 %2025 }
 0xef3   : > { %v2037_v28 = vadd.f32 1e-12, %v2033_v25  ;;  %v2034_v15 = vmul.f32 0.015625, %v2026_v26 }
 0xef4   : > { %v2029_v29 = vpop.xlane.xlu0 %2028 }
 0xef5   : > { %4361 = vrsqrt.f32 %v2037_v28  ;;  %v2038_v30 = vadd.f32 1e-12, %v2034_v15  ;;  %v2035_v32 = vmul.f32 0.015625, %v2029_v29 }
 0xef6   : > { %v2032_v33 = vpop.xlane.xlu1 %2031 }
 0xef7   : > { %4363 = vrsqrt.f32 %v2038_v30  ;;  %v2039_v34 = vadd.f32 1e-12, %v2035_v32  ;;  %v2036_v38 = vmul.f32 0.015625, %v2032_v33 }
 0xef9   : > { %4365 = vrsqrt.f32 %v2039_v34  ;;  %v2040_v40 = vadd.f32 1e-12, %v2036_v38 }
 0xefb   : > { %4367 = vrsqrt.f32 %v2040_v40 }
 0xeff   : > { %v4362_v36 = vpop.eup %4361 }
 0xf00   : > { %v2045_v44 = vmul.f32 %v4362_v36, %v2013_v60  ;;  %v2086_v60 = vrot.slane %v2081_v58, %v5551_v57 }
 0xf01   : > { %v4364_v41 = vpop.eup %4363 }
 0xf02   : > { %v2055_v45 = vmul.f32 %v3650_v43, %v2045_v44  ;;  %v2046_v46 = vmul.f32 %v4364_v41, %v2014_v62 }
 0xf03   : > { %v4366_v47 = vpop.eup %4365 }
 0xf04   : > { %v2056_v48 = vmul.f32 %v3650_v43, %v2046_v46  ;;  %v2047_v49 = vmul.f32 %v4366_v47, %v2015_v1  ;;  %v5760_v50 = vadd.f32 %v3651_v42, %v2055_v45 }
 0xf05   : > { %v4368_v21 = vpop.eup %4367 }
 0xf06   : > { %v2048_v35 = vmul.f32 %v4368_v21, %v2016_v4  ;;  %v5762_v51 = vadd.f32 %v3651_v42, %v2056_v48  ;;  %v2057_v53 = vmul.f32 %v3650_v43, %v2047_v49 }
 0xf08   : > { %v2069_v20 = vpack.c.bf16 %v5762_v51, %v5760_v50  ;;  %v2058_v52 = vmul.f32 %v3650_v43, %v2048_v35  ;;  %v5770_v55 = vadd.f32 %v3651_v42, %v2057_v53 }
 0xf0a   : > { %3668 = vmatmul.mubr.msk.bf16.vlgmr.msra.gmra.mrb[24].mxu0 %vm856_vm0, %v2069_v20  ;;  %v5768_v54 = vadd.f32 %v3651_v42, %v2058_v52 }
 0xf0b   : > { %2181 = vmatprep.mubr.bf16.mxu0 %v4931_v22 }
 0xf0c   : > { %v2070_v13 = vpack.c.bf16 %v5768_v54, %v5770_v55 }
 0xf12   : > { %3669 = vmatmul.mubr.msk.bf16.gmra.mrb[28].mxu0 %vm856_vm0, %v2070_v13 }
 0xf13   : > { %3918 = vmatprep.mubr.msk.bf16.mxu0 %vm4933_vm1, %v4932_v56 }
 0xfdd   : > { %v2173_v61 = vpop.f32.mrb[24].mxu0 }
 0xfde   : > { %v2175_v62 = vpop.f32.mrb[25].mxu0  ;;  %v2174_v39 = vadd.f32 %v2173_v61, %v2086_v60 }
 0xfdf   : > { %v2177_v22 = vpop.f32.mrb[26].mxu0  ;;  %v2176_v1 = vadd.f32 %v2175_v62, %v2090_v31 }
 0xfe0   : > { %v2178_v63 = vadd.f32 %v2177_v22, %v2086_v60  ;;  %v2179_v0 = vpop.f32.mrb[27].mxu0 }
 0xfe1   : > { %v2180_v2 = vadd.f32 %v2179_v0, %v2090_v31 }
 0xfe2   : > { %v2192_v7 = vpack.c.bf16 %v2178_v63, %v2174_v39 }
 0xfe3   : > { %v5779_v3 = vpack.c.bf16 %v2180_v2, %v2176_v1 }
 0xfe4   : > { %2315 = vrot.lane.b32.xlu1 %v2192_v7, %s4935_s7  ;;  %2197 = vrot.lane.b32.xlu0 %v2192_v7, %s6101_s6 }
 0xfe5   : > { %v2183_v4 = vpop.f32.mrb[28].mxu0  ;;  %3923 = vmatpush3.bf16.msra.mxu1 %v5779_v3 }
 0xfe6   : > { %v2185_v57 = vpop.f32.mrb[29].mxu0  ;;  %3934 = vmatprep.subr.bf16.mxu1 %v4932_v56  ;;  %v2184_v8 = vadd.f32 %v2183_v4, %v2086_v60 }
 0xfe7   : > { %v2186_v59 = vadd.f32 %v2185_v57, %v2090_v31  ;;  %v2187_v5 = vpop.f32.mrb[30].mxu0 }
 0xfe8   : > { %v2188_v6 = vadd.f32 %v2187_v5, %v2086_v60  ;;  %2313 = vrot.lane.b32.xlu1 %v2192_v7, %s6102_s2  ;;  %v2189_v9 = vpop.f32.mrb[31].mxu0 }
 0xfe9   : > { %v2190_v10 = vadd.f32 %v2189_v9, %v2090_v31 }
 0xfea   : > { %v2194_v11 = vpack.c.bf16 %v2188_v6, %v2184_v8 }
 0xfeb   : > { %v5786_v12 = vpack.c.bf16 %v2190_v10, %v2186_v59 }
 0xfec   : > { %2564 = vrot.lane.b32.xlu1 %v2194_v11, %s4935_s7  ;;  %2446 = vrot.lane.b32.xlu0 %v2194_v11, %s6101_s6  ;;  %s842_s6 = scalar_lea.vmem [#allocation25], %s6106_s29 }
 0xff0   : > { %2562 = vrot.lane.b32.xlu0 %v2194_v11, %s6102_s2 }
0x1056   : > { %v2198_v14 = vpop.permute.xlu0 %2197  ;;  %v2316_v17 = vpop.permute.xlu1 %2315 }
0x1057   : > { %v2203_v16 = vsel %vm1062_vm2, %v2198_v14, 0  ;;  %v2321_v18 = vsel %vm1062_vm2, %v2316_v17, 0 }
0x1058   : > { %3917 = vmatpush3.bf16.xpose.msra.mxu0 %v2203_v16 }
0x1059   : > { %3928 = vmatprep.subr.bf16.mxu0 %v4932_v56 }
0x105a   : > { %v2314_v23 = vpop.permute.xlu1 %2313 }
0x105e   : > { %v2447_v19 = vpop.permute.xlu0 %2446  ;;  %v2565_v25 = vpop.permute.xlu1 %2564 }
0x105f   : > { %3919 = vmatmul.mubr.msk.bf16.vlgmr.msra.gmra.mrb[32].mxu0 %vm1062_vm2, %v2192_v7  ;;  %v2452_v24 = vsel %vm1062_vm2, %v2447_v19, 0  ;;  %v2570_v26 = vsel %vm1062_vm2, %v2565_v25, 0 }
0x1060   : > { %3929 = vmatpush3.bf16.xpose.msra.mxu0 %v2321_v18  ;;  %3930 = vmatprep.mubr.msk.bf16.mxu0 %vm4933_vm1, %v4932_v56 }
0x1061   : > { %3940 = vmatprep.subr.bf16.mxu0 %v4932_v56 }
0x1062   : > { %v2563_v28 = vpop.permute.xlu0 %2562 }
0x1067   : > { %3931 = vmatmul.mubr.msk.bf16.vlgmr.msra.gmra.mrb[36].mxu0 %vm1062_vm2, %v2314_v23 }
0x1068   : > { %3941 = vmatpush3.bf16.xpose.msra.mxu0 %v2452_v24  ;;  %3942 = vmatprep.mubr.msk.bf16.mxu0 %vm4933_vm1, %v4932_v56 }
0x1069   : > { %3952 = vmatprep.subr.bf16.mxu0 %v4932_v56 }
0x106f   : > { %3943 = vmatmul.mubr.msk.bf16.vlgmr.msra.gmra.mrb[40].mxu0 %vm1062_vm2, %v2194_v11 }
0x1070   : > { %3953 = vmatpush3.bf16.xpose.msra.mxu0 %v2570_v26  ;;  %3954 = vmatprep.mubr.msk.bf16.mxu0 %vm4933_vm1, %v4932_v56 }
0x1077   : > { %3955 = vmatmul.mubr.msk.bf16.vlgmr.msra.gmra.mrb[44].mxu0 %vm1062_vm2, %v2563_v28 }
0x1132   : > { %v2239_v15 = vpop.f32.mrb[32].mxu0 }
0x1133   : > { %v2240_v29 = vadd.f32 %v2239_v15, %v5589_v37  ;;  %v3920_v30 = vpop.f32.mrb[33].mxu0 }
0x1134   : > { %v2242_v32 = vpop.f32.mrb[34].mxu0 }
0x1135   : > { %v2243_v33 = vadd.f32 %v2242_v32, %v5589_v37  ;;  %v3921_v34 = vpop.f32.mrb[35].mxu0  ;;  %v2246_v38 = vsel %vm1110_vm3, %v2240_v29, -inf }
0x1136   : > { %2247 = vmax.xlane.f32.xlu1 %v2246_v38 }
0x1137   : > { %v2249_v40 = vsel %vm1110_vm3, %v2243_v33, -inf }
0x1138   : > { %2250 = vmax.xlane.f32.xlu0 %v2249_v40 }
0x113a   : > { %v2357_v36 = vpop.f32.mrb[36].mxu0 }
0x113b   : > { %v2358_v43 = vadd.f32 %v2357_v36, %v5589_v37  ;;  %v3932_v44 = vpop.f32.mrb[37].mxu0 }
0x113c   : > { %v2360_v41 = vpop.f32.mrb[38].mxu0 }
0x113d   : > { %v2361_v45 = vadd.f32 %v2360_v41, %v5589_v37  ;;  %v3933_v46 = vpop.f32.mrb[39].mxu0  ;;  %v2364_v47 = vsel %vm1110_vm3, %v2358_v43, -inf }
0x113e   : > { %2365 = vmax.xlane.f32.xlu0 %v2364_v47 }
0x113f   : > { %v2367_v42 = vsel %vm1110_vm3, %v2361_v45, -inf }
0x1140   : > { %2368 = vmax.xlane.f32.xlu1 %v2367_v42 }
0x1142   : > { %v2488_v48 = vpop.f32.mrb[40].mxu0 }
0x1143   : > { %v2489_v21 = vadd.f32 %v2488_v48, %v5628_v27  ;;  %v3944_v49 = vpop.f32.mrb[41].mxu0 }
0x1144   : > { %v2491_v35 = vpop.f32.mrb[42].mxu0 }
0x1145   : > { %v2492_v20 = vadd.f32 %v2491_v35, %v5628_v27  ;;  %v3945_v52 = vpop.f32.mrb[43].mxu0  ;;  %v2495_v53 = vsel %vm1110_vm3, %v2489_v21, -inf }
0x1146   : > { %2496 = vmax.xlane.f32.xlu0 %v2495_v53 }
0x1147   : > { %v2498_v37 = vsel %vm1110_vm3, %v2492_v20, -inf }
0x1148   : > { %2499 = vmax.xlane.f32.xlu1 %v2498_v37 }
0x114a   : > { %v2606_v13 = vpop.f32.mrb[44].mxu0 }
0x114b   : > { %v2607_v58 = vadd.f32 %v2606_v13, %v5628_v27  ;;  %v3956_v60 = vpop.f32.mrb[45].mxu0 }
0x114c   : > { %v2609_v61 = vpop.f32.mrb[46].mxu0 }
0x114d   : > { %v2610_v31 = vadd.f32 %v2609_v61, %v5628_v27  ;;  %v3957_v62 = vpop.f32.mrb[47].mxu0  ;;  %v2613_v22 = vsel %vm1110_vm3, %v2607_v58, -inf }
0x114e   : > { %2614 = vmax.xlane.f32.xlu0 %v2613_v22 }
0x114f   : > { %v2616_v39 = vsel %vm1110_vm3, %v2610_v31, -inf }
0x1150   : > { %2617 = vmax.xlane.f32.xlu1 %v2616_v39 }
0x11c3   : > { %v2248_v63 = vpop.xlane.xlu1 %2247 }
0x11c4   : > { %v2252_v0 = vsub.f32 %v2240_v29, %v2248_v63 }
0x11c5   : > { %v2251_v1 = vpop.xlane.xlu0 %2250 }
0x11c6   : > { %v2254_v2 = vmul.f32 1.442695, %v2252_v0  ;;  %v2253_v7 = vsub.f32 %v2243_v33, %v2251_v1 }
0x11c8   : > { %4369 = vpow2.f32 %v2254_v2  ;;  %v2256_v4 = vmul.f32 1.442695, %v2253_v7 }
0x11ca   : > { %4371 = vpow2.f32 %v2256_v4 }
0x11cb   : > { %v2366_v57 = vpop.xlane.xlu0 %2365 }
0x11cc   : > { %v2370_v59 = vsub.f32 %v2358_v43, %v2366_v57 }
0x11cd   : > { %v2369_v5 = vpop.xlane.xlu1 %2368 }
0x11ce   : > { %v2372_v8 = vmul.f32 1.442695, %v2370_v59  ;;  %v2371_v27 = vsub.f32 %v2361_v45, %v2369_v5 }
0x11d0   : > { %4373 = vpow2.f32 %v2372_v8  ;;  %v2374_v6 = vmul.f32 1.442695, %v2371_v27 }
0x11d2   : > { %v4370_v9 = vpop.eup %4369  ;;  %4375 = vpow2.f32 %v2374_v6 }
0x11d3   : > { %v2497_v10 = vpop.xlane.xlu0 %2496  ;;  %v2258_v11 = vsel %vm1110_vm3, %v4370_v9, 0.0 }
0x11d4   : > { %v4372_v14 = vpop.eup %4371  ;;  %v2501_v16 = vsub.f32 %v2489_v21, %v2497_v10  ;;  %2259 = vadd.xlane.f32.xlu0 %v2258_v11 }
0x11d5   : > { %v2500_v17 = vpop.xlane.xlu1 %2499  ;;  %v2261_v18 = vsel %vm1110_vm3, %v4372_v14, 0.0 }
0x11d6   : > { %v2503_v19 = vmul.f32 1.442695, %v2501_v16  ;;  %v2502_v23 = vsub.f32 %v2492_v20, %v2500_v17  ;;  %2262 = vadd.xlane.f32.xlu1 %v2261_v18  ;;  %v4282_v16 = vld [vmem:[#allocation10 + $0x28] sm:$0xff]   ;;  %v4283_v17 = vld [vmem:[#allocation10 + $0x30] sm:$0xff]  }
0x11d8   : > { %4377 = vpow2.f32 %v2503_v19  ;;  %v2505_v24 = vmul.f32 1.442695, %v2502_v23 }
0x11da   : > { %v4374_v25 = vpop.eup %4373  ;;  %4379 = vpow2.f32 %v2505_v24 }
0x11db   : > { %v2615_v26 = vpop.xlane.xlu0 %2614  ;;  %v2376_v28 = vsel %vm1110_vm3, %v4374_v25, 0.0 }
0x11dc   : > { %v4376_v15 = vpop.eup %4375  ;;  %v2619_v29 = vsub.f32 %v2607_v58, %v2615_v26  ;;  %2377 = vadd.xlane.f32.xlu0 %v2376_v28  ;;  %v4284_v28 = vld [vmem:[#allocation10 + $0x38] sm:$0xff]  }
0x11dd   : > { %v2618_v30 = vpop.xlane.xlu1 %2617  ;;  %v2379_v32 = vsel %vm1110_vm3, %v4376_v15, 0.0 }
0x11de   : > { %v2621_v33 = vmul.f32 1.442695, %v2619_v29  ;;  %v2620_v34 = vsub.f32 %v2610_v31, %v2618_v30  ;;  %2380 = vadd.xlane.f32.xlu1 %v2379_v32 }
0x11e0   : > { %4381 = vpow2.f32 %v2621_v33  ;;  %v2623_v38 = vmul.f32 1.442695, %v2620_v34 }
0x11e2   : > { %v4378_v40 = vpop.eup %4377  ;;  %4383 = vpow2.f32 %v2623_v38 }
0x11e3   : > { %v2507_v36 = vsel %vm1110_vm3, %v4378_v40, 0.0 }
0x11e4   : > { %v4380_v43 = vpop.eup %4379  ;;  %2508 = vadd.xlane.f32.xlu0 %v2507_v36 }
0x11e5   : > { %v2510_v44 = vsel %vm1110_vm3, %v4380_v43, 0.0 }
0x11e6   : > { %2511 = vadd.xlane.f32.xlu1 %v2510_v44 }
0x11ea   : > { %v4382_v41 = vpop.eup %4381 }
0x11eb   : > { %v2625_v45 = vsel %vm1110_vm3, %v4382_v41, 0.0 }
0x11ec   : > { %v4384_v46 = vpop.eup %4383  ;;  %2626 = vadd.xlane.f32.xlu0 %v2625_v45 }
0x11ed   : > { %v2628_v47 = vsel %vm1110_vm3, %v4384_v46, 0.0 }
0x11ee   : > { %2629 = vadd.xlane.f32.xlu1 %v2628_v47 }
0x11ff   : > { %2637 = vrot.lane.b32.xlu1 %v5786_v12, %s6102_s2 }
0x1202   : > { %2388 = vrot.lane.b32.xlu0 %v5779_v3, %s6102_s2  ;;  %s3363_s2 = sshll.u32 %s842_s6, 4  ;;  %s5956_s2 = int_to_ptr.vmem [resolvable:$true] %s3363_s2 }
0x1203   : > { %s4815_s16 = scalar_lea.vmem %s5956_s2, 32 }
0x1204   : > { %p4816_p11 = scmp.ne.s32.totalorder %s5956_s2, %s4815_s16 }
0x1206   : > { %p4817_p8 = pnand %p4816_p11, %p6108_p12 }
0x1208   : > { %p4818_p5 = pneg %p4817_p8 }
0x1261   : > { %v2260_v42 = vpop.xlane.xlu0 %2259 }
0x1262   : > { %4385 = vrcp.f32 %v2260_v42 }
0x1263   : > { %v2263_v48 = vpop.xlane.xlu1 %2262 }
0x1264   : > { %4387 = vrcp.f32 %v2263_v48 }
0x1269   : > { %v2378_v35 = vpop.xlane.xlu0 %2377 }
0x126b   : > { %v2381_v21 = vpop.xlane.xlu1 %2380 }
0x126c   : > { %v4386_v49 = vpop.eup %4385  ;;  %4389 = vrcp.f32 %v2381_v21 }
0x126d   : > { %v2266_v52 = vmul.f32 %v4386_v49, %v4370_v9  ;;  %4391 = vrcp.f32 %v2378_v35 }
0x126e   : > { %v4388_v20 = vpop.eup %4387 }
0x126f   : > { %v2267_v53 = vmul.f32 %v4388_v20, %v4372_v14  ;;  %v4281_v14 = vld [vmem:[#allocation10 + $0x20] sm:$0xff]  }
0x1270   : > { %3964 = vmatprep.subr.bf16.mxu0 %v4281_v14  ;;  %v3678_v20 = vld [vmem:[#allocation11 + $0x1] ss:$0 sm:$0xff] }
0x1271   : > { %v2268_v37 = vpack.c.bf16 %v2267_v53, %v2266_v52  ;;  %v2509_v3 = vpop.xlane.xlu0 %2508  ;;  %3965 = vmatpush3.bf16.msra.mxu0 %v4281_v14 }
0x1272   : > { %3966 = vmatprep.subr.bf16.mxu0 %v4282_v16 }
0x1273   : > { %v2512_v13 = vpop.xlane.xlu1 %2511  ;;  %3925 = vmatmul.mubr.msk.bf16.vlgmr.msra.gmra.mrb[28].mxu1 %vm1110_vm3, %v2268_v37 }
0x1274   : > { %3936 = vmatprep.mubr.msk.bf16.mxu1 %vm4933_vm1, %v4932_v56  ;;  %4393 = vrcp.f32 %v2512_v13 }
0x1275   : > { %4395 = vrcp.f32 %v2509_v3  ;;  %3967 = vmatpush3.bf16.msra.mxu0 %v4282_v16 }
0x1276   : > { %v4390_v58 = vpop.eup %4389  ;;  %3968 = vmatprep.subr.bf16.mxu0 %v4283_v17 }
0x1277   : > { %v4392_v61 = vpop.eup %4391  ;;  %v2385_v31 = vmul.f32 %v4390_v58, %v4376_v15 }
0x1278   : > { %v2384_v22 = vmul.f32 %v4392_v61, %v4374_v25 }
0x1279   : > { %v2627_v60 = vpop.xlane.xlu0 %2626  ;;  %3969 = vmatpush3.bf16.msra.mxu0 %v4283_v17 }
0x127a   : > { %v2386_v63 = vpack.c.bf16 %v2385_v31, %v2384_v22  ;;  %3970 = vmatprep.subr.bf16.mxu0 %v4284_v28 }
0x127b   : > { %v2630_v62 = vpop.xlane.xlu1 %2629 }
0x127c   : > { %4397 = vrcp.f32 %v2630_v62 }
0x127d   : > { %v2389_v39 = vpop.permute.xlu0 %2388  ;;  %4399 = vrcp.f32 %v2627_v60  ;;  %3971 = vmatpush3.bf16.msra.mxu0 %v4284_v28 }
0x127e   : > { %3935 = vmatpush3.bf16.msra.mxu1 %v2389_v39  ;;  %v4394_v0 = vpop.eup %4393 }
0x127f   : > { %3946 = vmatprep.subr.bf16.mxu1 %v4932_v56  ;;  %v4396_v1 = vpop.eup %4395  ;;  %v2516_v2 = vmul.f32 %v4394_v0, %v4380_v43  ;;  %v2638_v59 = vpop.permute.xlu1 %2637 }
0x1280   : > { %v2515_v7 = vmul.f32 %v4396_v1, %v4378_v40 }
0x1281   : > { %3937 = vmatmul.mubr.msk.bf16.vlgmr.msra.gmra.mrb[32].mxu1 %vm1110_vm3, %v2386_v63 }
0x1282   : > { %3947 = vmatpush3.bf16.msra.mxu1 %v5786_v12  ;;  %3948 = vmatprep.mubr.msk.bf16.mxu1 %vm4933_vm1, %v4932_v56  ;;  %v2517_v4 = vpack.c.bf16 %v2516_v2, %v2515_v7 }
0x1283   : > { %3958 = vmatprep.subr.bf16.mxu1 %v4932_v56 }
0x1286   : > { %v4398_v57 = vpop.eup %4397 }
0x1287   : > { %v4400_v5 = vpop.eup %4399  ;;  %v2634_v8 = vmul.f32 %v4398_v57, %v4384_v46 }
0x1288   : > { %v2633_v27 = vmul.f32 %v4400_v5, %v4382_v41 }
0x1289   : > { %3949 = vmatmul.mubr.msk.bf16.vlgmr.msra.gmra.mrb[36].mxu1 %vm1110_vm3, %v2517_v4 }
0x128a   : > { %3959 = vmatpush3.bf16.msra.mxu1 %v2638_v59  ;;  %3960 = vmatprep.mubr.msk.bf16.mxu1 %vm4933_vm1, %v4932_v56  ;;  %v2635_v12 = vpack.c.bf16 %v2634_v8, %v2633_v27 }
0x1291   : > { %3961 = vmatmul.mubr.msk.bf16.vlgmr.msra.gmra.mrb[40].mxu1 %vm1110_vm3, %v2635_v12 }
0x1346   : > { %v2306_v6 = vpop.f32.mrb[28].mxu1 }
0x1347   : > { %v3926_v9 = vpop.f32.mrb[29].mxu1 }
0x1348   : > { %v2309_v10 = vpop.f32.mrb[30].mxu1 }
0x1349   : > { %v3927_v11 = vpop.f32.mrb[31].mxu1 }
0x1354   : > { %v2428_v18 = vpop.f32.mrb[32].mxu1 }
0x1355   : > { %v3938_v19 = vpop.f32.mrb[33].mxu1 }
0x1356   : > { %v2431_v23 = vpop.f32.mrb[34].mxu1  ;;  %v4285_v19 = vld [vmem:[#allocation16 + $0x20] sm:$0xff]  }
0x1357   : > { %v4231_v24 = vpack.i.bf16 %v2431_v23, %v2428_v18  ;;  %v3939_v25 = vpop.f32.mrb[35].mxu1  ;;  %3976 = vmatprep.subr.bf16.mxu1 %v4285_v19  ;;  %v4286_v23 = vld [vmem:[#allocation16 + $0x28] sm:$0xff]  }
0x1358   : > { %3977 = vmatpush3.bf16.msra.mxu1 %v4285_v19  ;;  %v4288_v25 = vld [vmem:[#allocation16 + $0x38] sm:$0xff]  }
0x1359   : > { %4232 = vrot.lane.b32.xlu1 %v4231_v24, %s4935_s7  ;;  %3978 = vmatprep.subr.bf16.mxu1 %v4286_v23  ;;  %v4287_v24 = vld [vmem:[#allocation16 + $0x30] sm:$0xff]  }
0x135c   : > { %v2555_v26 = vpop.f32.mrb[36].mxu1  ;;  %3979 = vmatpush3.bf16.msra.mxu1 %v4286_v23 }
0x135d   : > { %v3950_v15 = vpop.f32.mrb[37].mxu1  ;;  %3980 = vmatprep.subr.bf16.mxu1 %v4287_v24 }
0x135e   : > { %v2558_v29 = vpop.f32.mrb[38].mxu1 }
0x135f   : > { %v3951_v30 = vpop.f32.mrb[39].mxu1 }
0x1360   : > { %3981 = vmatpush3.bf16.msra.mxu1 %v4287_v24 }
0x1361   : > { %3982 = vmatprep.subr.bf16.mxu1 %v4288_v25 }
0x1364   : > { %v2677_v32 = vpop.f32.mrb[40].mxu1  ;;  %3983 = vmatpush3.bf16.msra.mxu1 %v4288_v25 }
0x1365   : > { %v3962_v33 = vpop.f32.mrb[41].mxu1  ;;  %4008 = vmatprep.subr.bf16.mxu1 %v4932_v56 }
0x1366   : > { %v2680_v34 = vpop.f32.mrb[42].mxu1 }
0x1367   : > { %v4236_v38 = vpack.i.bf16 %v2680_v34, %v2677_v32  ;;  %v3963_v40 = vpop.f32.mrb[43].mxu1 }
0x1369   : > { %4237 = vrot.lane.b32.xlu0 %v4236_v38, %s4935_s7 }
0x13cb   : > { %v4233_v36 = vpop.permute.xlu1 %4232 }
0x13cc   : > { %v4235_v43 = vunpack.i.h.bf16 %v4233_v36  ;;  %v4234_v44 = vunpack.i.l.bf16 %v4233_v36 }
0x13ce   : > { %v2444_v41 = vsel %vm1062_vm2, %v2309_v10, %v4235_v43  ;;  %v2443_v45 = vsel %vm1062_vm2, %v2306_v6, %v4234_v44 }
0x13cf   : > { %v2694_v46 = vpack.c.bf16 %v2444_v41, %v2443_v45  ;;  %v3685_v41 = vld [vmem:[#allocation13 + $0x1] ss:$0 sm:$0xff] }
0x13d1   : > { %3972 = vmatprep.mubr.msk.bf16.mxu0 %vm856_vm0, %v2694_v46 }
0x13db   : > { %v4238_v47 = vpop.permute.xlu0 %4237 }
0x13dc   : > { %v4240_v42 = vunpack.i.h.bf16 %v4238_v47  ;;  %v4239_v48 = vunpack.i.l.bf16 %v4238_v47 }
0x13de   : > { %v2693_v21 = vsel %vm1062_vm2, %v2558_v29, %v4240_v42  ;;  %v2692_v49 = vsel %vm1062_vm2, %v2555_v26, %v4239_v48  ;;  %v3686_v48 = vld [vmem:[#allocation14 + $0x1] ss:$0 sm:$0xff] }
0x13df   : > { %v2695_v35 = vpack.c.bf16 %v2693_v21, %v2692_v49 }
0x13e1   : > { %3973 = vmatmul.mubr.msk.bf16.vlgmr.msra.gmra.mrb[48].mxu0 %vm856_vm0, %v2695_v35 }
0x14b4   : > { %v3974_v52 = vpop.f32.mrb[48].mxu0 }
0x14b5   : > { %v2777_v53 = vpop.f32.mrb[49].mxu0  ;;  %v2786_v60 = vadd.f32 %v3974_v52, %v3678_v20 }
0x14b6   : > { %v2778_v37 = vadd.f32 %v3678_v20, %v2777_v53  ;;  %v3975_v13 = vpop.f32.mrb[50].mxu0 }
0x14b7   : > { %v2789_v3 = vadd.f32 %v3975_v13, %v3678_v20  ;;  %v2780_v58 = vpop.f32.mrb[51].mxu0  ;;  %v2794_v0 = vadd.f32 %v2786_v60, %v5770_v55 }
0x14b8   : > { %v2781_v61 = vadd.f32 %v3678_v20, %v2780_v58  ;;  %v2792_v31 = vadd.f32 %v2778_v37, %v5760_v50 }
0x14b9   : > { %v2795_v39 = vadd.f32 %v2789_v3, %v5768_v54  ;;  %v2806_v2 = vsel %vm856_vm0, %v2794_v0, 0.0 }
0x14ba   : > { %v2800_v62 = vsel %vm856_vm0, %v2792_v31, 0.0  ;;  %v2793_v22 = vadd.f32 %v2781_v61, %v5762_v51 }
0x14bb   : > { %2801 = vadd.xlane.f32.xlu1 %v2800_v62  ;;  %v2809_v1 = vsel %vm856_vm0, %v2795_v39, 0.0  ;;  %v4289_v62 = vld [vmem:[%s6100_s3 + $0x40] sm:$0xff]  }
0x14bc   : > { %v2803_v63 = vsel %vm856_vm0, %v2793_v22, 0.0  ;;  %3988 = vmatprep.subr.bf16.mxu0 %v4289_v62 }
0x14bd   : > { %2804 = vadd.xlane.f32.xlu0 %v2803_v63  ;;  %3989 = vmatpush3.bf16.msra.mxu0 %v4289_v62  ;;  %v4292_v63 = vld [vmem:[%s6100_s3 + $0x58] sm:$0xff]  }
0x14bf   : > { %2810 = vadd.xlane.f32.xlu1 %v2809_v1  ;;  %v4294_v1 = vld [vmem:[%s6100_s3 + $0x68] sm:$0xff]  }
0x14c1   : > { %2807 = vadd.xlane.f32.xlu0 %v2806_v2  ;;  %v4295_v2 = vld [vmem:[%s6100_s3 + $0x70] sm:$0xff]  }
0x1548   : > { %v2802_v7 = vpop.xlane.xlu1 %2801 }
0x1549   : > { %v2812_v50 = vmul.f32 0.015625, %v2802_v7  ;;  %v4296_v7 = vld [vmem:[%s6100_s3 + $0x78] sm:$0xff]  }
0x154a   : > { %v2805_v4 = vpop.xlane.xlu0 %2804 }
0x154b   : > { %v2816_v57 = vsub.f32 %v2792_v31, %v2812_v50  ;;  %v2813_v59 = vmul.f32 0.015625, %v2805_v4  ;;  %v3687_v50 = vld [vmem:[#allocation17 + $0x1] ss:$0 sm:$0xff] }
0x154c   : > { %v2811_v51 = vpop.xlane.xlu1 %2810 }
0x154d   : > { %v2817_v5 = vsub.f32 %v2793_v22, %v2813_v59  ;;  %v2815_v54 = vmul.f32 0.015625, %v2811_v51  ;;  %v2820_v8 = vmul.f32 %v2816_v57, %v2816_v57  ;;  %v4290_v22 = vld [vmem:[%s6100_s3 + $0x48] sm:$0xff]  }
0x154e   : > { %v2808_v27 = vpop.xlane.xlu0 %2807  ;;  %3990 = vmatprep.subr.bf16.mxu0 %v4290_v22 }
0x154f   : > { %v2819_v12 = vsub.f32 %v2795_v39, %v2815_v54  ;;  %v2814_v6 = vmul.f32 0.015625, %v2808_v27  ;;  %v2824_v55 = vsel %vm856_vm0, %v2820_v8, 0.0  ;;  %v2821_v9 = vmul.f32 %v2817_v5, %v2817_v5  ;;  %3991 = vmatpush3.bf16.msra.mxu0 %v4290_v22  ;;  %v4291_v39 = vld [vmem:[%s6100_s3 + $0x50] sm:$0xff]  }
0x1550   : > { %2825 = vadd.xlane.f32.xlu0 %v2824_v55  ;;  %3992 = vmatprep.subr.bf16.mxu0 %v4291_v39 }
0x1551   : > { %v2818_v10 = vsub.f32 %v2794_v0, %v2814_v6  ;;  %v2827_v11 = vsel %vm856_vm0, %v2821_v9, 0.0  ;;  %v2823_v14 = vmul.f32 %v2819_v12, %v2819_v12  ;;  %v4293_v0 = vld [vmem:[%s6100_s3 + $0x60] sm:$0xff]   ;;  %s5954_s3 = scalar_lea.hbm %s6107_s0, %s3734_s30 }
0x1552   : > { %2828 = vadd.xlane.f32.xlu1 %v2827_v11 }
0x1553   : > { %v2822_v16 = vmul.f32 %v2818_v10, %v2818_v10  ;;  %v2833_v18 = vsel %vm856_vm0, %v2823_v14, 0.0  ;;  %3993 = vmatpush3.bf16.msra.mxu0 %v4291_v39 }
0x1554   : > { %3994 = vmatprep.subr.bf16.mxu0 %v4292_v63 }
0x1555   : > { %v2830_v17 = vsel %vm856_vm0, %v2822_v16, 0.0 }
0x1556   : > { %2831 = vadd.xlane.f32.xlu0 %v2830_v17  ;;  %2834 = vadd.xlane.f32.xlu1 %v2833_v18 }
0x1557   : > { %3995 = vmatpush3.bf16.msra.mxu0 %v4292_v63 }
0x1558   : > { %3996 = vmatprep.subr.bf16.mxu0 %v4293_v0 }
0x155b   : > { %3997 = vmatpush3.bf16.msra.mxu0 %v4293_v0 }
0x155c   : > { %3998 = vmatprep.subr.bf16.mxu0 %v4294_v1 }
0x155f   : > { %3999 = vmatpush3.bf16.msra.mxu0 %v4294_v1 }
0x1560   : > { %4000 = vmatprep.subr.bf16.mxu0 %v4295_v2 }
0x1563   : > { %4001 = vmatpush3.bf16.msra.mxu0 %v4295_v2 }
0x1564   : > { %4002 = vmatprep.subr.bf16.mxu0 %v4296_v7 }
0x1567   : > { %4003 = vmatpush3.bf16.msra.mxu0 %v4296_v7 }
0x15dd   : > { %v2826_v26 = vpop.xlane.xlu0 %2825 }
0x15de   : > { %v2836_v28 = vmul.f32 0.015625, %v2826_v26 }
0x15df   : > { %v2829_v15 = vpop.xlane.xlu1 %2828 }
0x15e0   : > { %v2840_v29 = vadd.f32 1e-12, %v2836_v28  ;;  %v2837_v30 = vmul.f32 0.015625, %v2829_v15 }
0x15e2   : > { %4401 = vrsqrt.f32 %v2840_v29  ;;  %v2841_v32 = vadd.f32 1e-12, %v2837_v30 }
0x15e3   : > { %v2832_v33 = vpop.xlane.xlu0 %2831  ;;  %v2835_v34 = vpop.xlane.xlu1 %2834 }
0x15e4   : > { %4403 = vrsqrt.f32 %v2841_v32  ;;  %v2838_v38 = vmul.f32 0.015625, %v2832_v33  ;;  %v2839_v40 = vmul.f32 0.015625, %v2835_v34 }
0x15e6   : > { %v2842_v36 = vadd.f32 1e-12, %v2838_v38  ;;  %v2843_v43 = vadd.f32 1e-12, %v2839_v40 }
0x15e8   : > { %4405 = vrsqrt.f32 %v2842_v36 }
0x15e9   : > { %4407 = vrsqrt.f32 %v2843_v43 }
0x15ec   : > { %v4402_v44 = vpop.eup %4401 }
0x15ed   : > { %v2848_v45 = vmul.f32 %v4402_v44, %v2816_v57 }
0x15ee   : > { %v4404_v46 = vpop.eup %4403 }
0x15ef   : > { %v2849_v47 = vmul.f32 %v4404_v46, %v2817_v5  ;;  %v2858_v42 = vmul.f32 %v3685_v41, %v2848_v45 }
0x15f1   : > { %v2859_v21 = vmul.f32 %v3685_v41, %v2849_v47  ;;  %v5870_v52 = vadd.f32 %v3686_v48, %v2858_v42 }
0x15f2   : > { %v4406_v49 = vpop.eup %4405 }
0x15f3   : > { %v4408_v35 = vpop.eup %4407  ;;  %v2850_v20 = vmul.f32 %v4406_v49, %v2818_v10  ;;  %v2869_v53 = vadd.f32 %v3686_v48, %v2859_v21 }
0x15f4   : > { %v2851_v37 = vmul.f32 %v4408_v35, %v2819_v12 }
0x15f5   : > { %v2860_v13 = vmul.f32 %v3685_v41, %v2850_v20  ;;  %v2872_v3 = vpack.c.bf16 %v2869_v53, %v5870_v52 }
0x15f6   : > { %v2861_v58 = vmul.f32 %v3685_v41, %v2851_v37  ;;  %v3710_v37 = vld [vmem:[#allocation19 + $0x1] ss:$0 sm:$0xff] }
0x15f7   : > { %3984 = vmatprep.mubr.msk.bf16.mxu1 %vm856_vm0, %v2872_v3  ;;  %v5874_v60 = vadd.f32 %v3686_v48, %v2860_v13 }
0x15f8   : > { %v2871_v61 = vadd.f32 %v3686_v48, %v2861_v58 }
0x15fa   : > { %v2873_v31 = vpack.c.bf16 %v2871_v61, %v5874_v60 }
0x15fc   : > { %3985 = vmatmul.mubr.msk.bf16.vlgmr.msra.gmra.mrb[44].mxu1 %vm856_vm0, %v2873_v31 }
0x15fd   : > { %4016 = vmatprep.mubr.msk.bf16.mxu1 %vm4933_vm1, %v4932_v56 }
0x16cf   : > { %v3986_v4 = vpop.f32.mrb[44].mxu1 }
0x16d0   : > { %v2964_v57 = vadd.f32 %v3986_v4, %v3687_v50  ;;  %v2955_v59 = vpop.f32.mrb[45].mxu1 }
0x16d1   : > { %v2956_v51 = vadd.f32 %v3687_v50, %v2955_v59  ;;  %v3987_v5 = vpop.f32.mrb[46].mxu1 }
0x16d2   : > { %v2972_v54 = vmul.f32 %v2964_v57, %v2964_v57  ;;  %v2967_v8 = vadd.f32 %v3987_v5, %v3687_v50  ;;  %v2958_v27 = vpop.f32.mrb[47].mxu1 }
0x16d3   : > { %v2970_v12 = vmul.f32 %v2956_v51, %v2956_v51  ;;  %v2959_v6 = vadd.f32 %v3687_v50, %v2958_v27  ;;  %v4300_v27 = vld [vmem:[%s6103_s5 + $0x18] sm:$0xff]  }
0x16d4   : > { %v2976_v55 = vmul.f32 %v2972_v54, %v2964_v57  ;;  %v2973_v9 = vmul.f32 %v2967_v8, %v2967_v8  ;;  %v4298_v54 = vld [vmem:[%s6103_s5 + $0x8] sm:$0xff]  }
0x16d5   : > { %v2974_v10 = vmul.f32 %v2970_v12, %v2956_v51  ;;  %v2971_v11 = vmul.f32 %v2959_v6, %v2959_v6 }
0x16d6   : > { %v2980_v14 = vmul.f32 0.044715, %v2976_v55  ;;  %v2977_v16 = vmul.f32 %v2973_v9, %v2967_v8 }
0x16d7   : > { %v2978_v17 = vmul.f32 0.044715, %v2974_v10  ;;  %v2975_v18 = vmul.f32 %v2971_v11, %v2959_v6 }
0x16d8   : > { %v2984_v19 = vadd.f32 %v2980_v14, %v2964_v57  ;;  %v2981_v23 = vmul.f32 0.044715, %v2977_v16  ;;  %v3719_v16 = vld [vmem:[#allocation20 + $0x1] ss:$0 sm:$0xff] }
0x16d9   : > { %v2982_v24 = vadd.f32 %v2978_v17, %v2956_v51  ;;  %v2979_v25 = vmul.f32 0.044715, %v2975_v18 }
0x16da   : > { %v2988_v26 = vmul.f32 0.7978846, %v2984_v19  ;;  %v2985_v28 = vadd.f32 %v2981_v23, %v2967_v8  ;;  %v3720_v19 = vld [vmem:[#allocation22 + $0x1] ss:$0 sm:$0xff] }
0x16db   : > { %v2986_v15 = vmul.f32 0.7978846, %v2982_v24  ;;  %v2983_v29 = vadd.f32 %v2979_v25, %v2959_v6 }
0x16dc   : > { %4409 = vtanh.f32 %v2988_v26  ;;  %v2989_v30 = vmul.f32 0.7978846, %v2985_v28 }
0x16dd   : > { %4411 = vtanh.f32 %v2986_v15  ;;  %v2987_v32 = vmul.f32 0.7978846, %v2983_v29 }
0x16de   : > { %4413 = vtanh.f32 %v2989_v30  ;;  %v4301_v30 = vld [vmem:[%s6104_s18] sm:$0xff]  }
0x16df   : > { %4415 = vtanh.f32 %v2987_v32 }
0x16e6   : > { %v4410_v33 = vpop.eup %4409 }
0x16e7   : > { %v4412_v34 = vpop.eup %4411  ;;  %v2996_v38 = vadd.f32 1.0, %v4410_v33  ;;  %v4302_v33 = vld [vmem:[%s6104_s18 + $0x8] sm:$0xff]  }
0x16e8   : > { %v4414_v40 = vpop.eup %4413  ;;  %v2994_v36 = vadd.f32 1.0, %v4412_v34  ;;  %v4303_v34 = vld [vmem:[%s6104_s18 + $0x10] sm:$0xff]  }
0x16e9   : > { %v4416_v43 = vpop.eup %4415  ;;  %v3000_v44 = vmul.f32 0.5, %v2996_v38  ;;  %v2997_v41 = vadd.f32 1.0, %v4414_v40  ;;  %v4304_v38 = vld [vmem:[%s6104_s18 + $0x18] sm:$0xff]  }
0x16ea   : > { %v2995_v45 = vadd.f32 1.0, %v4416_v43  ;;  %v2998_v46 = vmul.f32 0.5, %v2994_v36  ;;  %v3721_v40 = vld [vmem:[#allocation23] ss:$0 sm:$0xff] }
0x16eb   : > { %v3001_v47 = vmul.f32 0.5, %v2997_v41  ;;  %v3004_v48 = vmul.f32 %v3000_v44, %v2964_v57 }
0x16ec   : > { %v2999_v42 = vmul.f32 0.5, %v2995_v45  ;;  %v3002_v49 = vmul.f32 %v2998_v46, %v2956_v51 }
0x16ed   : > { %v3005_v21 = vmul.f32 %v3001_v47, %v2967_v8  ;;  %v4299_v8 = vld [vmem:[%s6103_s5 + $0x10] sm:$0xff]  }
0x16ee   : > { %v3003_v35 = vmul.f32 %v2999_v42, %v2959_v6 }
0x16ef   : > { %v3007_v20 = vpack.c.bf16 %v3005_v21, %v3004_v48 }
0x16f0   : > { %v3006_v53 = vpack.c.bf16 %v3003_v35, %v3002_v49 }
0x16f2   : > { %4004 = vmatprep.mubr.bf16.mxu0 %v3006_v53 }
0x16f3   : > { %4005 = vmatmul.mubr.bf16.vlgmr.msra.gmra.mrb[52].mxu0 %v3007_v20 }
0x17c6   : > { %v4006_v13 = vpop.f32.mrb[52].mxu0 }
0x17c7   : > { %v3123_v3 = vadd.f32 %v4006_v13, %v3710_v37  ;;  %v3115_v58 = vpop.f32.mrb[53].mxu0 }
0x17c8   : > { %v3116_v61 = vadd.f32 %v3710_v37, %v3115_v58  ;;  %v4007_v31 = vpop.f32.mrb[54].mxu0 }
0x17c9   : > { %v3118_v62 = vpop.f32.mrb[55].mxu0  ;;  %v3129_v22 = vadd.f32 %v3123_v3, %v5874_v60 }
0x17ca   : > { %v3128_v39 = vadd.f32 %v3116_v61, %v5870_v52  ;;  %v4297_v52 = vld [vmem:[%s6103_s5] sm:$0xff]  }
0x17cb   : > { %v3137_v63 = vsel %vm856_vm0, %v3129_v22, 0.0  ;;  %4009 = vmatpush3.bf16.msra.mxu1 %v4297_v52 }
0x17cc   : > { %3138 = vadd.xlane.f32.xlu0 %v3137_v63  ;;  %v3134_v0 = vsel %vm856_vm0, %v3128_v39, 0.0  ;;  %4010 = vmatprep.subr.bf16.mxu1 %v4932_v56 }
0x17cd   : > { %3135 = vadd.xlane.f32.xlu1 %v3134_v0 }
0x17cf   : > { %4011 = vmatpush3.bf16.msra.mxu1 %v4298_v54 }
0x17d0   : > { %4012 = vmatprep.subr.bf16.mxu1 %v4932_v56 }
0x17d3   : > { %4013 = vmatpush3.bf16.msra.mxu1 %v4299_v8 }
0x17d4   : > { %4014 = vmatprep.subr.bf16.mxu1 %v4932_v56 }
0x17d7   : > { %4015 = vmatpush3.bf16.msra.mxu1 %v4300_v27 }
0x17d8   : > { %4020 = vmatprep.subr.bf16.mxu1 %v4932_v56 }
0x1859   : > { %v3139_v1 = vpop.xlane.xlu0 %3138 }
0x185a   : > { %v3141_v2 = vmul.f32 0.015625, %v3139_v1  ;;  %v3136_v7 = vpop.xlane.xlu1 %3135 }
0x185b   : > { %v3140_v50 = vmul.f32 0.015625, %v3136_v7 }
0x185c   : > { %v3143_v4 = vsub.f32 %v3129_v22, %v3141_v2 }
0x185d   : > { %v3142_v57 = vsub.f32 %v3128_v39, %v3140_v50 }
0x185e   : > { %v3145_v59 = vmul.f32 %v3143_v4, %v3143_v4 }
0x185f   : > { %v3144_v51 = vmul.f32 %v3142_v57, %v3142_v57 }
0x1860   : > { %v3149_v5 = vsel %vm856_vm0, %v3145_v59, 0.0 }
0x1861   : > { %3150 = vadd.xlane.f32.xlu0 %v3149_v5  ;;  %v3146_v60 = vsel %vm856_vm0, %v3144_v51, 0.0 }
0x1862   : > { %3147 = vadd.xlane.f32.xlu1 %v3146_v60 }
0x18ee   : > { %v3151_v12 = vpop.xlane.xlu0 %3150 }
0x18ef   : > { %v3153_v6 = vmul.f32 0.015625, %v3151_v12  ;;  %v3148_v55 = vpop.xlane.xlu1 %3147 }
0x18f0   : > { %v3152_v9 = vmul.f32 0.015625, %v3148_v55 }
0x18f1   : > { %v3155_v10 = vadd.f32 1e-12, %v3153_v6 }
0x18f2   : > { %v3154_v11 = vadd.f32 1e-12, %v3152_v9 }
0x18f3   : > { %4417 = vrsqrt.f32 %v3155_v10 }
0x18f4   : > { %4419 = vrsqrt.f32 %v3154_v11 }
0x18fd   : > { %v4418_v14 = vpop.eup %4417 }
0x18fe   : > { %v4420_v17 = vpop.eup %4419  ;;  %v3159_v18 = vmul.f32 %v4418_v14, %v3143_v4 }
0x18ff   : > { %v3158_v23 = vmul.f32 %v4420_v17, %v3142_v57 }
0x1900   : > { %v3167_v24 = vmul.f32 %v3719_v16, %v3159_v18 }
0x1901   : > { %v3166_v25 = vmul.f32 %v3719_v16, %v3158_v23 }
0x1902   : > { %v3175_v26 = vadd.f32 %v3720_v19, %v3167_v24 }
0x1903   : > { %v3174_v28 = vadd.f32 %v3720_v19, %v3166_v25 }
0x1904   : > { %v3177_v15 = vrot.slane %v3175_v26, 7 }
0x1906   : > { %v3180_v29 = vsel %vm3179_vm4, %v3174_v28, %v3177_v15 }
0x1907   : > { %v3181_v32 = vpack.c.bf16 %v3180_v29, %v3180_v29 }
0x1909   : > { %4017 = vmatmul.mubr.msk.bf16.vlgmr.msra.gmra.mrb[48].mxu1 %vm856_vm0, %v3181_v32 }
0x190a   : > { %4021 = vmatpush3.bf16.msra.mxu1 %v4301_v30  ;;  %4028 = vmatprep.mubr.msk.bf16.mxu1 %vm4933_vm1, %v4932_v56 }
0x190b   : > { %4022 = vmatprep.subr.bf16.mxu1 %v4932_v56 }
0x190e   : > { %4023 = vmatpush3.bf16.msra.mxu1 %v4302_v33 }
0x190f   : > { %4024 = vmatprep.subr.bf16.mxu1 %v4932_v56 }
0x1912   : > { %4025 = vmatpush3.bf16.msra.mxu1 %v4303_v34 }
0x1913   : > { %4026 = vmatprep.subr.bf16.mxu1 %v4932_v56  ;;  %v3727_v56 = vld [vmem:[%s6105_s1] ss:$0 sm:$0xff]  ;;  %s4819_s1 = sshll.u32 %s4937_s27, 4  ;;  %s4820_s1 = int_to_ptr.vmem [resolvable:$false] %s4819_s1 }
0x1914   : > { %s4821_s29 = scalar_lea.vmem %s4820_s1, 64  ;;  %p4822_p9 = scmp.lt.s32.totalorder %s5956_s2, %s4820_s1 }
0x1915   : > { %p4823_p7 = scmp.lt.s32.totalorder %s4821_s29, %s4815_s16 }
0x1916   : > { %4027 = vmatpush3.bf16.msra.mxu1 %v4304_v38 }
0x1917   : > { %p4824_p10 = por %p4823_p7, %p4822_p9 }
0x1919   : > { %p4825_p4 = pnand %p4824_p10, %p4818_p5 }
0x19dc   : > { %v3258_v36 = vpop.f32.mrb[48].mxu1 }
0x19dd   : > { %v3259_v43 = vadd.f32 %v3721_v40, %v3258_v36  ;;  %v4018_v44 = vpop.f32.mrb[49].mxu1 }
0x19de   : > { %v3261_v41 = vpop.f32.mrb[50].mxu1 }
0x19df   : > { %v3264_v45 = vmax.f32 %v3259_v43, 0.0  ;;  %v4019_v46 = vpop.f32.mrb[51].mxu1 }
0x19e1   : > { %v3265_v47 = vpack.c.bf16 %v3264_v45, %v3264_v45 }
0x19e3   : > { %4029 = vmatmul.mubr.msk.bf16.vlgmr.msra.gmra.mrb[52].mxu1 %vm856_vm0, %v3265_v47 }
0x1ab6   : > { %v3342_v42 = vpop.f32.mrb[52].mxu1 }
0x1ab7   : > { %v3343_v48 = vadd.f32 %v3727_v56, %v3342_v42  ;;  %v4030_v21 = vpop.f32.mrb[53].mxu1 }
0x1ab8   : > { %v3345_v49 = vpop.f32.mrb[54].mxu1 }
0x1ab9   : > { %3348 = vst [vmem:[%s842_s6] sm:$0x3] %v3343_v48  ;;  %v4031_v35 = vpop.f32.mrb[55].mxu1 }
0x1aba   : > { %4828 = shalt.err (!%p4825_p4)
}
0x1abb   : > { %s4829_s12 = scalar_lea.hbm %s5954_s3, 32  ;;  %s4833_s7 = scalar_lea.hbm %s6107_s0, 64 }
0x1abc   : > { %p4830_p1 = scmp.ne.s32.totalorder %s5954_s3, %s4829_s12  ;;  %p4834_p2 = scmp.lt.u32.totalorder %s5954_s3, %s6107_s0 }
0x1abd   : > { %p4835_p3 = scmp.lt.u32.totalorder %s4833_s7, %s4829_s12  ;;  %p4837_p11 = scmp.lt.u32.totalorder %s4829_s12, %s5954_s3 }
0x1abe   : > { %p4831_p13 = pnand %p4830_p1, %p6108_p12 }
0x1abf   : > { %p4836_p6 = por %p4835_p3, %p4834_p2 }
0x1ac0   : > { %p4832_p0 = pneg %p4831_p13 }
0x1ac1   : > { %p4838_p8 = por %p4837_p11, %p4836_p6 }
0x1ac3   : > { %p4839_p5 = pnand %p4838_p8, %p4832_p0 }
0x1ac5   : > { %4842 = shalt.err (!%p4839_p5)
}
0x1ac6   : > { %4086 = dma.vmem_to_hbm [thread:$0]  (%p6108_p12), %s5956_s2, 32, %s5954_s3, %s3350_s19  }
0x1ac7 PF: > { %s6109_s16 = sld [smem:[#allocation35_spill]]  ;;  %p6110_p9 = scmp.ne.s32.totalorder %s6078_s28, 0 }
0x1ac8   : > { %p6111_p7 = scmp.ge.s32.totalorder %s4909_s24, 2 }
0x1aca   : > { %p4133_p10 = pnand %p6111_p7, %p6110_p9 }
0x1acd   : > { %s3375_s1 = sand.u32 1, %s6109_s16  }
0x1ace   : > { %s3376_s29 = scalar_lea.sflag [#allocation4], %s3375_s1 }
0x1acf   : > { %4892 = dma.done.wait (!%p4133_p10), %s3376_s29, 32  }
0x1ad0   : > { %4894 = vsyncadd (!%p4133_p10), %s3376_s29, 4294967264  ;;  %p40_p4 = scmp.ge.s32.totalorder %s5387_s4, 4   ;;  %s6112_s1 = smov %s4901_s22 }
0x1ad1   : > { %s6113_s22 = smov %s4905_s23  ;;  %s6114_s23 = smov %s5399_s25 }
0x1ad2   : > { %s6115_s24 = smov %s5387_s4  ;;  %42 = sbr.rel (!%p40_p4) target bundleno = 26 (0x1a), region = 212 }
0x1ad9   :  { %3381 = vsyncpa [#allocation3], 1 }
0x1ada   :  { %3383 = vsyncpa [#allocation3 + $0x1], 1 }
0x1adb   :  { %3384 = vsyncpa [#allocation6], 1 }
0x1adc   :  { %3385 = vsyncpa [#allocation9], 1 }
0x1add   :  { %3386 = vsyncpa [#allocation12], 1 }
0x1ade   :  { %3387 = vsyncpa [#allocation15], 1 }
0x1adf   :  { %3388 = vsyncpa [#allocation18], 1 }
0x1ae0   :  { %3389 = vsyncpa [#allocation21], 1 }
0x1ae1   :  { %3390 = vsyncpa [#allocation24], 1 }
0x1ae2   :  { %3391 = vsyncpa [#allocation4], 1 }
0x1ae3   :  { %3393 = vsyncpa [#allocation4 + $0x1], 1 }

// kernel: tpu_custom_call.1
= control target key start
LH: loop header
LB: loop body
LE: loop exit
PB: predicated region body
PF: predicated region fallthrough
CT: control target
= control target key end

     0   :  { %s5998_s0 = inlined_call_operand.vmem [shape: f32[2,32,64], index: 0, kind: input, shape index: {}]   ;;  %s5999_s1 = inlined_call_operand.hbm [shape: f32[2,2,16], index: 1, kind: input, shape index: {}]   ;;  %s6000_s2 = inlined_call_operand.hbm [shape: f32[1,64], index: 2, kind: input, shape index: {}]   ;;  %s6001_s3 = inlined_call_operand.hbm [shape: f32[1,64], index: 3, kind: input, shape index: {}]   ;;  %s6002_s4 = inlined_call_operand.vmem [shape: bf16[2,64,192], index: 4, kind: input, shape index: {}]   ;;  %s6003_s5 = inlined_call_operand.hbm [shape: f32[2,1,192], index: 5, kind: input, shape index: {}]   ;;  %s6004_s6 = inlined_call_operand.hbm [shape: bf16[2,64,64], index: 6, kind: input, shape index: {}]   ;;  %s6005_s7 = inlined_call_operand.hbm [shape: f32[2,1,64], index: 7, kind: input, shape index: {}]   ;;  %s6006_s8 = inlined_call_operand.hbm [shape: f32[2,1,64], index: 8, kind: input, shape index: {}]   ;;  %s6007_s9 = inlined_call_operand.hbm [shape: f32[2,1,64], index: 9, kind: input, shape index: {}]   ;;  %s6008_s10 = inlined_call_operand.hbm [shape: bf16[2,64,128], index: 10, kind: input, shape index: {}]   ;;  %s6009_s11 = inlined_call_operand.hbm [shape: f32[2,1,128], index: 11, kind: input, shape index: {}]   ;;  %s6010_s12 = inlined_call_operand.vmem [shape: bf16[2,128,64], index: 12, kind: input, shape index: {}]   ;;  %s6011_s13 = inlined_call_operand.hbm [shape: f32[2,1,64], index: 13, kind: input, shape index: {}]   ;;  %s6012_s14 = inlined_call_operand.hbm [shape: f32[2,1,64], index: 14, kind: input, shape index: {}]   ;;  %s6013_s15 = inlined_call_operand.hbm [shape: f32[2,1,64], index: 15, kind: input, shape index: {}]   ;;  %s6014_s16 = inlined_call_operand.vmem [shape: bf16[64,64], index: 16, kind: input, shape index: {}]   ;;  %s6015_s17 = inlined_call_operand.hbm [shape: f32[1,64], index: 17, kind: input, shape index: {}]   ;;  %s6016_s18 = inlined_call_operand.vmem [shape: bf16[64,128], index: 18, kind: input, shape index: {}]   ;;  %s6017_s19 = inlined_call_operand.vmem [shape: f32[1,128], index: 19, kind: input, shape index: {}]   ;;  %s6018_s20 = inlined_call_operand.hbm [shape: f32[2,2,128], index: 20, kind: output, shape index: {}]  }
   0x1   :  { %6047 = sst [smem:[#allocation38_spill]] %s5998_s0 }
   0x2   :  { %6048 = sst [smem:[#allocation39_spill]] %s5999_s1 }
   0x3   :  { %6049 = sst [smem:[#allocation40_spill]] %s6000_s2 }
   0x4   :  { %6050 = sst [smem:[#allocation41_spill]] %s6001_s3 }
   0x5   :  { %6051 = sst [smem:[#allocation42_spill]] %s6002_s4 }
   0x6   :  { %6052 = sst [smem:[#allocation43_spill]] %s6003_s5 }
   0x7   :  { %6053 = sst [smem:[#allocation44_spill]] %s6004_s6 }
   0x8   :  { %6054 = sst [smem:[#allocation45_spill]] %s6005_s7 }
   0x9   :  { %6055 = sst [smem:[#allocation46_spill]] %s6010_s12 }
   0xa   :  { %6056 = sst [smem:[#allocation47_spill]] %s6014_s16 }
   0xb   :  { %6057 = sst [smem:[#allocation48_spill]] %s6016_s18 }
   0xc   :  { %6058 = sst [smem:[#allocation49_spill]] %s6017_s19 }
   0xd   :  { %6059 = sst [smem:[#allocation50_spill]] %s6018_s20 }
   0xe   :  { %25 = vsyncpa [#allocation3], 0 }
   0xf   :  { %27 = vsyncpa [#allocation3 + $0x1], 0 }
  0x10   :  { %28 = vsyncpa [#allocation6], 0 }
  0x11   :  { %29 = vsyncpa [#allocation9], 0 }
  0x12   :  { %30 = vsyncpa [#allocation12], 0 }
  0x13   :  { %31 = vsyncpa [#allocation15], 0 }
  0x14   :  { %32 = vsyncpa [#allocation18], 0 }
  0x15   :  { %33 = vsyncpa [#allocation21], 0 }
  0x16   :  { %34 = vsyncpa [#allocation24], 0 }
  0x17   :  { %35 = vsyncpa [#allocation4], 0 }
  0x18   :  { %37 = vsyncpa [#allocation4 + $0x1], 0  ;;  %s5043_s1 = smov 0   ;;  %s5045_s22 = smov 0  }
  0x19   :  { %s5047_s23 = smov 0   ;;  %s5049_s24 = smov 0  }
  0x1a LB: > { %6060 = sst [smem:[#allocation35_spill]] %s4897_s1  ;;  %s4911_s2 = smov [#allocation5]   ;;  %s4909_s24 = sphi %s5049_s24, %s6115_s24   ;;  %s4905_s23 = sphi %s5047_s23, %s6114_s23   ;;  %s4901_s22 = sphi %s5045_s22, %s6113_s22   ;;  %s4897_s1 = sphi %s5043_s1, %s6112_s1  }
  0x1b   : > { %s517_s25 = sshll.u32 %s4911_s2, 4  ;;  %s5064_s3 = sadd.s32 4294967295, %s4909_s24   ;;  %s5069_s25 = int_to_ptr.vmem [resolvable:$true] %s517_s25 }
  0x1c   : > { %6061 = sst [smem:[#allocation36_spill]] %s5064_s3  ;;  %p3570_p0 = scmp.ge.s32.totalorder %s4909_s24, 1 }
  0x1d   : > { %p6032_p1 = scmp.eq.s32.totalorder %s5064_s3, 0  ;;  %p504_p2 = scmp.lt.s32.totalorder %s4909_s24, 3 }
  0x1e   : > { %s4912_s27 = smov [#allocation8]   ;;  %s4913_s29 = smov [#allocation11]  }
  0x1f   : > { %p5071_p3 = pnand %p3570_p0, %p504_p2  ;;  %s541_s28 = sshll.u32 %s4912_s27, 4  ;;  %s5078_s28 = int_to_ptr.vmem [resolvable:$true] %s541_s28 }
  0x20   : > { %s567_s30 = sshll.u32 %s4913_s29, 4  ;;  %s6065_s2 = sld [smem:[#allocation40_spill]]  ;;  %s5086_s30 = int_to_ptr.vmem [resolvable:$true] %s567_s30 }
  0x21   : > { %s6062_s26 = scalar_select %p5071_p3, 1, 0 }
  0x22   : > { %p4088_p5 = pneg %p5071_p3 }
  0x23   : > { %6063 = sst [smem:[#allocation37_spill]] %s6062_s26 }
  0x24   : > { %p5082_p6 = pnand %p4088_p5, %p6032_p1 }
  0x26   : > { %s4421_s20 = scalar_lea.hbm %s6065_s2, 16  ;;  %p5096_p8 = pneg %p5082_p6 }
  0x27   : > { %p4422_p7 = scmp.ne.s32.totalorder %s6065_s2, %s4421_s20  ;;  %p4428_p11 = scmp.lt.u32.totalorder %s4421_s20, %s6065_s2 }
  0x29   : > { %p4424_p9 = pnand %p5096_p8, %p4422_p7 }
  0x2b   : > { %p4425_p10 = pneg %p4424_p9 }
  0x2d   : > { %p4430_p12 = pnand %p4428_p11, %p4425_p10 }
  0x2f   : > { %4433 = shalt.err (!%p4430_p12)
}
  0x30   : > { %s4434_s18 = scalar_lea.vmem %s5069_s25, 16  ;;  %s4441_s19 = scalar_lea.vmem %s5069_s25, 32 }
  0x31   : > { %p4435_p13 = scmp.ne.s32.totalorder %s5069_s25, %s4434_s18  ;;  %p4442_p5 = scmp.lt.s32.totalorder %s5069_s25, %s5069_s25 }
  0x32   : > { %p4443_p7 = scmp.lt.s32.totalorder %s4441_s19, %s4434_s18 }
  0x33   : > { %p4437_p0 = pnand %p4435_p13, %p5096_p8 }
  0x34   : > { %p4444_p9 = por %p4443_p7, %p4442_p5 }
  0x35   : > { %p4438_p2 = pneg %p4437_p0 }
  0x37   : > { %p4445_p4 = pnand %p4444_p9, %p4438_p2 }
  0x39   : > { %4448 = shalt.err (!%p4445_p4)
}
  0x3a   : > { %4091 = dma.hbm_to_vmem [thread:$0]  (!%p5082_p6), %s6065_s2, 16, %s5069_s25, [#allocation6]  }
  0x3b   : > { %s6067_s5 = sld [smem:[#allocation43_spill]] }
  0x41   : > { %s4449_s29 = scalar_lea.hbm %s6067_s5, 64 }
  0x42   : > { %p4450_p10 = scmp.ne.s32.totalorder %s6067_s5, %s4449_s29  ;;  %p4456_p4 = scmp.lt.u32.totalorder %s4449_s29, %s6067_s5 }
  0x44   : > { %p4452_p11 = pnand %p4450_p10, %p5096_p8 }
  0x46   : > { %p4453_p12 = pneg %p4452_p11 }
  0x48   : > { %p4458_p13 = pnand %p4456_p4, %p4453_p12 }
  0x4a   : > { %4461 = shalt.err (!%p4458_p13)
}
  0x4b   : > { %s4462_s25 = scalar_lea.vmem %s5078_s28, 64  ;;  %p4470_p7 = scmp.lt.s32.totalorder %s5078_s28, %s5078_s28 }
  0x4c   : > { %p4463_p0 = scmp.ne.s32.totalorder %s5078_s28, %s4462_s25  ;;  %p4471_p9 = scmp.lt.s32.totalorder %s4462_s25, %s4462_s25 }
  0x4e   : > { %p4465_p2 = pnand %p4463_p0, %p5096_p8  ;;  %p4472_p10 = por %p4471_p9, %p4470_p7 }
  0x50   : > { %p4466_p5 = pneg %p4465_p2 }
  0x52   : > { %p4473_p11 = pnand %p4472_p10, %p4466_p5 }
  0x54   : > { %4476 = shalt.err (!%p4473_p11)
}
  0x55   : > { %s4914_s12 = smov 32   ;;  %s4915_s26 = smov 2  }
  0x56   : > { %4097 = dma.hbm_to_vmem [thread:$0]  (!%p5082_p6), %s6067_s5, 64, %s5078_s28, [#allocation9], %s4914_s12, %s4914_s12, %s4915_s26  }
  0x57   : > { %s6068_s7 = sld [smem:[#allocation45_spill]] }
  0x5d   : > { %s4477_s29 = scalar_lea.hbm %s6068_s7, 32 }
  0x5e   : > { %p4478_p12 = scmp.ne.s32.totalorder %s6068_s7, %s4477_s29  ;;  %p4484_p0 = scmp.lt.u32.totalorder %s4477_s29, %s6068_s7 }
  0x60   : > { %p4480_p4 = pnand %p4478_p12, %p5096_p8 }
  0x62   : > { %p4481_p13 = pneg %p4480_p4 }
  0x64   : > { %p4486_p2 = pnand %p4484_p0, %p4481_p13 }
  0x66   : > { %4489 = shalt.err (!%p4486_p2)
}
  0x67   : > { %s4490_s28 = scalar_lea.vmem %s5086_s30, 32  ;;  %p4498_p10 = scmp.lt.s32.totalorder %s5086_s30, %s5086_s30 }
  0x68   : > { %p4491_p5 = scmp.ne.s32.totalorder %s5086_s30, %s4490_s28  ;;  %p4499_p11 = scmp.lt.s32.totalorder %s4490_s28, %s4490_s28 }
  0x6a   : > { %p4493_p7 = pnand %p4491_p5, %p5096_p8  ;;  %p4500_p12 = por %p4499_p11, %p4498_p10 }
  0x6c   : > { %p4494_p9 = pneg %p4493_p7 }
  0x6e   : > { %p4501_p4 = pnand %p4500_p12, %p4494_p9 }
  0x70   : > { %4504 = shalt.err (!%p4501_p4)
}
  0x71   : > { %s6034_s12 = smov 16   ;;  %s6036_s2 = smov 1  }
  0x72   : > { %4103 = dma.hbm_to_vmem [thread:$0]  (!%p5082_p6), %s6068_s7, 32, %s5086_s30, [#allocation12], %s6034_s12, %s6034_s12, %s6036_s2  }
  0x73   : > { %s4918_s20 = smov [#allocation14]   ;;  %s4919_s21 = smov [#allocation17]  }
  0x74   : > { %s593_s0 = sshll.u32 %s4918_s20, 4  ;;  %s619_s29 = sshll.u32 %s4919_s21, 4  ;;  %s594_s0 = int_to_ptr.vmem [resolvable:$true] %s593_s0  ;;  %s620_s29 = int_to_ptr.vmem [resolvable:$true] %s619_s29 }
  0x75   : > { %s4505_s25 = scalar_lea.hbm %s6007_s9, 32 }
  0x76   : > { %p4506_p13 = scmp.ne.s32.totalorder %s6007_s9, %s4505_s25  ;;  %p4512_p5 = scmp.lt.u32.totalorder %s4505_s25, %s6007_s9 }
  0x78   : > { %p4508_p0 = pnand %p4506_p13, %p5096_p8 }
  0x7a   : > { %p4509_p2 = pneg %p4508_p0 }
  0x7c   : > { %p4514_p7 = pnand %p4512_p5, %p4509_p2 }
  0x7e   : > { %4517 = shalt.err (!%p4514_p7)
}
  0x7f   : > { %s4518_s30 = scalar_lea.vmem %s594_s0, 32  ;;  %p4526_p12 = scmp.lt.s32.totalorder %s594_s0, %s594_s0 }
  0x80   : > { %p4519_p9 = scmp.ne.s32.totalorder %s594_s0, %s4518_s30  ;;  %p4527_p4 = scmp.lt.s32.totalorder %s4518_s30, %s4518_s30 }
  0x82   : > { %p4521_p10 = pnand %p4519_p9, %p5096_p8  ;;  %p4528_p1 = por %p4527_p4, %p4526_p12 }
  0x84   : > { %p4522_p11 = pneg %p4521_p10 }
  0x86   : > { %p4529_p3 = pnand %p4528_p1, %p4522_p11 }
  0x88   : > { %4532 = shalt.err (!%p4529_p3)
}
  0x89   : > { %4109 = dma.hbm_to_vmem [thread:$0]  (!%p5082_p6), %s6007_s9, 32, %s594_s0, [#allocation15], %s6034_s12, %s6034_s12, %s6036_s2  }
  0x8a   : > { %s4533_s16 = scalar_lea.hbm %s6009_s11, 32 }
  0x8b   : > { %p4534_p1 = scmp.ne.s32.totalorder %s6009_s11, %s4533_s16  ;;  %p4540_p0 = scmp.lt.u32.totalorder %s4533_s16, %s6009_s11 }
  0x8d   : > { %p4536_p3 = pnand %p4534_p1, %p5096_p8 }
  0x8f   : > { %p4537_p13 = pneg %p4536_p3 }
  0x91   : > { %p4542_p2 = pnand %p4540_p0, %p4537_p13 }
  0x93   : > { %4545 = shalt.err (!%p4542_p2)
}
  0x94   : > { %s4546_s25 = scalar_lea.vmem %s620_s29, 32  ;;  %p4554_p10 = scmp.lt.s32.totalorder %s620_s29, %s620_s29 }
  0x95   : > { %p4547_p5 = scmp.ne.s32.totalorder %s620_s29, %s4546_s25  ;;  %p4555_p11 = scmp.lt.s32.totalorder %s4546_s25, %s4546_s25 }
  0x97   : > { %p4549_p7 = pnand %p4547_p5, %p5096_p8  ;;  %p4556_p12 = por %p4555_p11, %p4554_p10 }
  0x99   : > { %p4550_p9 = pneg %p4549_p7 }
  0x9b   : > { %p4557_p4 = pnand %p4556_p12, %p4550_p9 }
  0x9d   : > { %4560 = shalt.err (!%p4557_p4)
}
  0x9e   : > { %4115 = dma.hbm_to_vmem [thread:$0]  (!%p5082_p6), %s6009_s11, 32, %s620_s29, [#allocation18], %s6034_s12, %s6034_s12, %s6036_s2  }
  0x9f   : > { %s4920_s30 = smov [#allocation20]   ;;  %s4921_s1 = smov [#allocation7]  }
  0xa0   : > { %s648_s5 = sshll.u32 %s4920_s30, 4  ;;  %s528_s3 = sshll.u32 %s4921_s1, 4  ;;  %s649_s5 = int_to_ptr.vmem [resolvable:$true] %s648_s5  ;;  %s529_s3 = int_to_ptr.vmem [resolvable:$true] %s528_s3 }
  0xa1   : > { %s4561_s20 = scalar_lea.hbm %s6012_s14, 32 }
  0xa2   : > { %p4562_p1 = scmp.ne.s32.totalorder %s6012_s14, %s4561_s20  ;;  %p4568_p0 = scmp.lt.u32.totalorder %s4561_s20, %s6012_s14 }
  0xa4   : > { %p4564_p3 = pnand %p4562_p1, %p5096_p8 }
  0xa6   : > { %p4565_p13 = pneg %p4564_p3 }
  0xa8   : > { %p4570_p2 = pnand %p4568_p0, %p4565_p13 }
  0xaa   : > { %4573 = shalt.err (!%p4570_p2)
}
  0xab   : > { %s4574_s29 = scalar_lea.vmem %s649_s5, 32  ;;  %p4582_p10 = scmp.lt.s32.totalorder %s649_s5, %s649_s5 }
  0xac   : > { %p4575_p5 = scmp.ne.s32.totalorder %s649_s5, %s4574_s29  ;;  %p4583_p11 = scmp.lt.s32.totalorder %s4574_s29, %s4574_s29 }
  0xae   : > { %p4577_p7 = pnand %p4575_p5, %p5096_p8  ;;  %p4584_p12 = por %p4583_p11, %p4582_p10 }
  0xb0   : > { %p4578_p9 = pneg %p4577_p7 }
  0xb2   : > { %p4585_p4 = pnand %p4584_p12, %p4578_p9 }
  0xb4   : > { %4588 = shalt.err (!%p4585_p4)
}
  0xb5   : > { %4121 = dma.hbm_to_vmem [thread:$0]  (!%p5082_p6), %s6012_s14, 32, %s649_s5, [#allocation21], %s6034_s12, %s6034_s12, %s6036_s2  }
  0xb6   : > { %s6069_s26 = sld [smem:[#allocation41_spill]] }
  0xbc   : > { %s4589_s16 = scalar_lea.hbm %s6069_s26, 16 }
  0xbd   : > { %p4590_p1 = scmp.ne.s32.totalorder %s6069_s26, %s4589_s16  ;;  %p4596_p0 = scmp.lt.u32.totalorder %s4589_s16, %s6069_s26 }
  0xbf   : > { %p4592_p3 = pnand %p4590_p1, %p5096_p8 }
  0xc1   : > { %p4593_p13 = pneg %p4592_p3 }
  0xc3   : > { %p4598_p2 = pnand %p4596_p0, %p4593_p13 }
  0xc5   : > { %4601 = shalt.err (!%p4598_p2)
}
  0xc6   : > { %s4602_s25 = scalar_lea.vmem %s529_s3, 16  ;;  %s4609_s5 = scalar_lea.vmem %s529_s3, 32 }
  0xc7   : > { %p4603_p5 = scmp.ne.s32.totalorder %s529_s3, %s4602_s25  ;;  %p4610_p10 = scmp.lt.s32.totalorder %s529_s3, %s529_s3 }
  0xc8   : > { %p4611_p11 = scmp.lt.s32.totalorder %s4609_s5, %s4602_s25 }
  0xc9   : > { %p4605_p7 = pnand %p4603_p5, %p5096_p8 }
  0xca   : > { %p4612_p12 = por %p4611_p11, %p4610_p10 }
  0xcb   : > { %p4606_p9 = pneg %p4605_p7 }
  0xcd   : > { %p4613_p4 = pnand %p4612_p12, %p4606_p9 }
  0xcf   : > { %4616 = shalt.err (!%p4613_p4)
}
  0xd0   : > { %4094 = dma.hbm_to_vmem [thread:$0]  (!%p5082_p6), %s6069_s26, 16, %s529_s3, [#allocation6]  }
  0xd1   : > { %s4922_s28 = smov [#allocation10]   ;;  %s6070_s6 = sld [smem:[#allocation44_spill]] }
  0xd2   : > { %s554_s30 = sshll.u32 %s4922_s28, 4  ;;  %s555_s30 = int_to_ptr.vmem [resolvable:$true] %s554_s30 }
  0xd7   : > { %s4617_s20 = scalar_lea.hbm %s6070_s6, 1024 }
  0xd8   : > { %p4618_p1 = scmp.ne.s32.totalorder %s6070_s6, %s4617_s20  ;;  %p4624_p0 = scmp.lt.u32.totalorder %s4617_s20, %s6070_s6 }
  0xda   : > { %p4620_p3 = pnand %p4618_p1, %p5096_p8 }
  0xdc   : > { %p4621_p13 = pneg %p4620_p3 }
  0xde   : > { %p4626_p2 = pnand %p4624_p0, %p4621_p13 }
  0xe0   : > { %4629 = shalt.err (!%p4626_p2)
}
  0xe1   : > { %s4630_s3 = scalar_lea.vmem %s555_s30, 1024  ;;  %p4638_p10 = scmp.lt.s32.totalorder %s555_s30, %s555_s30 }
  0xe2   : > { %p4631_p5 = scmp.ne.s32.totalorder %s555_s30, %s4630_s3  ;;  %p4639_p11 = scmp.lt.s32.totalorder %s4630_s3, %s4630_s3 }
  0xe4   : > { %p4633_p7 = pnand %p4631_p5, %p5096_p8  ;;  %p4640_p12 = por %p4639_p11, %p4638_p10 }
  0xe6   : > { %p4634_p9 = pneg %p4633_p7 }
  0xe8   : > { %p4641_p4 = pnand %p4640_p12, %p4634_p9 }
  0xea   : > { %4644 = shalt.err (!%p4641_p4)
}
  0xeb   : > { %s4923_s5 = smov 64   ;;  %s4924_s29 = smov 4  }
  0xec   : > { %4100 = dma.hbm_to_vmem [thread:$0]  (!%p5082_p6), %s6070_s6, 1024, %s555_s30, [#allocation9], %s4923_s5, %s4923_s5, %s4924_s29  }
  0xed   : > { %s4925_s1 = smov [#allocation13]   ;;  %s4926_s20 = smov [#allocation16]  }
  0xee   : > { %s580_s16 = sshll.u32 %s4925_s1, 4  ;;  %s606_s21 = sshll.u32 %s4926_s20, 4  ;;  %s581_s16 = int_to_ptr.vmem [resolvable:$true] %s580_s16  ;;  %s5269_s21 = int_to_ptr.vmem [resolvable:$true] %s606_s21 }
  0xef   : > { %s4645_s25 = scalar_lea.hbm %s6006_s8, 32 }
  0xf0   : > { %p4646_p1 = scmp.ne.s32.totalorder %s6006_s8, %s4645_s25  ;;  %p4652_p0 = scmp.lt.u32.totalorder %s4645_s25, %s6006_s8 }
  0xf2   : > { %p4648_p3 = pnand %p4646_p1, %p5096_p8 }
  0xf4   : > { %p4649_p13 = pneg %p4648_p3 }
  0xf6   : > { %p4654_p2 = pnand %p4652_p0, %p4649_p13 }
  0xf8   : > { %4657 = shalt.err (!%p4654_p2)
}
  0xf9   : > { %s4658_s28 = scalar_lea.vmem %s581_s16, 32  ;;  %p4666_p10 = scmp.lt.s32.totalorder %s581_s16, %s581_s16 }
  0xfa   : > { %p4659_p5 = scmp.ne.s32.totalorder %s581_s16, %s4658_s28  ;;  %p4667_p11 = scmp.lt.s32.totalorder %s4658_s28, %s4658_s28 }
  0xfc   : > { %p4661_p7 = pnand %p4659_p5, %p5096_p8  ;;  %p4668_p12 = por %p4667_p11, %p4666_p10 }
  0xfe   : > { %p4662_p9 = pneg %p4661_p7 }
 0x100   : > { %p4669_p4 = pnand %p4668_p12, %p4662_p9 }
 0x102   : > { %4672 = shalt.err (!%p4669_p4)
}
 0x103   : > { %s6071_s12 = smov 16   ;;  %s4673_s25 = scalar_lea.hbm %s6008_s10, 1024 }
 0x104   : > { %4106 = dma.hbm_to_vmem [thread:$0]  (!%p5082_p6), %s6006_s8, 32, %s581_s16, [#allocation12], %s6071_s12, %s6071_s12, %s6036_s2  }
 0x105   : > { %p4674_p1 = scmp.ne.s32.totalorder %s6008_s10, %s4673_s25  ;;  %p4680_p0 = scmp.lt.u32.totalorder %s4673_s25, %s6008_s10 }
 0x107   : > { %p4676_p3 = pnand %p4674_p1, %p5096_p8 }
 0x109   : > { %p4677_p13 = pneg %p4676_p3 }
 0x10b   : > { %p4682_p2 = pnand %p4680_p0, %p4677_p13 }
 0x10d   : > { %4685 = shalt.err (!%p4682_p2)
}
 0x10e   : > { %s4686_s16 = scalar_lea.vmem %s5269_s21, 1024  ;;  %p4694_p10 = scmp.lt.s32.totalorder %s5269_s21, %s5269_s21 }
 0x10f   : > { %p4687_p5 = scmp.ne.s32.totalorder %s5269_s21, %s4686_s16  ;;  %p4695_p11 = scmp.lt.s32.totalorder %s4686_s16, %s4686_s16 }
 0x111   : > { %p4689_p7 = pnand %p4687_p5, %p5096_p8  ;;  %p4696_p12 = por %p4695_p11, %p4694_p10 }
 0x113   : > { %p4690_p9 = pneg %p4689_p7 }
 0x115   : > { %p4697_p4 = pnand %p4696_p12, %p4690_p9 }
 0x117   : > { %4700 = shalt.err (!%p4697_p4)
}
 0x118   : > { %4112 = dma.hbm_to_vmem [thread:$0]  (!%p5082_p6), %s6008_s10, 1024, %s5269_s21, [#allocation15], %s4923_s5, %s4923_s5, %s4924_s29  }
 0x119   : > { %s4927_s18 = smov [#allocation19]   ;;  %s4928_s25 = smov [#allocation22]  }
 0x11a   : > { %s635_s19 = sshll.u32 %s4927_s18, 4  ;;  %s661_s3 = sshll.u32 %s4928_s25, 4  ;;  %s636_s19 = int_to_ptr.vmem [resolvable:$true] %s635_s19  ;;  %s5318_s3 = int_to_ptr.vmem [resolvable:$true] %s661_s3 }
 0x11b   : > { %s4701_s28 = scalar_lea.hbm %s6011_s13, 32 }
 0x11c   : > { %p4702_p1 = scmp.ne.s32.totalorder %s6011_s13, %s4701_s28  ;;  %p4708_p0 = scmp.lt.u32.totalorder %s4701_s28, %s6011_s13 }
 0x11e   : > { %p4704_p3 = pnand %p4702_p1, %p5096_p8 }
 0x120   : > { %p4705_p13 = pneg %p4704_p3 }
 0x122   : > { %p4710_p2 = pnand %p4708_p0, %p4705_p13 }
 0x124   : > { %4713 = shalt.err (!%p4710_p2)
}
 0x125   : > { %s4714_s29 = scalar_lea.vmem %s636_s19, 32  ;;  %p4722_p10 = scmp.lt.s32.totalorder %s636_s19, %s636_s19 }
 0x126   : > { %p4715_p5 = scmp.ne.s32.totalorder %s636_s19, %s4714_s29  ;;  %p4723_p11 = scmp.lt.s32.totalorder %s4714_s29, %s4714_s29 }
 0x128   : > { %p4717_p7 = pnand %p4715_p5, %p5096_p8  ;;  %p4724_p12 = por %p4723_p11, %p4722_p10 }
 0x12a   : > { %p4718_p9 = pneg %p4717_p7 }
 0x12c   : > { %p4725_p4 = pnand %p4724_p12, %p4718_p9 }
 0x12e   : > { %4728 = shalt.err (!%p4725_p4)
}
 0x12f   : > { %s6072_s2 = smov 1   ;;  %s4729_s0 = scalar_lea.hbm %s6013_s15, 32 }
 0x130   : > { %4118 = dma.hbm_to_vmem [thread:$0]  (!%p5082_p6), %s6011_s13, 32, %s636_s19, [#allocation18], %s6071_s12, %s6071_s12, %s6072_s2  }
 0x131   : > { %p4730_p1 = scmp.ne.s32.totalorder %s6013_s15, %s4729_s0  ;;  %p4736_p0 = scmp.lt.u32.totalorder %s4729_s0, %s6013_s15 }
 0x133   : > { %p4732_p3 = pnand %p4730_p1, %p5096_p8 }
 0x135   : > { %p4733_p13 = pneg %p4732_p3 }
 0x137   : > { %p4738_p2 = pnand %p4736_p0, %p4733_p13 }
 0x139   : > { %4741 = shalt.err (!%p4738_p2)
}
 0x13a   : > { %s4742_s19 = scalar_lea.vmem %s5318_s3, 32  ;;  %p4750_p10 = scmp.lt.s32.totalorder %s5318_s3, %s5318_s3 }
 0x13b   : > { %p4743_p5 = scmp.ne.s32.totalorder %s5318_s3, %s4742_s19  ;;  %p4751_p11 = scmp.lt.s32.totalorder %s4742_s19, %s4742_s19 }
 0x13d   : > { %p4745_p7 = pnand %p4743_p5, %p5096_p8  ;;  %p4752_p12 = por %p4751_p11, %p4750_p10 }
 0x13f   : > { %p4746_p9 = pneg %p4745_p7 }
 0x141   : > { %p4753_p4 = pnand %p4752_p12, %p4746_p9 }
 0x143   : > { %4756 = shalt.err (!%p4753_p4)
}
 0x144   : > { %4124 = dma.hbm_to_vmem [thread:$0]  (!%p5082_p6), %s6013_s15, 32, %s5318_s3, [#allocation21], %s6071_s12, %s6071_s12, %s6072_s2  }
 0x145   : > { %s4929_s21 = smov [#allocation23]   ;;  %s4757_s0 = scalar_lea.hbm %s6015_s17, 16 }
 0x146   : > { %s678_s20 = sshll.u32 %s4929_s21, 4  ;;  %p4758_p1 = scmp.ne.s32.totalorder %s6015_s17, %s4757_s0  ;;  %s679_s20 = int_to_ptr.vmem [resolvable:$true] %s678_s20 }
 0x147   : > { %p4764_p0 = scmp.lt.u32.totalorder %s4757_s0, %s6015_s17 }
 0x148   : > { %p4760_p3 = pnand %p4758_p1, %p5096_p8 }
 0x14a   : > { %p4761_p13 = pneg %p4760_p3 }
 0x14c   : > { %p4766_p2 = pnand %p4764_p0, %p4761_p13 }
 0x14e   : > { %4769 = shalt.err (!%p4766_p2)
}
 0x14f   : > { %s4770_s12 = scalar_lea.vmem %s679_s20, 16  ;;  %s4777_s3 = scalar_lea.vmem %s679_s20, 32 }
 0x150   : > { %p4771_p5 = scmp.ne.s32.totalorder %s679_s20, %s4770_s12  ;;  %p4778_p10 = scmp.lt.s32.totalorder %s679_s20, %s679_s20 }
 0x151   : > { %p4779_p11 = scmp.lt.s32.totalorder %s4777_s3, %s4770_s12 }
 0x152   : > { %p4773_p7 = pnand %p4771_p5, %p5096_p8 }
 0x153   : > { %p4780_p12 = por %p4779_p11, %p4778_p10 }
 0x154   : > { %p4774_p9 = pneg %p4773_p7 }
 0x156   : > { %p4781_p4 = pnand %p4780_p12, %p4774_p9 }
 0x158   : > { %4784 = shalt.err (!%p4781_p4)
}
 0x159   : > { %s6073_s27 = sld [smem:[#allocation35_spill]]  ;;  %s6074_s5 = sld [smem:[#allocation36_spill]] }
 0x15a   : > { %4127 = dma.hbm_to_vmem [thread:$0]  (!%p5082_p6), %s6015_s17, 16, %s679_s20, [#allocation24]  }
 0x15b   : > { %s3569_s29 = sadd.s32 4294967294, %s4909_s24   ;;  %s5387_s4 = sadd.s32 1, %s4909_s24  }
 0x15c   : > { %s76_s21 = sadd.s32 1, %s4905_s23  ;;  %s73_s18 = ssub.s32 %s4909_s24, %s5387_s4 }
 0x15d   : > { %p83_p8 = scmp.ne.s32.totalorder %s4905_s23, %s4901_s22  ;;  %p74_p1 = scmp.eq.s32.totalorder %s73_s18, 0 }
 0x15e   : > { %p84_p3 = scmp.eq.s32.totalorder %s4909_s24, 0  ;;  %p497_p9 = scmp.eq.s32.totalorder %s3569_s29, 1 }
 0x15f   : > { %p89_p13 = scmp.ne.s32.totalorder %s4901_s22, %s6073_s27  ;;  %p491_p0 = scmp.eq.s32.totalorder %s6074_s5, 1 }
 0x160   : > { %s5399_s25 = scalar_select %p74_p1, %s4905_s23, %s76_s21  }
 0x161   : > { %p85_p2 = por %p84_p3, %p83_p8  ;;  %p6075_p5 = scmp.eq.s32.totalorder %s6074_s5, 0 }
 0x162   : > { %p5407_p6 = por %p491_p0, %p83_p8  ;;  %p4149_p10 = scmp.lt.s32.totalorder %s4909_s24, 2 }
 0x163   : > { %p5403_p7 = por %p6075_p5, %p89_p13  ;;  %s703_s30 = sand.u32 1, %s4905_s23  }
 0x164   : > { %s6077_s20 = scalar_select %p5407_p6, 1, 0 }
 0x165   : > { %p5413_p11 = por %p497_p9, %p89_p13  ;;  %s3585_s16 = sshll.u32 %s703_s30, 1 }
 0x166   : > { %s3586_s1 = sshll.u32 %s4909_s24, 5  ;;  %s6079_s2 = sld [smem:[#allocation39_spill]] }
 0x167   : > { %s6078_s28 = scalar_select %p5413_p11, 1, 0 }
 0x168   : > { %s707_s27 = scalar_lea.vmem [#allocation2], %s3585_s16  ;;  %p5423_p12 = pnand %p4149_p10, %p85_p2 }
 0x169   : > { %s714_s5 = sshll.u32 %s707_s27, 4  ;;  %s704_s21 = scalar_lea.sflag [#allocation3], %s703_s30  ;;  %s5427_s5 = int_to_ptr.vmem [resolvable:$true] %s714_s5 }
 0x16a   : > { %p4787_p8 = pneg %p5423_p12 }
 0x16c   : > { %s5421_s19 = scalar_lea.hbm %s6079_s2, %s3586_s1  ;;  %s4790_s12 = scalar_lea.hbm %s6079_s2, 64 }
 0x16d   : > { %s4785_s18 = scalar_lea.hbm %s5421_s19, 32  ;;  %p4791_p13 = scmp.lt.u32.totalorder %s5421_s19, %s6079_s2 }
 0x16e   : > { %p4786_p4 = scmp.ne.s32.totalorder %s5421_s19, %s4785_s18  ;;  %p4792_p0 = scmp.lt.u32.totalorder %s4790_s12, %s4785_s18 }
 0x16f   : > { %p4794_p5 = scmp.lt.u32.totalorder %s4785_s18, %s5421_s19 }
 0x170   : > { %p4788_p1 = pnand %p4787_p8, %p4786_p4  ;;  %p4793_p2 = por %p4792_p0, %p4791_p13 }
 0x172   : > { %p4789_p3 = pneg %p4788_p1  ;;  %p4795_p9 = por %p4794_p5, %p4793_p2 }
 0x174   : > { %p4796_p10 = pnand %p4795_p9, %p4789_p3 }
 0x176   : > { %4799 = shalt.err (!%p4796_p10)
}
 0x177   : > { %s4800_s30 = scalar_lea.vmem %s5427_s5, 32  ;;  %s4930_s1 = smov [#allocation2]  }
 0x178   : > { %p4801_p4 = scmp.ne.s32.totalorder %s5427_s5, %s4800_s30  ;;  %s4805_s16 = sshll.u32 %s4930_s1, 4  ;;  %s4806_s16 = int_to_ptr.vmem [resolvable:$false] %s4805_s16 }
 0x179   : > { %s4807_s3 = scalar_lea.vmem %s4806_s16, 64  ;;  %p4808_p6 = scmp.lt.s32.totalorder %s5427_s5, %s4806_s16 }
 0x17a   : > { %p4803_p1 = pnand %p4801_p4, %p4787_p8  ;;  %p4809_p13 = scmp.lt.s32.totalorder %s4807_s3, %s4800_s30 }
 0x17c   : > { %p4804_p11 = pneg %p4803_p1  ;;  %p4810_p0 = por %p4809_p13, %p4808_p6 }
 0x17e   : > { %p4811_p2 = pnand %p4810_p0, %p4804_p11 }
 0x180   : > { %4814 = shalt.err (!%p4811_p2)
}
 0x181   : > { %4131 = dma.hbm_to_vmem [thread:$0]  (!%p5423_p12), %s5421_s19, 32, %s5427_s5, %s704_s21  }
 0x182   : > { %s6081_s18 = sld [smem:[#allocation37_spill]] }
 0x188   : > { %p6082_p3 = scmp.ne.s32.totalorder %s6081_s18, 0 }
 0x189   : > { %s5457_s12 = sand.u32 (!%p6082_p3), 1, %s4901_s22  }
 0x18a   : > { %723 = sbr.rel (%p6082_p3) target bundleno = 6855 (0x1ac7), region = 100  ;;  %s6039_s27 = sshll.u32 (!%p6082_p3), %s5457_s12, 1 }
 0x18b   : > { %s726_s30 = scalar_lea.sflag (!%p6082_p3), [#allocation3], %s5457_s12  ;;  %s5463_s1 = scalar_lea.vmem (!%p6082_p3), [#allocation2], %s6039_s27 }
 0x191   : > { %4860 = dma.done.wait (%p5403_p7), %s726_s30, 32  }
 0x192   : > { %4862 = vsyncadd (%p5403_p7), %s726_s30, 4294967264  ;;  %s6083_s19 = sld [smem:[#allocation36_spill]] }
 0x198   : > { %p6084_p6 = scmp.eq.s32.totalorder %s6083_s19, 0 }
 0x19a   : > { %4864 = dma.done.wait (%p6084_p6), [#allocation6], 32   ;;  %p6085_p11 = pmov %p6084_p6 }
 0x19b   : > { %p6086_p12 = pmov %p6084_p6 }
 0x19c   : > { %4866 = vsyncadd (%p6085_p11), [#allocation6], 4294967264 }
 0x19d   : > { %4868 = dma.done.wait (%p6086_p12), [#allocation9], 1088   ;;  %p6087_p8 = pmov %p6084_p6 }
 0x19e   : > { %p6088_p5 = pmov %p6084_p6 }
 0x19f   : > { %4870 = vsyncadd (%p6087_p8), [#allocation9], 4294966208 }
 0x1a0   : > { %4872 = dma.done.wait (%p6088_p5), [#allocation12], 64   ;;  %p6089_p9 = pmov %p6088_p5 }
 0x1a1   : > { %p6090_p7 = pmov %p6088_p5 }
 0x1a2   : > { %4874 = vsyncadd (%p6089_p9), [#allocation12], 4294967232 }
 0x1a3   : > { %4876 = dma.done.wait (%p6090_p7), [#allocation15], 1056   ;;  %p6091_p10 = pmov %p6088_p5 }
 0x1a4   : > { %p6092_p4 = pmov %p6088_p5 }
 0x1a5   : > { %4878 = vsyncadd (%p6091_p10), [#allocation15], 4294966240 }
 0x1a6   : > { %4880 = dma.done.wait (%p6092_p4), [#allocation18], 64   ;;  %p6093_p1 = pmov %p6092_p4 }
 0x1a8   : > { %4882 = vsyncadd (%p6093_p1), [#allocation18], 4294967232  ;;  %p6094_p13 = pmov %p6093_p1 }
 0x1a9   : > { %p6095_p0 = pmov %p6093_p1 }
 0x1aa   : > { %4884 = dma.done.wait (%p6094_p13), [#allocation21], 64  }
 0x1ab   : > { %4886 = vsyncadd (%p6095_p0), [#allocation21], 4294967232  ;;  %p6096_p2 = pmov %p6095_p0 }
 0x1ac   : > { %p6097_p3 = pmov %p6095_p0 }
 0x1ad   : > { %4888 = dma.done.wait (%p6096_p2), [#allocation24], 16  }
 0x1ae   : > { %4890 = vsyncadd (%p6097_p3), [#allocation24], 4294967280  ;;  %p843_p6 = scmp.lt.s32.totalorder %s6083_s19, 1  ;;  %s6098_s16 = sld [smem:[#allocation38_spill]]  ;;  %vm856_vm0 = vcmask 523264   ;;  %v4931_v22 = vmov 0   ;;  %v942_v54 = vlaneseq }
 0x1af   : > { %1030 = vmatprep.mubr.bf16.mxu0 %v4931_v22  ;;  %v3605_v35 = vld [vmem:[#allocation5] ss:$0 sm:$0xff]  ;;  %v3606_v39 = vld [vmem:[#allocation7] ss:$0 sm:$0xff]  ;;  %v4932_v56 = vmov 0.0   ;;  %vm4933_vm1 = vmmov 0  }
 0x1b0   : > { %s844_s0 = scalar_select %p843_p6, %s6083_s19, 1  ;;  %v943_v55 = vshrl.u32 %v942_v54, 7  ;;  %3824 = vmatprep.subr.bf16.mxu1 %v4932_v56  ;;  %v940_v58 = vld [vmem:[#allocation8] sm:$0x3]  ;;  %3826 = vmatprep.mubr.msk.bf16.mxu1 %vm4933_vm1, %v4932_v56  ;;  %vm1062_vm2 = vcmask 261120   ;;  %vm1110_vm3 = vcmask 130048  }
 0x1b1   : > { %s6043_s6 = smov 64   ;;  %s4935_s7 = smov 32   ;;  %vm3179_vm4 = vcmask 1040384  }
 0x1b2   : > { %s3737_s5 = sshll.u32 %s844_s0, 5  ;;  %s6099_s0 = sld [smem:[#allocation42_spill]]  ;;  %v5551_v57 = vsub.s32 0, %v943_v55  ;;  %v5553_v59 = vsub.s32 1, %v943_v55 }
 0x1b3   : > { %s6041_s2 = smov 96   ;;  %s6104_s18 = sld [smem:[#allocation48_spill]] }
 0x1b4   : > { %s5502_s3 = scalar_lea.vmem %s6098_s16, %s3737_s5  ;;  %v945_v60 = vrot.slane %v940_v58, %v5551_v57  ;;  %v949_v62 = vrot.slane %v940_v58, %v5553_v59  ;;  %s6103_s5 = sld [smem:[#allocation47_spill]] }
 0x1b5   : > { %v849_v0 = vld [vmem:[%s5502_s3] sm:$0xff]  ;;  %v850_v1 = vld [vmem:[%s5502_s3 + $0x8] sm:$0xff]  ;;  %v851_v23 = vld [vmem:[%s5502_s3 + $0x10] sm:$0xff]  ;;  %s3734_s30 = sshll.u32 %s6083_s19, 5  ;;  %s6106_s29 = sshll.u32 %s5457_s12, 1 }
 0x1b6   : > { %v857_v2 = vsel %vm856_vm0, %v849_v0, 0.0  ;;  %v860_v3 = vsel %vm856_vm0, %v850_v1, 0.0  ;;  %v852_v24 = vld [vmem:[%s5502_s3 + $0x18] sm:$0xff]  ;;  %v863_v25 = vsel %vm856_vm0, %v851_v23, 0.0  ;;  %s6100_s3 = sld [smem:[#allocation46_spill]]  ;;  %s3350_s19 = scalar_lea.sflag [#allocation4], %s5457_s12 }
 0x1b7   : > { %858 = vadd.xlane.f32.xlu0 %v857_v2  ;;  %v866_v26 = vsel %vm856_vm0, %v852_v24, 0.0  ;;  %p6108_p12 = scmp.ne.s32.totalorder %s6077_s20, 0  ;;  %s4937_s27 = smov [#allocation25]  }
 0x1b8   : > { %v4241_v14 = vld [vmem:[%s6099_s0 + $0x4] ss:$8 sps:$4 sm:$0xff]   ;;  %v4243_v15 = vld [vmem:[%s6099_s0] ss:$8 sps:$4 sm:$0xff]   ;;  %v4244_v16 = vld [vmem:[%s6099_s0 + $0x14] ss:$8 sps:$4 sm:$0xff]  }
 0x1b9   : > { %998 = vmatprep.subr.bf16.mxu0 %v4241_v14  ;;  %v4246_v17 = vld [vmem:[%s6099_s0 + $0x10] ss:$8 sps:$4 sm:$0xff]   ;;  %v4247_v18 = vld [vmem:[%s6099_s0 + $0x24] ss:$8 sps:$4 sm:$0xff]   ;;  %v4249_v19 = vld [vmem:[%s6099_s0 + $0x20] ss:$8 sps:$4 sm:$0xff]  }
 0x1ba   : > { %999 = vmatpush1.bf16.msra.mxu0 %v4243_v15  ;;  %v4250_v20 = vld [vmem:[%s6099_s0 + $0x34] ss:$8 sps:$4 sm:$0xff]   ;;  %v4252_v21 = vld [vmem:[%s6099_s0 + $0x30] ss:$8 sps:$4 sm:$0xff]  }
 0x1bb   : > { %861 = vadd.xlane.f32.xlu0 %v860_v3  ;;  %1000 = vmatprep.subr.bf16.mxu0 %v4244_v16 }
 0x1be   : > { %1001 = vmatpush1.bf16.msra.mxu0 %v4246_v17 }
 0x1bf   : > { %1002 = vmatprep.subr.bf16.mxu0 %v4247_v18 }
 0x1c2   : > { %1003 = vmatpush1.bf16.msra.mxu0 %v4249_v19 }
 0x1c3   : > { %1004 = vmatprep.subr.bf16.mxu0 %v4250_v20 }
 0x1c6   : > { %1005 = vmatpush1.bf16.msra.mxu0 %v4252_v21 }
 0x1c7   : > { %3842 = vmatprep.subr.bf16.mxu0 %v4932_v56 }
 0x244   : > { %v859_v4 = vpop.xlane.xlu0 %858 }
 0x245   : > { %v870_v5 = vmul.f32 0.015625, %v859_v4 }
 0x247   : > { %v874_v6 = vsub.f32 %v849_v0, %v870_v5 }
 0x248   : > { %v862_v7 = vpop.xlane.xlu0 %861 }
 0x249   : > { %v871_v8 = vmul.f32 0.015625, %v862_v7  ;;  %v878_v9 = vmul.f32 %v874_v6, %v874_v6 }
 0x24b   : > { %v875_v10 = vsub.f32 %v850_v1, %v871_v8  ;;  %v882_v11 = vsel %vm856_vm0, %v878_v9, 0.0 }
 0x24c   : > { %883 = vadd.xlane.f32.xlu1 %v882_v11 }
 0x24d   : > { %v879_v12 = vmul.f32 %v875_v10, %v875_v10 }
 0x24f   : > { %v885_v13 = vsel %vm856_vm0, %v879_v12, 0.0 }
 0x250   : > { %886 = vadd.xlane.f32.xlu1 %v885_v13 }
 0x254   : > { %864 = vadd.xlane.f32.xlu1 %v863_v25 }
 0x258   : > { %867 = vadd.xlane.f32.xlu1 %v866_v26 }
 0x2d9   : > { %v884_v27 = vpop.xlane.xlu1 %883 }
 0x2da   : > { %v894_v28 = vmul.f32 0.015625, %v884_v27 }
 0x2dc   : > { %v898_v29 = vadd.f32 1e-12, %v894_v28 }
 0x2dd   : > { %v887_v30 = vpop.xlane.xlu1 %886 }
 0x2de   : > { %4305 = vrsqrt.f32 %v898_v29  ;;  %v895_v31 = vmul.f32 0.015625, %v887_v30 }
 0x2e0   : > { %v899_v32 = vadd.f32 1e-12, %v895_v31 }
 0x2e1   : > { %v865_v44 = vpop.xlane.xlu1 %864 }
 0x2e2   : > { %4307 = vrsqrt.f32 %v899_v32  ;;  %v872_v45 = vmul.f32 0.015625, %v865_v44 }
 0x2e4   : > { %v876_v47 = vsub.f32 %v851_v23, %v872_v45 }
 0x2e5   : > { %v868_v46 = vpop.xlane.xlu1 %867 }
 0x2e6   : > { %v873_v48 = vmul.f32 0.015625, %v868_v46  ;;  %v880_v50 = vmul.f32 %v876_v47, %v876_v47 }
 0x2e8   : > { %v4306_v33 = vpop.eup %4305  ;;  %v877_v49 = vsub.f32 %v852_v24, %v873_v48  ;;  %v888_v51 = vsel %vm856_vm0, %v880_v50, 0.0 }
 0x2e9   : > { %v906_v34 = vmul.f32 %v4306_v33, %v874_v6  ;;  %889 = vadd.xlane.f32.xlu1 %v888_v51 }
 0x2ea   : > { %v881_v52 = vmul.f32 %v877_v49, %v877_v49 }
 0x2eb   : > { %v916_v38 = vmul.f32 %v3605_v35, %v906_v34 }
 0x2ec   : > { %v4308_v36 = vpop.eup %4307  ;;  %v891_v53 = vsel %vm856_vm0, %v881_v52, 0.0 }
 0x2ed   : > { %v907_v37 = vmul.f32 %v4308_v36, %v875_v10  ;;  %v5539_v41 = vadd.f32 %v3606_v39, %v916_v38  ;;  %892 = vadd.xlane.f32.xlu1 %v891_v53  ;;  %v5585_v36 = vld [vmem:[%s5463_s1] sm:$0x3]  ;;  %s6105_s1 = sld [smem:[#allocation49_spill]] }
 0x2ef   : > { %v917_v40 = vmul.f32 %v3605_v35, %v907_v37  ;;  %v5589_v37 = vrot.slane %v5585_v36, %v5551_v57 }
 0x2f1   : > { %v5541_v42 = vadd.f32 %v3606_v39, %v917_v40 }
 0x2f3   : > { %v930_v43 = vpack.c.bf16 %v5541_v42, %v5539_v41 }
 0x2f5   : > { %3615 = vmatmul.mubr.msk.bf16.vlgmr.msra.gmra.mrb[0].mxu0 %vm856_vm0, %v930_v43 }
 0x2f6   : > { %1040 = vmatprep.mubr.bf16.mxu0 %v4931_v22 }
 0x376   : > { %v890_v8 = vpop.xlane.xlu1 %889 }
 0x377   : > { %v896_v9 = vmul.f32 0.015625, %v890_v8 }
 0x379   : > { %v900_v10 = vadd.f32 1e-12, %v896_v9 }
 0x37a   : > { %v893_v11 = vpop.xlane.xlu1 %892 }
 0x37b   : > { %4309 = vrsqrt.f32 %v900_v10  ;;  %v897_v12 = vmul.f32 0.015625, %v893_v11 }
 0x37d   : > { %v901_v13 = vadd.f32 1e-12, %v897_v12 }
 0x37f   : > { %4311 = vrsqrt.f32 %v901_v13 }
 0x385   : > { %v4310_v14 = vpop.eup %4309 }
 0x386   : > { %v908_v15 = vmul.f32 %v4310_v14, %v876_v47 }
 0x388   : > { %v918_v16 = vmul.f32 %v3605_v35, %v908_v15 }
 0x389   : > { %v4312_v17 = vpop.eup %4311 }
 0x38a   : > { %v909_v18 = vmul.f32 %v4312_v17, %v877_v49  ;;  %v5565_v20 = vadd.f32 %v3606_v39, %v918_v16 }
 0x38c   : > { %v919_v19 = vmul.f32 %v3605_v35, %v909_v18 }
 0x38e   : > { %v5567_v21 = vadd.f32 %v3606_v39, %v919_v19 }
 0x390   : > { %v931_v23 = vpack.c.bf16 %v5567_v21, %v5565_v20 }
 0x392   : > { %3616 = vmatmul.mubr.msk.bf16.gmra.mrb[4].mxu0 %vm856_vm0, %v931_v23 }
 0x393   : > { %3844 = vmatprep.mubr.msk.bf16.mxu0 %vm4933_vm1, %v4932_v56 }
 0x3c8   : > { %v1032_v61 = vpop.f32.mrb[0].mxu0 }
 0x3c9   : > { %v1034_v63 = vpop.f32.mrb[1].mxu0  ;;  %v1033_v1 = vadd.f32 %v1032_v61, %v945_v60 }
 0x3ca   : > { %v1036_v0 = vpop.f32.mrb[2].mxu0  ;;  %v1035_v4 = vadd.f32 %v1034_v63, %v949_v62 }
 0x3cb   : > { %v1037_v2 = vadd.f32 %v1036_v0, %v945_v60  ;;  %v1038_v3 = vpop.f32.mrb[3].mxu0 }
 0x3cc   : > { %v1039_v5 = vadd.f32 %v1038_v3, %v949_v62 }
 0x3cd   : > { %v5559_v6 = vpack.c.bf16 %v1037_v2, %v1033_v1 }
 0x3ce   : > { %v5561_v7 = vpack.c.bf16 %v1039_v5, %v1035_v4 }
 0x3cf   : > { %1060 = vrot.lane.b32.xlu0 %v5559_v6, %s6043_s6 }
 0x441   : > { %v1061_v24 = vpop.permute.xlu0 %1060 }
 0x442   : > { %v1067_v25 = vsel %vm1062_vm2, %v1061_v24, 0 }
 0x443   : > { %3825 = vmatpush3.bf16.xpose.msra.mxu1 %v1067_v25 }
 0x444   : > { %3830 = vmatprep.subr.bf16.mxu1 %v4932_v56 }
 0x44a   : > { %3827 = vmatmul.mubr.msk.bf16.vlgmr.msra.gmra.mrb[0].mxu1 %vm1062_vm2, %v5559_v6 }
 0x44b   : > { %3831 = vmatpush3.bf16.msra.mxu1 %v5561_v7  ;;  %3832 = vmatprep.mubr.msk.bf16.mxu1 %vm4933_vm1, %v4932_v56 }
 0x44c   : > { %3836 = vmatprep.subr.bf16.mxu1 %v4932_v56 }
 0x465   : > { %v1042_v26 = vpop.f32.mrb[4].mxu0 }
 0x466   : > { %v1043_v27 = vadd.f32 %v1042_v26, %v945_v60  ;;  %v1044_v28 = vpop.f32.mrb[5].mxu0 }
 0x467   : > { %v1045_v29 = vadd.f32 %v1044_v28, %v949_v62  ;;  %v1046_v30 = vpop.f32.mrb[6].mxu0 }
 0x468   : > { %v1047_v31 = vadd.f32 %v1046_v30, %v945_v60  ;;  %v1048_v32 = vpop.f32.mrb[7].mxu0 }
 0x469   : > { %v1049_v33 = vadd.f32 %v1048_v32, %v949_v62 }
 0x46a   : > { %v1053_v34 = vpack.c.bf16 %v1047_v31, %v1043_v27  ;;  %v5628_v27 = vrot.slane %v5585_v36, %v5553_v59 }
 0x46b   : > { %v5582_v35 = vpack.c.bf16 %v1049_v33, %v1045_v29 }
 0x51d   : > { %v1103_v38 = vpop.f32.mrb[0].mxu1 }
 0x51e   : > { %v1104_v39 = vadd.f32 %v1103_v38, %v5589_v37  ;;  %v3828_v40 = vpop.f32.mrb[1].mxu1 }
 0x51f   : > { %v1106_v43 = vpop.f32.mrb[2].mxu1 }
 0x520   : > { %v1107_v44 = vadd.f32 %v1106_v43, %v5589_v37  ;;  %v3829_v45 = vpop.f32.mrb[3].mxu1  ;;  %v1111_v46 = vsel %vm1110_vm3, %v1104_v39, -inf }
 0x521   : > { %1112 = vmax.xlane.f32.xlu1 %v1111_v46 }
 0x522   : > { %v1114_v47 = vsel %vm1110_vm3, %v1107_v44, -inf }
 0x525   : > { %1115 = vmax.xlane.f32.xlu1 %v1114_v47 }
 0x536   : > { %1180 = vrot.lane.b32.xlu1 %v5559_v6, %s4935_s7 }
 0x5ae   : > { %v1113_v48 = vpop.xlane.xlu1 %1112 }
 0x5af   : > { %v1117_v49 = vsub.f32 %v1104_v39, %v1113_v48 }
 0x5b1   : > { %v1119_v50 = vmul.f32 1.442695, %v1117_v49 }
 0x5b2   : > { %v1116_v51 = vpop.xlane.xlu1 %1115 }
 0x5b3   : > { %4313 = vpow2.f32 %v1119_v50  ;;  %v1118_v52 = vsub.f32 %v1107_v44, %v1116_v51 }
 0x5b5   : > { %v1121_v53 = vmul.f32 1.442695, %v1118_v52 }
 0x5b6   : > { %v1181_v61 = vpop.permute.xlu1 %1180 }
 0x5b7   : > { %4315 = vpow2.f32 %v1121_v53  ;;  %v1186_v8 = vsel %vm1062_vm2, %v1181_v61, 0 }
 0x5bd   : > { %v4314_v54 = vpop.eup %4313 }
 0x5be   : > { %v1123_v55 = vsel %vm1110_vm3, %v4314_v54, 0.0 }
 0x5bf   : > { %1124 = vadd.xlane.f32.xlu0 %v1123_v55 }
 0x5c1   : > { %v4316_v58 = vpop.eup %4315 }
 0x5c2   : > { %v1126_v60 = vsel %vm1110_vm3, %v4316_v58, 0.0 }
 0x5c3   : > { %1127 = vadd.xlane.f32.xlu1 %v1126_v60 }
 0x5d4   : > { %1178 = vrot.lane.b32.xlu1 %v5559_v6, %s6041_s2 }
 0x5d5   : > { %1433 = vrot.lane.b32.xlu0 %v1053_v34, %s4935_s7 }
 0x5d8   : > { %1315 = vrot.lane.b32.xlu1 %v1053_v34, %s6043_s6  ;;  %s6101_s6 = smov 64  }
 0x5dc   : > { %1431 = vrot.lane.b32.xlu1 %v1053_v34, %s6041_s2 }
 0x64c   : > { %v1125_v62 = vpop.xlane.xlu0 %1124 }
 0x64d   : > { %4317 = vrcp.f32 %v1125_v62 }
 0x650   : > { %v1128_v63 = vpop.xlane.xlu1 %1127  ;;  %v1434_v10 = vpop.permute.xlu0 %1433 }
 0x651   : > { %4319 = vrcp.f32 %v1128_v63  ;;  %v1439_v11 = vsel %vm1062_vm2, %v1434_v10, 0 }
 0x654   : > { %v1179_v5 = vpop.permute.xlu1 %1178 }
 0x657   : > { %v4318_v0 = vpop.eup %4317 }
 0x658   : > { %v1131_v2 = vmul.f32 %v4318_v0, %v4314_v54  ;;  %v1316_v6 = vpop.permute.xlu1 %1315 }
 0x659   : > { %v1321_v9 = vsel %vm1062_vm2, %v1316_v6, 0 }
 0x65b   : > { %v4320_v1 = vpop.eup %4319 }
 0x65c   : > { %v1132_v3 = vmul.f32 %v4320_v1, %v4316_v58  ;;  %v1432_v12 = vpop.permute.xlu1 %1431 }
 0x65e   : > { %v1133_v4 = vpack.c.bf16 %v1132_v3, %v1131_v2 }
 0x660   : > { %3833 = vmatmul.mubr.msk.bf16.vlgmr.msra.gmra.mrb[4].mxu1 %vm1110_vm3, %v1133_v4 }
 0x661   : > { %3837 = vmatpush3.bf16.xpose.msra.mxu1 %v1186_v8  ;;  %3838 = vmatprep.mubr.msk.bf16.mxu1 %vm4933_vm1, %v4932_v56 }
 0x662   : > { %3848 = vmatprep.subr.bf16.mxu1 %v4932_v56 }
 0x668   : > { %3839 = vmatmul.mubr.msk.bf16.vlgmr.msra.gmra.mrb[8].mxu1 %vm1062_vm2, %v1179_v5 }
 0x669   : > { %3849 = vmatpush3.bf16.xpose.msra.mxu1 %v1321_v9  ;;  %3850 = vmatprep.mubr.msk.bf16.mxu1 %vm4933_vm1, %v4932_v56 }
 0x66a   : > { %3860 = vmatprep.subr.bf16.mxu1 %v4932_v56 }
 0x670   : > { %3851 = vmatmul.mubr.msk.bf16.vlgmr.msra.gmra.mrb[12].mxu1 %vm1062_vm2, %v1053_v34 }
 0x671   : > { %3861 = vmatpush3.bf16.xpose.msra.mxu1 %v1439_v11  ;;  %3862 = vmatprep.mubr.msk.bf16.mxu1 %vm4933_vm1, %v4932_v56 }
 0x678   : > { %3863 = vmatmul.mubr.msk.bf16.vlgmr.msra.gmra.mrb[16].mxu1 %vm1062_vm2, %v1432_v12 }
 0x733   : > { %v5619_v13 = vpop.f32.mrb[4].mxu1 }
 0x734   : > { %v3834_v14 = vpop.f32.mrb[5].mxu1 }
 0x735   : > { %v5621_v15 = vpop.f32.mrb[6].mxu1 }
 0x736   : > { %v3835_v16 = vpop.f32.mrb[7].mxu1 }
 0x73b   : > { %v1222_v17 = vpop.f32.mrb[8].mxu1 }
 0x73c   : > { %v1223_v18 = vadd.f32 %v1222_v17, %v5589_v37  ;;  %v3840_v19 = vpop.f32.mrb[9].mxu1 }
 0x73d   : > { %v1225_v23 = vpop.f32.mrb[10].mxu1 }
 0x73e   : > { %v1226_v24 = vadd.f32 %v1225_v23, %v5589_v37  ;;  %v3841_v25 = vpop.f32.mrb[11].mxu1  ;;  %v1229_v26 = vsel %vm1110_vm3, %v1223_v18, -inf }
 0x73f   : > { %1230 = vmax.xlane.f32.xlu1 %v1229_v26 }
 0x740   : > { %v1232_v28 = vsel %vm1110_vm3, %v1226_v24, -inf }
 0x741   : > { %1233 = vmax.xlane.f32.xlu0 %v1232_v28 }
 0x743   : > { %v1357_v29 = vpop.f32.mrb[12].mxu1 }
 0x744   : > { %v1358_v30 = vadd.f32 %v1357_v29, %v5628_v27  ;;  %v3852_v31 = vpop.f32.mrb[13].mxu1 }
 0x745   : > { %v1360_v32 = vpop.f32.mrb[14].mxu1 }
 0x746   : > { %v1361_v33 = vadd.f32 %v1360_v32, %v5628_v27  ;;  %v3853_v34 = vpop.f32.mrb[15].mxu1  ;;  %v1364_v38 = vsel %vm1110_vm3, %v1358_v30, -inf }
 0x747   : > { %1365 = vmax.xlane.f32.xlu1 %v1364_v38 }
 0x748   : > { %v1367_v39 = vsel %vm1110_vm3, %v1361_v33, -inf }
 0x74b   : > { %1368 = vmax.xlane.f32.xlu1 %v1367_v39  ;;  %v1475_v40 = vpop.f32.mrb[16].mxu1 }
 0x74c   : > { %v1476_v36 = vadd.f32 %v1475_v40, %v5628_v27  ;;  %v3864_v43 = vpop.f32.mrb[17].mxu1 }
 0x74d   : > { %v1478_v44 = vpop.f32.mrb[18].mxu1 }
 0x74e   : > { %v1479_v45 = vadd.f32 %v1478_v44, %v5628_v27  ;;  %v3865_v46 = vpop.f32.mrb[19].mxu1  ;;  %v1482_v47 = vsel %vm1110_vm3, %v1476_v36, -inf }
 0x74f   : > { %1483 = vmax.xlane.f32.xlu1 %v1482_v47 }
 0x750   : > { %v1485_v48 = vsel %vm1110_vm3, %v1479_v45, -inf }
 0x753   : > { %1486 = vmax.xlane.f32.xlu1 %v1485_v48 }
 0x7cc   : > { %v1231_v49 = vpop.xlane.xlu1 %1230 }
 0x7cd   : > { %v1235_v50 = vsub.f32 %v1223_v18, %v1231_v49 }
 0x7ce   : > { %v1234_v51 = vpop.xlane.xlu0 %1233 }
 0x7cf   : > { %v1237_v52 = vmul.f32 1.442695, %v1235_v50  ;;  %v1236_v53 = vsub.f32 %v1226_v24, %v1234_v51  ;;  %v4253_v50 = vld [vmem:[#allocation10] sm:$0xff]   ;;  %v4254_v51 = vld [vmem:[#allocation10 + $0x8] sm:$0xff]  }
 0x7d0   : > { %3872 = vmatprep.subr.bf16.mxu1 %v4253_v50 }
 0x7d1   : > { %4321 = vpow2.f32 %v1237_v52  ;;  %v1239_v54 = vmul.f32 1.442695, %v1236_v53  ;;  %3873 = vmatpush3.bf16.msra.mxu1 %v4253_v50  ;;  %v4255_v52 = vld [vmem:[#allocation10 + $0x10] sm:$0xff]  }
 0x7d2   : > { %3874 = vmatprep.subr.bf16.mxu1 %v4254_v51 }
 0x7d3   : > { %4323 = vpow2.f32 %v1239_v54 }
 0x7d4   : > { %v1366_v55 = vpop.xlane.xlu1 %1365 }
 0x7d5   : > { %v1370_v58 = vsub.f32 %v1358_v30, %v1366_v55  ;;  %3875 = vmatpush3.bf16.msra.mxu1 %v4254_v51 }
 0x7d6   : > { %3876 = vmatprep.subr.bf16.mxu1 %v4255_v52 }
 0x7d7   : > { %v1372_v60 = vmul.f32 1.442695, %v1370_v58 }
 0x7d8   : > { %v1369_v61 = vpop.xlane.xlu1 %1368 }
 0x7d9   : > { %4325 = vpow2.f32 %v1372_v60  ;;  %v1371_v62 = vsub.f32 %v1361_v33, %v1369_v61  ;;  %3877 = vmatpush3.bf16.msra.mxu1 %v4255_v52 }
 0x7db   : > { %v4322_v63 = vpop.eup %4321  ;;  %v1374_v0 = vmul.f32 1.442695, %v1371_v62  ;;  %v4256_v62 = vld [vmem:[#allocation10 + $0x18] sm:$0xff]  }
 0x7dc   : > { %v1484_v1 = vpop.xlane.xlu1 %1483  ;;  %v1241_v2 = vsel %vm1110_vm3, %v4322_v63, 0.0  ;;  %3878 = vmatprep.subr.bf16.mxu1 %v4256_v62 }
 0x7dd   : > { %v4324_v3 = vpop.eup %4323  ;;  %4327 = vpow2.f32 %v1374_v0  ;;  %v1488_v4 = vsub.f32 %v1476_v36, %v1484_v1  ;;  %1242 = vadd.xlane.f32.xlu0 %v1241_v2  ;;  %3879 = vmatpush3.bf16.msra.mxu1 %v4256_v62  ;;  %v4257_v62 = vld [vmem:[#allocation16] sm:$0xff]  }
 0x7de   : > { %v1244_v5 = vsel %vm1110_vm3, %v4324_v3, 0.0 }
 0x7df   : > { %v1490_v8 = vmul.f32 1.442695, %v1488_v4  ;;  %1245 = vadd.xlane.f32.xlu1 %v1244_v5 }
 0x7e0   : > { %v1487_v6 = vpop.xlane.xlu1 %1486 }
 0x7e1   : > { %4329 = vpow2.f32 %v1490_v8  ;;  %v1489_v9 = vsub.f32 %v1479_v45, %v1487_v6 }
 0x7e3   : > { %v4326_v10 = vpop.eup %4325  ;;  %v1492_v11 = vmul.f32 1.442695, %v1489_v9 }
 0x7e4   : > { %v1376_v12 = vsel %vm1110_vm3, %v4326_v10, 0.0 }
 0x7e5   : > { %4331 = vpow2.f32 %v1492_v11  ;;  %1377 = vadd.xlane.f32.xlu0 %v1376_v12 }
 0x7e7   : > { %v4328_v14 = vpop.eup %4327 }
 0x7e8   : > { %v1379_v16 = vsel %vm1110_vm3, %v4328_v14, 0.0 }
 0x7e9   : > { %1380 = vadd.xlane.f32.xlu1 %v1379_v16 }
 0x7eb   : > { %v4330_v17 = vpop.eup %4329 }
 0x7ec   : > { %v1494_v18 = vsel %vm1110_vm3, %v4330_v17, 0.0 }
 0x7ed   : > { %1495 = vadd.xlane.f32.xlu0 %v1494_v18 }
 0x7ef   : > { %v4332_v19 = vpop.eup %4331 }
 0x7f0   : > { %v1497_v23 = vsel %vm1110_vm3, %v4332_v19, 0.0 }
 0x7f1   : > { %1498 = vadd.xlane.f32.xlu1 %v1497_v23 }
 0x802   : > { %1506 = vrot.lane.b32.xlu1 %v5582_v35, %s6041_s2 }
 0x803   : > { %1253 = vrot.lane.b32.xlu0 %v5561_v7, %s6041_s2  ;;  %s6102_s2 = smov 96  }
 0x86a   : > { %v1243_v25 = vpop.xlane.xlu0 %1242 }
 0x86c   : > { %v1246_v24 = vpop.xlane.xlu1 %1245 }
 0x86d   : > { %4333 = vrcp.f32 %v1246_v24 }
 0x86e   : > { %4335 = vrcp.f32 %v1243_v25  ;;  %v3625_v25 = vld [vmem:[#allocation11] ss:$0 sm:$0xff] }
 0x872   : > { %v1378_v26 = vpop.xlane.xlu0 %1377 }
 0x876   : > { %v1381_v28 = vpop.xlane.xlu1 %1380 }
 0x877   : > { %4337 = vrcp.f32 %v1381_v28  ;;  %v4334_v29 = vpop.eup %4333 }
 0x878   : > { %4339 = vrcp.f32 %v1378_v26  ;;  %v4336_v31 = vpop.eup %4335  ;;  %v1250_v32 = vmul.f32 %v4334_v29, %v4324_v3 }
 0x879   : > { %v1249_v33 = vmul.f32 %v4336_v31, %v4322_v63 }
 0x87a   : > { %v1496_v30 = vpop.xlane.xlu0 %1495 }
 0x87b   : > { %v1251_v39 = vpack.c.bf16 %v1250_v32, %v1249_v33 }
 0x87e   : > { %v1254_v34 = vpop.permute.xlu0 %1253  ;;  %v1499_v38 = vpop.xlane.xlu1 %1498 }
 0x87f   : > { %4341 = vrcp.f32 %v1499_v38  ;;  %3843 = vmatpush3.bf16.msra.mxu0 %v1254_v34 }
 0x880   : > { %3854 = vmatprep.subr.bf16.mxu0 %v4932_v56  ;;  %4343 = vrcp.f32 %v1496_v30 }
 0x881   : > { %v4338_v7 = vpop.eup %4337 }
 0x882   : > { %3845 = vmatmul.mubr.msk.bf16.vlgmr.msra.gmra.mrb[8].mxu0 %vm1110_vm3, %v1251_v39  ;;  %v4340_v40 = vpop.eup %4339  ;;  %v1385_v36 = vmul.f32 %v4338_v7, %v4328_v14  ;;  %v1507_v46 = vpop.permute.xlu1 %1506 }
 0x883   : > { %3855 = vmatpush3.bf16.msra.mxu0 %v5582_v35  ;;  %3856 = vmatprep.mubr.msk.bf16.mxu0 %vm4933_vm1, %v4932_v56  ;;  %v1384_v43 = vmul.f32 %v4340_v40, %v4326_v10 }
 0x884   : > { %3866 = vmatprep.subr.bf16.mxu0 %v4932_v56 }
 0x885   : > { %v1386_v44 = vpack.c.bf16 %v1385_v36, %v1384_v43 }
 0x889   : > { %v4342_v45 = vpop.eup %4341 }
 0x88a   : > { %3857 = vmatmul.mubr.msk.bf16.vlgmr.msra.gmra.mrb[12].mxu0 %vm1110_vm3, %v1386_v44  ;;  %v4344_v47 = vpop.eup %4343  ;;  %v1503_v48 = vmul.f32 %v4342_v45, %v4332_v19 }
 0x88b   : > { %3867 = vmatpush3.bf16.msra.mxu0 %v1507_v46  ;;  %3868 = vmatprep.mubr.msk.bf16.mxu0 %vm4933_vm1, %v4932_v56  ;;  %v1502_v49 = vmul.f32 %v4344_v47, %v4330_v17 }
 0x88c   : > { %3884 = vmatprep.subr.bf16.mxu0 %v4257_v62 }
 0x88d   : > { %v1504_v35 = vpack.c.bf16 %v1503_v48, %v1502_v49 }
 0x892   : > { %3869 = vmatmul.mubr.msk.bf16.vlgmr.msra.gmra.mrb[16].mxu0 %vm1110_vm3, %v1504_v35 }
 0x893   : > { %3885 = vmatpush3.bf16.msra.mxu0 %v4257_v62 }
 0x955   : > { %v1293_v53 = vpop.f32.mrb[8].mxu0 }
 0x956   : > { %v3846_v54 = vpop.f32.mrb[9].mxu0 }
 0x957   : > { %v1296_v55 = vpop.f32.mrb[10].mxu0 }
 0x958   : > { %v4221_v58 = vpack.i.bf16 %v1296_v55, %v1293_v53  ;;  %v3847_v60 = vpop.f32.mrb[11].mxu0 }
 0x95a   : > { %4222 = vrot.lane.b32.xlu1 %v4221_v58, %s4935_s7 }
 0x95d   : > { %v1424_v61 = vpop.f32.mrb[12].mxu0 }
 0x95e   : > { %v3858_v63 = vpop.f32.mrb[13].mxu0 }
 0x95f   : > { %v1427_v0 = vpop.f32.mrb[14].mxu0  ;;  %v4258_v63 = vld [vmem:[#allocation16 + $0x8] sm:$0xff]  }
 0x960   : > { %v3859_v1 = vpop.f32.mrb[15].mxu0  ;;  %3886 = vmatprep.subr.bf16.mxu0 %v4258_v63 }
 0x961   : > { %3887 = vmatpush3.bf16.msra.mxu0 %v4258_v63  ;;  %v4260_v1 = vld [vmem:[#allocation16 + $0x18] sm:$0xff]  }
 0x965   : > { %v1546_v2 = vpop.f32.mrb[16].mxu0 }
 0x966   : > { %v3870_v3 = vpop.f32.mrb[17].mxu0 }
 0x967   : > { %v1549_v4 = vpop.f32.mrb[18].mxu0 }
 0x968   : > { %v4226_v5 = vpack.i.bf16 %v1549_v4, %v1546_v2  ;;  %v3871_v8 = vpop.f32.mrb[19].mxu0 }
 0x96a   : > { %4227 = vrot.lane.b32.xlu0 %v4226_v5, %s4935_s7 }
 0x9cc   : > { %v4223_v6 = vpop.permute.xlu1 %4222 }
 0x9cd   : > { %v4225_v9 = vunpack.i.h.bf16 %v4223_v6  ;;  %v4224_v10 = vunpack.i.l.bf16 %v4223_v6 }
 0x9cf   : > { %v1309_v11 = vsel %vm1062_vm2, %v5621_v15, %v4225_v9  ;;  %v1308_v12 = vsel %vm1062_vm2, %v5619_v13, %v4224_v10 }
 0x9d0   : > { %v1563_v14 = vpack.c.bf16 %v1309_v11, %v1308_v12 }
 0x9d2   : > { %3880 = vmatprep.mubr.msk.bf16.mxu1 %vm856_vm0, %v1563_v14 }
 0x9dc   : > { %v4228_v16 = vpop.permute.xlu0 %4227 }
 0x9dd   : > { %v4230_v17 = vunpack.i.h.bf16 %v4228_v16  ;;  %v4229_v18 = vunpack.i.l.bf16 %v4228_v16 }
 0x9df   : > { %v1562_v19 = vsel %vm1062_vm2, %v1427_v0, %v4230_v17  ;;  %v1561_v23 = vsel %vm1062_vm2, %v1424_v61, %v4229_v18  ;;  %v4259_v0 = vld [vmem:[#allocation16 + $0x10] sm:$0xff]   ;;  %v3632_v18 = vld [vmem:[#allocation13] ss:$0 sm:$0xff] }
 0x9e0   : > { %v1564_v24 = vpack.c.bf16 %v1562_v19, %v1561_v23  ;;  %3888 = vmatprep.subr.bf16.mxu0 %v4259_v0 }
 0x9e1   : > { %3889 = vmatpush3.bf16.msra.mxu0 %v4259_v0 }
 0x9e2   : > { %3881 = vmatmul.mubr.msk.bf16.vlgmr.msra.gmra.mrb[20].mxu1 %vm856_vm0, %v1564_v24  ;;  %3890 = vmatprep.subr.bf16.mxu0 %v4260_v1 }
 0x9e5   : > { %3891 = vmatpush3.bf16.msra.mxu0 %v4260_v1 }
 0xab5   : > { %v3882_v26 = vpop.f32.mrb[20].mxu1 }
 0xab6   : > { %v1644_v28 = vpop.f32.mrb[21].mxu1  ;;  %v1653_v31 = vadd.f32 %v3882_v26, %v3625_v25  ;;  %v3633_v26 = vld [vmem:[#allocation14] ss:$0 sm:$0xff] }
 0xab7   : > { %v1645_v15 = vadd.f32 %v3625_v25, %v1644_v28  ;;  %v3883_v29 = vpop.f32.mrb[22].mxu1 }
 0xab8   : > { %v1656_v30 = vadd.f32 %v3883_v29, %v3625_v25  ;;  %v1647_v13 = vpop.f32.mrb[23].mxu1  ;;  %v1661_v40 = vadd.f32 %v1653_v31, %v5565_v20 }
 0xab9   : > { %v1648_v32 = vadd.f32 %v3625_v25, %v1647_v13  ;;  %v1659_v33 = vadd.f32 %v1645_v15, %v5539_v41 }
 0xaba   : > { %v1662_v39 = vadd.f32 %v1656_v30, %v5567_v21  ;;  %v1671_v43 = vsel %vm856_vm0, %v1661_v40, 0.0 }
 0xabb   : > { %v1665_v34 = vsel %vm856_vm0, %v1659_v33, 0.0  ;;  %v1660_v38 = vadd.f32 %v1648_v32, %v5541_v42 }
 0xabc   : > { %1666 = vadd.xlane.f32.xlu1 %v1665_v34  ;;  %v1674_v36 = vsel %vm856_vm0, %v1662_v39, 0.0 }
 0xabd   : > { %v1668_v7 = vsel %vm856_vm0, %v1660_v38, 0.0 }
 0xabe   : > { %1669 = vadd.xlane.f32.xlu0 %v1668_v7 }
 0xac0   : > { %1675 = vadd.xlane.f32.xlu1 %v1674_v36  ;;  %v4261_v36 = vld [vmem:[%s6100_s3] sm:$0xff]  }
 0xac1   : > { %3896 = vmatprep.subr.bf16.mxu1 %v4261_v36 }
 0xac2   : > { %1672 = vadd.xlane.f32.xlu0 %v1671_v43  ;;  %3897 = vmatpush3.bf16.msra.mxu1 %v4261_v36  ;;  %v4262_v43 = vld [vmem:[%s6100_s3 + $0x8] sm:$0xff]  }
 0xac3   : > { %3898 = vmatprep.subr.bf16.mxu1 %v4262_v43 }
 0xac6   : > { %3899 = vmatpush3.bf16.msra.mxu1 %v4262_v43  ;;  %v3641_v43 = vld [vmem:[#allocation19] ss:$0 sm:$0xff] }
 0xb49   : > { %v1667_v44 = vpop.xlane.xlu1 %1666 }
 0xb4a   : > { %v1677_v41 = vmul.f32 0.015625, %v1667_v44  ;;  %v4263_v44 = vld [vmem:[%s6100_s3 + $0x10] sm:$0xff]  }
 0xb4b   : > { %v1670_v45 = vpop.xlane.xlu0 %1669  ;;  %3900 = vmatprep.subr.bf16.mxu1 %v4263_v44 }
 0xb4c   : > { %v1681_v46 = vsub.f32 %v1659_v33, %v1677_v41  ;;  %v1678_v47 = vmul.f32 0.015625, %v1670_v45  ;;  %3901 = vmatpush3.bf16.msra.mxu1 %v4263_v44  ;;  %v4264_v41 = vld [vmem:[%s6100_s3 + $0x18] sm:$0xff]   ;;  %v4265_v45 = vld [vmem:[%s6100_s3 + $0x20] sm:$0xff]  }
 0xb4d   : > { %v1676_v42 = vpop.xlane.xlu1 %1675  ;;  %3902 = vmatprep.subr.bf16.mxu1 %v4264_v41 }
 0xb4e   : > { %v1682_v48 = vsub.f32 %v1660_v38, %v1678_v47  ;;  %v1680_v21 = vmul.f32 0.015625, %v1676_v42  ;;  %v1685_v49 = vmul.f32 %v1681_v46, %v1681_v46  ;;  %v4267_v47 = vld [vmem:[%s6100_s3 + $0x30] sm:$0xff]   ;;  %v4268_v42 = vld [vmem:[%s6100_s3 + $0x38] sm:$0xff]  }
 0xb4f   : > { %v1673_v35 = vpop.xlane.xlu0 %1672 }
 0xb50   : > { %v1684_v50 = vsub.f32 %v1662_v39, %v1680_v21  ;;  %v1679_v51 = vmul.f32 0.015625, %v1673_v35  ;;  %v1689_v20 = vsel %vm856_vm0, %v1685_v49, 0.0  ;;  %v1686_v52 = vmul.f32 %v1682_v48, %v1682_v48  ;;  %3903 = vmatpush3.bf16.msra.mxu1 %v4264_v41 }
 0xb51   : > { %1690 = vadd.xlane.f32.xlu0 %v1689_v20  ;;  %3904 = vmatprep.subr.bf16.mxu1 %v4265_v45 }
 0xb52   : > { %v1683_v53 = vsub.f32 %v1661_v40, %v1679_v51  ;;  %v1692_v54 = vsel %vm856_vm0, %v1686_v52, 0.0  ;;  %v1688_v55 = vmul.f32 %v1684_v50, %v1684_v50 }
 0xb53   : > { %1693 = vadd.xlane.f32.xlu1 %v1692_v54 }
 0xb54   : > { %v1687_v58 = vmul.f32 %v1683_v53, %v1683_v53  ;;  %v1698_v61 = vsel %vm856_vm0, %v1688_v55, 0.0  ;;  %3905 = vmatpush3.bf16.msra.mxu1 %v4265_v45 }
 0xb56   : > { %v1695_v60 = vsel %vm856_vm0, %v1687_v58, 0.0 }
 0xb57   : > { %1696 = vadd.xlane.f32.xlu0 %v1695_v60  ;;  %1699 = vadd.xlane.f32.xlu1 %v1698_v61 }
 0xbde   : > { %v1691_v2 = vpop.xlane.xlu0 %1690 }
 0xbdf   : > { %v1701_v3 = vmul.f32 0.015625, %v1691_v2 }
 0xbe0   : > { %v1694_v4 = vpop.xlane.xlu1 %1693 }
 0xbe1   : > { %v1705_v5 = vadd.f32 1e-12, %v1701_v3  ;;  %v1702_v8 = vmul.f32 0.015625, %v1694_v4 }
 0xbe3   : > { %4345 = vrsqrt.f32 %v1705_v5  ;;  %v1706_v6 = vadd.f32 1e-12, %v1702_v8 }
 0xbe4   : > { %v1697_v9 = vpop.xlane.xlu0 %1696  ;;  %v1700_v10 = vpop.xlane.xlu1 %1699 }
 0xbe5   : > { %4347 = vrsqrt.f32 %v1706_v6  ;;  %v1703_v11 = vmul.f32 0.015625, %v1697_v9  ;;  %v1704_v12 = vmul.f32 0.015625, %v1700_v10 }
 0xbe7   : > { %v1707_v14 = vadd.f32 1e-12, %v1703_v11  ;;  %v1708_v16 = vadd.f32 1e-12, %v1704_v12 }
 0xbe9   : > { %4349 = vrsqrt.f32 %v1707_v14 }
 0xbea   : > { %4351 = vrsqrt.f32 %v1708_v16 }
 0xbed   : > { %v4346_v17 = vpop.eup %4345 }
 0xbee   : > { %v1713_v19 = vmul.f32 %v4346_v17, %v1681_v46  ;;  %v4266_v46 = vld [vmem:[%s6100_s3 + $0x28] sm:$0xff]  }
 0xbef   : > { %v4348_v23 = vpop.eup %4347  ;;  %3906 = vmatprep.subr.bf16.mxu1 %v4266_v46 }
 0xbf0   : > { %v1714_v24 = vmul.f32 %v4348_v23, %v1682_v48  ;;  %v1723_v25 = vmul.f32 %v3632_v18, %v1713_v19  ;;  %3907 = vmatpush3.bf16.msra.mxu1 %v4266_v46  ;;  %v3634_v48 = vld [vmem:[#allocation17] ss:$0 sm:$0xff] }
 0xbf1   : > { %3908 = vmatprep.subr.bf16.mxu1 %v4267_v47 }
 0xbf2   : > { %v1724_v28 = vmul.f32 %v3632_v18, %v1714_v24  ;;  %v5681_v13 = vadd.f32 %v3633_v26, %v1723_v25 }
 0xbf3   : > { %v4350_v15 = vpop.eup %4349 }
 0xbf4   : > { %v4352_v29 = vpop.eup %4351  ;;  %v1715_v30 = vmul.f32 %v4350_v15, %v1683_v53  ;;  %v5683_v31 = vadd.f32 %v3633_v26, %v1724_v28  ;;  %3909 = vmatpush3.bf16.msra.mxu1 %v4267_v47 }
 0xbf5   : > { %v1716_v32 = vmul.f32 %v4352_v29, %v1684_v50  ;;  %3910 = vmatprep.subr.bf16.mxu1 %v4268_v42 }
 0xbf6   : > { %v1725_v33 = vmul.f32 %v3632_v18, %v1715_v30  ;;  %v1737_v34 = vpack.c.bf16 %v5683_v31, %v5681_v13 }
 0xbf7   : > { %v1726_v38 = vmul.f32 %v3632_v18, %v1716_v32 }
 0xbf8   : > { %3892 = vmatprep.mubr.msk.bf16.mxu0 %vm856_vm0, %v1737_v34  ;;  %v5688_v39 = vadd.f32 %v3633_v26, %v1725_v33  ;;  %3911 = vmatpush3.bf16.msra.mxu1 %v4268_v42 }
 0xbf9   : > { %v5690_v7 = vadd.f32 %v3633_v26, %v1726_v38  ;;  %3922 = vmatprep.subr.bf16.mxu1 %v4932_v56 }
 0xbfb   : > { %v1738_v40 = vpack.c.bf16 %v5690_v7, %v5688_v39 }
 0xbfd   : > { %3893 = vmatmul.mubr.msk.bf16.vlgmr.msra.gmra.mrb[20].mxu0 %vm856_vm0, %v1738_v40 }
 0xbfe   : > { %2171 = vmatprep.mubr.bf16.mxu0 %v4931_v22 }
 0xcd0   : > { %v3894_v21 = vpop.f32.mrb[20].mxu0 }
 0xcd1   : > { %v1827_v49 = vadd.f32 %v3894_v21, %v3634_v48  ;;  %v1818_v35 = vpop.f32.mrb[21].mxu0 }
 0xcd2   : > { %v1819_v50 = vadd.f32 %v3634_v48, %v1818_v35  ;;  %v3895_v51 = vpop.f32.mrb[22].mxu0 }
 0xcd3   : > { %v1835_v20 = vmul.f32 %v1827_v49, %v1827_v49  ;;  %v1830_v52 = vadd.f32 %v3895_v51, %v3634_v48  ;;  %v1821_v53 = vpop.f32.mrb[23].mxu0 }
 0xcd4   : > { %v1833_v54 = vmul.f32 %v1819_v50, %v1819_v50  ;;  %v1822_v55 = vadd.f32 %v3634_v48, %v1821_v53 }
 0xcd5   : > { %v1839_v58 = vmul.f32 %v1835_v20, %v1827_v49  ;;  %v1836_v60 = vmul.f32 %v1830_v52, %v1830_v52 }
 0xcd6   : > { %v1837_v61 = vmul.f32 %v1833_v54, %v1819_v50  ;;  %v1834_v62 = vmul.f32 %v1822_v55, %v1822_v55 }
 0xcd7   : > { %v1843_v63 = vmul.f32 0.044715, %v1839_v58  ;;  %v1840_v0 = vmul.f32 %v1836_v60, %v1830_v52 }
 0xcd8   : > { %v1841_v1 = vmul.f32 0.044715, %v1837_v61  ;;  %v1838_v2 = vmul.f32 %v1834_v62, %v1822_v55 }
 0xcd9   : > { %v1847_v3 = vadd.f32 %v1843_v63, %v1827_v49  ;;  %v1844_v4 = vmul.f32 0.044715, %v1840_v0 }
 0xcda   : > { %v1845_v5 = vadd.f32 %v1841_v1, %v1819_v50  ;;  %v1842_v8 = vmul.f32 0.044715, %v1838_v2 }
 0xcdb   : > { %v1851_v6 = vmul.f32 0.7978846, %v1847_v3  ;;  %v1848_v9 = vadd.f32 %v1844_v4, %v1830_v52 }
 0xcdc   : > { %v1849_v10 = vmul.f32 0.7978846, %v1845_v5  ;;  %v1846_v11 = vadd.f32 %v1842_v8, %v1822_v55 }
 0xcdd   : > { %4353 = vtanh.f32 %v1851_v6  ;;  %v1852_v12 = vmul.f32 0.7978846, %v1848_v9 }
 0xcde   : > { %4355 = vtanh.f32 %v1849_v10  ;;  %v1850_v14 = vmul.f32 0.7978846, %v1846_v11  ;;  %v4271_v11 = vld [vmem:[%s6099_s0 + $0x44] ss:$8 sps:$4 sm:$0xff]  }
 0xcdf   : > { %4357 = vtanh.f32 %v1852_v12  ;;  %v4269_v12 = vld [vmem:[%s6099_s0 + $0x40] ss:$8 sps:$4 sm:$0xff]   ;;  %2139 = vmatprep.subr.bf16.mxu0 %v4271_v11 }
 0xce0   : > { %4359 = vtanh.f32 %v1850_v14  ;;  %2140 = vmatpush1.bf16.msra.mxu0 %v4269_v12  ;;  %v4274_v14 = vld [vmem:[%s6099_s0 + $0x54] ss:$8 sps:$4 sm:$0xff]  }
 0xce1   : > { %2141 = vmatprep.subr.bf16.mxu0 %v4274_v14 }
 0xce7   : > { %v4354_v16 = vpop.eup %4353 }
 0xce8   : > { %v4356_v17 = vpop.eup %4355  ;;  %v1859_v18 = vadd.f32 1.0, %v4354_v16  ;;  %v4272_v16 = vld [vmem:[%s6099_s0 + $0x50] ss:$8 sps:$4 sm:$0xff]  }
 0xce9   : > { %v4358_v19 = vpop.eup %4357  ;;  %v1857_v23 = vadd.f32 1.0, %v4356_v17  ;;  %2142 = vmatpush1.bf16.msra.mxu0 %v4272_v16  ;;  %v4277_v17 = vld [vmem:[%s6099_s0 + $0x64] ss:$8 sps:$4 sm:$0xff]  }
 0xcea   : > { %v4360_v24 = vpop.eup %4359  ;;  %v1863_v25 = vmul.f32 0.5, %v1859_v18  ;;  %v1860_v26 = vadd.f32 1.0, %v4358_v19  ;;  %v4275_v18 = vld [vmem:[%s6099_s0 + $0x60] ss:$8 sps:$4 sm:$0xff]   ;;  %2143 = vmatprep.subr.bf16.mxu0 %v4277_v17  ;;  %v4280_v19 = vld [vmem:[%s6099_s0 + $0x74] ss:$8 sps:$4 sm:$0xff]  }
 0xceb   : > { %v1858_v28 = vadd.f32 1.0, %v4360_v24  ;;  %v1861_v15 = vmul.f32 0.5, %v1857_v23  ;;  %v4278_v23 = vld [vmem:[%s6099_s0 + $0x70] ss:$8 sps:$4 sm:$0xff]   ;;  %s6107_s0 = sld [smem:[#allocation50_spill]] }
 0xcec   : > { %v1864_v29 = vmul.f32 0.5, %v1860_v26  ;;  %v1867_v32 = vmul.f32 %v1863_v25, %v1827_v49 }
 0xced   : > { %v1862_v30 = vmul.f32 0.5, %v1858_v28  ;;  %v1865_v34 = vmul.f32 %v1861_v15, %v1819_v50  ;;  %2144 = vmatpush1.bf16.msra.mxu0 %v4275_v18 }
 0xcee   : > { %v1868_v33 = vmul.f32 %v1864_v29, %v1830_v52  ;;  %2145 = vmatprep.subr.bf16.mxu0 %v4280_v19 }
 0xcef   : > { %v1866_v38 = vmul.f32 %v1862_v30, %v1822_v55 }
 0xcf0   : > { %v1870_v40 = vpack.c.bf16 %v1868_v33, %v1867_v32 }
 0xcf1   : > { %v1869_v36 = vpack.c.bf16 %v1866_v38, %v1865_v34  ;;  %2146 = vmatpush1.bf16.msra.mxu0 %v4278_v23 }
 0xcf2   : > { %3916 = vmatprep.subr.bf16.mxu0 %v4932_v56 }
 0xcf3   : > { %3912 = vmatprep.mubr.bf16.mxu1 %v1869_v36 }
 0xcf4   : > { %3913 = vmatmul.mubr.bf16.vlgmr.msra.gmra.mrb[24].mxu1 %v1870_v40 }
 0xcf5   : > { %3924 = vmatprep.mubr.msk.bf16.mxu1 %vm4933_vm1, %v4932_v56 }
 0xdc7   : > { %v3914_v44 = vpop.f32.mrb[24].mxu1 }
 0xdc8   : > { %v1976_v41 = vpop.f32.mrb[25].mxu1  ;;  %v1985_v45 = vadd.f32 %v3914_v44, %v3641_v43 }
 0xdc9   : > { %v1977_v46 = vadd.f32 %v3641_v43, %v1976_v41  ;;  %v3915_v47 = vpop.f32.mrb[26].mxu1 }
 0xdca   : > { %v1979_v42 = vpop.f32.mrb[27].mxu1  ;;  %v1988_v48 = vadd.f32 %v3915_v47, %v3641_v43  ;;  %v1993_v51 = vadd.f32 %v1985_v45, %v5688_v39 }
 0xdcb   : > { %v1980_v21 = vadd.f32 %v3641_v43, %v1979_v42  ;;  %v1991_v49 = vadd.f32 %v1977_v46, %v5681_v13  ;;  %v3650_v43 = vld [vmem:[#allocation20] ss:$0 sm:$0xff]  ;;  %v3651_v42 = vld [vmem:[#allocation22] ss:$0 sm:$0xff] }
 0xdcc   : > { %v1994_v52 = vadd.f32 %v1988_v48, %v5690_v7  ;;  %v2003_v53 = vsel %vm856_vm0, %v1993_v51, 0.0 }
 0xdcd   : > { %v1997_v35 = vsel %vm856_vm0, %v1991_v49, 0.0  ;;  %v1992_v50 = vadd.f32 %v1980_v21, %v5683_v31 }
 0xdce   : > { %1998 = vadd.xlane.f32.xlu0 %v1997_v35  ;;  %v2006_v54 = vsel %vm856_vm0, %v1994_v52, 0.0 }
 0xdcf   : > { %v2000_v20 = vsel %vm856_vm0, %v1992_v50, 0.0 }
 0xdd0   : > { %2001 = vadd.xlane.f32.xlu1 %v2000_v20 }
 0xdd2   : > { %2004 = vadd.xlane.f32.xlu0 %v2003_v53 }
 0xdd4   : > { %2007 = vadd.xlane.f32.xlu1 %v2006_v54 }
 0xe5b   : > { %v1999_v55 = vpop.xlane.xlu0 %1998 }
 0xe5c   : > { %v2009_v13 = vmul.f32 0.015625, %v1999_v55 }
 0xe5d   : > { %v2002_v58 = vpop.xlane.xlu1 %2001 }
 0xe5e   : > { %v2013_v60 = vsub.f32 %v1991_v49, %v2009_v13  ;;  %v2010_v61 = vmul.f32 0.015625, %v2002_v58  ;;  %v2081_v58 = vld [vmem:[#allocation8 + $0x2] sm:$0x3] }
 0xe5f   : > { %v2005_v31 = vpop.xlane.xlu0 %2004 }
 0xe60   : > { %v2014_v62 = vsub.f32 %v1992_v50, %v2010_v61  ;;  %v2011_v39 = vmul.f32 0.015625, %v2005_v31  ;;  %v2017_v63 = vmul.f32 %v2013_v60, %v2013_v60  ;;  %v2090_v31 = vrot.slane %v2081_v58, %v5553_v59 }
 0xe61   : > { %v2008_v0 = vpop.xlane.xlu1 %2007 }
 0xe62   : > { %v2015_v1 = vsub.f32 %v1993_v51, %v2011_v39  ;;  %v2012_v2 = vmul.f32 0.015625, %v2008_v0  ;;  %v2021_v7 = vsel %vm856_vm0, %v2017_v63, 0.0  ;;  %v2018_v3 = vmul.f32 %v2014_v62, %v2014_v62 }
 0xe63   : > { %2022 = vadd.xlane.f32.xlu0 %v2021_v7 }
 0xe64   : > { %v2016_v4 = vsub.f32 %v1994_v52, %v2012_v2  ;;  %v2024_v5 = vsel %vm856_vm0, %v2018_v3, 0.0  ;;  %v2019_v8 = vmul.f32 %v2015_v1, %v2015_v1 }
 0xe65   : > { %2025 = vadd.xlane.f32.xlu1 %v2024_v5 }
 0xe66   : > { %v2027_v6 = vsel %vm856_vm0, %v2019_v8, 0.0  ;;  %v2020_v9 = vmul.f32 %v2016_v4, %v2016_v4 }
 0xe67   : > { %2028 = vadd.xlane.f32.xlu0 %v2027_v6 }
 0xe68   : > { %v2030_v10 = vsel %vm856_vm0, %v2020_v9, 0.0 }
 0xe69   : > { %2031 = vadd.xlane.f32.xlu1 %v2030_v10 }
 0xef0   : > { %v2023_v24 = vpop.xlane.xlu0 %2022 }
 0xef1   : > { %v2033_v25 = vmul.f32 0.015625, %v2023_v24 }
 0xef2   : > { %v2026_v26 = vpop.xlane.xlu1 %2025 }
 0xef3   : > { %v2037_v28 = vadd.f32 1e-12, %v2033_v25  ;;  %v2034_v15 = vmul.f32 0.015625, %v2026_v26 }
 0xef4   : > { %v2029_v29 = vpop.xlane.xlu0 %2028 }
 0xef5   : > { %4361 = vrsqrt.f32 %v2037_v28  ;;  %v2038_v30 = vadd.f32 1e-12, %v2034_v15  ;;  %v2035_v32 = vmul.f32 0.015625, %v2029_v29 }
 0xef6   : > { %v2032_v33 = vpop.xlane.xlu1 %2031 }
 0xef7   : > { %4363 = vrsqrt.f32 %v2038_v30  ;;  %v2039_v34 = vadd.f32 1e-12, %v2035_v32  ;;  %v2036_v38 = vmul.f32 0.015625, %v2032_v33 }
 0xef9   : > { %4365 = vrsqrt.f32 %v2039_v34  ;;  %v2040_v40 = vadd.f32 1e-12, %v2036_v38 }
 0xefb   : > { %4367 = vrsqrt.f32 %v2040_v40 }
 0xeff   : > { %v4362_v36 = vpop.eup %4361 }
 0xf00   : > { %v2045_v44 = vmul.f32 %v4362_v36, %v2013_v60  ;;  %v2086_v60 = vrot.slane %v2081_v58, %v5551_v57 }
 0xf01   : > { %v4364_v41 = vpop.eup %4363 }
 0xf02   : > { %v2055_v45 = vmul.f32 %v3650_v43, %v2045_v44  ;;  %v2046_v46 = vmul.f32 %v4364_v41, %v2014_v62 }
 0xf03   : > { %v4366_v47 = vpop.eup %4365 }
 0xf04   : > { %v2056_v48 = vmul.f32 %v3650_v43, %v2046_v46  ;;  %v2047_v49 = vmul.f32 %v4366_v47, %v2015_v1  ;;  %v5760_v50 = vadd.f32 %v3651_v42, %v2055_v45 }
 0xf05   : > { %v4368_v21 = vpop.eup %4367 }
 0xf06   : > { %v2048_v35 = vmul.f32 %v4368_v21, %v2016_v4  ;;  %v5762_v51 = vadd.f32 %v3651_v42, %v2056_v48  ;;  %v2057_v53 = vmul.f32 %v3650_v43, %v2047_v49 }
 0xf08   : > { %v2069_v20 = vpack.c.bf16 %v5762_v51, %v5760_v50  ;;  %v2058_v52 = vmul.f32 %v3650_v43, %v2048_v35  ;;  %v5770_v55 = vadd.f32 %v3651_v42, %v2057_v53 }
 0xf0a   : > { %3668 = vmatmul.mubr.msk.bf16.vlgmr.msra.gmra.mrb[24].mxu0 %vm856_vm0, %v2069_v20  ;;  %v5768_v54 = vadd.f32 %v3651_v42, %v2058_v52 }
 0xf0b   : > { %2181 = vmatprep.mubr.bf16.mxu0 %v4931_v22 }
 0xf0c   : > { %v2070_v13 = vpack.c.bf16 %v5768_v54, %v5770_v55 }
 0xf12   : > { %3669 = vmatmul.mubr.msk.bf16.gmra.mrb[28].mxu0 %vm856_vm0, %v2070_v13 }
 0xf13   : > { %3918 = vmatprep.mubr.msk.bf16.mxu0 %vm4933_vm1, %v4932_v56 }
 0xfdd   : > { %v2173_v61 = vpop.f32.mrb[24].mxu0 }
 0xfde   : > { %v2175_v62 = vpop.f32.mrb[25].mxu0  ;;  %v2174_v39 = vadd.f32 %v2173_v61, %v2086_v60 }
 0xfdf   : > { %v2177_v22 = vpop.f32.mrb[26].mxu0  ;;  %v2176_v1 = vadd.f32 %v2175_v62, %v2090_v31 }
 0xfe0   : > { %v2178_v63 = vadd.f32 %v2177_v22, %v2086_v60  ;;  %v2179_v0 = vpop.f32.mrb[27].mxu0 }
 0xfe1   : > { %v2180_v2 = vadd.f32 %v2179_v0, %v2090_v31 }
 0xfe2   : > { %v2192_v7 = vpack.c.bf16 %v2178_v63, %v2174_v39 }
 0xfe3   : > { %v5779_v3 = vpack.c.bf16 %v2180_v2, %v2176_v1 }
 0xfe4   : > { %2315 = vrot.lane.b32.xlu1 %v2192_v7, %s4935_s7  ;;  %2197 = vrot.lane.b32.xlu0 %v2192_v7, %s6101_s6 }
 0xfe5   : > { %v2183_v4 = vpop.f32.mrb[28].mxu0  ;;  %3923 = vmatpush3.bf16.msra.mxu1 %v5779_v3 }
 0xfe6   : > { %v2185_v57 = vpop.f32.mrb[29].mxu0  ;;  %3934 = vmatprep.subr.bf16.mxu1 %v4932_v56  ;;  %v2184_v8 = vadd.f32 %v2183_v4, %v2086_v60 }
 0xfe7   : > { %v2186_v59 = vadd.f32 %v2185_v57, %v2090_v31  ;;  %v2187_v5 = vpop.f32.mrb[30].mxu0 }
 0xfe8   : > { %v2188_v6 = vadd.f32 %v2187_v5, %v2086_v60  ;;  %2313 = vrot.lane.b32.xlu1 %v2192_v7, %s6102_s2  ;;  %v2189_v9 = vpop.f32.mrb[31].mxu0 }
 0xfe9   : > { %v2190_v10 = vadd.f32 %v2189_v9, %v2090_v31 }
 0xfea   : > { %v2194_v11 = vpack.c.bf16 %v2188_v6, %v2184_v8 }
 0xfeb   : > { %v5786_v12 = vpack.c.bf16 %v2190_v10, %v2186_v59 }
 0xfec   : > { %2564 = vrot.lane.b32.xlu1 %v2194_v11, %s4935_s7  ;;  %2446 = vrot.lane.b32.xlu0 %v2194_v11, %s6101_s6  ;;  %s842_s6 = scalar_lea.vmem [#allocation25], %s6106_s29 }
 0xff0   : > { %2562 = vrot.lane.b32.xlu0 %v2194_v11, %s6102_s2 }
0x1056   : > { %v2198_v14 = vpop.permute.xlu0 %2197  ;;  %v2316_v17 = vpop.permute.xlu1 %2315 }
0x1057   : > { %v2203_v16 = vsel %vm1062_vm2, %v2198_v14, 0  ;;  %v2321_v18 = vsel %vm1062_vm2, %v2316_v17, 0 }
0x1058   : > { %3917 = vmatpush3.bf16.xpose.msra.mxu0 %v2203_v16 }
0x1059   : > { %3928 = vmatprep.subr.bf16.mxu0 %v4932_v56 }
0x105a   : > { %v2314_v23 = vpop.permute.xlu1 %2313 }
0x105e   : > { %v2447_v19 = vpop.permute.xlu0 %2446  ;;  %v2565_v25 = vpop.permute.xlu1 %2564 }
0x105f   : > { %3919 = vmatmul.mubr.msk.bf16.vlgmr.msra.gmra.mrb[32].mxu0 %vm1062_vm2, %v2192_v7  ;;  %v2452_v24 = vsel %vm1062_vm2, %v2447_v19, 0  ;;  %v2570_v26 = vsel %vm1062_vm2, %v2565_v25, 0 }
0x1060   : > { %3929 = vmatpush3.bf16.xpose.msra.mxu0 %v2321_v18  ;;  %3930 = vmatprep.mubr.msk.bf16.mxu0 %vm4933_vm1, %v4932_v56 }
0x1061   : > { %3940 = vmatprep.subr.bf16.mxu0 %v4932_v56 }
0x1062   : > { %v2563_v28 = vpop.permute.xlu0 %2562 }
0x1067   : > { %3931 = vmatmul.mubr.msk.bf16.vlgmr.msra.gmra.mrb[36].mxu0 %vm1062_vm2, %v2314_v23 }
0x1068   : > { %3941 = vmatpush3.bf16.xpose.msra.mxu0 %v2452_v24  ;;  %3942 = vmatprep.mubr.msk.bf16.mxu0 %vm4933_vm1, %v4932_v56 }
0x1069   : > { %3952 = vmatprep.subr.bf16.mxu0 %v4932_v56 }
0x106f   : > { %3943 = vmatmul.mubr.msk.bf16.vlgmr.msra.gmra.mrb[40].mxu0 %vm1062_vm2, %v2194_v11 }
0x1070   : > { %3953 = vmatpush3.bf16.xpose.msra.mxu0 %v2570_v26  ;;  %3954 = vmatprep.mubr.msk.bf16.mxu0 %vm4933_vm1, %v4932_v56 }
0x1077   : > { %3955 = vmatmul.mubr.msk.bf16.vlgmr.msra.gmra.mrb[44].mxu0 %vm1062_vm2, %v2563_v28 }
0x1132   : > { %v2239_v15 = vpop.f32.mrb[32].mxu0 }
0x1133   : > { %v2240_v29 = vadd.f32 %v2239_v15, %v5589_v37  ;;  %v3920_v30 = vpop.f32.mrb[33].mxu0 }
0x1134   : > { %v2242_v32 = vpop.f32.mrb[34].mxu0 }
0x1135   : > { %v2243_v33 = vadd.f32 %v2242_v32, %v5589_v37  ;;  %v3921_v34 = vpop.f32.mrb[35].mxu0  ;;  %v2246_v38 = vsel %vm1110_vm3, %v2240_v29, -inf }
0x1136   : > { %2247 = vmax.xlane.f32.xlu1 %v2246_v38 }
0x1137   : > { %v2249_v40 = vsel %vm1110_vm3, %v2243_v33, -inf }
0x1138   : > { %2250 = vmax.xlane.f32.xlu0 %v2249_v40 }
0x113a   : > { %v2357_v36 = vpop.f32.mrb[36].mxu0 }
0x113b   : > { %v2358_v43 = vadd.f32 %v2357_v36, %v5589_v37  ;;  %v3932_v44 = vpop.f32.mrb[37].mxu0 }
0x113c   : > { %v2360_v41 = vpop.f32.mrb[38].mxu0 }
0x113d   : > { %v2361_v45 = vadd.f32 %v2360_v41, %v5589_v37  ;;  %v3933_v46 = vpop.f32.mrb[39].mxu0  ;;  %v2364_v47 = vsel %vm1110_vm3, %v2358_v43, -inf }
0x113e   : > { %2365 = vmax.xlane.f32.xlu0 %v2364_v47 }
0x113f   : > { %v2367_v42 = vsel %vm1110_vm3, %v2361_v45, -inf }
0x1140   : > { %2368 = vmax.xlane.f32.xlu1 %v2367_v42 }
0x1142   : > { %v2488_v48 = vpop.f32.mrb[40].mxu0 }
0x1143   : > { %v2489_v21 = vadd.f32 %v2488_v48, %v5628_v27  ;;  %v3944_v49 = vpop.f32.mrb[41].mxu0 }
0x1144   : > { %v2491_v35 = vpop.f32.mrb[42].mxu0 }
0x1145   : > { %v2492_v20 = vadd.f32 %v2491_v35, %v5628_v27  ;;  %v3945_v52 = vpop.f32.mrb[43].mxu0  ;;  %v2495_v53 = vsel %vm1110_vm3, %v2489_v21, -inf }
0x1146   : > { %2496 = vmax.xlane.f32.xlu0 %v2495_v53 }
0x1147   : > { %v2498_v37 = vsel %vm1110_vm3, %v2492_v20, -inf }
0x1148   : > { %2499 = vmax.xlane.f32.xlu1 %v2498_v37 }
0x114a   : > { %v2606_v13 = vpop.f32.mrb[44].mxu0 }
0x114b   : > { %v2607_v58 = vadd.f32 %v2606_v13, %v5628_v27  ;;  %v3956_v60 = vpop.f32.mrb[45].mxu0 }
0x114c   : > { %v2609_v61 = vpop.f32.mrb[46].mxu0 }
0x114d   : > { %v2610_v31 = vadd.f32 %v2609_v61, %v5628_v27  ;;  %v3957_v62 = vpop.f32.mrb[47].mxu0  ;;  %v2613_v22 = vsel %vm1110_vm3, %v2607_v58, -inf }
0x114e   : > { %2614 = vmax.xlane.f32.xlu0 %v2613_v22 }
0x114f   : > { %v2616_v39 = vsel %vm1110_vm3, %v2610_v31, -inf }
0x1150   : > { %2617 = vmax.xlane.f32.xlu1 %v2616_v39 }
0x11c3   : > { %v2248_v63 = vpop.xlane.xlu1 %2247 }
0x11c4   : > { %v2252_v0 = vsub.f32 %v2240_v29, %v2248_v63 }
0x11c5   : > { %v2251_v1 = vpop.xlane.xlu0 %2250 }
0x11c6   : > { %v2254_v2 = vmul.f32 1.442695, %v2252_v0  ;;  %v2253_v7 = vsub.f32 %v2243_v33, %v2251_v1 }
0x11c8   : > { %4369 = vpow2.f32 %v2254_v2  ;;  %v2256_v4 = vmul.f32 1.442695, %v2253_v7 }
0x11ca   : > { %4371 = vpow2.f32 %v2256_v4 }
0x11cb   : > { %v2366_v57 = vpop.xlane.xlu0 %2365 }
0x11cc   : > { %v2370_v59 = vsub.f32 %v2358_v43, %v2366_v57 }
0x11cd   : > { %v2369_v5 = vpop.xlane.xlu1 %2368 }
0x11ce   : > { %v2372_v8 = vmul.f32 1.442695, %v2370_v59  ;;  %v2371_v27 = vsub.f32 %v2361_v45, %v2369_v5 }
0x11d0   : > { %4373 = vpow2.f32 %v2372_v8  ;;  %v2374_v6 = vmul.f32 1.442695, %v2371_v27 }
0x11d2   : > { %v4370_v9 = vpop.eup %4369  ;;  %4375 = vpow2.f32 %v2374_v6 }
0x11d3   : > { %v2497_v10 = vpop.xlane.xlu0 %2496  ;;  %v2258_v11 = vsel %vm1110_vm3, %v4370_v9, 0.0 }
0x11d4   : > { %v4372_v14 = vpop.eup %4371  ;;  %v2501_v16 = vsub.f32 %v2489_v21, %v2497_v10  ;;  %2259 = vadd.xlane.f32.xlu0 %v2258_v11 }
0x11d5   : > { %v2500_v17 = vpop.xlane.xlu1 %2499  ;;  %v2261_v18 = vsel %vm1110_vm3, %v4372_v14, 0.0 }
0x11d6   : > { %v2503_v19 = vmul.f32 1.442695, %v2501_v16  ;;  %v2502_v23 = vsub.f32 %v2492_v20, %v2500_v17  ;;  %2262 = vadd.xlane.f32.xlu1 %v2261_v18  ;;  %v4282_v16 = vld [vmem:[#allocation10 + $0x28] sm:$0xff]   ;;  %v4283_v17 = vld [vmem:[#allocation10 + $0x30] sm:$0xff]  }
0x11d8   : > { %4377 = vpow2.f32 %v2503_v19  ;;  %v2505_v24 = vmul.f32 1.442695, %v2502_v23 }
0x11da   : > { %v4374_v25 = vpop.eup %4373  ;;  %4379 = vpow2.f32 %v2505_v24 }
0x11db   : > { %v2615_v26 = vpop.xlane.xlu0 %2614  ;;  %v2376_v28 = vsel %vm1110_vm3, %v4374_v25, 0.0 }
0x11dc   : > { %v4376_v15 = vpop.eup %4375  ;;  %v2619_v29 = vsub.f32 %v2607_v58, %v2615_v26  ;;  %2377 = vadd.xlane.f32.xlu0 %v2376_v28  ;;  %v4284_v28 = vld [vmem:[#allocation10 + $0x38] sm:$0xff]  }
0x11dd   : > { %v2618_v30 = vpop.xlane.xlu1 %2617  ;;  %v2379_v32 = vsel %vm1110_vm3, %v4376_v15, 0.0 }
0x11de   : > { %v2621_v33 = vmul.f32 1.442695, %v2619_v29  ;;  %v2620_v34 = vsub.f32 %v2610_v31, %v2618_v30  ;;  %2380 = vadd.xlane.f32.xlu1 %v2379_v32 }
0x11e0   : > { %4381 = vpow2.f32 %v2621_v33  ;;  %v2623_v38 = vmul.f32 1.442695, %v2620_v34 }
0x11e2   : > { %v4378_v40 = vpop.eup %4377  ;;  %4383 = vpow2.f32 %v2623_v38 }
0x11e3   : > { %v2507_v36 = vsel %vm1110_vm3, %v4378_v40, 0.0 }
0x11e4   : > { %v4380_v43 = vpop.eup %4379  ;;  %2508 = vadd.xlane.f32.xlu0 %v2507_v36 }
0x11e5   : > { %v2510_v44 = vsel %vm1110_vm3, %v4380_v43, 0.0 }
0x11e6   : > { %2511 = vadd.xlane.f32.xlu1 %v2510_v44 }
0x11ea   : > { %v4382_v41 = vpop.eup %4381 }
0x11eb   : > { %v2625_v45 = vsel %vm1110_vm3, %v4382_v41, 0.0 }
0x11ec   : > { %v4384_v46 = vpop.eup %4383  ;;  %2626 = vadd.xlane.f32.xlu0 %v2625_v45 }
0x11ed   : > { %v2628_v47 = vsel %vm1110_vm3, %v4384_v46, 0.0 }
0x11ee   : > { %2629 = vadd.xlane.f32.xlu1 %v2628_v47 }
0x11ff   : > { %2637 = vrot.lane.b32.xlu1 %v5786_v12, %s6102_s2 }
0x1202   : > { %2388 = vrot.lane.b32.xlu0 %v5779_v3, %s6102_s2  ;;  %s3363_s2 = sshll.u32 %s842_s6, 4  ;;  %s5956_s2 = int_to_ptr.vmem [resolvable:$true] %s3363_s2 }
0x1203   : > { %s4815_s16 = scalar_lea.vmem %s5956_s2, 32 }
0x1204   : > { %p4816_p11 = scmp.ne.s32.totalorder %s5956_s2, %s4815_s16 }
0x1206   : > { %p4817_p8 = pnand %p4816_p11, %p6108_p12 }
0x1208   : > { %p4818_p5 = pneg %p4817_p8 }
0x1261   : > { %v2260_v42 = vpop.xlane.xlu0 %2259 }
0x1262   : > { %4385 = vrcp.f32 %v2260_v42 }
0x1263   : > { %v2263_v48 = vpop.xlane.xlu1 %2262 }
0x1264   : > { %4387 = vrcp.f32 %v2263_v48 }
0x1269   : > { %v2378_v35 = vpop.xlane.xlu0 %2377 }
0x126b   : > { %v2381_v21 = vpop.xlane.xlu1 %2380 }
0x126c   : > { %v4386_v49 = vpop.eup %4385  ;;  %4389 = vrcp.f32 %v2381_v21 }
0x126d   : > { %v2266_v52 = vmul.f32 %v4386_v49, %v4370_v9  ;;  %4391 = vrcp.f32 %v2378_v35 }
0x126e   : > { %v4388_v20 = vpop.eup %4387 }
0x126f   : > { %v2267_v53 = vmul.f32 %v4388_v20, %v4372_v14  ;;  %v4281_v14 = vld [vmem:[#allocation10 + $0x20] sm:$0xff]  }
0x1270   : > { %3964 = vmatprep.subr.bf16.mxu0 %v4281_v14  ;;  %v3678_v20 = vld [vmem:[#allocation11 + $0x1] ss:$0 sm:$0xff] }
0x1271   : > { %v2268_v37 = vpack.c.bf16 %v2267_v53, %v2266_v52  ;;  %v2509_v3 = vpop.xlane.xlu0 %2508  ;;  %3965 = vmatpush3.bf16.msra.mxu0 %v4281_v14 }
0x1272   : > { %3966 = vmatprep.subr.bf16.mxu0 %v4282_v16 }
0x1273   : > { %v2512_v13 = vpop.xlane.xlu1 %2511  ;;  %3925 = vmatmul.mubr.msk.bf16.vlgmr.msra.gmra.mrb[28].mxu1 %vm1110_vm3, %v2268_v37 }
0x1274   : > { %3936 = vmatprep.mubr.msk.bf16.mxu1 %vm4933_vm1, %v4932_v56  ;;  %4393 = vrcp.f32 %v2512_v13 }
0x1275   : > { %4395 = vrcp.f32 %v2509_v3  ;;  %3967 = vmatpush3.bf16.msra.mxu0 %v4282_v16 }
0x1276   : > { %v4390_v58 = vpop.eup %4389  ;;  %3968 = vmatprep.subr.bf16.mxu0 %v4283_v17 }
0x1277   : > { %v4392_v61 = vpop.eup %4391  ;;  %v2385_v31 = vmul.f32 %v4390_v58, %v4376_v15 }
0x1278   : > { %v2384_v22 = vmul.f32 %v4392_v61, %v4374_v25 }
0x1279   : > { %v2627_v60 = vpop.xlane.xlu0 %2626  ;;  %3969 = vmatpush3.bf16.msra.mxu0 %v4283_v17 }
0x127a   : > { %v2386_v63 = vpack.c.bf16 %v2385_v31, %v2384_v22  ;;  %3970 = vmatprep.subr.bf16.mxu0 %v4284_v28 }
0x127b   : > { %v2630_v62 = vpop.xlane.xlu1 %2629 }
0x127c   : > { %4397 = vrcp.f32 %v2630_v62 }
0x127d   : > { %v2389_v39 = vpop.permute.xlu0 %2388  ;;  %4399 = vrcp.f32 %v2627_v60  ;;  %3971 = vmatpush3.bf16.msra.mxu0 %v4284_v28 }
0x127e   : > { %3935 = vmatpush3.bf16.msra.mxu1 %v2389_v39  ;;  %v4394_v0 = vpop.eup %4393 }
0x127f   : > { %3946 = vmatprep.subr.bf16.mxu1 %v4932_v56  ;;  %v4396_v1 = vpop.eup %4395  ;;  %v2516_v2 = vmul.f32 %v4394_v0, %v4380_v43  ;;  %v2638_v59 = vpop.permute.xlu1 %2637 }
0x1280   : > { %v2515_v7 = vmul.f32 %v4396_v1, %v4378_v40 }
0x1281   : > { %3937 = vmatmul.mubr.msk.bf16.vlgmr.msra.gmra.mrb[32].mxu1 %vm1110_vm3, %v2386_v63 }
0x1282   : > { %3947 = vmatpush3.bf16.msra.mxu1 %v5786_v12  ;;  %3948 = vmatprep.mubr.msk.bf16.mxu1 %vm4933_vm1, %v4932_v56  ;;  %v2517_v4 = vpack.c.bf16 %v2516_v2, %v2515_v7 }
0x1283   : > { %3958 = vmatprep.subr.bf16.mxu1 %v4932_v56 }
0x1286   : > { %v4398_v57 = vpop.eup %4397 }
0x1287   : > { %v4400_v5 = vpop.eup %4399  ;;  %v2634_v8 = vmul.f32 %v4398_v57, %v4384_v46 }
0x1288   : > { %v2633_v27 = vmul.f32 %v4400_v5, %v4382_v41 }
0x1289   : > { %3949 = vmatmul.mubr.msk.bf16.vlgmr.msra.gmra.mrb[36].mxu1 %vm1110_vm3, %v2517_v4 }
0x128a   : > { %3959 = vmatpush3.bf16.msra.mxu1 %v2638_v59  ;;  %3960 = vmatprep.mubr.msk.bf16.mxu1 %vm4933_vm1, %v4932_v56  ;;  %v2635_v12 = vpack.c.bf16 %v2634_v8, %v2633_v27 }
0x1291   : > { %3961 = vmatmul.mubr.msk.bf16.vlgmr.msra.gmra.mrb[40].mxu1 %vm1110_vm3, %v2635_v12 }
0x1346   : > { %v2306_v6 = vpop.f32.mrb[28].mxu1 }
0x1347   : > { %v3926_v9 = vpop.f32.mrb[29].mxu1 }
0x1348   : > { %v2309_v10 = vpop.f32.mrb[30].mxu1 }
0x1349   : > { %v3927_v11 = vpop.f32.mrb[31].mxu1 }
0x1354   : > { %v2428_v18 = vpop.f32.mrb[32].mxu1 }
0x1355   : > { %v3938_v19 = vpop.f32.mrb[33].mxu1 }
0x1356   : > { %v2431_v23 = vpop.f32.mrb[34].mxu1  ;;  %v4285_v19 = vld [vmem:[#allocation16 + $0x20] sm:$0xff]  }
0x1357   : > { %v4231_v24 = vpack.i.bf16 %v2431_v23, %v2428_v18  ;;  %v3939_v25 = vpop.f32.mrb[35].mxu1  ;;  %3976 = vmatprep.subr.bf16.mxu1 %v4285_v19  ;;  %v4286_v23 = vld [vmem:[#allocation16 + $0x28] sm:$0xff]  }
0x1358   : > { %3977 = vmatpush3.bf16.msra.mxu1 %v4285_v19  ;;  %v4288_v25 = vld [vmem:[#allocation16 + $0x38] sm:$0xff]  }
0x1359   : > { %4232 = vrot.lane.b32.xlu1 %v4231_v24, %s4935_s7  ;;  %3978 = vmatprep.subr.bf16.mxu1 %v4286_v23  ;;  %v4287_v24 = vld [vmem:[#allocation16 + $0x30] sm:$0xff]  }
0x135c   : > { %v2555_v26 = vpop.f32.mrb[36].mxu1  ;;  %3979 = vmatpush3.bf16.msra.mxu1 %v4286_v23 }
0x135d   : > { %v3950_v15 = vpop.f32.mrb[37].mxu1  ;;  %3980 = vmatprep.subr.bf16.mxu1 %v4287_v24 }
0x135e   : > { %v2558_v29 = vpop.f32.mrb[38].mxu1 }
0x135f   : > { %v3951_v30 = vpop.f32.mrb[39].mxu1 }
0x1360   : > { %3981 = vmatpush3.bf16.msra.mxu1 %v4287_v24 }
0x1361   : > { %3982 = vmatprep.subr.bf16.mxu1 %v4288_v25 }
0x1364   : > { %v2677_v32 = vpop.f32.mrb[40].mxu1  ;;  %3983 = vmatpush3.bf16.msra.mxu1 %v4288_v25 }
0x1365   : > { %v3962_v33 = vpop.f32.mrb[41].mxu1  ;;  %4008 = vmatprep.subr.bf16.mxu1 %v4932_v56 }
0x1366   : > { %v2680_v34 = vpop.f32.mrb[42].mxu1 }
0x1367   : > { %v4236_v38 = vpack.i.bf16 %v2680_v34, %v2677_v32  ;;  %v3963_v40 = vpop.f32.mrb[43].mxu1 }
0x1369   : > { %4237 = vrot.lane.b32.xlu0 %v4236_v38, %s4935_s7 }
0x13cb   : > { %v4233_v36 = vpop.permute.xlu1 %4232 }
0x13cc   : > { %v4235_v43 = vunpack.i.h.bf16 %v4233_v36  ;;  %v4234_v44 = vunpack.i.l.bf16 %v4233_v36 }
0x13ce   : > { %v2444_v41 = vsel %vm1062_vm2, %v2309_v10, %v4235_v43  ;;  %v2443_v45 = vsel %vm1062_vm2, %v2306_v6, %v4234_v44 }
0x13cf   : > { %v2694_v46 = vpack.c.bf16 %v2444_v41, %v2443_v45  ;;  %v3685_v41 = vld [vmem:[#allocation13 + $0x1] ss:$0 sm:$0xff] }
0x13d1   : > { %3972 = vmatprep.mubr.msk.bf16.mxu0 %vm856_vm0, %v2694_v46 }
0x13db   : > { %v4238_v47 = vpop.permute.xlu0 %4237 }
0x13dc   : > { %v4240_v42 = vunpack.i.h.bf16 %v4238_v47  ;;  %v4239_v48 = vunpack.i.l.bf16 %v4238_v47 }
0x13de   : > { %v2693_v21 = vsel %vm1062_vm2, %v2558_v29, %v4240_v42  ;;  %v2692_v49 = vsel %vm1062_vm2, %v2555_v26, %v4239_v48  ;;  %v3686_v48 = vld [vmem:[#allocation14 + $0x1] ss:$0 sm:$0xff] }
0x13df   : > { %v2695_v35 = vpack.c.bf16 %v2693_v21, %v2692_v49 }
0x13e1   : > { %3973 = vmatmul.mubr.msk.bf16.vlgmr.msra.gmra.mrb[48].mxu0 %vm856_vm0, %v2695_v35 }
0x14b4   : > { %v3974_v52 = vpop.f32.mrb[48].mxu0 }
0x14b5   : > { %v2777_v53 = vpop.f32.mrb[49].mxu0  ;;  %v2786_v60 = vadd.f32 %v3974_v52, %v3678_v20 }
0x14b6   : > { %v2778_v37 = vadd.f32 %v3678_v20, %v2777_v53  ;;  %v3975_v13 = vpop.f32.mrb[50].mxu0 }
0x14b7   : > { %v2789_v3 = vadd.f32 %v3975_v13, %v3678_v20  ;;  %v2780_v58 = vpop.f32.mrb[51].mxu0  ;;  %v2794_v0 = vadd.f32 %v2786_v60, %v5770_v55 }
0x14b8   : > { %v2781_v61 = vadd.f32 %v3678_v20, %v2780_v58  ;;  %v2792_v31 = vadd.f32 %v2778_v37, %v5760_v50 }
0x14b9   : > { %v2795_v39 = vadd.f32 %v2789_v3, %v5768_v54  ;;  %v2806_v2 = vsel %vm856_vm0, %v2794_v0, 0.0 }
0x14ba   : > { %v2800_v62 = vsel %vm856_vm0, %v2792_v31, 0.0  ;;  %v2793_v22 = vadd.f32 %v2781_v61, %v5762_v51 }
0x14bb   : > { %2801 = vadd.xlane.f32.xlu1 %v2800_v62  ;;  %v2809_v1 = vsel %vm856_vm0, %v2795_v39, 0.0  ;;  %v4289_v62 = vld [vmem:[%s6100_s3 + $0x40] sm:$0xff]  }
0x14bc   : > { %v2803_v63 = vsel %vm856_vm0, %v2793_v22, 0.0  ;;  %3988 = vmatprep.subr.bf16.mxu0 %v4289_v62 }
0x14bd   : > { %2804 = vadd.xlane.f32.xlu0 %v2803_v63  ;;  %3989 = vmatpush3.bf16.msra.mxu0 %v4289_v62  ;;  %v4292_v63 = vld [vmem:[%s6100_s3 + $0x58] sm:$0xff]  }
0x14bf   : > { %2810 = vadd.xlane.f32.xlu1 %v2809_v1  ;;  %v4294_v1 = vld [vmem:[%s6100_s3 + $0x68] sm:$0xff]  }
0x14c1   : > { %2807 = vadd.xlane.f32.xlu0 %v2806_v2  ;;  %v4295_v2 = vld [vmem:[%s6100_s3 + $0x70] sm:$0xff]  }
0x1548   : > { %v2802_v7 = vpop.xlane.xlu1 %2801 }
0x1549   : > { %v2812_v50 = vmul.f32 0.015625, %v2802_v7  ;;  %v4296_v7 = vld [vmem:[%s6100_s3 + $0x78] sm:$0xff]  }
0x154a   : > { %v2805_v4 = vpop.xlane.xlu0 %2804 }
0x154b   : > { %v2816_v57 = vsub.f32 %v2792_v31, %v2812_v50  ;;  %v2813_v59 = vmul.f32 0.015625, %v2805_v4  ;;  %v3687_v50 = vld [vmem:[#allocation17 + $0x1] ss:$0 sm:$0xff] }
0x154c   : > { %v2811_v51 = vpop.xlane.xlu1 %2810 }
0x154d   : > { %v2817_v5 = vsub.f32 %v2793_v22, %v2813_v59  ;;  %v2815_v54 = vmul.f32 0.015625, %v2811_v51  ;;  %v2820_v8 = vmul.f32 %v2816_v57, %v2816_v57  ;;  %v4290_v22 = vld [vmem:[%s6100_s3 + $0x48] sm:$0xff]  }
0x154e   : > { %v2808_v27 = vpop.xlane.xlu0 %2807  ;;  %3990 = vmatprep.subr.bf16.mxu0 %v4290_v22 }
0x154f   : > { %v2819_v12 = vsub.f32 %v2795_v39, %v2815_v54  ;;  %v2814_v6 = vmul.f32 0.015625, %v2808_v27  ;;  %v2824_v55 = vsel %vm856_vm0, %v2820_v8, 0.0  ;;  %v2821_v9 = vmul.f32 %v2817_v5, %v2817_v5  ;;  %3991 = vmatpush3.bf16.msra.mxu0 %v4290_v22  ;;  %v4291_v39 = vld [vmem:[%s6100_s3 + $0x50] sm:$0xff]  }
0x1550   : > { %2825 = vadd.xlane.f32.xlu0 %v2824_v55  ;;  %3992 = vmatprep.subr.bf16.mxu0 %v4291_v39 }
0x1551   : > { %v2818_v10 = vsub.f32 %v2794_v0, %v2814_v6  ;;  %v2827_v11 = vsel %vm856_vm0, %v2821_v9, 0.0  ;;  %v2823_v14 = vmul.f32 %v2819_v12, %v2819_v12  ;;  %v4293_v0 = vld [vmem:[%s6100_s3 + $0x60] sm:$0xff]   ;;  %s5954_s3 = scalar_lea.hbm %s6107_s0, %s3734_s30 }
0x1552   : > { %2828 = vadd.xlane.f32.xlu1 %v2827_v11 }
0x1553   : > { %v2822_v16 = vmul.f32 %v2818_v10, %v2818_v10  ;;  %v2833_v18 = vsel %vm856_vm0, %v2823_v14, 0.0  ;;  %3993 = vmatpush3.bf16.msra.mxu0 %v4291_v39 }
0x1554   : > { %3994 = vmatprep.subr.bf16.mxu0 %v4292_v63 }
0x1555   : > { %v2830_v17 = vsel %vm856_vm0, %v2822_v16, 0.0 }
0x1556   : > { %2831 = vadd.xlane.f32.xlu0 %v2830_v17  ;;  %2834 = vadd.xlane.f32.xlu1 %v2833_v18 }
0x1557   : > { %3995 = vmatpush3.bf16.msra.mxu0 %v4292_v63 }
0x1558   : > { %3996 = vmatprep.subr.bf16.mxu0 %v4293_v0 }
0x155b   : > { %3997 = vmatpush3.bf16.msra.mxu0 %v4293_v0 }
0x155c   : > { %3998 = vmatprep.subr.bf16.mxu0 %v4294_v1 }
0x155f   : > { %3999 = vmatpush3.bf16.msra.mxu0 %v4294_v1 }
0x1560   : > { %4000 = vmatprep.subr.bf16.mxu0 %v4295_v2 }
0x1563   : > { %4001 = vmatpush3.bf16.msra.mxu0 %v4295_v2 }
0x1564   : > { %4002 = vmatprep.subr.bf16.mxu0 %v4296_v7 }
0x1567   : > { %4003 = vmatpush3.bf16.msra.mxu0 %v4296_v7 }
0x15dd   : > { %v2826_v26 = vpop.xlane.xlu0 %2825 }
0x15de   : > { %v2836_v28 = vmul.f32 0.015625, %v2826_v26 }
0x15df   : > { %v2829_v15 = vpop.xlane.xlu1 %2828 }
0x15e0   : > { %v2840_v29 = vadd.f32 1e-12, %v2836_v28  ;;  %v2837_v30 = vmul.f32 0.015625, %v2829_v15 }
0x15e2   : > { %4401 = vrsqrt.f32 %v2840_v29  ;;  %v2841_v32 = vadd.f32 1e-12, %v2837_v30 }
0x15e3   : > { %v2832_v33 = vpop.xlane.xlu0 %2831  ;;  %v2835_v34 = vpop.xlane.xlu1 %2834 }
0x15e4   : > { %4403 = vrsqrt.f32 %v2841_v32  ;;  %v2838_v38 = vmul.f32 0.015625, %v2832_v33  ;;  %v2839_v40 = vmul.f32 0.015625, %v2835_v34 }
0x15e6   : > { %v2842_v36 = vadd.f32 1e-12, %v2838_v38  ;;  %v2843_v43 = vadd.f32 1e-12, %v2839_v40 }
0x15e8   : > { %4405 = vrsqrt.f32 %v2842_v36 }
0x15e9   : > { %4407 = vrsqrt.f32 %v2843_v43 }
0x15ec   : > { %v4402_v44 = vpop.eup %4401 }
0x15ed   : > { %v2848_v45 = vmul.f32 %v4402_v44, %v2816_v57 }
0x15ee   : > { %v4404_v46 = vpop.eup %4403 }
0x15ef   : > { %v2849_v47 = vmul.f32 %v4404_v46, %v2817_v5  ;;  %v2858_v42 = vmul.f32 %v3685_v41, %v2848_v45 }
0x15f1   : > { %v2859_v21 = vmul.f32 %v3685_v41, %v2849_v47  ;;  %v5870_v52 = vadd.f32 %v3686_v48, %v2858_v42 }
0x15f2   : > { %v4406_v49 = vpop.eup %4405 }
0x15f3   : > { %v4408_v35 = vpop.eup %4407  ;;  %v2850_v20 = vmul.f32 %v4406_v49, %v2818_v10  ;;  %v2869_v53 = vadd.f32 %v3686_v48, %v2859_v21 }
0x15f4   : > { %v2851_v37 = vmul.f32 %v4408_v35, %v2819_v12 }
0x15f5   : > { %v2860_v13 = vmul.f32 %v3685_v41, %v2850_v20  ;;  %v2872_v3 = vpack.c.bf16 %v2869_v53, %v5870_v52 }
0x15f6   : > { %v2861_v58 = vmul.f32 %v3685_v41, %v2851_v37  ;;  %v3710_v37 = vld [vmem:[#allocation19 + $0x1] ss:$0 sm:$0xff] }
0x15f7   : > { %3984 = vmatprep.mubr.msk.bf16.mxu1 %vm856_vm0, %v2872_v3  ;;  %v5874_v60 = vadd.f32 %v3686_v48, %v2860_v13 }
0x15f8   : > { %v2871_v61 = vadd.f32 %v3686_v48, %v2861_v58 }
0x15fa   : > { %v2873_v31 = vpack.c.bf16 %v2871_v61, %v5874_v60 }
0x15fc   : > { %3985 = vmatmul.mubr.msk.bf16.vlgmr.msra.gmra.mrb[44].mxu1 %vm856_vm0, %v2873_v31 }
0x15fd   : > { %4016 = vmatprep.mubr.msk.bf16.mxu1 %vm4933_vm1, %v4932_v56 }
0x16cf   : > { %v3986_v4 = vpop.f32.mrb[44].mxu1 }
0x16d0   : > { %v2964_v57 = vadd.f32 %v3986_v4, %v3687_v50  ;;  %v2955_v59 = vpop.f32.mrb[45].mxu1 }
0x16d1   : > { %v2956_v51 = vadd.f32 %v3687_v50, %v2955_v59  ;;  %v3987_v5 = vpop.f32.mrb[46].mxu1 }
0x16d2   : > { %v2972_v54 = vmul.f32 %v2964_v57, %v2964_v57  ;;  %v2967_v8 = vadd.f32 %v3987_v5, %v3687_v50  ;;  %v2958_v27 = vpop.f32.mrb[47].mxu1 }
0x16d3   : > { %v2970_v12 = vmul.f32 %v2956_v51, %v2956_v51  ;;  %v2959_v6 = vadd.f32 %v3687_v50, %v2958_v27  ;;  %v4300_v27 = vld [vmem:[%s6103_s5 + $0x18] sm:$0xff]  }
0x16d4   : > { %v2976_v55 = vmul.f32 %v2972_v54, %v2964_v57  ;;  %v2973_v9 = vmul.f32 %v2967_v8, %v2967_v8  ;;  %v4298_v54 = vld [vmem:[%s6103_s5 + $0x8] sm:$0xff]  }
0x16d5   : > { %v2974_v10 = vmul.f32 %v2970_v12, %v2956_v51  ;;  %v2971_v11 = vmul.f32 %v2959_v6, %v2959_v6 }
0x16d6   : > { %v2980_v14 = vmul.f32 0.044715, %v2976_v55  ;;  %v2977_v16 = vmul.f32 %v2973_v9, %v2967_v8 }
0x16d7   : > { %v2978_v17 = vmul.f32 0.044715, %v2974_v10  ;;  %v2975_v18 = vmul.f32 %v2971_v11, %v2959_v6 }
0x16d8   : > { %v2984_v19 = vadd.f32 %v2980_v14, %v2964_v57  ;;  %v2981_v23 = vmul.f32 0.044715, %v2977_v16  ;;  %v3719_v16 = vld [vmem:[#allocation20 + $0x1] ss:$0 sm:$0xff] }
0x16d9   : > { %v2982_v24 = vadd.f32 %v2978_v17, %v2956_v51  ;;  %v2979_v25 = vmul.f32 0.044715, %v2975_v18 }
0x16da   : > { %v2988_v26 = vmul.f32 0.7978846, %v2984_v19  ;;  %v2985_v28 = vadd.f32 %v2981_v23, %v2967_v8  ;;  %v3720_v19 = vld [vmem:[#allocation22 + $0x1] ss:$0 sm:$0xff] }
0x16db   : > { %v2986_v15 = vmul.f32 0.7978846, %v2982_v24  ;;  %v2983_v29 = vadd.f32 %v2979_v25, %v2959_v6 }
0x16dc   : > { %4409 = vtanh.f32 %v2988_v26  ;;  %v2989_v30 = vmul.f32 0.7978846, %v2985_v28 }
0x16dd   : > { %4411 = vtanh.f32 %v2986_v15  ;;  %v2987_v32 = vmul.f32 0.7978846, %v2983_v29 }
0x16de   : > { %4413 = vtanh.f32 %v2989_v30  ;;  %v4301_v30 = vld [vmem:[%s6104_s18] sm:$0xff]  }
0x16df   : > { %4415 = vtanh.f32 %v2987_v32 }
0x16e6   : > { %v4410_v33 = vpop.eup %4409 }
0x16e7   : > { %v4412_v34 = vpop.eup %4411  ;;  %v2996_v38 = vadd.f32 1.0, %v4410_v33  ;;  %v4302_v33 = vld [vmem:[%s6104_s18 + $0x8] sm:$0xff]  }
0x16e8   : > { %v4414_v40 = vpop.eup %4413  ;;  %v2994_v36 = vadd.f32 1.0, %v4412_v34  ;;  %v4303_v34 = vld [vmem:[%s6104_s18 + $0x10] sm:$0xff]  }
0x16e9   : > { %v4416_v43 = vpop.eup %4415  ;;  %v3000_v44 = vmul.f32 0.5, %v2996_v38  ;;  %v2997_v41 = vadd.f32 1.0, %v4414_v40  ;;  %v4304_v38 = vld [vmem:[%s6104_s18 + $0x18] sm:$0xff]  }
0x16ea   : > { %v2995_v45 = vadd.f32 1.0, %v4416_v43  ;;  %v2998_v46 = vmul.f32 0.5, %v2994_v36  ;;  %v3721_v40 = vld [vmem:[#allocation23] ss:$0 sm:$0xff] }
0x16eb   : > { %v3001_v47 = vmul.f32 0.5, %v2997_v41  ;;  %v3004_v48 = vmul.f32 %v3000_v44, %v2964_v57 }
0x16ec   : > { %v2999_v42 = vmul.f32 0.5, %v2995_v45  ;;  %v3002_v49 = vmul.f32 %v2998_v46, %v2956_v51 }
0x16ed   : > { %v3005_v21 = vmul.f32 %v3001_v47, %v2967_v8  ;;  %v4299_v8 = vld [vmem:[%s6103_s5 + $0x10] sm:$0xff]  }
0x16ee   : > { %v3003_v35 = vmul.f32 %v2999_v42, %v2959_v6 }
0x16ef   : > { %v3007_v20 = vpack.c.bf16 %v3005_v21, %v3004_v48 }
0x16f0   : > { %v3006_v53 = vpack.c.bf16 %v3003_v35, %v3002_v49 }
0x16f2   : > { %4004 = vmatprep.mubr.bf16.mxu0 %v3006_v53 }
0x16f3   : > { %4005 = vmatmul.mubr.bf16.vlgmr.msra.gmra.mrb[52].mxu0 %v3007_v20 }
0x17c6   : > { %v4006_v13 = vpop.f32.mrb[52].mxu0 }
0x17c7   : > { %v3123_v3 = vadd.f32 %v4006_v13, %v3710_v37  ;;  %v3115_v58 = vpop.f32.mrb[53].mxu0 }
0x17c8   : > { %v3116_v61 = vadd.f32 %v3710_v37, %v3115_v58  ;;  %v4007_v31 = vpop.f32.mrb[54].mxu0 }
0x17c9   : > { %v3118_v62 = vpop.f32.mrb[55].mxu0  ;;  %v3129_v22 = vadd.f32 %v3123_v3, %v5874_v60 }
0x17ca   : > { %v3128_v39 = vadd.f32 %v3116_v61, %v5870_v52  ;;  %v4297_v52 = vld [vmem:[%s6103_s5] sm:$0xff]  }
0x17cb   : > { %v3137_v63 = vsel %vm856_vm0, %v3129_v22, 0.0  ;;  %4009 = vmatpush3.bf16.msra.mxu1 %v4297_v52 }
0x17cc   : > { %3138 = vadd.xlane.f32.xlu0 %v3137_v63  ;;  %v3134_v0 = vsel %vm856_vm0, %v3128_v39, 0.0  ;;  %4010 = vmatprep.subr.bf16.mxu1 %v4932_v56 }
0x17cd   : > { %3135 = vadd.xlane.f32.xlu1 %v3134_v0 }
0x17cf   : > { %4011 = vmatpush3.bf16.msra.mxu1 %v4298_v54 }
0x17d0   : > { %4012 = vmatprep.subr.bf16.mxu1 %v4932_v56 }
0x17d3   : > { %4013 = vmatpush3.bf16.msra.mxu1 %v4299_v8 }
0x17d4   : > { %4014 = vmatprep.subr.bf16.mxu1 %v4932_v56 }
0x17d7   : > { %4015 = vmatpush3.bf16.msra.mxu1 %v4300_v27 }
0x17d8   : > { %4020 = vmatprep.subr.bf16.mxu1 %v4932_v56 }
0x1859   : > { %v3139_v1 = vpop.xlane.xlu0 %3138 }
0x185a   : > { %v3141_v2 = vmul.f32 0.015625, %v3139_v1  ;;  %v3136_v7 = vpop.xlane.xlu1 %3135 }
0x185b   : > { %v3140_v50 = vmul.f32 0.015625, %v3136_v7 }
0x185c   : > { %v3143_v4 = vsub.f32 %v3129_v22, %v3141_v2 }
0x185d   : > { %v3142_v57 = vsub.f32 %v3128_v39, %v3140_v50 }
0x185e   : > { %v3145_v59 = vmul.f32 %v3143_v4, %v3143_v4 }
0x185f   : > { %v3144_v51 = vmul.f32 %v3142_v57, %v3142_v57 }
0x1860   : > { %v3149_v5 = vsel %vm856_vm0, %v3145_v59, 0.0 }
0x1861   : > { %3150 = vadd.xlane.f32.xlu0 %v3149_v5  ;;  %v3146_v60 = vsel %vm856_vm0, %v3144_v51, 0.0 }
0x1862   : > { %3147 = vadd.xlane.f32.xlu1 %v3146_v60 }
0x18ee   : > { %v3151_v12 = vpop.xlane.xlu0 %3150 }
0x18ef   : > { %v3153_v6 = vmul.f32 0.015625, %v3151_v12  ;;  %v3148_v55 = vpop.xlane.xlu1 %3147 }
0x18f0   : > { %v3152_v9 = vmul.f32 0.015625, %v3148_v55 }
0x18f1   : > { %v3155_v10 = vadd.f32 1e-12, %v3153_v6 }
0x18f2   : > { %v3154_v11 = vadd.f32 1e-12, %v3152_v9 }
0x18f3   : > { %4417 = vrsqrt.f32 %v3155_v10 }
0x18f4   : > { %4419 = vrsqrt.f32 %v3154_v11 }
0x18fd   : > { %v4418_v14 = vpop.eup %4417 }
0x18fe   : > { %v4420_v17 = vpop.eup %4419  ;;  %v3159_v18 = vmul.f32 %v4418_v14, %v3143_v4 }
0x18ff   : > { %v3158_v23 = vmul.f32 %v4420_v17, %v3142_v57 }
0x1900   : > { %v3167_v24 = vmul.f32 %v3719_v16, %v3159_v18 }
0x1901   : > { %v3166_v25 = vmul.f32 %v3719_v16, %v3158_v23 }
0x1902   : > { %v3175_v26 = vadd.f32 %v3720_v19, %v3167_v24 }
0x1903   : > { %v3174_v28 = vadd.f32 %v3720_v19, %v3166_v25 }
0x1904   : > { %v3177_v15 = vrot.slane %v3175_v26, 7 }
0x1906   : > { %v3180_v29 = vsel %vm3179_vm4, %v3174_v28, %v3177_v15 }
0x1907   : > { %v3181_v32 = vpack.c.bf16 %v3180_v29, %v3180_v29 }
0x1909   : > { %4017 = vmatmul.mubr.msk.bf16.vlgmr.msra.gmra.mrb[48].mxu1 %vm856_vm0, %v3181_v32 }
0x190a   : > { %4021 = vmatpush3.bf16.msra.mxu1 %v4301_v30  ;;  %4028 = vmatprep.mubr.msk.bf16.mxu1 %vm4933_vm1, %v4932_v56 }
0x190b   : > { %4022 = vmatprep.subr.bf16.mxu1 %v4932_v56 }
0x190e   : > { %4023 = vmatpush3.bf16.msra.mxu1 %v4302_v33 }
0x190f   : > { %4024 = vmatprep.subr.bf16.mxu1 %v4932_v56 }
0x1912   : > { %4025 = vmatpush3.bf16.msra.mxu1 %v4303_v34 }
0x1913   : > { %4026 = vmatprep.subr.bf16.mxu1 %v4932_v56  ;;  %v3727_v56 = vld [vmem:[%s6105_s1] ss:$0 sm:$0xff]  ;;  %s4819_s1 = sshll.u32 %s4937_s27, 4  ;;  %s4820_s1 = int_to_ptr.vmem [resolvable:$false] %s4819_s1 }
0x1914   : > { %s4821_s29 = scalar_lea.vmem %s4820_s1, 64  ;;  %p4822_p9 = scmp.lt.s32.totalorder %s5956_s2, %s4820_s1 }
0x1915   : > { %p4823_p7 = scmp.lt.s32.totalorder %s4821_s29, %s4815_s16 }
0x1916   : > { %4027 = vmatpush3.bf16.msra.mxu1 %v4304_v38 }
0x1917   : > { %p4824_p10 = por %p4823_p7, %p4822_p9 }
0x1919   : > { %p4825_p4 = pnand %p4824_p10, %p4818_p5 }
0x19dc   : > { %v3258_v36 = vpop.f32.mrb[48].mxu1 }
0x19dd   : > { %v3259_v43 = vadd.f32 %v3721_v40, %v3258_v36  ;;  %v4018_v44 = vpop.f32.mrb[49].mxu1 }
0x19de   : > { %v3261_v41 = vpop.f32.mrb[50].mxu1 }
0x19df   : > { %v3264_v45 = vmax.f32 %v3259_v43, 0.0  ;;  %v4019_v46 = vpop.f32.mrb[51].mxu1 }
0x19e1   : > { %v3265_v47 = vpack.c.bf16 %v3264_v45, %v3264_v45 }
0x19e3   : > { %4029 = vmatmul.mubr.msk.bf16.vlgmr.msra.gmra.mrb[52].mxu1 %vm856_vm0, %v3265_v47 }
0x1ab6   : > { %v3342_v42 = vpop.f32.mrb[52].mxu1 }
0x1ab7   : > { %v3343_v48 = vadd.f32 %v3727_v56, %v3342_v42  ;;  %v4030_v21 = vpop.f32.mrb[53].mxu1 }
0x1ab8   : > { %v3345_v49 = vpop.f32.mrb[54].mxu1 }
0x1ab9   : > { %3348 = vst [vmem:[%s842_s6] sm:$0x3] %v3343_v48  ;;  %v4031_v35 = vpop.f32.mrb[55].mxu1 }
0x1aba   : > { %4828 = shalt.err (!%p4825_p4)
}
0x1abb   : > { %s4829_s12 = scalar_lea.hbm %s5954_s3, 32  ;;  %s4833_s7 = scalar_lea.hbm %s6107_s0, 64 }
0x1abc   : > { %p4830_p1 = scmp.ne.s32.totalorder %s5954_s3, %s4829_s12  ;;  %p4834_p2 = scmp.lt.u32.totalorder %s5954_s3, %s6107_s0 }
0x1abd   : > { %p4835_p3 = scmp.lt.u32.totalorder %s4833_s7, %s4829_s12  ;;  %p4837_p11 = scmp.lt.u32.totalorder %s4829_s12, %s5954_s3 }
0x1abe   : > { %p4831_p13 = pnand %p4830_p1, %p6108_p12 }
0x1abf   : > { %p4836_p6 = por %p4835_p3, %p4834_p2 }
0x1ac0   : > { %p4832_p0 = pneg %p4831_p13 }
0x1ac1   : > { %p4838_p8 = por %p4837_p11, %p4836_p6 }
0x1ac3   : > { %p4839_p5 = pnand %p4838_p8, %p4832_p0 }
0x1ac5   : > { %4842 = shalt.err (!%p4839_p5)
}
0x1ac6   : > { %4086 = dma.vmem_to_hbm [thread:$0]  (%p6108_p12), %s5956_s2, 32, %s5954_s3, %s3350_s19  }
0x1ac7 PF: > { %s6109_s16 = sld [smem:[#allocation35_spill]]  ;;  %p6110_p9 = scmp.ne.s32.totalorder %s6078_s28, 0 }
0x1ac8   : > { %p6111_p7 = scmp.ge.s32.totalorder %s4909_s24, 2 }
0x1aca   : > { %p4133_p10 = pnand %p6111_p7, %p6110_p9 }
0x1acd   : > { %s3375_s1 = sand.u32 1, %s6109_s16  }
0x1ace   : > { %s3376_s29 = scalar_lea.sflag [#allocation4], %s3375_s1 }
0x1acf   : > { %4892 = dma.done.wait (!%p4133_p10), %s3376_s29, 32  }
0x1ad0   : > { %4894 = vsyncadd (!%p4133_p10), %s3376_s29, 4294967264  ;;  %p40_p4 = scmp.ge.s32.totalorder %s5387_s4, 4   ;;  %s6112_s1 = smov %s4901_s22 }
0x1ad1   : > { %s6113_s22 = smov %s4905_s23  ;;  %s6114_s23 = smov %s5399_s25 }
0x1ad2   : > { %s6115_s24 = smov %s5387_s4  ;;  %42 = sbr.rel (!%p40_p4) target bundleno = 26 (0x1a), region = 212 }
0x1ad9   :  { %3381 = vsyncpa [#allocation3], 1 }
0x1ada   :  { %3383 = vsyncpa [#allocation3 + $0x1], 1 }
0x1adb   :  { %3384 = vsyncpa [#allocation6], 1 }
0x1adc   :  { %3385 = vsyncpa [#allocation9], 1 }
0x1add   :  { %3386 = vsyncpa [#allocation12], 1 }
0x1ade   :  { %3387 = vsyncpa [#allocation15], 1 }
0x1adf   :  { %3388 = vsyncpa [#allocation18], 1 }
0x1ae0   :  { %3389 = vsyncpa [#allocation21], 1 }
0x1ae1   :  { %3390 = vsyncpa [#allocation24], 1 }
0x1ae2   :  { %3391 = vsyncpa [#allocation4], 1 }
0x1ae3   :  { %3393 = vsyncpa [#allocation4 + $0x1], 1 }

</bundles_post_ra>
